<compile_context>
chip_gen: v6e
topology: v6e:2x2x1
jax: 0.10.0
libtpu: 0.0.40
codegen_flags: <defaults>
</compile_context>

<pallas_src>
import functools
import math

import jax
import jax.numpy as jnp
from jax import lax
from jax.experimental import pallas as pl
from jax.experimental.pallas import tpu as pltpu

jax.config.update("jax_default_matmul_precision", "highest")

_LANE = 128


def _round_up(n, m):
    return ((n + m - 1) // m) * m


def _recip(x):
    """EUP approximate reciprocal + one Newton step (keeps divides off the VALU)."""
    r = pl.reciprocal(x, approx=True)
    return r * (2.0 - x * r)


def _maybe_cast(a, dtype):
    return a if dtype is None else a.astype(dtype)


# ----------------------------------------------------------------------------
# Kernel 1: Q/K/V projections + row l2-normalization
# ----------------------------------------------------------------------------
def _make_proj_kernel(mxu_dtype):
    def proj_kernel(x_ref, wq_ref, wk_ref, wv_ref, q_ref, k_ref, v_ref, xu_ref):
        x = x_ref[...]
        xm = _maybe_cast(x, mxu_dtype)
        q_ref[...] = jnp.dot(xm, _maybe_cast(wq_ref[...], mxu_dtype),
                             preferred_element_type=jnp.float32)
        k_ref[...] = jnp.dot(xm, _maybe_cast(wk_ref[...], mxu_dtype),
                             preferred_element_type=jnp.float32)
        v_ref[...] = jnp.dot(xm, _maybe_cast(wv_ref[...], mxu_dtype),
                             preferred_element_type=jnp.float32)
        # F.normalize(x, p=2, dim=1)
        nrm = jnp.sqrt(jnp.sum(x * x, axis=-1, keepdims=True))
        xu_ref[...] = x * _recip(jnp.maximum(nrm, 1e-12))
    return proj_kernel


# ----------------------------------------------------------------------------
# Kernel 2: streaming block-diagonal attention (flash-style online softmax)
# ----------------------------------------------------------------------------
def _make_attention_kernel(seq_len, mxu_dtype, dense_att):
    inv_log_t = 1.0 / math.log(seq_len)

    def attn_kernel(keep_ref, q_ref, k_ref, v_ref, xuq_ref, xuk_ref,
                    wmain_ref, wdep_ref,
                    y_ref, att_ref, ent_ref,
                    m_scr, s_scr, a_scr, nd_scr, dd_scr):
        ki = pl.program_id(1)
        is_last = ki == pl.num_programs(1) - 1

        @pl.when(ki == 0)
        def _init():
            m_scr[...] = jnp.full_like(m_scr, -1e30)
            s_scr[...] = jnp.zeros_like(s_scr)
            a_scr[...] = jnp.zeros_like(a_scr)
            nd_scr[...] = jnp.zeros_like(nd_scr)
            dd_scr[...] = jnp.zeros_like(dd_scr)

        if dense_att:
            # Zero this (q-tile, permuted k-tile) block of the dense att_win;
            # the diagonal block is overwritten with real values at the last
            # step below (output index map places this step's block there).
            att_ref[...] = jnp.zeros_like(att_ref)

        # energies and diversity for this (q-tile, k-tile) pair; contract the
        # last dims of both operands so no explicit transpose is materialized.
        dn = (((1,), (1,)), ((), ()))
        e = lax.dot_general(_maybe_cast(q_ref[...], mxu_dtype),
                            _maybe_cast(k_ref[...], mxu_dtype), dn,
                            preferred_element_type=jnp.float32)        # [TQ, TK]
        sim = lax.dot_general(_maybe_cast(xuq_ref[...], mxu_dtype),
                              _maybe_cast(xuk_ref[...], mxu_dtype), dn,
                              preferred_element_type=jnp.float32)      # [TQ, TK]
        div = 1.0 - sim

        # K tiles are streamed in a rotated order (see index maps), so the
        # diagonal tile is exactly the last step.  keep is nonzero only there.
        keep = keep_ref[...]
        is_diag = is_last.astype(jnp.float32)
        off = 1.0 - keep * is_diag            # 1.0 where column j is OUTSIDE block(i)

        # --- online-softmax update ---
        m_old = m_scr[...]
        s_old = s_scr[...]
        m_new = jnp.maximum(m_old, jnp.max(e, axis=-1, keepdims=True))
        delta = m_old - m_new
        alpha = jnp.exp(delta)
        em = e - m_new
        p = jnp.exp(em)                        # unnormalized softmax numerators
        div_off = div * off
        s_scr[...] = alpha * s_old + jnp.sum(p, axis=-1, keepdims=True)
        # entropy accumulator: sum_j p_j * (e_j - m)
        a_scr[...] = alpha * (a_scr[...] + delta * s_old) + jnp.sum(
            p * em, axis=-1, keepdims=True)
        # dependence-factor accumulators (out-of-block columns only)
        nd_scr[...] = alpha * nd_scr[...] + jnp.sum(p * div_off, axis=-1,
                                                    keepdims=True)
        dd_scr[...] = dd_scr[...] + jnp.sum(div_off, axis=-1, keepdims=True)
        m_scr[...] = m_new

        @pl.when(is_last)
        def _finalize():
            # At the last step (diagonal tile) the running stats are final and
            # `p` already holds exp(e_diag - global_max).
            s = s_scr[...]
            inv_s = _recip(s)
            # entropy per row: log(s) - sum_j p_j (e_j - m) / s, scaled by 1/log(T)
            ent_ref[...] = (jnp.log(s) - a_scr[...] * inv_s) * inv_log_t
            # dependence factor per row
            dep = (nd_scr[...] * inv_s) / dd_scr[...]
            # diagonal att_win block; dep is added per COLUMN index
            attw = (p * inv_s + jnp.transpose(dep)) * keep
            att_ref[...] = attw
            # att_win @ V: only the diagonal block contributes
            yw = jnp.dot(_maybe_cast(attw, mxu_dtype),
                         _maybe_cast(v_ref[...], mxu_dtype),
                         preferred_element_type=jnp.float32)           # [TQ, Dh]
            yp = jnp.dot(_maybe_cast(yw, mxu_dtype),
                         _maybe_cast(wmain_ref[...], mxu_dtype),
                         preferred_element_type=jnp.float32)           # [TQ, Din]
            y_ref[...] = yp + dep * wdep_ref[...]

    return attn_kernel


# ----------------------------------------------------------------------------
# Kernel 3: add the globally L1-normalized entropy term (in place on y)
# ----------------------------------------------------------------------------
def _finalize_kernel(yp_ref, ent_ref, invs_ref, went_ref, y_ref):
    y_ref[...] = yp_ref[...] + (ent_ref[...] * invs_ref[0, 0]) * went_ref[...]


def _pick_tile(seq_len, block_size):
    base = block_size * 8 // math.gcd(block_size, 8)      # lcm(block_size, 8)
    if seq_len % base != 0:
        return seq_len                                     # single-tile fallback
    tile = base
    while tile * 2 <= 512 and seq_len % (tile * 2) == 0:
        tile *= 2
    return tile


def _attention_vmem_limit(tile, di_p, do_p):
    f32 = 4
    per_buf = (tile * tile + 3 * tile * do_p + 2 * tile * di_p
               + do_p * di_p + di_p)
    outs = tile * di_p + tile * tile + tile
    scratch = 5 * tile
    temps = 8 * tile * tile                                # live [tile,tile] temporaries
    est = (2 * per_buf + 2 * outs + scratch + temps) * f32
    return int(min(max(2 * est, 16 * 1024 * 1024), 64 * 1024 * 1024))


@functools.partial(jax.jit, static_argnames=("block_size", "tile", "mxu_dtype"))
def self_attention_forward(x, wq, wk, wv, wout, *, block_size, tile=None,
                           mxu_dtype=None):
    """x: [T, input_size]; wq/wk/wv: [output_size, input_size] (PyTorch Linear
    layout); wout: [input_size, output_size + 2].  Returns (y, att_win[T, T]).
    Set mxu_dtype=jnp.bfloat16 for higher MXU throughput on v6e/v7x."""
    x = x.astype(jnp.float32)
    T, d_in = x.shape
    d_out = wq.shape[0]

    if tile is None:
        tile = _pick_tile(T, block_size)
    assert T % tile == 0, "sequence length must be divisible by the tile size"
    assert tile == T or (tile % 8 == 0 and tile % block_size == 0), \
        "tile must be a multiple of 8 and of block_size (or equal to T)"
    nq = T // tile
    # Emit the dense [T, T] att_win straight from the kernel when the tile is
    # lane-aligned (128), otherwise fall back to a compact [T, tile] output.
    dense_att = (tile % _LANE == 0) or (tile == T)

    # ---- pad feature dims to the 128-lane width (dense vregs, unmasked stores)
    di_p = _round_up(d_in, _LANE)
    do_p = _round_up(d_out, _LANE)
    x_p = jnp.pad(x, ((0, 0), (0, di_p - d_in)))
    pad_w = lambda w: jnp.pad(w.astype(jnp.float32).T,
                              ((0, di_p - d_in), (0, do_p - d_out)))
    wq_p, wk_p, wv_p = pad_w(wq), pad_w(wk), pad_w(wv)
    w_main = jnp.pad(wout[:, :d_out].astype(jnp.float32).T,
                     ((0, do_p - d_out), (0, di_p - d_in)))            # [do_p, di_p]
    w_ent = jnp.pad(wout[:, d_out:d_out + 1].astype(jnp.float32).T,
                    ((0, 0), (0, di_p - d_in)))                        # [1, di_p]
    w_dep = jnp.pad(wout[:, d_out + 1:d_out + 2].astype(jnp.float32).T,
                    ((0, 0), (0, di_p - d_in)))                        # [1, di_p]
    f32 = jnp.float32

    # ---- 1) projections + row l2-normalization -----------------------------
    q, k, v, xu = pl.pallas_call(
        _make_proj_kernel(mxu_dtype),
        out_shape=(jax.ShapeDtypeStruct((T, do_p), f32),
                   jax.ShapeDtypeStruct((T, do_p), f32),
                   jax.ShapeDtypeStruct((T, do_p), f32),
                   jax.ShapeDtypeStruct((T, di_p), f32)),
        grid_spec=pltpu.PrefetchScalarGridSpec(
            num_scalar_prefetch=0,
            grid=(nq,),
            in_specs=[pl.BlockSpec((tile, di_p), lambda i: (i, 0)),
                      pl.BlockSpec((di_p, do_p), lambda i: (0, 0)),
                      pl.BlockSpec((di_p, do_p), lambda i: (0, 0)),
                      pl.BlockSpec((di_p, do_p), lambda i: (0, 0))],
            out_specs=[pl.BlockSpec((tile, do_p), lambda i: (i, 0)),
                       pl.BlockSpec((tile, do_p), lambda i: (i, 0)),
                       pl.BlockSpec((tile, do_p), lambda i: (i, 0)),
                       pl.BlockSpec((tile, di_p), lambda i: (i, 0))]),
        compiler_params=pltpu.CompilerParams(dimension_semantics=("parallel",)),
    )(x_p, wq_p, wk_p, wv_p)

    # ---- 2) streaming attention over the (q_tile, k_tile) grid -------------
    ids = jnp.arange(tile) // block_size
    keep_diag = (ids[:, None] == ids[None, :]).astype(f32)             # [tile, tile]

    # Rotated k-stream order: step ki processes k-block (qi + 1 + ki) % nq, so
    # the diagonal block (== qi) is processed at the final step.
    k_stream_map = lambda qi, ki: ((qi + 1 + ki) % nq, 0)

    if dense_att:
        att_out_shape = jax.ShapeDtypeStruct((T, T), f32)
        att_out_spec = pl.BlockSpec((tile, tile),
                                    lambda qi, ki: (qi, (qi + 1 + ki) % nq))
    else:
        att_out_shape = jax.ShapeDtypeStruct((T, tile), f32)
        att_out_spec = pl.BlockSpec((tile, tile), lambda qi, ki: (qi, 0))

    y_partial, att_raw, ent_raw = pl.pallas_call(
        _make_attention_kernel(T, mxu_dtype, dense_att),
        out_shape=(jax.ShapeDtypeStruct((T, di_p), f32),
                   att_out_shape,
                   jax.ShapeDtypeStruct((T, 1), f32)),
        grid_spec=pltpu.PrefetchScalarGridSpec(
            num_scalar_prefetch=0,
            grid=(nq, nq),
            in_specs=[
                pl.BlockSpec((tile, tile), lambda qi, ki: (0, 0)),   # keep (diag tile)
                pl.BlockSpec((tile, do_p), lambda qi, ki: (qi, 0)),  # Q (q tile)
                pl.BlockSpec((tile, do_p), k_stream_map),            # K (streamed, rotated)
                pl.BlockSpec((tile, do_p), lambda qi, ki: (qi, 0)),  # V (diag tile only)
                pl.BlockSpec((tile, di_p), lambda qi, ki: (qi, 0)),  # x_unit (q rows)
                pl.BlockSpec((tile, di_p), k_stream_map),            # x_unit (k rows, rotated)
                pl.BlockSpec((do_p, di_p), lambda qi, ki: (0, 0)),   # W_out main part
                pl.BlockSpec((1, di_p), lambda qi, ki: (0, 0)),      # W_out dep column
            ],
            out_specs=[
                pl.BlockSpec((tile, di_p), lambda qi, ki: (qi, 0)),  # y (partial)
                att_out_spec,                                        # att_win
                pl.BlockSpec((tile, 1), lambda qi, ki: (qi, 0)),     # raw entropy
            ],
            scratch_shapes=[pltpu.VMEM((tile, 1), f32)] * 5),
        compiler_params=pltpu.CompilerParams(
            dimension_semantics=("parallel", "arbitrary"),
            vmem_limit_bytes=_attention_vmem_limit(tile, di_p, do_p)),
    )(keep_diag, q, k, v, xu, xu, w_main, w_dep)

    # ---- 3) finalize: globally L1-normalized entropy term ------------------
    # The L1 normalization couples every row, so it needs this tiny second pass.
    inv_l1 = (1.0 / jnp.maximum(jnp.sum(jnp.abs(ent_raw)), 1e-12)
              ).reshape(1, 1).astype(f32)
    y_pad = pl.pallas_call(
        _finalize_kernel,
        out_shape=jax.ShapeDtypeStruct((T, di_p), f32),
        grid_spec=pltpu.PrefetchScalarGridSpec(
            num_scalar_prefetch=0,
            grid=(nq,),
            in_specs=[pl.BlockSpec((tile, di_p), lambda i: (i, 0)),
                      pl.BlockSpec((tile, 1), lambda i: (i, 0)),
                      pl.BlockSpec(memory_space=pltpu.MemorySpace.SMEM),
                      pl.BlockSpec((1, di_p), lambda i: (0, 0))],
            out_specs=pl.BlockSpec((tile, di_p), lambda i: (i, 0))),
        compiler_params=pltpu.CompilerParams(dimension_semantics=("parallel",)),
        input_output_aliases={0: 0},
    )(y_partial, ent_raw, inv_l1, w_ent)

    y = y_pad[:, :d_in]

    if dense_att:
        att_win = att_raw
    else:
        # Compact fallback: expand block-diagonal [T, tile] to dense [T, T]
        # with a zero-FLOP broadcast (no MXU work against an identity).
        blocks = att_raw.reshape(nq, tile, tile)
        eye = jnp.eye(nq, dtype=f32)
        att_win = (blocks[:, :, None, :] * eye[:, None, :, None]).reshape(T, T)
    return y, att_win


def reference_forward(x, wq, wk, wv, wout, block_size):
    """Pure-JAX replica of the PyTorch forward, for verification."""
    T = x.shape[0]
    x_unit = x / jnp.maximum(jnp.linalg.norm(x, axis=1, keepdims=True), 1e-12)
    diversity = 1.0 - x_unit @ x_unit.T
    K = x @ wk.T
    Q = x @ wq.T
    V = x @ wv.T
    energies = Q @ K.T
    att_weights = jax.nn.softmax(energies, axis=-1)
    entropy = -jnp.sum(att_weights * jax.nn.log_softmax(energies, axis=-1), axis=-1)
    entropy = entropy / jnp.log(float(T))
    entropy = entropy / jnp.maximum(jnp.sum(jnp.abs(entropy)), 1e-12)
    idx = jnp.arange(T)
    keep = (idx[:, None] // block_size == idx[None, :] // block_size).astype(x.dtype)
    zero = 1.0 - keep
    att_win = att_weights * keep
    dep = jnp.sum((diversity * zero) * (att_weights * zero), -1) / \
        jnp.sum(diversity * zero, -1)
    att_win = att_win + dep[None, :] * keep
    y = att_win @ V
    outputs = jnp.concatenate([y, entropy[:, None], dep[:, None]], axis=-1)
    return outputs @ wout.T, att_win


if __name__ == "__main__":
    # Small, PyTorch-consistent shapes; non-128 feature dims exercise the
    # lane-padding path, T/tile = 2 exercises the streaming grid and the
    # fused dense att_win output (tile is 128-lane aligned).
    T, d_in, d_out, block = 256, 96, 80, 32

    key = jax.random.PRNGKey(0)
    kx, kq, kk, kv, ko = jax.random.split(key, 5)
    x = jax.random.normal(kx, (T, d_in), dtype=jnp.float32)

    # Deterministic PyTorch-Linear-style init: U(-1/sqrt(fan_in), 1/sqrt(fan_in)).
    b1 = 1.0 / math.sqrt(d_in)
    b2 = 1.0 / math.sqrt(d_out + 2)
    wq = jax.random.uniform(kq, (d_out, d_in), jnp.float32, -b1, b1)
    wk = jax.random.uniform(kk, (d_out, d_in), jnp.float32, -b1, b1)
    wv = jax.random.uniform(kv, (d_out, d_in), jnp.float32, -b1, b1)
    wout = jax.random.uniform(ko, (d_in, d_out + 2), jnp.float32, -b2, b2)

    y, att_win = self_attention_forward(x, wq, wk, wv, wout,
                                        block_size=block, tile=128)
    jax.block_until_ready((y, att_win))

    y_ref, att_ref = reference_forward(x, wq, wk, wv, wout, block)
    assert y.shape == (T, d_in) and att_win.shape == (T, T)
    assert jnp.allclose(y, y_ref, rtol=1e-4, atol=1e-4), \
        float(jnp.max(jnp.abs(y - y_ref)))
    assert jnp.allclose(att_win, att_ref, rtol=1e-4, atol=1e-4), \
        float(jnp.max(jnp.abs(att_win - att_ref)))

    print("KERNEL_OK")
</pallas_src>

<mosaic_0001>
module attributes {stable_mosaic.version = 11 : i64} {
  func.func @proj_kernel(%arg0: i32, %arg1: memref<128x128xf32, #tpu.memory_space<vmem>>, %arg2: memref<128x128xf32, #tpu.memory_space<vmem>>, %arg3: memref<128x128xf32, #tpu.memory_space<vmem>>, %arg4: memref<128x128xf32, #tpu.memory_space<vmem>>, %arg5: memref<128x128xf32, #tpu.memory_space<vmem>>, %arg6: memref<128x128xf32, #tpu.memory_space<vmem>>, %arg7: memref<128x128xf32, #tpu.memory_space<vmem>>, %arg8: memref<128x128xf32, #tpu.memory_space<vmem>>) attributes {dimension_semantics = [#tpu.dimension_semantics<parallel>], iteration_bounds = array<i64: 2>, scalar_prefetch = 0 : i64, scratch_operands = 0 : i64, tpu.core_type = #tpu.core_type<tc>, window_params = [{transform_indices = @transform_0, window_bounds = array<i64: 128, 128>}, {pipeline_mode = #tpu.pipeline_mode<synchronous>, transform_indices = @transform_1, window_bounds = array<i64: 128, 128>}, {pipeline_mode = #tpu.pipeline_mode<synchronous>, transform_indices = @transform_2, window_bounds = array<i64: 128, 128>}, {pipeline_mode = #tpu.pipeline_mode<synchronous>, transform_indices = @transform_3, window_bounds = array<i64: 128, 128>}, {transform_indices = @transform_4, window_bounds = array<i64: 128, 128>}, {transform_indices = @transform_5, window_bounds = array<i64: 128, 128>}, {transform_indices = @transform_6, window_bounds = array<i64: 128, 128>}, {transform_indices = @transform_7, window_bounds = array<i64: 128, 128>}]} {
    %c0 = arith.constant 0 : index
    %c0_0 = arith.constant 0 : index
    %0 = vector.load %arg1[%c0, %c0_0] : memref<128x128xf32, #tpu.memory_space<vmem>>, vector<128x128xf32>
    %c0_1 = arith.constant 0 : index
    %c0_2 = arith.constant 0 : index
    %1 = vector.load %arg2[%c0_1, %c0_2] : memref<128x128xf32, #tpu.memory_space<vmem>>, vector<128x128xf32>
    %cst = arith.constant dense<0.000000e+00> : vector<128x128xf32>
    %2 = tpu.matmul %0, %1, %cst {dimension_numbers = #tpu.dot_dimension_numbers<[1], [0], [0], [1], [0, 0, 1, 1], [], []>, precision = #tpu.contract_precision<fp32>} : vector<128x128xf32>, vector<128x128xf32>, vector<128x128xf32> -> vector<128x128xf32>
    %c0_3 = arith.constant 0 : index
    %c0_4 = arith.constant 0 : index
    %3 = vector.load %arg5[%c0_3, %c0_4] : memref<128x128xf32, #tpu.memory_space<vmem>>, vector<128x128xf32>
    tpu.vector_store %arg5[%c0_3, %c0_4], %2 {strides = array<i32>} : memref<128x128xf32, #tpu.memory_space<vmem>>, vector<128x128xf32>,
    %c0_5 = arith.constant 0 : index
    %c0_6 = arith.constant 0 : index
    %4 = vector.load %arg3[%c0_5, %c0_6] : memref<128x128xf32, #tpu.memory_space<vmem>>, vector<128x128xf32>
    %cst_7 = arith.constant dense<0.000000e+00> : vector<128x128xf32>
    %5 = tpu.matmul %0, %4, %cst_7 {dimension_numbers = #tpu.dot_dimension_numbers<[1], [0], [0], [1], [0, 0, 1, 1], [], []>, precision = #tpu.contract_precision<fp32>} : vector<128x128xf32>, vector<128x128xf32>, vector<128x128xf32> -> vector<128x128xf32>
    %c0_8 = arith.constant 0 : index
    %c0_9 = arith.constant 0 : index
    %6 = vector.load %arg6[%c0_8, %c0_9] : memref<128x128xf32, #tpu.memory_space<vmem>>, vector<128x128xf32>
    tpu.vector_store %arg6[%c0_8, %c0_9], %5 {strides = array<i32>} : memref<128x128xf32, #tpu.memory_space<vmem>>, vector<128x128xf32>,
    %c0_10 = arith.constant 0 : index
    %c0_11 = arith.constant 0 : index
    %7 = vector.load %arg4[%c0_10, %c0_11] : memref<128x128xf32, #tpu.memory_space<vmem>>, vector<128x128xf32>
    %cst_12 = arith.constant dense<0.000000e+00> : vector<128x128xf32>
    %8 = tpu.matmul %0, %7, %cst_12 {dimension_numbers = #tpu.dot_dimension_numbers<[1], [0], [0], [1], [0, 0, 1, 1], [], []>, precision = #tpu.contract_precision<fp32>} : vector<128x128xf32>, vector<128x128xf32>, vector<128x128xf32> -> vector<128x128xf32>
    %c0_13 = arith.constant 0 : index
    %c0_14 = arith.constant 0 : index
    %9 = vector.load %arg7[%c0_13, %c0_14] : memref<128x128xf32, #tpu.memory_space<vmem>>, vector<128x128xf32>
    tpu.vector_store %arg7[%c0_13, %c0_14], %8 {strides = array<i32>} : memref<128x128xf32, #tpu.memory_space<vmem>>, vector<128x128xf32>,
    %10 = arith.mulf %0, %0 : vector<128x128xf32>
    %cst_15 = arith.constant dense<0.000000e+00> : vector<128xf32>
    %11 = vector.multi_reduction <add>, %10, %cst_15 [1] : vector<128x128xf32> to vector<128xf32>
    %12 = vector.shape_cast %11 : vector<128xf32> to vector<128x1xf32>
    %13 = math.sqrt %12 : vector<128x1xf32>
    %cst_16 = arith.constant 9.99999996E-13 : f32
    %14 = vector.broadcast %cst_16 : f32 to vector<128x1xf32>
    %15 = arith.maximumf %13, %14 : vector<128x1xf32>
    %16 = tpu.reciprocal %15 {approx = true} : vector<128x1xf32> -> vector<128x1xf32>
    %17 = arith.mulf %15, %16 : vector<128x1xf32>
    %cst_17 = arith.constant 2.000000e+00 : f32
    %18 = vector.broadcast %cst_17 : f32 to vector<128x1xf32>
    %19 = arith.subf %18, %17 : vector<128x1xf32>
    %20 = arith.mulf %16, %19 : vector<128x1xf32>
    %21 = vector.broadcast %20 : vector<128x1xf32> to vector<128x128xf32>
    %22 = arith.mulf %0, %21 : vector<128x128xf32>
    %c0_18 = arith.constant 0 : index
    %c0_19 = arith.constant 0 : index
    %23 = vector.load %arg8[%c0_18, %c0_19] : memref<128x128xf32, #tpu.memory_space<vmem>>, vector<128x128xf32>
    tpu.vector_store %arg8[%c0_18, %c0_19], %22 {strides = array<i32>} : memref<128x128xf32, #tpu.memory_space<vmem>>, vector<128x128xf32>,
    return
  }
  func.func @transform_0(%arg0: i32) -> (i32, i32) {
    %c0_i32 = arith.constant 0 : i32
    %c0_i32_0 = arith.constant 0 : i32
    return %arg0, %c0_i32 : i32, i32
  }
  func.func @transform_1(%arg0: i32) -> (i32, i32) {
    %c0_i32 = arith.constant 0 : i32
    %c0_i32_0 = arith.constant 0 : i32
    %c0_i32_1 = arith.constant 0 : i32
    return %c0_i32, %c0_i32_0 : i32, i32
  }
  func.func @transform_2(%arg0: i32) -> (i32, i32) {
    %c0_i32 = arith.constant 0 : i32
    %c0_i32_0 = arith.constant 0 : i32
    %c0_i32_1 = arith.constant 0 : i32
    return %c0_i32, %c0_i32_0 : i32, i32
  }
  func.func @transform_3(%arg0: i32) -> (i32, i32) {
    %c0_i32 = arith.constant 0 : i32
    %c0_i32_0 = arith.constant 0 : i32
    %c0_i32_1 = arith.constant 0 : i32
    return %c0_i32, %c0_i32_0 : i32, i32
  }
  func.func @transform_4(%arg0: i32) -> (i32, i32) {
    %c0_i32 = arith.constant 0 : i32
    %c0_i32_0 = arith.constant 0 : i32
    return %arg0, %c0_i32 : i32, i32
  }
  func.func @transform_5(%arg0: i32) -> (i32, i32) {
    %c0_i32 = arith.constant 0 : i32
    %c0_i32_0 = arith.constant 0 : i32
    return %arg0, %c0_i32 : i32, i32
  }
  func.func @transform_6(%arg0: i32) -> (i32, i32) {
    %c0_i32 = arith.constant 0 : i32
    %c0_i32_0 = arith.constant 0 : i32
    return %arg0, %c0_i32 : i32, i32
  }
  func.func @transform_7(%arg0: i32) -> (i32, i32) {
    %c0_i32 = arith.constant 0 : i32
    %c0_i32_0 = arith.constant 0 : i32
    return %arg0, %c0_i32 : i32, i32
  }
}

module attributes {stable_mosaic.version = 11 : i64} {
  func.func @_finalize_kernel(%arg0: i32, %arg1: memref<128x128xf32, #tpu.memory_space<vmem>>, %arg2: memref<128x1xf32, #tpu.memory_space<vmem>>, %arg3: memref<1x1xf32, #tpu.memory_space<smem>>, %arg4: memref<1x128xf32, #tpu.memory_space<vmem>>, %arg5: memref<128x128xf32, #tpu.memory_space<vmem>>) attributes {dimension_semantics = [#tpu.dimension_semantics<parallel>], iteration_bounds = array<i64: 2>, scalar_prefetch = 0 : i64, scratch_operands = 0 : i64, tpu.core_type = #tpu.core_type<tc>, window_params = [{transform_indices = @transform_0, window_bounds = array<i64: 128, 128>}, {transform_indices = @transform_1, window_bounds = array<i64: 128, 1>}, {transform_indices = @transform_2, window_bounds = array<i64: 1, 1>}, {pipeline_mode = #tpu.pipeline_mode<synchronous>, transform_indices = @transform_3, window_bounds = array<i64: 1, 128>}, {transform_indices = @transform_4, window_bounds = array<i64: 128, 128>}]} {
    %c0 = arith.constant 0 : index
    %c0_0 = arith.constant 0 : index
    %0 = vector.load %arg1[%c0, %c0_0] : memref<128x128xf32, #tpu.memory_space<vmem>>, vector<128x128xf32>
    %c0_1 = arith.constant 0 : index
    %c0_2 = arith.constant 0 : index
    %1 = vector.load %arg2[%c0_1, %c0_2] : memref<128x1xf32, #tpu.memory_space<vmem>>, vector<128x1xf32>
    %c0_3 = arith.constant 0 : index
    %c0_4 = arith.constant 0 : index
    %2 = memref.load %arg3[%c0_3, %c0_4] : memref<1x1xf32, #tpu.memory_space<smem>>
    %3 = vector.broadcast %2 : f32 to vector<128x1xf32>
    %4 = arith.mulf %1, %3 : vector<128x1xf32>
    %c0_5 = arith.constant 0 : index
    %c0_6 = arith.constant 0 : index
    %5 = vector.load %arg4[%c0_5, %c0_6] : memref<1x128xf32, #tpu.memory_space<vmem>>, vector<1x128xf32>
    %6 = vector.broadcast %4 : vector<128x1xf32> to vector<128x128xf32>
    %7 = vector.broadcast %5 : vector<1x128xf32> to vector<128x128xf32>
    %8 = arith.mulf %6, %7 : vector<128x128xf32>
    %9 = arith.addf %0, %8 : vector<128x128xf32>
    %c0_7 = arith.constant 0 : index
    %c0_8 = arith.constant 0 : index
    %10 = vector.load %arg5[%c0_7, %c0_8] : memref<128x128xf32, #tpu.memory_space<vmem>>, vector<128x128xf32>
    tpu.vector_store %arg5[%c0_7, %c0_8], %9 {strides = array<i32>} : memref<128x128xf32, #tpu.memory_space<vmem>>, vector<128x128xf32>,
    return
  }
  func.func @transform_0(%arg0: i32) -> (i32, i32) {
    %c0_i32 = arith.constant 0 : i32
    %c0_i32_0 = arith.constant 0 : i32
    return %arg0, %c0_i32 : i32, i32
  }
  func.func @transform_1(%arg0: i32) -> (i32, i32) {
    %c0_i32 = arith.constant 0 : i32
    %c0_i32_0 = arith.constant 0 : i32
    return %arg0, %c0_i32 : i32, i32
  }
  func.func @transform_2(%arg0: i32) -> (i32, i32) {
    %c0_i32 = arith.constant 0 : i32
    %c0_i32_0 = arith.constant 0 : i32
    %c0_i32_1 = arith.constant 0 : i32
    return %c0_i32, %c0_i32_0 : i32, i32
  }
  func.func @transform_3(%arg0: i32) -> (i32, i32) {
    %c0_i32 = arith.constant 0 : i32
    %c0_i32_0 = arith.constant 0 : i32
    %c0_i32_1 = arith.constant 0 : i32
    return %c0_i32, %c0_i32_0 : i32, i32
  }
  func.func @transform_4(%arg0: i32) -> (i32, i32) {
    %c0_i32 = arith.constant 0 : i32
    %c0_i32_0 = arith.constant 0 : i32
    return %arg0, %c0_i32 : i32, i32
  }
}

module attributes {stable_mosaic.version = 11 : i64} {
  func.func @attn_kernel(%arg0: i32, %arg1: i32, %arg2: memref<128x128xf32, #tpu.memory_space<vmem>>, %arg3: memref<128x128xf32, #tpu.memory_space<vmem>>, %arg4: memref<128x128xf32, #tpu.memory_space<vmem>>, %arg5: memref<128x128xf32, #tpu.memory_space<vmem>>, %arg6: memref<128x128xf32, #tpu.memory_space<vmem>>, %arg7: memref<128x128xf32, #tpu.memory_space<vmem>>, %arg8: memref<128x128xf32, #tpu.memory_space<vmem>>, %arg9: memref<1x128xf32, #tpu.memory_space<vmem>>, %arg10: memref<128x128xf32, #tpu.memory_space<vmem>>, %arg11: memref<128x128xf32, #tpu.memory_space<vmem>>, %arg12: memref<128x1xf32, #tpu.memory_space<vmem>>, %arg13: memref<128x1xf32, #tpu.memory_space<vmem>>, %arg14: memref<128x1xf32, #tpu.memory_space<vmem>>, %arg15: memref<128x1xf32, #tpu.memory_space<vmem>>, %arg16: memref<128x1xf32, #tpu.memory_space<vmem>>, %arg17: memref<128x1xf32, #tpu.memory_space<vmem>>) attributes {dimension_semantics = [#tpu.dimension_semantics<parallel>, #tpu.dimension_semantics<arbitrary>], iteration_bounds = array<i64: 2, 2>, scalar_prefetch = 0 : i64, scratch_operands = 5 : i64, tpu.core_type = #tpu.core_type<tc>, window_params = [{pipeline_mode = #tpu.pipeline_mode<synchronous>, transform_indices = @transform_0, window_bounds = array<i64: 128, 128>}, {transform_indices = @transform_1, window_bounds = array<i64: 128, 128>}, {transform_indices = @transform_2, window_bounds = array<i64: 128, 128>}, {transform_indices = @transform_3, window_bounds = array<i64: 128, 128>}, {transform_indices = @transform_4, window_bounds = array<i64: 128, 128>}, {transform_indices = @transform_5, window_bounds = array<i64: 128, 128>}, {pipeline_mode = #tpu.pipeline_mode<synchronous>, transform_indices = @transform_6, window_bounds = array<i64: 128, 128>}, {pipeline_mode = #tpu.pipeline_mode<synchronous>, transform_indices = @transform_7, window_bounds = array<i64: 1, 128>}, {transform_indices = @transform_8, window_bounds = array<i64: 128, 128>}, {transform_indices = @transform_9, window_bounds = array<i64: 128, 128>}, {transform_indices = @transform_10, window_bounds = array<i64: 128, 1>}]} {
    %c1_i32 = arith.constant 1 : i32
    %0 = arith.cmpi eq, %arg1, %c1_i32 : i32
    %c0_i32 = arith.constant 0 : i32
    %1 = arith.cmpi eq, %arg1, %c0_i32 : i32
    %2 = arith.extui %1 : i1 to i32
    %c0_i32_0 = arith.constant 0 : i32
    %3 = arith.cmpi ne, %2, %c0_i32_0 : i32
    scf.if %3 {
      %cst_42 = arith.constant -1.000000e+30 : f32
      %61 = vector.broadcast %cst_42 : f32 to vector<128x1xf32>
      %c0_43 = arith.constant 0 : index
      %c0_44 = arith.constant 0 : index
      %62 = vector.load %arg13[%c0_43, %c0_44] : memref<128x1xf32, #tpu.memory_space<vmem>>, vector<128x1xf32>
      tpu.vector_store %arg13[%c0_43, %c0_44], %61 {strides = array<i32>} : memref<128x1xf32, #tpu.memory_space<vmem>>, vector<128x1xf32>,
      %cst_45 = arith.constant 0.000000e+00 : f32
      %63 = vector.broadcast %cst_45 : f32 to vector<128x1xf32>
      %c0_46 = arith.constant 0 : index
      %c0_47 = arith.constant 0 : index
      %64 = vector.load %arg14[%c0_46, %c0_47] : memref<128x1xf32, #tpu.memory_space<vmem>>, vector<128x1xf32>
      tpu.vector_store %arg14[%c0_46, %c0_47], %63 {strides = array<i32>} : memref<128x1xf32, #tpu.memory_space<vmem>>, vector<128x1xf32>,
      %cst_48 = arith.constant 0.000000e+00 : f32
      %65 = vector.broadcast %cst_48 : f32 to vector<128x1xf32>
      %c0_49 = arith.constant 0 : index
      %c0_50 = arith.constant 0 : index
      %66 = vector.load %arg15[%c0_49, %c0_50] : memref<128x1xf32, #tpu.memory_space<vmem>>, vector<128x1xf32>
      tpu.vector_store %arg15[%c0_49, %c0_50], %65 {strides = array<i32>} : memref<128x1xf32, #tpu.memory_space<vmem>>, vector<128x1xf32>,
      %cst_51 = arith.constant 0.000000e+00 : f32
      %67 = vector.broadcast %cst_51 : f32 to vector<128x1xf32>
      %c0_52 = arith.constant 0 : index
      %c0_53 = arith.constant 0 : index
      %68 = vector.load %arg16[%c0_52, %c0_53] : memref<128x1xf32, #tpu.memory_space<vmem>>, vector<128x1xf32>
      tpu.vector_store %arg16[%c0_52, %c0_53], %67 {strides = array<i32>} : memref<128x1xf32, #tpu.memory_space<vmem>>, vector<128x1xf32>,
      %cst_54 = arith.constant 0.000000e+00 : f32
      %69 = vector.broadcast %cst_54 : f32 to vector<128x1xf32>
      %c0_55 = arith.constant 0 : index
      %c0_56 = arith.constant 0 : index
      %70 = vector.load %arg17[%c0_55, %c0_56] : memref<128x1xf32, #tpu.memory_space<vmem>>, vector<128x1xf32>
      tpu.vector_store %arg17[%c0_55, %c0_56], %69 {strides = array<i32>} : memref<128x1xf32, #tpu.memory_space<vmem>>, vector<128x1xf32>,
    } else {
    }
    %cst = arith.constant 0.000000e+00 : f32
    %4 = vector.broadcast %cst : f32 to vector<128x128xf32>
    %c0 = arith.constant 0 : index
    %c0_1 = arith.constant 0 : index
    %5 = vector.load %arg11[%c0, %c0_1] : memref<128x128xf32, #tpu.memory_space<vmem>>, vector<128x128xf32>
    tpu.vector_store %arg11[%c0, %c0_1], %4 {strides = array<i32>} : memref<128x128xf32, #tpu.memory_space<vmem>>, vector<128x128xf32>,
    %c0_2 = arith.constant 0 : index
    %c0_3 = arith.constant 0 : index
    %6 = vector.load %arg3[%c0_2, %c0_3] : memref<128x128xf32, #tpu.memory_space<vmem>>, vector<128x128xf32>
    %c0_4 = arith.constant 0 : index
    %c0_5 = arith.constant 0 : index
    %7 = vector.load %arg4[%c0_4, %c0_5] : memref<128x128xf32, #tpu.memory_space<vmem>>, vector<128x128xf32>
    %cst_6 = arith.constant dense<0.000000e+00> : vector<128x128xf32>
    %8 = tpu.matmul %6, %7, %cst_6 {dimension_numbers = #tpu.dot_dimension_numbers<[1], [1], [0], [0], [0, 0, 1, 0], [], []>, precision = #tpu.contract_precision<fp32>} : vector<128x128xf32>, vector<128x128xf32>, vector<128x128xf32> -> vector<128x128xf32>
    %c0_7 = arith.constant 0 : index
    %c0_8 = arith.constant 0 : index
    %9 = vector.load %arg6[%c0_7, %c0_8] : memref<128x128xf32, #tpu.memory_space<vmem>>, vector<128x128xf32>
    %c0_9 = arith.constant 0 : index
    %c0_10 = arith.constant 0 : index
    %10 = vector.load %arg7[%c0_9, %c0_10] : memref<128x128xf32, #tpu.memory_space<vmem>>, vector<128x128xf32>
    %cst_11 = arith.constant dense<0.000000e+00> : vector<128x128xf32>
    %11 = tpu.matmul %9, %10, %cst_11 {dimension_numbers = #tpu.dot_dimension_numbers<[1], [1], [0], [0], [0, 0, 1, 0], [], []>, precision = #tpu.contract_precision<fp32>} : vector<128x128xf32>, vector<128x128xf32>, vector<128x128xf32> -> vector<128x128xf32>
    %cst_12 = arith.constant 1.000000e+00 : f32
    %12 = vector.broadcast %cst_12 : f32 to vector<128x128xf32>
    %13 = arith.subf %12, %11 : vector<128x128xf32>
    %c0_13 = arith.constant 0 : index
    %c0_14 = arith.constant 0 : index
    %14 = vector.load %arg2[%c0_13, %c0_14] : memref<128x128xf32, #tpu.memory_space<vmem>>, vector<128x128xf32>
    %15 = arith.extui %0 : i1 to i32
    %16 = arith.sitofp %15 : i32 to f32
    %17 = vector.broadcast %16 : f32 to vector<128x128xf32>
    %18 = arith.mulf %14, %17 : vector<128x128xf32>
    %cst_15 = arith.constant 1.000000e+00 : f32
    %19 = vector.broadcast %cst_15 : f32 to vector<128x128xf32>
    %20 = arith.subf %19, %18 : vector<128x128xf32>
    %c0_16 = arith.constant 0 : index
    %c0_17 = arith.constant 0 : index
    %21 = vector.load %arg13[%c0_16, %c0_17] : memref<128x1xf32, #tpu.memory_space<vmem>>, vector<128x1xf32>
    %c0_18 = arith.constant 0 : index
    %c0_19 = arith.constant 0 : index
    %22 = vector.load %arg14[%c0_18, %c0_19] : memref<128x1xf32, #tpu.memory_space<vmem>>, vector<128x1xf32>
    %cst_20 = arith.constant dense<0xFF800000> : vector<128xf32>
    %23 = vector.multi_reduction <maximumf>, %8, %cst_20 [1] : vector<128x128xf32> to vector<128xf32>
    %24 = vector.shape_cast %23 : vector<128xf32> to vector<128x1xf32>
    %25 = arith.maximumf %21, %24 : vector<128x1xf32>
    %26 = arith.subf %21, %25 : vector<128x1xf32>
    %27 = math.exp %26 : vector<128x1xf32>
    %28 = vector.broadcast %25 : vector<128x1xf32> to vector<128x128xf32>
    %29 = arith.subf %8, %28 : vector<128x128xf32>
    %30 = math.exp %29 : vector<128x128xf32>
    %31 = arith.mulf %13, %20 : vector<128x128xf32>
    %32 = arith.mulf %27, %22 : vector<128x1xf32>
    %cst_21 = arith.constant dense<0.000000e+00> : vector<128xf32>
    %33 = vector.multi_reduction <add>, %30, %cst_21 [1] : vector<128x128xf32> to vector<128xf32>
    %34 = vector.shape_cast %33 : vector<128xf32> to vector<128x1xf32>
    %35 = arith.addf %32, %34 : vector<128x1xf32>
    %c0_22 = arith.constant 0 : index
    %c0_23 = arith.constant 0 : index
    %36 = vector.load %arg14[%c0_22, %c0_23] : memref<128x1xf32, #tpu.memory_space<vmem>>, vector<128x1xf32>
    tpu.vector_store %arg14[%c0_22, %c0_23], %35 {strides = array<i32>} : memref<128x1xf32, #tpu.memory_space<vmem>>, vector<128x1xf32>,
    %c0_24 = arith.constant 0 : index
    %c0_25 = arith.constant 0 : index
    %37 = vector.load %arg15[%c0_24, %c0_25] : memref<128x1xf32, #tpu.memory_space<vmem>>, vector<128x1xf32>
    %38 = arith.mulf %26, %22 : vector<128x1xf32>
    %39 = arith.addf %37, %38 : vector<128x1xf32>
    %40 = arith.mulf %27, %39 : vector<128x1xf32>
    %41 = arith.mulf %30, %29 : vector<128x128xf32>
    %cst_26 = arith.constant dense<0.000000e+00> : vector<128xf32>
    %42 = vector.multi_reduction <add>, %41, %cst_26 [1] : vector<128x128xf32> to vector<128xf32>
    %43 = vector.shape_cast %42 : vector<128xf32> to vector<128x1xf32>
    %44 = arith.addf %40, %43 : vector<128x1xf32>
    %c0_27 = arith.constant 0 : index
    %c0_28 = arith.constant 0 : index
    %45 = vector.load %arg15[%c0_27, %c0_28] : memref<128x1xf32, #tpu.memory_space<vmem>>, vector<128x1xf32>
    tpu.vector_store %arg15[%c0_27, %c0_28], %44 {strides = array<i32>} : memref<128x1xf32, #tpu.memory_space<vmem>>, vector<128x1xf32>,
    %c0_29 = arith.constant 0 : index
    %c0_30 = arith.constant 0 : index
    %46 = vector.load %arg16[%c0_29, %c0_30] : memref<128x1xf32, #tpu.memory_space<vmem>>, vector<128x1xf32>
    %47 = arith.mulf %27, %46 : vector<128x1xf32>
    %48 = arith.mulf %30, %31 : vector<128x128xf32>
    %cst_31 = arith.constant dense<0.000000e+00> : vector<128xf32>
    %49 = vector.multi_reduction <add>, %48, %cst_31 [1] : vector<128x128xf32> to vector<128xf32>
    %50 = vector.shape_cast %49 : vector<128xf32> to vector<128x1xf32>
    %51 = arith.addf %47, %50 : vector<128x1xf32>
    %c0_32 = arith.constant 0 : index
    %c0_33 = arith.constant 0 : index
    %52 = vector.load %arg16[%c0_32, %c0_33] : memref<128x1xf32, #tpu.memory_space<vmem>>, vector<128x1xf32>
    tpu.vector_store %arg16[%c0_32, %c0_33], %51 {strides = array<i32>} : memref<128x1xf32, #tpu.memory_space<vmem>>, vector<128x1xf32>,
    %c0_34 = arith.constant 0 : index
    %c0_35 = arith.constant 0 : index
    %53 = vector.load %arg17[%c0_34, %c0_35] : memref<128x1xf32, #tpu.memory_space<vmem>>, vector<128x1xf32>
    %cst_36 = arith.constant dense<0.000000e+00> : vector<128xf32>
    %54 = vector.multi_reduction <add>, %31, %cst_36 [1] : vector<128x128xf32> to vector<128xf32>
    %55 = vector.shape_cast %54 : vector<128xf32> to vector<128x1xf32>
    %56 = arith.addf %53, %55 : vector<128x1xf32>
    %c0_37 = arith.constant 0 : index
    %c0_38 = arith.constant 0 : index
    %57 = vector.load %arg17[%c0_37, %c0_38] : memref<128x1xf32, #tpu.memory_space<vmem>>, vector<128x1xf32>
    tpu.vector_store %arg17[%c0_37, %c0_38], %56 {strides = array<i32>} : memref<128x1xf32, #tpu.memory_space<vmem>>, vector<128x1xf32>,
    %c0_39 = arith.constant 0 : index
    %c0_40 = arith.constant 0 : index
    %58 = vector.load %arg13[%c0_39, %c0_40] : memref<128x1xf32, #tpu.memory_space<vmem>>, vector<128x1xf32>
    tpu.vector_store %arg13[%c0_39, %c0_40], %25 {strides = array<i32>} : memref<128x1xf32, #tpu.memory_space<vmem>>, vector<128x1xf32>,
    %59 = arith.extui %0 : i1 to i32
    %c0_i32_41 = arith.constant 0 : i32
    %60 = arith.cmpi ne, %59, %c0_i32_41 : i32
    scf.if %60 {
      %c0_42 = arith.constant 0 : index
      %c0_43 = arith.constant 0 : index
      %61 = vector.load %arg14[%c0_42, %c0_43] : memref<128x1xf32, #tpu.memory_space<vmem>>, vector<128x1xf32>
      %62 = tpu.reciprocal %61 {approx = true} : vector<128x1xf32> -> vector<128x1xf32>
      %63 = arith.mulf %61, %62 : vector<128x1xf32>
      %cst_44 = arith.constant 2.000000e+00 : f32
      %64 = vector.broadcast %cst_44 : f32 to vector<128x1xf32>
      %65 = arith.subf %64, %63 : vector<128x1xf32>
      %66 = arith.mulf %62, %65 : vector<128x1xf32>
      %67 = math.log %61 : vector<128x1xf32>
      %c0_45 = arith.constant 0 : index
      %c0_46 = arith.constant 0 : index
      %68 = vector.load %arg15[%c0_45, %c0_46] : memref<128x1xf32, #tpu.memory_space<vmem>>, vector<128x1xf32>
      %69 = arith.mulf %68, %66 : vector<128x1xf32>
      %70 = arith.subf %67, %69 : vector<128x1xf32>
      %cst_47 = arith.constant 0.180336878 : f32
      %71 = vector.broadcast %cst_47 : f32 to vector<128x1xf32>
      %72 = arith.mulf %70, %71 : vector<128x1xf32>
      %c0_48 = arith.constant 0 : index
      %c0_49 = arith.constant 0 : index
      %73 = vector.load %arg12[%c0_48, %c0_49] : memref<128x1xf32, #tpu.memory_space<vmem>>, vector<128x1xf32>
      tpu.vector_store %arg12[%c0_48, %c0_49], %72 {strides = array<i32>} : memref<128x1xf32, #tpu.memory_space<vmem>>, vector<128x1xf32>,
      %c0_50 = arith.constant 0 : index
      %c0_51 = arith.constant 0 : index
      %74 = vector.load %arg16[%c0_50, %c0_51] : memref<128x1xf32, #tpu.memory_space<vmem>>, vector<128x1xf32>
      %75 = arith.mulf %74, %66 : vector<128x1xf32>
      %c0_52 = arith.constant 0 : index
      %c0_53 = arith.constant 0 : index
      %76 = vector.load %arg17[%c0_52, %c0_53] : memref<128x1xf32, #tpu.memory_space<vmem>>, vector<128x1xf32>
      %77 = arith.divf %75, %76 : vector<128x1xf32>
      %78 = vector.broadcast %66 : vector<128x1xf32> to vector<128x128xf32>
      %79 = arith.mulf %30, %78 : vector<128x128xf32>
      %80 = tpu.transpose %77, [1, 0] : vector<128x1xf32> -> vector<1x128xf32>
      %81 = vector.broadcast %80 : vector<1x128xf32> to vector<128x128xf32>
      %82 = arith.addf %79, %81 : vector<128x128xf32>
      %83 = arith.mulf %82, %14 : vector<128x128xf32>
      %c0_54 = arith.constant 0 : index
      %c0_55 = arith.constant 0 : index
      %84 = vector.load %arg11[%c0_54, %c0_55] : memref<128x128xf32, #tpu.memory_space<vmem>>, vector<128x128xf32>
      tpu.vector_store %arg11[%c0_54, %c0_55], %83 {strides = array<i32>} : memref<128x128xf32, #tpu.memory_space<vmem>>, vector<128x128xf32>,
      %c0_56 = arith.constant 0 : index
      %c0_57 = arith.constant 0 : index
      %85 = vector.load %arg5[%c0_56, %c0_57] : memref<128x128xf32, #tpu.memory_space<vmem>>, vector<128x128xf32>
      %cst_58 = arith.constant dense<0.000000e+00> : vector<128x128xf32>
      %86 = tpu.matmul %83, %85, %cst_58 {dimension_numbers = #tpu.dot_dimension_numbers<[1], [0], [0], [1], [0, 0, 1, 1], [], []>, precision = #tpu.contract_precision<fp32>} : vector<128x128xf32>, vector<128x128xf32>, vector<128x128xf32> -> vector<128x128xf32>
      %c0_59 = arith.constant 0 : index
      %c0_60 = arith.constant 0 : index
      %87 = vector.load %arg8[%c0_59, %c0_60] : memref<128x128xf32, #tpu.memory_space<vmem>>, vector<128x128xf32>
      %cst_61 = arith.constant dense<0.000000e+00> : vector<128x128xf32>
      %88 = tpu.matmul %86, %87, %cst_61 {dimension_numbers = #tpu.dot_dimension_numbers<[1], [0], [0], [1], [0, 0, 1, 1], [], []>, precision = #tpu.contract_precision<fp32>} : vector<128x128xf32>, vector<128x128xf32>, vector<128x128xf32> -> vector<128x128xf32>
      %c0_62 = arith.constant 0 : index
      %c0_63 = arith.constant 0 : index
      %89 = vector.load %arg9[%c0_62, %c0_63] : memref<1x128xf32, #tpu.memory_space<vmem>>, vector<1x128xf32>
      %90 = vector.broadcast %77 : vector<128x1xf32> to vector<128x128xf32>
      %91 = vector.broadcast %89 : vector<1x128xf32> to vector<128x128xf32>
      %92 = arith.mulf %90, %91 : vector<128x128xf32>
      %93 = arith.addf %88, %92 : vector<128x128xf32>
      %c0_64 = arith.constant 0 : index
      %c0_65 = arith.constant 0 : index
      %94 = vector.load %arg10[%c0_64, %c0_65] : memref<128x128xf32, #tpu.memory_space<vmem>>, vector<128x128xf32>
      tpu.vector_store %arg10[%c0_64, %c0_65], %93 {strides = array<i32>} : memref<128x128xf32, #tpu.memory_space<vmem>>, vector<128x128xf32>,
    } else {
    }
    return
  }
  func.func @transform_0(%arg0: i32, %arg1: i32) -> (i32, i32) {
    %c0_i32 = arith.constant 0 : i32
    %c0_i32_0 = arith.constant 0 : i32
    %c0_i32_1 = arith.constant 0 : i32
    return %c0_i32, %c0_i32_0 : i32, i32
  }
  func.func @transform_1(%arg0: i32, %arg1: i32) -> (i32, i32) {
    %c0_i32 = arith.constant 0 : i32
    %c0_i32_0 = arith.constant 0 : i32
    return %arg0, %c0_i32 : i32, i32
  }
  func.func @transform_2(%arg0: i32, %arg1: i32) -> (i32, i32) {
    %c1_i32 = arith.constant 1 : i32
    %0 = arith.addi %arg0, %c1_i32 : i32
    %1 = arith.addi %0, %arg1 : i32
    %c2_i32 = arith.constant 2 : i32
    %c0_i32 = arith.constant 0 : i32
    %2 = arith.cmpi eq, %c2_i32, %c0_i32 : i32
    %c1_i32_0 = arith.constant 1 : i32
    %3 = arith.select %2, %c1_i32_0, %c2_i32 : i32
    %4 = arith.remsi %1, %3 : i32
    %c0_i32_1 = arith.constant 0 : i32
    %5 = arith.cmpi ne, %4, %c0_i32_1 : i32
    %c0_i32_2 = arith.constant 0 : i32
    %6 = arith.cmpi slt, %4, %c0_i32_2 : i32
    %c0_i32_3 = arith.constant 0 : i32
    %7 = arith.cmpi slt, %3, %c0_i32_3 : i32
    %8 = arith.xori %6, %7 : i1
    %9 = arith.andi %8, %5 : i1
    %10 = arith.addi %4, %3 : i32
    %11 = arith.select %9, %10, %4 : i32
    %c0_i32_4 = arith.constant 0 : i32
    %c0_i32_5 = arith.constant 0 : i32
    return %11, %c0_i32_4 : i32, i32
  }
  func.func @transform_3(%arg0: i32, %arg1: i32) -> (i32, i32) {
    %c0_i32 = arith.constant 0 : i32
    %c0_i32_0 = arith.constant 0 : i32
    return %arg0, %c0_i32 : i32, i32
  }
  func.func @transform_4(%arg0: i32, %arg1: i32) -> (i32, i32) {
    %c0_i32 = arith.constant 0 : i32
    %c0_i32_0 = arith.constant 0 : i32
    return %arg0, %c0_i32 : i32, i32
  }
  func.func @transform_5(%arg0: i32, %arg1: i32) -> (i32, i32) {
    %c1_i32 = arith.constant 1 : i32
    %0 = arith.addi %arg0, %c1_i32 : i32
    %1 = arith.addi %0, %arg1 : i32
    %c2_i32 = arith.constant 2 : i32
    %c0_i32 = arith.constant 0 : i32
    %2 = arith.cmpi eq, %c2_i32, %c0_i32 : i32
    %c1_i32_0 = arith.constant 1 : i32
    %3 = arith.select %2, %c1_i32_0, %c2_i32 : i32
    %4 = arith.remsi %1, %3 : i32
    %c0_i32_1 = arith.constant 0 : i32
    %5 = arith.cmpi ne, %4, %c0_i32_1 : i32
    %c0_i32_2 = arith.constant 0 : i32
    %6 = arith.cmpi slt, %4, %c0_i32_2 : i32
    %c0_i32_3 = arith.constant 0 : i32
    %7 = arith.cmpi slt, %3, %c0_i32_3 : i32
    %8 = arith.xori %6, %7 : i1
    %9 = arith.andi %8, %5 : i1
    %10 = arith.addi %4, %3 : i32
    %11 = arith.select %9, %10, %4 : i32
    %c0_i32_4 = arith.constant 0 : i32
    %c0_i32_5 = arith.constant 0 : i32
    return %11, %c0_i32_4 : i32, i32
  }
  func.func @transform_6(%arg0: i32, %arg1: i32) -> (i32, i32) {
    %c0_i32 = arith.constant 0 : i32
    %c0_i32_0 = arith.constant 0 : i32
    %c0_i32_1 = arith.constant 0 : i32
    return %c0_i32, %c0_i32_0 : i32, i32
  }
  func.func @transform_7(%arg0: i32, %arg1: i32) -> (i32, i32) {
    %c0_i32 = arith.constant 0 : i32
    %c0_i32_0 = arith.constant 0 : i32
    %c0_i32_1 = arith.constant 0 : i32
    return %c0_i32, %c0_i32_0 : i32, i32
  }
  func.func @transform_8(%arg0: i32, %arg1: i32) -> (i32, i32) {
    %c0_i32 = arith.constant 0 : i32
    %c0_i32_0 = arith.constant 0 : i32
    return %arg0, %c0_i32 : i32, i32
  }
  func.func @transform_9(%arg0: i32, %arg1: i32) -> (i32, i32) {
    %c1_i32 = arith.constant 1 : i32
    %0 = arith.addi %arg0, %c1_i32 : i32
    %1 = arith.addi %0, %arg1 : i32
    %c2_i32 = arith.constant 2 : i32
    %c0_i32 = arith.constant 0 : i32
    %2 = arith.cmpi eq, %c2_i32, %c0_i32 : i32
    %c1_i32_0 = arith.constant 1 : i32
    %3 = arith.select %2, %c1_i32_0, %c2_i32 : i32
    %4 = arith.remsi %1, %3 : i32
    %c0_i32_1 = arith.constant 0 : i32
    %5 = arith.cmpi ne, %4, %c0_i32_1 : i32
    %c0_i32_2 = arith.constant 0 : i32
    %6 = arith.cmpi slt, %4, %c0_i32_2 : i32
    %c0_i32_3 = arith.constant 0 : i32
    %7 = arith.cmpi slt, %3, %c0_i32_3 : i32
    %8 = arith.xori %6, %7 : i1
    %9 = arith.andi %8, %5 : i1
    %10 = arith.addi %4, %3 : i32
    %11 = arith.select %9, %10, %4 : i32
    %c0_i32_4 = arith.constant 0 : i32
    return %arg0, %11 : i32, i32
  }
  func.func @transform_10(%arg0: i32, %arg1: i32) -> (i32, i32) {
    %c0_i32 = arith.constant 0 : i32
    %c0_i32_0 = arith.constant 0 : i32
    return %arg0, %c0_i32 : i32, i32
  }
}

</mosaic_0001>

<bundles_post_ra>
// kernel: self_attention_forward.5
= control target key start
LH: loop header
LB: loop body
LE: loop exit
PB: predicated region body
PF: predicated region fallthrough
CT: control target
= control target key end

     0   :  { %s539_s17 = smov 0   ;;  %s621_s0 = inlined_call_operand.vmem [shape: f32[256,128], index: 0, kind: input, shape index: {}, may-alias: {0,4}]   ;;  %s622_s1 = inlined_call_operand.vmem [shape: f32[256,1], index: 1, kind: input, shape index: {}]   ;;  %s623_s2 = inlined_call_operand.<no memory space> [shape: f32[1,1], index: 2, kind: input, shape index: {}]   ;;  %s624_s3 = inlined_call_operand.vmem [shape: f32[1,128], index: 3, kind: input, shape index: {}]   ;;  %s625_s4 = inlined_call_operand.vmem [shape: f32[256,128], index: 4, kind: output, shape index: {}, may-alias: {0,4}]  }
   0x1   :  { %9 = sst [smem:[#allocation2]] %s623_s2 }
   0x2 LB: > { %s477_s18 = sadd.s32 4294967295, %s508_s17   ;;  %p481_p0 = scmp.ge.s32.totalorder %s508_s17, 1  ;;  %s508_s17 = sphi %s539_s17, %s15_s17  }
   0x3   : > { %p175_p1 = scmp.lt.s32.totalorder %s508_s17, 3 }
   0x5   : > { %p176_p2 = pnand %p481_p0, %p175_p1 }
   0x6   : > { %s482_s19 = sshll.u32 (!%p176_p2), %s477_s18, 4  ;;  %s256_s20 = sld [smem:[#allocation2]] (!%p176_p2) }
   0x7   : > { %179 = sbr.rel (%p176_p2) target bundleno = 175 (0xaf), region = 36  ;;  %p207_p3 = scmp.lt.s32.totalorder (!%p176_p2), %s482_s19, 31 }
   0xc   : > { %v510_v0 = vmov 0   ;;  %s627_s19 = smov (!%p207_p3, %s482_s19), 31  ;;  %v257_v1 = vstv %s256_s20  ;;  %v578_v34 = vld [vmem:[%s624_s3] ss:$0 sm:$0xff] }
   0xd   : > { %501 = vset.pattern.permute.xlu1 %v510_v0  ;;  %500 = vset.pattern.permute.xlu0 %v510_v0  ;;  %s547_s2 = sshll.u32 %s627_s19, 3 }
   0xe   : > { %s553_s23 = scalar_lea.vmem %s622_s1, %s547_s2  ;;  %s210_s26 = scalar_lea.vmem %s621_s0, %s547_s2 }
   0xf   : > { %v242_v2 = vld [vmem:[%s553_s23 + $0x10] sm:$0xff]  ;;  %v240_v3 = vld [vmem:[%s553_s23] sm:$0xff]  ;;  %v243_v4 = vld [vmem:[%s553_s23 + $0x18] sm:$0xff]  ;;  %s586_s5 = scalar_lea.vmem %s625_s4, %s547_s2 }
  0x10   : > { %v260_v5 = vmul.f32 %v257_v1, %v242_v2  ;;  %v258_v6 = vmul.f32 %v257_v1, %v240_v3  ;;  %v241_v7 = vld [vmem:[%s553_s23 + $0x8] sm:$0xff]  ;;  %v261_v8 = vmul.f32 %v257_v1, %v243_v4  ;;  %v244_v11 = vld [vmem:[%s553_s23 + $0x20] sm:$0xff]  ;;  %v247_v14 = vld [vmem:[%s553_s23 + $0x38] sm:$0xff] }
  0x11   : > { %v259_v9 = vmul.f32 %v257_v1, %v241_v7  ;;  %v245_v10 = vld [vmem:[%s553_s23 + $0x28] sm:$0xff]  ;;  %v262_v13 = vmul.f32 %v257_v1, %v244_v11  ;;  %v246_v15 = vld [vmem:[%s553_s23 + $0x30] sm:$0xff]  ;;  %v265_v16 = vmul.f32 %v257_v1, %v247_v14  ;;  %v248_v19 = vld [vmem:[%s553_s23 + $0x40] sm:$0xff] }
  0x12   : > { %287 = vperm.xlu1 %501, %v260_v5   ;;  %277 = vperm.xlu0 %500, %v258_v6   ;;  %v263_v12 = vmul.f32 %v257_v1, %v245_v10  ;;  %v264_v17 = vmul.f32 %v257_v1, %v246_v15  ;;  %v249_v18 = vld [vmem:[%s553_s23 + $0x48] sm:$0xff]  ;;  %v266_v21 = vmul.f32 %v257_v1, %v248_v19  ;;  %v251_v22 = vld [vmem:[%s553_s23 + $0x58] sm:$0xff]  ;;  %v250_v23 = vld [vmem:[%s553_s23 + $0x50] sm:$0xff] }
  0x13   : > { %v267_v20 = vmul.f32 %v257_v1, %v249_v18  ;;  %v269_v24 = vmul.f32 %v257_v1, %v251_v22  ;;  %v268_v25 = vmul.f32 %v257_v1, %v250_v23  ;;  %v253_v26 = vld [vmem:[%s553_s23 + $0x68] sm:$0xff]  ;;  %v252_v27 = vld [vmem:[%s553_s23 + $0x60] sm:$0xff]  ;;  %v255_v30 = vld [vmem:[%s553_s23 + $0x78] sm:$0xff] }
  0x14   : > { %v271_v28 = vmul.f32 %v257_v1, %v253_v26  ;;  %v270_v29 = vmul.f32 %v257_v1, %v252_v27  ;;  %v254_v31 = vld [vmem:[%s553_s23 + $0x70] sm:$0xff]  ;;  %v273_v32 = vmul.f32 %v257_v1, %v255_v30  ;;  %v224_v36 = vld [vmem:[%s210_s26] sm:$0xff]  ;;  %v227_v39 = vld [vmem:[%s210_s26 + $0x18] sm:$0xff] }
  0x15   : > { %v272_v33 = vmul.f32 %v257_v1, %v254_v31  ;;  %v226_v35 = vld [vmem:[%s210_s26 + $0x10] sm:$0xff]  ;;  %v225_v40 = vld [vmem:[%s210_s26 + $0x8] sm:$0xff]  ;;  %v228_v42 = vld [vmem:[%s210_s26 + $0x20] sm:$0xff] }
  0x16   : > { %292 = vperm.xlu1 %501, %v261_v8   ;;  %282 = vperm.xlu0 %500, %v259_v9   ;;  %v229_v41 = vld [vmem:[%s210_s26 + $0x28] sm:$0xff]  ;;  %v231_v43 = vld [vmem:[%s210_s26 + $0x38] sm:$0xff]  ;;  %v230_v44 = vld [vmem:[%s210_s26 + $0x30] sm:$0xff] }
  0x17   : > { %v233_v45 = vld [vmem:[%s210_s26 + $0x48] sm:$0xff]  ;;  %v232_v46 = vld [vmem:[%s210_s26 + $0x40] sm:$0xff]  ;;  %v235_v49 = vld [vmem:[%s210_s26 + $0x58] sm:$0xff] }
  0x18   : > { %v234_v50 = vld [vmem:[%s210_s26 + $0x50] sm:$0xff]  ;;  %v237_v51 = vld [vmem:[%s210_s26 + $0x68] sm:$0xff]  ;;  %v236_v52 = vld [vmem:[%s210_s26 + $0x60] sm:$0xff] }
  0x19   : > { %v239_v53 = vld [vmem:[%s210_s26 + $0x78] sm:$0xff]  ;;  %v238_v54 = vld [vmem:[%s210_s26 + $0x70] sm:$0xff] }
  0x1a   : > { %302 = vperm.xlu1 %501, %v263_v12   ;;  %297 = vperm.xlu0 %500, %v262_v13  }
  0x1e   : > { %312 = vperm.xlu1 %501, %v265_v16   ;;  %307 = vperm.xlu0 %500, %v264_v17  }
  0x22   : > { %322 = vperm.xlu1 %501, %v267_v20   ;;  %317 = vperm.xlu0 %500, %v266_v21  }
  0x26   : > { %332 = vperm.xlu1 %501, %v269_v24   ;;  %327 = vperm.xlu0 %500, %v268_v25  }
  0x2a   : > { %342 = vperm.xlu1 %501, %v271_v28   ;;  %337 = vperm.xlu0 %500, %v270_v29  }
  0x2e   : > { %352 = vperm.xlu1 %501, %v273_v32   ;;  %347 = vperm.xlu0 %500, %v272_v33  }
  0x8d   : > { %v288_v37 = vpop.permute.xlu1 %287  ;;  %v278_v38 = vpop.permute.xlu0 %277 }
  0x8e   : > { %v363_v47 = vmul.f32 %v578_v34, %v288_v37  ;;  %v361_v48 = vmul.f32 %v578_v34, %v278_v38 }
  0x90   : > { %v379_v55 = vadd.f32 %v363_v47, %v226_v35  ;;  %v377_v56 = vadd.f32 %v361_v48, %v224_v36 }
  0x91   : > { %v293_v57 = vpop.permute.xlu1 %292  ;;  %v283_v58 = vpop.permute.xlu0 %282 }
  0x92   : > { %v364_v59 = vmul.f32 %v578_v34, %v293_v57  ;;  %v362_v60 = vmul.f32 %v578_v34, %v283_v58  ;;  %393 = vst [vmem:[%s586_s5] sm:$0xff] %v377_v56  ;;  %395 = vst [vmem:[%s586_s5 + $0x10] sm:$0xff] %v379_v55 }
  0x94   : > { %v380_v61 = vadd.f32 %v364_v59, %v227_v39  ;;  %v378_v62 = vadd.f32 %v362_v60, %v225_v40 }
  0x95   : > { %v303_v63 = vpop.permute.xlu1 %302  ;;  %v298_v0 = vpop.permute.xlu0 %297 }
  0x96   : > { %v366_v1 = vmul.f32 %v578_v34, %v303_v63  ;;  %v365_v2 = vmul.f32 %v578_v34, %v298_v0  ;;  %394 = vst [vmem:[%s586_s5 + $0x8] sm:$0xff] %v378_v62  ;;  %396 = vst [vmem:[%s586_s5 + $0x18] sm:$0xff] %v380_v61 }
  0x98   : > { %v382_v3 = vadd.f32 %v366_v1, %v229_v41  ;;  %v381_v4 = vadd.f32 %v365_v2, %v228_v42 }
  0x99   : > { %v313_v5 = vpop.permute.xlu1 %312  ;;  %v308_v6 = vpop.permute.xlu0 %307 }
  0x9a   : > { %v368_v7 = vmul.f32 %v578_v34, %v313_v5  ;;  %v367_v8 = vmul.f32 %v578_v34, %v308_v6  ;;  %397 = vst [vmem:[%s586_s5 + $0x20] sm:$0xff] %v381_v4  ;;  %398 = vst [vmem:[%s586_s5 + $0x28] sm:$0xff] %v382_v3 }
  0x9c   : > { %v384_v9 = vadd.f32 %v368_v7, %v231_v43  ;;  %v383_v10 = vadd.f32 %v367_v8, %v230_v44 }
  0x9d   : > { %v323_v11 = vpop.permute.xlu1 %322  ;;  %v318_v12 = vpop.permute.xlu0 %317 }
  0x9e   : > { %v370_v13 = vmul.f32 %v578_v34, %v323_v11  ;;  %v369_v14 = vmul.f32 %v578_v34, %v318_v12  ;;  %399 = vst [vmem:[%s586_s5 + $0x30] sm:$0xff] %v383_v10  ;;  %400 = vst [vmem:[%s586_s5 + $0x38] sm:$0xff] %v384_v9 }
  0xa0   : > { %v386_v15 = vadd.f32 %v370_v13, %v233_v45  ;;  %v385_v16 = vadd.f32 %v369_v14, %v232_v46 }
  0xa1   : > { %v333_v17 = vpop.permute.xlu1 %332  ;;  %v328_v18 = vpop.permute.xlu0 %327 }
  0xa2   : > { %v372_v19 = vmul.f32 %v578_v34, %v333_v17  ;;  %v371_v20 = vmul.f32 %v578_v34, %v328_v18  ;;  %401 = vst [vmem:[%s586_s5 + $0x40] sm:$0xff] %v385_v16  ;;  %402 = vst [vmem:[%s586_s5 + $0x48] sm:$0xff] %v386_v15 }
  0xa4   : > { %v388_v21 = vadd.f32 %v372_v19, %v235_v49  ;;  %v387_v22 = vadd.f32 %v371_v20, %v234_v50 }
  0xa5   : > { %v343_v23 = vpop.permute.xlu1 %342  ;;  %v338_v24 = vpop.permute.xlu0 %337 }
  0xa6   : > { %v374_v25 = vmul.f32 %v578_v34, %v343_v23  ;;  %v373_v26 = vmul.f32 %v578_v34, %v338_v24  ;;  %403 = vst [vmem:[%s586_s5 + $0x50] sm:$0xff] %v387_v22  ;;  %404 = vst [vmem:[%s586_s5 + $0x58] sm:$0xff] %v388_v21 }
  0xa8   : > { %v390_v27 = vadd.f32 %v374_v25, %v237_v51  ;;  %v389_v28 = vadd.f32 %v373_v26, %v236_v52 }
  0xa9   : > { %v353_v29 = vpop.permute.xlu1 %352  ;;  %v348_v30 = vpop.permute.xlu0 %347 }
  0xaa   : > { %v376_v31 = vmul.f32 %v578_v34, %v353_v29  ;;  %v375_v32 = vmul.f32 %v578_v34, %v348_v30  ;;  %405 = vst [vmem:[%s586_s5 + $0x60] sm:$0xff] %v389_v28  ;;  %406 = vst [vmem:[%s586_s5 + $0x68] sm:$0xff] %v390_v27 }
  0xac   : > { %v392_v33 = vadd.f32 %v376_v31, %v239_v53  ;;  %v391_v35 = vadd.f32 %v375_v32, %v238_v54 }
  0xae   : > { %407 = vst [vmem:[%s586_s5 + $0x70] sm:$0xff] %v391_v35  ;;  %408 = vst [vmem:[%s586_s5 + $0x78] sm:$0xff] %v392_v33 }
  0xaf PF: > { %s15_s17 = sadd.s32 1, %s508_s17  }
  0xb0   : > { %p12_p4 = scmp.ge.s32.totalorder %s15_s17, 4  }
  0xb2   :  { %14 = sbr.rel (!%p12_p4) target bundleno = 2 (0x2), region = 69 }

// kernel: self_attention_forward.3
= control target key start
LH: loop header
LB: loop body
LE: loop exit
PB: predicated region body
PF: predicated region fallthrough
CT: control target
= control target key end

     0   :  { %s6462_s24 = smov 0   ;;  %s9067_s0 = inlined_call_operand.vmem [shape: f32[256,128], index: 0, kind: input, shape index: {}]   ;;  %s9068_s1 = inlined_call_operand.vmem [shape: f32[128,128], index: 1, kind: input, shape index: {}]   ;;  %s9069_s2 = inlined_call_operand.vmem [shape: f32[128,128], index: 2, kind: input, shape index: {}]   ;;  %s9070_s3 = inlined_call_operand.vmem [shape: f32[128,128], index: 3, kind: input, shape index: {}]   ;;  %s9071_s4 = inlined_call_operand.vmem [shape: f32[256,128], index: 4, kind: output, shape index: {0}]   ;;  %s9072_s5 = inlined_call_operand.vmem [shape: f32[256,128], index: 5, kind: output, shape index: {1}]   ;;  %s9073_s6 = inlined_call_operand.vmem [shape: f32[256,128], index: 6, kind: output, shape index: {2}]   ;;  %s9074_s7 = inlined_call_operand.vmem [shape: f32[256,128], index: 7, kind: output, shape index: {3}]  }
   0x1 LB: > { %s4722_s25 = sadd.s32 4294967295, %s6420_s24   ;;  %p4726_p0 = scmp.ge.s32.totalorder %s6420_s24, 1  ;;  %s6420_s24 = sphi %s6462_s24, %s18_s24  }
   0x2   : > { %p245_p1 = scmp.lt.s32.totalorder %s6420_s24, 3 }
   0x4   : > { %p246_p2 = pnand %p4726_p0, %p245_p1 }
   0x6   : > { %249 = sbr.rel (%p246_p2) target bundleno = 668 (0x29c), region = 36 }
   0xb   : > { %v353_v0 = vld [vmem:[%s9068_s1 + $0x78] sm:$0xff]  ;;  %v352_v1 = vld [vmem:[%s9068_s1 + $0x70] sm:$0xff]  ;;  %v351_v2 = vld [vmem:[%s9068_s1 + $0x68] sm:$0xff]  ;;  %s4727_s9 = sshll.u32 %s4722_s25, 4 }
   0xc   : > { %v6479_v3 = vand.u32 4294901760, %v353_v0  ;;  %v6481_v4 = vand.u32 4294901760, %v352_v1  ;;  %v6483_v5 = vand.u32 4294901760, %v351_v2  ;;  %v350_v6 = vld [vmem:[%s9068_s1 + $0x60] sm:$0xff]  ;;  %v349_v7 = vld [vmem:[%s9068_s1 + $0x58] sm:$0xff]  ;;  %v348_v8 = vld [vmem:[%s9068_s1 + $0x50] sm:$0xff] }
   0xd   : > { %v6494_v9 = vand.u32 4294901760, %v350_v6  ;;  %v6496_v10 = vand.u32 4294901760, %v349_v7  ;;  %v6498_v11 = vand.u32 4294901760, %v348_v8  ;;  %v347_v12 = vld [vmem:[%s9068_s1 + $0x48] sm:$0xff]  ;;  %v346_v13 = vld [vmem:[%s9068_s1 + $0x40] sm:$0xff]  ;;  %v345_v18 = vld [vmem:[%s9068_s1 + $0x38] sm:$0xff] }
   0xe   : > { %5315 = vmatprep.subr.mxu0 %v6479_v3  ;;  %v6508_v14 = vsub.f32 %v353_v0, %v6479_v3  ;;  %v6511_v15 = vsub.f32 %v352_v1, %v6481_v4  ;;  %v6513_v16 = vand.u32 4294901760, %v347_v12  ;;  %v6516_v17 = vsub.f32 %v351_v2, %v6483_v5  ;;  %p293_p3 = scmp.lt.s32.totalorder %s4727_s9, 31  ;;  %v344_v25 = vld [vmem:[%s9068_s1 + $0x30] sm:$0xff]  ;;  %v343_v35 = vld [vmem:[%s9068_s1 + $0x28] sm:$0xff]  ;;  %v342_v40 = vld [vmem:[%s9068_s1 + $0x20] sm:$0xff] }
   0xf   : > { %5316 = vmatpush3.msra.mxu0 %v6479_v3  ;;  %v6523_v19 = vsub.f32 %v350_v6, %v6494_v9  ;;  %v6526_v20 = vsub.f32 %v349_v7, %v6496_v10  ;;  %v6538_v24 = vand.u32 4294901760, %v346_v13  ;;  %v6547_v27 = vand.u32 4294901760, %v345_v18  ;;  %v341_v53 = vld [vmem:[%s9068_s1 + $0x18] sm:$0xff]  ;;  %v340_v59 = vld [vmem:[%s9068_s1 + $0x10] sm:$0xff]  ;;  %v339_v6 = vld [vmem:[%s9068_s1 + $0x8] sm:$0xff] }
  0x10   : > { %5317 = vmatprep.subr.mxu0 %v6481_v4  ;;  %v6530_v21 = vand.u32 4294901760, %v6508_v14  ;;  %v6533_v22 = vand.u32 4294901760, %v6511_v15  ;;  %v6536_v23 = vand.u32 4294901760, %v6516_v17  ;;  %s9780_s9 = smov (!%p293_p3, %s4727_s9), 31  ;;  %v6553_v29 = vsub.f32 %v348_v8, %v6498_v11 }
  0x11   : > { %5318 = vmatpush3.msra.mxu0 %v6481_v4  ;;  %v6545_v26 = vand.u32 4294901760, %v6523_v19  ;;  %v6550_v28 = vand.u32 4294901760, %v6526_v20  ;;  %v6563_v33 = vsub.f32 %v347_v12, %v6513_v16  ;;  %s6565_s25 = sshll.u32 %s9780_s9, 3  ;;  %v6568_v34 = vand.u32 4294901760, %v344_v25 }
  0x12   : > { %9330 = vst [vmem:[#allocation2_spill] sm:$0xff] %v6533_v22  ;;  %9331 = vst [vmem:[#allocation3_spill] sm:$0xff] %v6536_v23  ;;  %5319 = vmatprep.subr.mxu0 %v6483_v5  ;;  %v599_v30 = vsub.f32 %v6508_v14, %v6530_v21  ;;  %v606_v31 = vsub.f32 %v6511_v15, %v6533_v22  ;;  %v613_v32 = vsub.f32 %v6516_v17, %v6536_v23  ;;  %s6577_s30 = scalar_lea.vmem %s9067_s0, %s6565_s25  ;;  %s8006_s26 = scalar_lea.vmem %s9071_s4, %s6565_s25 }
  0x13   : > { %9332 = vst [vmem:[#allocation4_spill] sm:$0xff] %v6545_v26  ;;  %9333 = vst [vmem:[#allocation5_spill] sm:$0xff] %v6550_v28  ;;  %5320 = vmatpush3.msra.mxu0 %v6483_v5  ;;  %v620_v38 = vsub.f32 %v6523_v19, %v6545_v26  ;;  %v6583_v39 = vand.u32 4294901760, %v6553_v29  ;;  %v6590_v41 = vand.u32 4294901760, %v6563_v33  ;;  %v6593_v42 = vsub.f32 %v346_v13, %v6538_v24  ;;  %v322_v47 = vld [vmem:[%s6577_s30] sm:$0xff]  ;;  %v323_v49 = vld [vmem:[%s6577_s30 + $0x8] sm:$0xff]  ;;  %s8474_s29 = scalar_lea.vmem %s9072_s5, %s6565_s25  ;;  %s8801_s10 = scalar_lea.vmem %s9074_s7, %s6565_s25 }
  0x14   : > { %5321 = vmatprep.subr.mxu0 %v6494_v9  ;;  %v600_v36 = vand.u32 4294901760, %v599_v30  ;;  %v607_v37 = vand.u32 4294901760, %v606_v31  ;;  %v614_v43 = vand.u32 4294901760, %v613_v32  ;;  %v627_v44 = vsub.f32 %v6526_v20, %v6550_v28  ;;  %v324_v63 = vld [vmem:[%s6577_s30 + $0x10] sm:$0xff]  ;;  %v338_v31 = vld [vmem:[%s9068_s1] sm:$0xff]  ;;  %s8992_s13 = scalar_lea.vmem %s9073_s6, %s6565_s25 }
  0x15   : > { %9334 = vst [vmem:[#allocation6_spill] sm:$0xff] %v6583_v39  ;;  %5322 = vmatpush3.msra.mxu0 %v6494_v9  ;;  %9335 = vst [vmem:[#allocation7_spill] sm:$0xff] %v6590_v41  ;;  %v6598_v45 = vand.u32 4294901760, %v343_v35  ;;  %v6601_v46 = vsub.f32 %v345_v18, %v6547_v27  ;;  %v6605_v48 = vand.u32 4294901760, %v342_v40  ;;  %v621_v50 = vand.u32 4294901760, %v620_v38  ;;  %v325_v18 = vld [vmem:[%s6577_s30 + $0x18] sm:$0xff] }
  0x16   : > { %5323 = vmatprep.subr.mxu0 %v6496_v10  ;;  %5371 = vmatprep.subr.mxu1 %v600_v36  ;;  %v634_v51 = vsub.f32 %v6553_v29, %v6583_v39  ;;  %v6612_v52 = vand.u32 4294901760, %v6593_v42  ;;  %v6618_v54 = vsub.f32 %v344_v25, %v6568_v34  ;;  %v641_v55 = vsub.f32 %v6563_v33, %v6590_v41  ;;  %v328_v41 = vld [vmem:[%s6577_s30 + $0x30] sm:$0xff] }
  0x17   : > { %5324 = vmatpush3.msra.mxu0 %v6496_v10  ;;  %5372 = vmatpush3.msra.mxu1 %v600_v36  ;;  %v6623_v56 = vand.u32 4294901760, %v322_v47  ;;  %v628_v57 = vand.u32 4294901760, %v627_v44  ;;  %v6627_v58 = vand.u32 4294901760, %v6601_v46  ;;  %v6633_v60 = vsub.f32 %v343_v35, %v6598_v45 }
  0x18   : > { %5325 = vmatprep.subr.mxu0 %v6498_v11  ;;  %5373 = vmatprep.subr.mxu1 %v607_v37  ;;  %9336 = vst [vmem:[#allocation8_spill] sm:$0xff] %v6612_v52  ;;  %v6635_v61 = vand.u32 4294901760, %v323_v49  ;;  %v6638_v62 = vand.u32 4294901760, %v341_v53  ;;  %v635_v0 = vand.u32 4294901760, %v634_v51  ;;  %v648_v1 = vsub.f32 %v6593_v42, %v6612_v52 }
  0x19   : > { %5326 = vmatpush3.msra.mxu0 %v6498_v11  ;;  %5374 = vmatpush3.msra.mxu1 %v607_v37  ;;  %9337 = vst [vmem:[#allocation9_spill] sm:$0xff] %v6623_v56  ;;  %9338 = vst [vmem:[#allocation10_spill] sm:$0xff] %v6627_v58  ;;  %v6645_v2 = vand.u32 4294901760, %v6618_v54  ;;  %v6651_v7 = vsub.f32 %v342_v40, %v6605_v48  ;;  %v642_v8 = vand.u32 4294901760, %v641_v55  ;;  %v6654_v12 = vand.u32 4294901760, %v340_v59 }
  0x1a   : > { %5327 = vmatprep.subr.mxu0 %v6513_v16  ;;  %5375 = vmatprep.subr.mxu1 %v614_v43  ;;  %9339 = vst [vmem:[#allocation11_spill] sm:$0xff] %v6635_v61  ;;  %v6657_v13 = vsub.f32 %v322_v47, %v6623_v56  ;;  %v655_v25 = vsub.f32 %v6601_v46, %v6627_v58  ;;  %v6664_v30 = vand.u32 4294901760, %v6633_v60  ;;  %v6672_v35 = vand.u32 4294901760, %v324_v63  ;;  %v326_v47 = vld [vmem:[%s6577_s30 + $0x20] sm:$0xff] }
  0x1b   : > { %5328 = vmatpush3.msra.mxu0 %v6513_v16  ;;  %5376 = vmatpush3.msra.mxu1 %v614_v43  ;;  %9340 = vst [vmem:[#allocation12_spill] sm:$0xff] %v6645_v2  ;;  %v6670_v32 = vsub.f32 %v323_v49, %v6635_v61  ;;  %v6675_v36 = vand.u32 4294901760, %v339_v6  ;;  %v6678_v37 = vsub.f32 %v341_v53, %v6638_v62  ;;  %v649_v38 = vand.u32 4294901760, %v648_v1  ;;  %v327_v1 = vld [vmem:[%s6577_s30 + $0x28] sm:$0xff] }
  0x1c   : > { %5329 = vmatprep.subr.mxu0 %v6538_v24  ;;  %5377 = vmatprep.subr.mxu1 %v621_v50  ;;  %9341 = vst [vmem:[#allocation13_spill] sm:$0xff] %v6657_v13  ;;  %9342 = vst [vmem:[#allocation14_spill] sm:$0xff] %v6664_v30  ;;  %v662_v40 = vsub.f32 %v6618_v54, %v6645_v2  ;;  %v6684_v43 = vand.u32 4294901760, %v6651_v7  ;;  %v6686_v44 = vand.u32 4294901760, %v325_v18  ;;  %v6690_v49 = vand.u32 4294901760, %v338_v31 }
  0x1d   : > { %5330 = vmatpush3.msra.mxu0 %v6538_v24  ;;  %5378 = vmatpush3.msra.mxu1 %v621_v50  ;;  %9343 = vst [vmem:[#allocation15_spill] sm:$0xff] %v6670_v32  ;;  %9344 = vst [vmem:[#allocation16_spill] sm:$0xff] %v6672_v35  ;;  %v6693_v50 = vand.u32 4294901760, %v6657_v13  ;;  %v6696_v51 = vsub.f32 %v340_v59, %v6654_v12  ;;  %v656_v53 = vand.u32 4294901760, %v655_v25  ;;  %v6710_v59 = vand.u32 4294901760, %v6678_v37 }
  0x1e   : > { %5331 = vmatprep.subr.mxu0 %v6547_v27  ;;  %5379 = vmatprep.subr.mxu1 %v628_v57  ;;  %9345 = vst [vmem:[#allocation17_spill] sm:$0xff] %v6675_v36  ;;  %9346 = vst [vmem:[#allocation18_spill] sm:$0xff] %v6684_v43  ;;  %v669_v55 = vsub.f32 %v6633_v60, %v6664_v30  ;;  %v6713_v2 = vsub.f32 %v339_v6, %v6675_v36  ;;  %v6715_v25 = vand.u32 4294901760, %v326_v47 }
  0x1f   : > { %5332 = vmatpush3.msra.mxu0 %v6547_v27  ;;  %5380 = vmatpush3.msra.mxu1 %v628_v57  ;;  %9347 = vst [vmem:[#allocation19_spill] sm:$0xff] %v6686_v44  ;;  %9348 = vst [vmem:[#allocation20_spill] sm:$0xff] %v6693_v50  ;;  %v6702_v57 = vand.u32 4294901760, %v6670_v32  ;;  %v663_v30 = vand.u32 4294901760, %v662_v40  ;;  %v6721_v58 = vsub.f32 %v325_v18, %v6686_v44  ;;  %v6729_v52 = vand.u32 4294901760, %v327_v1 }
  0x20   : > { %5333 = vmatprep.subr.mxu0 %v6568_v34  ;;  %5381 = vmatprep.subr.mxu1 %v635_v0  ;;  %9351 = vst [vmem:[#allocation23_spill] sm:$0xff] %v6710_v59  ;;  %9352 = vst [vmem:[#allocation24_spill] sm:$0xff] %v6715_v25  ;;  %v438_v6 = vsub.f32 %v6657_v13, %v6693_v50  ;;  %v670_v40 = vand.u32 4294901760, %v669_v55  ;;  %v683_v39 = vsub.f32 %v6678_v37, %v6710_v59  ;;  %v329_v50 = vld [vmem:[%s6577_s30 + $0x38] sm:$0xff] }
  0x21   : > { %5334 = vmatpush3.msra.mxu0 %v6568_v34  ;;  %5382 = vmatpush3.msra.mxu1 %v635_v0  ;;  %9349 = vst [vmem:[#allocation21_spill] sm:$0xff] %v6702_v57  ;;  %v6705_v0 = vsub.f32 %v324_v63, %v6672_v35  ;;  %v676_v63 = vsub.f32 %v6651_v7, %v6684_v43  ;;  %9353 = vst [vmem:[#allocation25_spill] sm:$0xff] %v6721_v58  ;;  %v6745_v28 = vand.u32 4294901760, %v6713_v2 }
  0x22   : > { %5335 = vmatprep.subr.mxu0 %v6598_v45  ;;  %5383 = vmatprep.subr.mxu1 %v642_v8  ;;  %9355 = vst [vmem:[#allocation27_spill] sm:$0xff] %v6729_v52  ;;  %v448_v18 = vsub.f32 %v6670_v32, %v6702_v57  ;;  %v6748_v55 = vsub.f32 %v326_v47, %v6715_v25  ;;  %v6763_v47 = vand.u32 4294901760, %v328_v41  ;;  %v6779_v22 = vand.u32 4294901760, %v329_v50 }
  0x23   : > { %9350 = vst [vmem:[#allocation22_spill] sm:$0xff] %v6705_v0  ;;  %5336 = vmatpush3.msra.mxu0 %v6598_v45  ;;  %5384 = vmatpush3.msra.mxu1 %v642_v8  ;;  %v6727_v8 = vand.u32 4294901760, %v6696_v51  ;;  %v6735_v43 = vand.u32 4294901760, %v6705_v0  ;;  %9357 = vst [vmem:[#allocation29_spill] sm:$0xff] %v6745_v28  ;;  %v677_v57 = vand.u32 4294901760, %v676_v63  ;;  %v6761_v26 = vsub.f32 %v327_v1, %v6729_v52 }
  0x24   : > { %5337 = vmatprep.subr.mxu0 %v6605_v48  ;;  %5385 = vmatprep.subr.mxu1 %v649_v38  ;;  %9358 = vst [vmem:[#allocation30_spill] sm:$0xff] %v6748_v55  ;;  %9362 = vst [vmem:[#allocation34_spill] sm:$0xff] %v6763_v47  ;;  %v6766_v63 = vand.u32 4294901760, %v448_v18  ;;  %v697_v1 = vsub.f32 %v6713_v2, %v6745_v28  ;;  %v6791_v28 = vsub.f32 %v328_v41, %v6763_v47 }
  0x25   : > { %5338 = vmatpush3.msra.mxu0 %v6605_v48  ;;  %5386 = vmatpush3.msra.mxu1 %v649_v38  ;;  %9354 = vst [vmem:[#allocation26_spill] sm:$0xff] %v6727_v8  ;;  %9356 = vst [vmem:[#allocation28_spill] sm:$0xff] %v6735_v43  ;;  %v6738_v38 = vsub.f32 %v338_v31, %v6690_v49  ;;  %v6752_v31 = vand.u32 4294901760, %v6721_v58  ;;  %v690_v59 = vsub.f32 %v6696_v51, %v6727_v8 }
  0x26   : > { %5339 = vmatprep.subr.mxu0 %v6638_v62  ;;  %5387 = vmatprep.subr.mxu1 %v656_v53  ;;  %9361 = vst [vmem:[#allocation33_spill] sm:$0xff] %v6761_v26  ;;  %9363 = vst [vmem:[#allocation35_spill] sm:$0xff] %v6766_v63  ;;  %v458_v23 = vsub.f32 %v6705_v0, %v6735_v43  ;;  %v6777_v8 = vand.u32 4294901760, %v6748_v55  ;;  %v330_v43 = vld [vmem:[%s6577_s30 + $0x40] sm:$0xff]  ;;  %v6803_v41 = vsub.f32 %v329_v50, %v6779_v22 }
  0x27   : > { %5340 = vmatpush3.msra.mxu0 %v6638_v62  ;;  %5388 = vmatpush3.msra.mxu1 %v656_v53  ;;  %9359 = vst [vmem:[#allocation31_spill] sm:$0xff] %v6752_v31  ;;  %v6756_v53 = vand.u32 4294901760, %v438_v6  ;;  %v684_v6 = vand.u32 4294901760, %v683_v39  ;;  %9366 = vst [vmem:[#allocation38_spill] sm:$0xff] %v6779_v22  ;;  %v468_v18 = vsub.f32 %v6721_v58, %v6752_v31  ;;  %v691_v39 = vand.u32 4294901760, %v690_v59  ;;  %v331_v58 = vld [vmem:[%s6577_s30 + $0x48] sm:$0xff] }
  0x28   : > { %5341 = vmatprep.subr.mxu0 %v6654_v12  ;;  %5389 = vmatprep.subr.mxu1 %v663_v30  ;;  %9365 = vst [vmem:[#allocation37_spill] sm:$0xff] %v6777_v8  ;;  %9368 = vst [vmem:[#allocation40_spill] sm:$0xff] %v6791_v28  ;;  %v698_v59 = vand.u32 4294901760, %v697_v1 }
  0x29   : > { %5342 = vmatpush3.msra.mxu0 %v6654_v12  ;;  %5390 = vmatpush3.msra.mxu1 %v663_v30  ;;  %9360 = vst [vmem:[#allocation32_spill] sm:$0xff] %v6756_v53  ;;  %v6771_v30 = vand.u32 4294901760, %v6738_v38  ;;  %9370 = vst [vmem:[#allocation42_spill] sm:$0xff] %v6803_v41 }
  0x2a   : > { %5343 = vmatprep.subr.mxu0 %v6675_v36  ;;  %5391 = vmatprep.subr.mxu1 %v670_v40 }
  0x2b   : > { %9364 = vst [vmem:[#allocation36_spill] sm:$0xff] %v6771_v30  ;;  %5344 = vmatpush3.msra.mxu0 %v6675_v36  ;;  %5392 = vmatpush3.msra.mxu1 %v670_v40  ;;  %v6788_v40 = vand.u32 4294901760, %v6761_v26  ;;  %v6794_v36 = vand.u32 4294901760, %v458_v23  ;;  %v704_v31 = vsub.f32 %v6738_v38, %v6771_v30  ;;  %v6808_v23 = vand.u32 4294901760, %v468_v18 }
  0x2c   : > { %5345 = vmatprep.subr.mxu0 %v6690_v49  ;;  %5393 = vmatprep.subr.mxu1 %v677_v57  ;;  %v6816_v30 = vand.u32 4294901760, %v331_v58  ;;  %v6824_v18 = vand.u32 4294901760, %v6803_v41 }
  0x2d   : > { %5346 = vmatpush3.msra.mxu0 %v6690_v49  ;;  %5347 = vmatprep.mubr.f32.mxu0 %v6756_v53  ;;  %9367 = vst [vmem:[#allocation39_spill] sm:$0xff] %v6788_v40  ;;  %9369 = vst [vmem:[#allocation41_spill] sm:$0xff] %v6794_v36  ;;  %v478_v53 = vsub.f32 %v6748_v55, %v6777_v8  ;;  %v488_v1 = vsub.f32 %v6761_v26, %v6788_v40  ;;  %v705_v50 = vand.u32 4294901760, %v704_v31  ;;  %v333_v8 = vld [vmem:[%s6577_s30 + $0x58] sm:$0xff] }
  0x2e   : > { %5394 = vmatpush3.msra.mxu1 %v677_v57  ;;  %5348 = vmatmul.mubr.f32.vlgmr.msra.gmra.mxu0 %v6766_v63  ;;  %v6805_v57 = vand.u32 4294901760, %v330_v43  ;;  %9372 = vst [vmem:[#allocation44_spill] sm:$0xff] %v6808_v23  ;;  %v6814_v63 = vand.u32 4294901760, %v6791_v28  ;;  %9374 = vst [vmem:[#allocation46_spill] sm:$0xff] %v6816_v30 }
  0x2f   : > { %5395 = vmatprep.subr.mxu1 %v684_v6  ;;  %5427 = vmatprep.subr.mxu0 %v6508_v14  ;;  %9376 = vst [vmem:[#allocation48_spill] sm:$0xff] %v6824_v18  ;;  %v6833_v31 = vand.u32 4294901760, %v488_v1 }
  0x30   : > { %9371 = vst [vmem:[#allocation43_spill] sm:$0xff] %v6805_v57  ;;  %5396 = vmatpush3.msra.mxu1 %v684_v6  ;;  %5428 = vmatpush3.msra.mxu0 %v6508_v14  ;;  %9373 = vst [vmem:[#allocation45_spill] sm:$0xff] %v6814_v63  ;;  %v332_v6 = vld [vmem:[%s6577_s30 + $0x50] sm:$0xff]  ;;  %v6821_v14 = vand.u32 4294901760, %v478_v53  ;;  %v6827_v40 = vsub.f32 %v330_v43, %v6805_v57  ;;  %v6838_v53 = vsub.f32 %v331_v58, %v6816_v30  ;;  %v334_v58 = vld [vmem:[%s6577_s30 + $0x60] sm:$0xff] }
  0x31   : > { %5397 = vmatprep.subr.mxu1 %v691_v39  ;;  %5429 = vmatprep.subr.mxu0 %v6511_v15  ;;  %9378 = vst [vmem:[#allocation50_spill] sm:$0xff] %v6833_v31 }
  0x32   : > { %5350 = vmatprep.mubr.f32.mxu0 %v6794_v36  ;;  %5398 = vmatpush3.msra.mxu1 %v691_v39  ;;  %9375 = vst [vmem:[#allocation47_spill] sm:$0xff] %v6821_v14  ;;  %9377 = vst [vmem:[#allocation49_spill] sm:$0xff] %v6827_v40  ;;  %v6840_v39 = vand.u32 4294901760, %v332_v6  ;;  %v6847_v43 = vand.u32 4294901760, %v6827_v40 }
  0x33   : > { %5430 = vmatpush3.msra.mxu0 %v6511_v15  ;;  %5399 = vmatprep.subr.mxu1 %v698_v59  ;;  %v498_v15 = vsub.f32 %v6791_v28, %v6814_v63  ;;  %9379 = vst [vmem:[#allocation51_spill] sm:$0xff] %v6838_v53 }
  0x34   : > { %5351 = vmatmul.mubr.f32.gmra.mxu0 %v6808_v23  ;;  %5431 = vmatprep.subr.mxu0 %v6516_v17  ;;  %9380 = vst [vmem:[#allocation52_spill] sm:$0xff] %v6847_v43  ;;  %v335_v23 = vld [vmem:[%s6577_s30 + $0x68] sm:$0xff] }
  0x35   : > { %5400 = vmatpush3.msra.mxu1 %v698_v59  ;;  %5432 = vmatpush3.msra.mxu0 %v6516_v17  ;;  %v508_v17 = vsub.f32 %v6803_v41, %v6824_v18  ;;  %v6849_v59 = vand.u32 4294901760, %v333_v8  ;;  %v6856_v1 = vand.u32 4294901760, %v498_v15  ;;  %v518_v15 = vsub.f32 %v6827_v40, %v6847_v43 }
  0x36   : > { %5401 = vmatprep.subr.mxu1 %v705_v50  ;;  %5433 = vmatprep.subr.mxu0 %v6523_v19  ;;  %v6887_v36 = vand.u32 4294901760, %v335_v23 }
  0x37   : > { %5353 = vmatprep.mubr.f32.mxu0 %v6821_v14  ;;  %5402 = vmatpush3.msra.mxu1 %v705_v50  ;;  %9381 = vst [vmem:[#allocation53_spill] sm:$0xff] %v6856_v1  ;;  %v6859_v50 = vand.u32 4294901760, %v6838_v53  ;;  %v6862_v14 = vsub.f32 %v332_v6, %v6840_v39  ;;  %v6876_v6 = vand.u32 4294901760, %v334_v58 }
  0x38   : > { %5403 = vmatprep.mubr.f32.mxu1 %v6623_v56  ;;  %5434 = vmatpush3.msra.mxu0 %v6523_v19  ;;  %v6869_v19 = vand.u32 4294901760, %v508_v17 }
  0x39   : > { %5354 = vmatmul.mubr.f32.gmra.mxu0 %v6833_v31  ;;  %5404 = vmatmul.mubr.f32.vlgmr.msra.gmra.mxu1 %v6635_v61  ;;  %9382 = vst [vmem:[#allocation54_spill] sm:$0xff] %v6859_v50  ;;  %9383 = vst [vmem:[#allocation55_spill] sm:$0xff] %v6862_v14  ;;  %v6874_v31 = vsub.f32 %v333_v8, %v6849_v59  ;;  %v6885_v17 = vand.u32 4294901760, %v6862_v14  ;;  %v336_v8 = vld [vmem:[%s6577_s30 + $0x70] sm:$0xff]  ;;  %v6900_v61 = vsub.f32 %v334_v58, %v6876_v6 }
  0x3a   : > { %5435 = vmatprep.subr.mxu0 %v6526_v20  ;;  %5483 = vmatprep.subr.mxu1 %v6479_v3  ;;  %9384 = vst [vmem:[#allocation56_spill] sm:$0xff] %v6869_v19  ;;  %v6914_v56 = vand.u32 4294901760, %v336_v8 }
  0x3b   : > { %5436 = vmatpush3.msra.mxu0 %v6526_v20  ;;  %5484 = vmatpush3.msra.mxu1 %v6479_v3  ;;  %9385 = vst [vmem:[#allocation57_spill] sm:$0xff] %v6874_v31  ;;  %v528_v20 = vsub.f32 %v6838_v53, %v6859_v50  ;;  %9386 = vst [vmem:[#allocation58_spill] sm:$0xff] %v6885_v17  ;;  %v6923_v58 = vand.u32 4294901760, %v6900_v61 }
  0x3c   : > { %5437 = vmatprep.subr.mxu0 %v6553_v29  ;;  %5485 = vmatprep.subr.mxu1 %v6481_v4  ;;  %9389 = vst [vmem:[#allocation61_spill] sm:$0xff] %v6900_v61 }
  0x3d   : > { %5356 = vmatprep.mubr.f32.mxu0 %v6856_v1  ;;  %5406 = vmatprep.mubr.f32.mxu1 %v6672_v35  ;;  %v6894_v1 = vand.u32 4294901760, %v518_v15  ;;  %v6897_v35 = vand.u32 4294901760, %v6874_v31  ;;  %v538_v15 = vsub.f32 %v6862_v14, %v6885_v17  ;;  %9392 = vst [vmem:[#allocation64_spill] sm:$0xff] %v6923_v58 }
  0x3e   : > { %5438 = vmatpush3.msra.mxu0 %v6553_v29  ;;  %5486 = vmatpush3.msra.mxu1 %v6481_v4  ;;  %v337_v29 = vld [vmem:[%s6577_s30 + $0x78] sm:$0xff] }
  0x3f   : > { %5357 = vmatmul.mubr.f32.gmra.mxu0 %v6869_v19  ;;  %5407 = vmatmul.mubr.f32.gmra.mxu1 %v6686_v44  ;;  %9387 = vst [vmem:[#allocation59_spill] sm:$0xff] %v6894_v1  ;;  %9388 = vst [vmem:[#allocation60_spill] sm:$0xff] %v6897_v35  ;;  %v6907_v19 = vand.u32 4294901760, %v528_v20  ;;  %v6912_v44 = vsub.f32 %v335_v23, %v6887_v36  ;;  %v6925_v20 = vand.u32 4294901760, %v337_v29  ;;  %v6931_v23 = vand.u32 4294901760, %v538_v15 }
  0x40   : > { %5439 = vmatprep.subr.mxu0 %v6563_v33  ;;  %5487 = vmatprep.subr.mxu1 %v6483_v5  ;;  %v558_v15 = vsub.f32 %v6900_v61, %v6923_v58 }
  0x41   : > { %5440 = vmatpush3.msra.mxu0 %v6563_v33  ;;  %5488 = vmatpush3.msra.mxu1 %v6483_v5  ;;  %9390 = vst [vmem:[#allocation62_spill] sm:$0xff] %v6907_v19  ;;  %9391 = vst [vmem:[#allocation63_spill] sm:$0xff] %v6912_v44  ;;  %v548_v33 = vsub.f32 %v6874_v31, %v6897_v35 }
  0x42   : > { %5441 = vmatprep.subr.mxu0 %v6593_v42  ;;  %5489 = vmatprep.subr.mxu1 %v6494_v9  ;;  %9393 = vst [vmem:[#allocation65_spill] sm:$0xff] %v6931_v23 }
  0x43   : > { %5359 = vmatprep.mubr.f32.mxu0 %v6894_v1  ;;  %5409 = vmatprep.mubr.f32.mxu1 %v6715_v25  ;;  %v6934_v1 = vand.u32 4294901760, %v6912_v44  ;;  %v6937_v25 = vsub.f32 %v336_v8, %v6914_v56 }
  0x44   : > { %5442 = vmatpush3.msra.mxu0 %v6593_v42  ;;  %5490 = vmatpush3.msra.mxu1 %v6494_v9  ;;  %v6943_v42 = vand.u32 4294901760, %v548_v33 }
  0x45   : > { %5360 = vmatmul.mubr.f32.gmra.mxu0 %v6907_v19  ;;  %5410 = vmatmul.mubr.f32.gmra.mxu1 %v6729_v52  ;;  %9394 = vst [vmem:[#allocation66_spill] sm:$0xff] %v6934_v1  ;;  %9395 = vst [vmem:[#allocation67_spill] sm:$0xff] %v6937_v25  ;;  %v6948_v19 = vsub.f32 %v337_v29, %v6925_v20  ;;  %v6957_v8 = vand.u32 4294901760, %v6937_v25  ;;  %v6963_v29 = vand.u32 4294901760, %v558_v15 }
  0x46   : > { %5443 = vmatprep.subr.mxu0 %v6601_v46  ;;  %5491 = vmatprep.subr.mxu1 %v6496_v10  ;;  %9396 = vst [vmem:[#allocation68_spill] sm:$0xff] %v6943_v42 }
  0x47   : > { %5444 = vmatpush3.msra.mxu0 %v6601_v46  ;;  %5492 = vmatpush3.msra.mxu1 %v6496_v10  ;;  %9397 = vst [vmem:[#allocation69_spill] sm:$0xff] %v6948_v19  ;;  %v568_v46 = vsub.f32 %v6912_v44, %v6934_v1  ;;  %9398 = vst [vmem:[#allocation70_spill] sm:$0xff] %v6957_v8  ;;  %v6966_v33 = vand.u32 4294901760, %v6948_v19 }
  0x48   : > { %5445 = vmatprep.subr.mxu0 %v6618_v54  ;;  %5493 = vmatprep.subr.mxu1 %v6498_v11  ;;  %9399 = vst [vmem:[#allocation71_spill] sm:$0xff] %v6963_v29 }
  0x49   : > { %5362 = vmatprep.mubr.f32.mxu0 %v6931_v23  ;;  %5412 = vmatprep.mubr.f32.mxu1 %v6763_v47  ;;  %9400 = vst [vmem:[#allocation72_spill] sm:$0xff] %v6966_v33  ;;  %v588_v15 = vsub.f32 %v6948_v19, %v6966_v33 }
  0x4a   : > { %5446 = vmatpush3.msra.mxu0 %v6618_v54  ;;  %5494 = vmatpush3.msra.mxu1 %v6498_v11  ;;  %v6972_v54 = vand.u32 4294901760, %v568_v46 }
  0x4b   : > { %5363 = vmatmul.mubr.f32.gmra.mxu0 %v6943_v42  ;;  %5413 = vmatmul.mubr.f32.gmra.mxu1 %v6779_v22  ;;  %v578_v42 = vsub.f32 %v6937_v25, %v6957_v8  ;;  %v6992_v46 = vand.u32 4294901760, %v588_v15  ;;  %v9411_v15 = vld [vmem:[#allocation5_spill] sm:$0xff] }
  0x4c   : > { %5447 = vmatprep.subr.mxu0 %v6633_v60  ;;  %5495 = vmatprep.subr.mxu1 %v6513_v16  ;;  %9401 = vst [vmem:[#allocation73_spill] sm:$0xff] %v6972_v54 }
  0x4d   : > { %5448 = vmatpush3.msra.mxu0 %v6633_v60  ;;  %5496 = vmatpush3.msra.mxu1 %v6513_v16  ;;  %v6986_v60 = vand.u32 4294901760, %v578_v42  ;;  %9403 = vst [vmem:[#allocation75_spill] sm:$0xff] %v6992_v46  ;;  %v9410_v42 = vld [vmem:[#allocation21_spill] sm:$0xff] }
  0x4e   : > { %5449 = vmatprep.subr.mxu0 %v6651_v7  ;;  %5497 = vmatprep.subr.mxu1 %v6538_v24 }
  0x4f   : > { %5365 = vmatprep.mubr.f32.mxu0 %v6963_v29  ;;  %5415 = vmatprep.mubr.f32.mxu1 %v6805_v57  ;;  %9402 = vst [vmem:[#allocation74_spill] sm:$0xff] %v6986_v60 }
  0x50   : > { %5450 = vmatpush3.msra.mxu0 %v6651_v7  ;;  %5498 = vmatpush3.msra.mxu1 %v6538_v24  ;;  %v9405_v7 = vld [vmem:[#allocation25_spill] sm:$0xff] }
  0x51   : > { %5366 = vmatmul.mubr.f32.gmra.mxu0 %v6972_v54  ;;  %5416 = vmatmul.mubr.f32.gmra.mxu1 %v6816_v30 }
  0x52   : > { %5451 = vmatprep.subr.mxu0 %v6678_v37  ;;  %5499 = vmatprep.subr.mxu1 %v6547_v27 }
  0x53   : > { %5452 = vmatpush3.msra.mxu0 %v6678_v37  ;;  %5500 = vmatpush3.msra.mxu1 %v6547_v27  ;;  %v9406_v37 = vld [vmem:[#allocation17_spill] sm:$0xff] }
  0x54   : > { %5453 = vmatprep.subr.mxu0 %v6696_v51  ;;  %5501 = vmatprep.subr.mxu1 %v6568_v34 }
  0x55   : > { %5368 = vmatprep.mubr.f32.mxu0 %v6986_v60  ;;  %5418 = vmatprep.mubr.f32.mxu1 %v6840_v39 }
  0x56   : > { %5454 = vmatpush3.msra.mxu0 %v6696_v51  ;;  %5502 = vmatpush3.msra.mxu1 %v6568_v34  ;;  %v9407_v51 = vld [vmem:[#allocation3_spill] sm:$0xff] }
  0x57   : > { %5369 = vmatmul.mubr.f32.gmra.mxu0 %v6992_v46  ;;  %5419 = vmatmul.mubr.f32.gmra.mxu1 %v6849_v59 }
  0x58   : > { %5455 = vmatprep.subr.mxu0 %v6713_v2  ;;  %5503 = vmatprep.subr.mxu1 %v6598_v45 }
  0x59   : > { %5456 = vmatpush3.msra.mxu0 %v6713_v2  ;;  %5504 = vmatpush3.msra.mxu1 %v6598_v45  ;;  %v9404_v2 = vld [vmem:[#allocation2_spill] sm:$0xff] }
  0x5a   : > { %5457 = vmatprep.subr.mxu0 %v6738_v38  ;;  %5505 = vmatprep.subr.mxu1 %v6605_v48 }
  0x5b   : > { %5421 = vmatprep.mubr.f32.mxu1 %v6876_v6  ;;  %5458 = vmatpush3.msra.mxu0 %v6738_v38  ;;  %v9409_v38 = vld [vmem:[#allocation20_spill] sm:$0xff] }
  0x5c   : > { %5459 = vmatprep.mubr.f32.mxu0 %v6657_v13  ;;  %5506 = vmatpush3.msra.mxu1 %v6605_v48 }
  0x5d   : > { %5422 = vmatmul.mubr.f32.gmra.mxu1 %v6887_v36  ;;  %5460 = vmatmul.mubr.f32.vlgmr.msra.gmra.mxu0 %v6670_v32 }
  0x5e   : > { %5507 = vmatprep.subr.mxu1 %v6638_v62  ;;  %5539 = vmatprep.subr.mxu0 %v6530_v21 }
  0x5f   : > { %5508 = vmatpush3.msra.mxu1 %v6638_v62  ;;  %5540 = vmatpush3.msra.mxu0 %v6530_v21  ;;  %v9408_v21 = vld [vmem:[#allocation4_spill] sm:$0xff] }
  0x60   : > { %5509 = vmatprep.subr.mxu1 %v6654_v12  ;;  %5541 = vmatprep.subr.mxu0 %v9404_v2 }
  0x61   : > { %5424 = vmatprep.mubr.f32.mxu1 %v6914_v56  ;;  %5462 = vmatprep.mubr.f32.mxu0 %v6705_v0 }
  0x62   : > { %5510 = vmatpush3.msra.mxu1 %v6654_v12  ;;  %5542 = vmatpush3.msra.mxu0 %v9404_v2  ;;  %v9412_v2 = vld [vmem:[#allocation6_spill] sm:$0xff] }
  0x63   : > { %5425 = vmatmul.mubr.f32.gmra.mxu1 %v6925_v20  ;;  %5463 = vmatmul.mubr.f32.gmra.mxu0 %v9405_v7 }
  0x64   : > { %5511 = vmatprep.subr.mxu1 %v9406_v37  ;;  %5543 = vmatprep.subr.mxu0 %v9407_v51 }
  0x65   : > { %5512 = vmatpush3.msra.mxu1 %v9406_v37  ;;  %5544 = vmatpush3.msra.mxu0 %v9407_v51  ;;  %v9413_v51 = vld [vmem:[#allocation28_spill] sm:$0xff] }
  0x66   : > { %5513 = vmatprep.subr.mxu1 %v6690_v49  ;;  %5545 = vmatprep.subr.mxu0 %v9408_v21 }
  0x67   : > { %5465 = vmatprep.mubr.f32.mxu0 %v6748_v55  ;;  %5514 = vmatpush3.msra.mxu1 %v6690_v49 }
  0x68   : > { %5515 = vmatprep.mubr.f32.mxu1 %v9409_v38  ;;  %5546 = vmatpush3.msra.mxu0 %v9408_v21  ;;  %v9414_v21 = vld [vmem:[#allocation31_spill] sm:$0xff] }
  0x69   : > { %5466 = vmatmul.mubr.f32.gmra.mxu0 %v6761_v26  ;;  %5516 = vmatmul.mubr.f32.vlgmr.msra.gmra.mxu1 %v9410_v42  ;;  %v9415_v42 = vld [vmem:[#allocation7_spill] sm:$0xff] }
  0x6a   : > { %5547 = vmatprep.subr.mxu0 %v9411_v15  ;;  %5595 = vmatprep.subr.mxu1 %v6479_v3 }
  0x6b   : > { %5548 = vmatpush3.msra.mxu0 %v9411_v15  ;;  %5596 = vmatpush3.msra.mxu1 %v6479_v3  ;;  %v9416_v3 = vld [vmem:[#allocation8_spill] sm:$0xff]  ;;  %v9417_v15 = vld [vmem:[#allocation37_spill] sm:$0xff] }
  0x6c   : > { %5549 = vmatprep.subr.mxu0 %v9412_v2  ;;  %5597 = vmatprep.subr.mxu1 %v6481_v4 }
  0x6d   : > { %5468 = vmatprep.mubr.f32.mxu0 %v6791_v28  ;;  %5518 = vmatprep.mubr.f32.mxu1 %v9413_v51 }
  0x6e   : > { %5550 = vmatpush3.msra.mxu0 %v9412_v2  ;;  %5598 = vmatpush3.msra.mxu1 %v6481_v4  ;;  %v9418_v4 = vld [vmem:[#allocation39_spill] sm:$0xff]  ;;  %v9419_v2 = vld [vmem:[#allocation10_spill] sm:$0xff] }
  0x6f   : > { %5469 = vmatmul.mubr.f32.gmra.mxu0 %v6803_v41  ;;  %5519 = vmatmul.mubr.f32.gmra.mxu1 %v9414_v21 }
  0x70   : > { %5551 = vmatprep.subr.mxu0 %v9415_v42  ;;  %5599 = vmatprep.subr.mxu1 %v6483_v5 }
  0x71   : > { %5552 = vmatpush3.msra.mxu0 %v9415_v42  ;;  %5600 = vmatpush3.msra.mxu1 %v6483_v5  ;;  %v9420_v5 = vld [vmem:[#allocation12_spill] sm:$0xff]  ;;  %v9424_v42 = vld [vmem:[#allocation26_spill] sm:$0xff] }
  0x72   : > { %5553 = vmatprep.subr.mxu0 %v9416_v3  ;;  %5601 = vmatprep.subr.mxu1 %v6494_v9 }
  0x73   : > { %5471 = vmatprep.mubr.f32.mxu0 %v6827_v40  ;;  %5521 = vmatprep.mubr.f32.mxu1 %v9417_v15 }
  0x74   : > { %5554 = vmatpush3.msra.mxu0 %v9416_v3  ;;  %5602 = vmatpush3.msra.mxu1 %v6494_v9  ;;  %v9421_v9 = vld [vmem:[#allocation14_spill] sm:$0xff]  ;;  %v9425_v3 = vld [vmem:[#allocation29_spill] sm:$0xff] }
  0x75   : > { %5472 = vmatmul.mubr.f32.gmra.mxu0 %v6838_v53  ;;  %5522 = vmatmul.mubr.f32.gmra.mxu1 %v9418_v4 }
  0x76   : > { %5555 = vmatprep.subr.mxu0 %v9419_v2  ;;  %5603 = vmatprep.subr.mxu1 %v6496_v10 }
  0x77   : > { %5556 = vmatpush3.msra.mxu0 %v9419_v2  ;;  %5604 = vmatpush3.msra.mxu1 %v6496_v10  ;;  %v9422_v10 = vld [vmem:[#allocation18_spill] sm:$0xff] }
  0x78   : > { %5557 = vmatprep.subr.mxu0 %v9420_v5  ;;  %5605 = vmatprep.subr.mxu1 %v6498_v11 }
  0x79   : > { %5474 = vmatprep.mubr.f32.mxu0 %v6862_v14  ;;  %5524 = vmatprep.mubr.f32.mxu1 %v6814_v63 }
  0x7a   : > { %5558 = vmatpush3.msra.mxu0 %v9420_v5  ;;  %5606 = vmatpush3.msra.mxu1 %v6498_v11  ;;  %v9423_v11 = vld [vmem:[#allocation23_spill] sm:$0xff]  ;;  %v9426_v5 = vld [vmem:[#allocation36_spill] sm:$0xff] }
  0x7b   : > { %5475 = vmatmul.mubr.f32.gmra.mxu0 %v6874_v31  ;;  %5525 = vmatmul.mubr.f32.gmra.mxu1 %v6824_v18 }
  0x7c   : > { %5559 = vmatprep.subr.mxu0 %v9421_v9  ;;  %5607 = vmatprep.subr.mxu1 %v6513_v16 }
  0x7d   : > { %5560 = vmatpush3.msra.mxu0 %v9421_v9  ;;  %5608 = vmatpush3.msra.mxu1 %v6513_v16  ;;  %v1671_v16 = vld [vmem:[%s9069_s2 + $0x78] sm:$0xff] }
  0x7e   : > { %5561 = vmatprep.subr.mxu0 %v9422_v10  ;;  %5609 = vmatprep.subr.mxu1 %v6538_v24 }
  0x7f   : > { %5477 = vmatprep.mubr.f32.mxu0 %v6900_v61  ;;  %5527 = vmatprep.mubr.f32.mxu1 %v6847_v43  ;;  %v9435_v43 = vld [vmem:[#allocation24_spill] sm:$0xff] }
  0x80   : > { %5562 = vmatpush3.msra.mxu0 %v9422_v10  ;;  %5610 = vmatpush3.msra.mxu1 %v6538_v24  ;;  %v1670_v24 = vld [vmem:[%s9069_s2 + $0x70] sm:$0xff]  ;;  %v1668_v10 = vld [vmem:[%s9069_s2 + $0x60] sm:$0xff] }
  0x81   : > { %5478 = vmatmul.mubr.f32.gmra.mxu0 %v6912_v44  ;;  %5528 = vmatmul.mubr.f32.gmra.mxu1 %v6859_v50  ;;  %v7108_v2 = vand.u32 4294901760, %v1670_v24 }
  0x82   : > { %5563 = vmatprep.subr.mxu0 %v9423_v11  ;;  %5611 = vmatprep.subr.mxu1 %v6547_v27 }
  0x83   : > { %5564 = vmatpush3.msra.mxu0 %v9423_v11  ;;  %5612 = vmatpush3.msra.mxu1 %v6547_v27  ;;  %v7102_v27 = vand.u32 4294901760, %v1671_v16 }
  0x84   : > { %5565 = vmatprep.subr.mxu0 %v9424_v42  ;;  %5613 = vmatprep.subr.mxu1 %v6568_v34 }
  0x85   : > { %5480 = vmatprep.mubr.f32.mxu0 %v6937_v25  ;;  %5530 = vmatprep.mubr.f32.mxu1 %v6885_v17  ;;  %v7118_v9 = vsub.f32 %v1671_v16, %v7102_v27  ;;  %v9428_v16 = vld [vmem:[#allocation11_spill] sm:$0xff] }
  0x86   : > { %5566 = vmatpush3.msra.mxu0 %v9424_v42  ;;  %5614 = vmatpush3.msra.mxu1 %v6568_v34  ;;  %v1669_v34 = vld [vmem:[%s9069_s2 + $0x68] sm:$0xff]  ;;  %v7130_v42 = vsub.f32 %v1670_v24, %v7108_v2 }
  0x87   : > { %5481 = vmatmul.mubr.f32.gmra.mxu0 %v6948_v19  ;;  %5531 = vmatmul.mubr.f32.gmra.mxu1 %v6897_v35  ;;  %v7127_v11 = vand.u32 4294901760, %v1669_v34 }
  0x88   : > { %5567 = vmatprep.subr.mxu0 %v9425_v3  ;;  %5615 = vmatprep.subr.mxu1 %v6598_v45  ;;  %v7149_v24 = vand.u32 4294901760, %v7130_v42 }
  0x89   : > { %5568 = vmatpush3.msra.mxu0 %v9425_v3  ;;  %5616 = vmatpush3.msra.mxu1 %v6598_v45  ;;  %v9427_v45 = vld [vmem:[#allocation9_spill] sm:$0xff]  ;;  %v7136_v3 = vand.u32 4294901760, %v1668_v10 }
  0x8a   : > { %5569 = vmatprep.subr.mxu0 %v9426_v5  ;;  %5617 = vmatprep.subr.mxu1 %v6605_v48  ;;  %9430 = vst [vmem:[#allocation17_spill] sm:$0xff] %v7149_v24 }
  0x8b   : > { %5533 = vmatprep.mubr.f32.mxu1 %v6923_v58  ;;  %5570 = vmatpush3.msra.mxu0 %v9426_v5  ;;  %v7139_v5 = vand.u32 4294901760, %v7118_v9  ;;  %v9431_v58 = vld [vmem:[#allocation16_spill] sm:$0xff] }
  0x8c   : > { %5571 = vmatprep.mubr.f32.mxu0 %v9427_v45  ;;  %5618 = vmatpush3.msra.mxu1 %v6605_v48  ;;  %v1667_v48 = vld [vmem:[%s9069_s2 + $0x58] sm:$0xff] }
  0x8d   : > { %5534 = vmatmul.mubr.f32.gmra.mxu1 %v6934_v1  ;;  %5572 = vmatmul.mubr.f32.vlgmr.msra.gmra.mxu0 %v9428_v16  ;;  %9429 = vst [vmem:[#allocation2_spill] sm:$0xff] %v7139_v5  ;;  %v7152_v1 = vsub.f32 %v1669_v34, %v7127_v11  ;;  %v7161_v35 = vand.u32 4294901760, %v1667_v48  ;;  %v1917_v19 = vsub.f32 %v7118_v9, %v7139_v5 }
  0x8e   : > { %5619 = vmatprep.subr.mxu1 %v6638_v62  ;;  %5651 = vmatprep.subr.mxu0 %v7102_v27  ;;  %v7166_v34 = vsub.f32 %v1668_v10, %v7136_v3  ;;  %v1665_v10 = vld [vmem:[%s9069_s2 + $0x48] sm:$0xff] }
  0x8f   : > { %5620 = vmatpush3.msra.mxu1 %v6638_v62  ;;  %5652 = vmatpush3.msra.mxu0 %v7102_v27  ;;  %v1666_v62 = vld [vmem:[%s9069_s2 + $0x50] sm:$0xff]  ;;  %v7177_v25 = vand.u32 4294901760, %v7152_v1  ;;  %v7190_v44 = vsub.f32 %v1667_v48, %v7161_v35 }
  0x90   : > { %5621 = vmatprep.subr.mxu1 %v6654_v12  ;;  %5653 = vmatprep.subr.mxu0 %v7108_v2  ;;  %v7172_v17 = vand.u32 4294901760, %v1666_v62  ;;  %v7187_v50 = vand.u32 4294901760, %v7166_v34 }
  0x91   : > { %5536 = vmatprep.mubr.f32.mxu1 %v6957_v8  ;;  %5574 = vmatprep.mubr.f32.mxu0 %v9431_v58  ;;  %v9432_v8 = vld [vmem:[#allocation19_spill] sm:$0xff]  ;;  %9433 = vst [vmem:[#allocation3_spill] sm:$0xff] %v7177_v25  ;;  %v1931_v18 = vsub.f32 %v7152_v1, %v7177_v25  ;;  %v7214_v31 = vand.u32 4294901760, %v7190_v44 }
  0x92   : > { %5622 = vmatpush3.msra.mxu1 %v6654_v12  ;;  %5654 = vmatpush3.msra.mxu0 %v7108_v2  ;;  %v1924_v12 = vsub.f32 %v7130_v42, %v7149_v24  ;;  %9434 = vst [vmem:[#allocation4_spill] sm:$0xff] %v7187_v50  ;;  %v7204_v48 = vsub.f32 %v1666_v62, %v7172_v17  ;;  %v1663_v62 = vld [vmem:[%s9069_s2 + $0x38] sm:$0xff] }
  0x93   : > { %5537 = vmatmul.mubr.f32.gmra.mxu1 %v6966_v33  ;;  %5575 = vmatmul.mubr.f32.gmra.mxu0 %v9432_v8  ;;  %v1918_v33 = vand.u32 4294901760, %v1917_v19  ;;  %v7199_v19 = vand.u32 4294901760, %v1665_v10  ;;  %9436 = vst [vmem:[#allocation5_spill] sm:$0xff] %v7214_v31  ;;  %v1932_v63 = vand.u32 4294901760, %v1931_v18  ;;  %v7233_v15 = vand.u32 4294901760, %v1663_v62 }
  0x94   : > { %5623 = vmatprep.subr.mxu1 %v9406_v37  ;;  %5655 = vmatprep.subr.mxu0 %v7127_v11  ;;  %v1925_v61 = vand.u32 4294901760, %v1924_v12  ;;  %v1938_v12 = vsub.f32 %v7166_v34, %v7187_v50  ;;  %v7222_v14 = vand.u32 4294901760, %v7204_v48  ;;  %v1945_v18 = vsub.f32 %v7190_v44, %v7214_v31 }
  0x95   : > { %5624 = vmatpush3.msra.mxu1 %v9406_v37  ;;  %5656 = vmatpush3.msra.mxu0 %v7127_v11  ;;  %v1664_v37 = vld [vmem:[%s9069_s2 + $0x40] sm:$0xff]  ;;  %v7225_v4 = vsub.f32 %v1665_v10, %v7199_v19  ;;  %v7259_v51 = vsub.f32 %v1663_v62, %v7233_v15 }
  0x96   : > { %5625 = vmatprep.subr.mxu1 %v6690_v49  ;;  %5657 = vmatprep.subr.mxu0 %v7136_v3  ;;  %9437 = vst [vmem:[#allocation6_spill] sm:$0xff] %v7222_v14  ;;  %v1939_v53 = vand.u32 4294901760, %v1938_v12  ;;  %v1946_v21 = vand.u32 4294901760, %v1945_v18 }
  0x97   : > { %5577 = vmatprep.mubr.f32.mxu0 %v9435_v43  ;;  %5626 = vmatpush3.msra.mxu1 %v6690_v49  ;;  %v7209_v49 = vand.u32 4294901760, %v1664_v37  ;;  %v7248_v12 = vand.u32 4294901760, %v7225_v4 }
  0x98   : > { %5627 = vmatprep.mubr.f32.mxu1 %v9427_v45  ;;  %5658 = vmatpush3.msra.mxu0 %v7136_v3 }
  0x99   : > { %5578 = vmatmul.mubr.f32.gmra.mxu0 %v6729_v52  ;;  %5628 = vmatmul.mubr.f32.vlgmr.msra.gmra.mxu1 %v9428_v16  ;;  %v7238_v10 = vsub.f32 %v1664_v37, %v7209_v49  ;;  %9438 = vst [vmem:[#allocation7_spill] sm:$0xff] %v7248_v12  ;;  %v1661_v37 = vld [vmem:[%s9069_s2 + $0x28] sm:$0xff]  ;;  %v1959_v18 = vsub.f32 %v7225_v4, %v7248_v12 }
  0x9a   : > { %5659 = vmatprep.subr.mxu0 %v7161_v35  ;;  %5707 = vmatprep.subr.mxu1 %v1918_v33 }
  0x9b   : > { %5660 = vmatpush3.msra.mxu0 %v7161_v35  ;;  %5708 = vmatpush3.msra.mxu1 %v1918_v33  ;;  %v1662_v33 = vld [vmem:[%s9069_s2 + $0x30] sm:$0xff]  ;;  %v7256_v41 = vand.u32 4294901760, %v7238_v10  ;;  %v1960_v12 = vand.u32 4294901760, %v1959_v18 }
  0x9c   : > { %5661 = vmatprep.subr.mxu0 %v7172_v17  ;;  %5709 = vmatprep.subr.mxu1 %v1925_v61  ;;  %v7243_v40 = vand.u32 4294901760, %v1662_v33 }
  0x9d   : > { %5580 = vmatprep.mubr.f32.mxu0 %v6763_v47  ;;  %5630 = vmatprep.mubr.f32.mxu1 %v9431_v58  ;;  %9439 = vst [vmem:[#allocation8_spill] sm:$0xff] %v7256_v41 }
  0x9e   : > { %5662 = vmatpush3.msra.mxu0 %v7172_v17  ;;  %5710 = vmatpush3.msra.mxu1 %v1925_v61  ;;  %v1952_v61 = vsub.f32 %v7204_v48, %v7222_v14  ;;  %v7267_v14 = vand.u32 4294901760, %v1661_v37  ;;  %v7272_v62 = vsub.f32 %v1662_v33, %v7243_v40  ;;  %v1659_v33 = vld [vmem:[%s9069_s2 + $0x18] sm:$0xff] }
  0x9f   : > { %5581 = vmatmul.mubr.f32.gmra.mxu0 %v6779_v22  ;;  %5631 = vmatmul.mubr.f32.gmra.mxu1 %v9432_v8  ;;  %v7301_v55 = vand.u32 4294901760, %v1659_v33 }
  0xa0   : > { %5663 = vmatprep.subr.mxu0 %v7199_v19  ;;  %5711 = vmatprep.subr.mxu1 %v1932_v63  ;;  %v1953_v28 = vand.u32 4294901760, %v1952_v61  ;;  %v7282_v61 = vand.u32 4294901760, %v7259_v51  ;;  %v7290_v26 = vand.u32 4294901760, %v7272_v62  ;;  %v7293_v38 = vsub.f32 %v1661_v37, %v7267_v14 }
  0xa1   : > { %5664 = vmatpush3.msra.mxu0 %v7199_v19  ;;  %5712 = vmatpush3.msra.mxu1 %v1932_v63  ;;  %v1660_v63 = vld [vmem:[%s9069_s2 + $0x20] sm:$0xff]  ;;  %9442 = vst [vmem:[#allocation14_spill] sm:$0xff] %v7301_v55  ;;  %v7327_v7 = vsub.f32 %v1659_v33, %v7301_v55 }
  0xa2   : > { %5665 = vmatprep.subr.mxu0 %v7209_v49  ;;  %5713 = vmatprep.subr.mxu1 %v1939_v53  ;;  %v7277_v31 = vand.u32 4294901760, %v1660_v63  ;;  %9440 = vst [vmem:[#allocation10_spill] sm:$0xff] %v7282_v61  ;;  %9441 = vst [vmem:[#allocation12_spill] sm:$0xff] %v7290_v26  ;;  %v1973_v18 = vsub.f32 %v7259_v51, %v7282_v61 }
  0xa3   : > { %5583 = vmatprep.mubr.f32.mxu0 %v6805_v57  ;;  %5633 = vmatprep.mubr.f32.mxu1 %v9435_v43 }
  0xa4   : > { %5666 = vmatpush3.msra.mxu0 %v7209_v49  ;;  %5714 = vmatpush3.msra.mxu1 %v1939_v53  ;;  %v1966_v53 = vsub.f32 %v7238_v10, %v7256_v41  ;;  %v7306_v37 = vsub.f32 %v1660_v63, %v7277_v31  ;;  %v1657_v63 = vld [vmem:[%s9069_s2 + $0x8] sm:$0xff]  ;;  %v1974_v61 = vand.u32 4294901760, %v1973_v18 }
  0xa5   : > { %5584 = vmatmul.mubr.f32.gmra.mxu0 %v6816_v30  ;;  %5634 = vmatmul.mubr.f32.gmra.mxu1 %v6729_v52  ;;  %v7335_v0 = vand.u32 4294901760, %v1657_v63 }
  0xa6   : > { %5667 = vmatprep.subr.mxu0 %v7233_v15  ;;  %5715 = vmatprep.subr.mxu1 %v1946_v21  ;;  %v1967_v41 = vand.u32 4294901760, %v1966_v53  ;;  %v7316_v53 = vand.u32 4294901760, %v7293_v38  ;;  %v7324_v25 = vand.u32 4294901760, %v7306_v37 }
  0xa7   : > { %5668 = vmatpush3.msra.mxu0 %v7233_v15  ;;  %5716 = vmatpush3.msra.mxu1 %v1946_v21  ;;  %v1658_v21 = vld [vmem:[%s9069_s2 + $0x10] sm:$0xff]  ;;  %v7358_v5 = vsub.f32 %v1657_v63, %v7335_v0 }
  0xa8   : > { %5669 = vmatprep.subr.mxu0 %v7243_v40  ;;  %5717 = vmatprep.subr.mxu1 %v1953_v28  ;;  %v7311_v50 = vand.u32 4294901760, %v1658_v21  ;;  %9443 = vst [vmem:[#allocation18_spill] sm:$0xff] %v7316_v53  ;;  %9444 = vst [vmem:[#allocation23_spill] sm:$0xff] %v7324_v25  ;;  %v1987_v18 = vsub.f32 %v7293_v38, %v7316_v53 }
  0xa9   : > { %5586 = vmatprep.mubr.f32.mxu0 %v6840_v39  ;;  %5636 = vmatprep.mubr.f32.mxu1 %v6763_v47 }
  0xaa   : > { %5670 = vmatpush3.msra.mxu0 %v7243_v40  ;;  %5718 = vmatpush3.msra.mxu1 %v1953_v28  ;;  %v1980_v28 = vsub.f32 %v7272_v62, %v7290_v26  ;;  %v7340_v33 = vsub.f32 %v1658_v21, %v7311_v50  ;;  %v1988_v21 = vand.u32 4294901760, %v1987_v18  ;;  %v7374_v18 = vand.u32 4294901760, %v7358_v5 }
  0xab   : > { %5587 = vmatmul.mubr.f32.gmra.mxu0 %v6849_v59  ;;  %5637 = vmatmul.mubr.f32.gmra.mxu1 %v6779_v22 }
  0xac   : > { %5671 = vmatprep.subr.mxu0 %v7267_v14  ;;  %5719 = vmatprep.subr.mxu1 %v1960_v12  ;;  %v1981_v26 = vand.u32 4294901760, %v1980_v28  ;;  %v7350_v28 = vand.u32 4294901760, %v7327_v7  ;;  %v7355_v53 = vand.u32 4294901760, %v7340_v33 }
  0xad   : > { %5672 = vmatpush3.msra.mxu0 %v7267_v14  ;;  %5720 = vmatpush3.msra.mxu1 %v1960_v12  ;;  %v1656_v12 = vld [vmem:[%s9069_s2] sm:$0xff] }
  0xae   : > { %5673 = vmatprep.subr.mxu0 %v7277_v31  ;;  %5721 = vmatprep.subr.mxu1 %v1967_v41  ;;  %v7345_v24 = vand.u32 4294901760, %v1656_v12  ;;  %9445 = vst [vmem:[#allocation26_spill] sm:$0xff] %v7350_v28  ;;  %9446 = vst [vmem:[#allocation29_spill] sm:$0xff] %v7355_v53  ;;  %v2008_v63 = vsub.f32 %v7340_v33, %v7355_v53 }
  0xaf   : > { %5589 = vmatprep.mubr.f32.mxu0 %v6876_v6  ;;  %5639 = vmatprep.mubr.f32.mxu1 %v6805_v57 }
  0xb0   : > { %5674 = vmatpush3.msra.mxu0 %v7277_v31  ;;  %5722 = vmatpush3.msra.mxu1 %v1967_v41  ;;  %v1994_v41 = vsub.f32 %v7306_v37, %v7324_v25  ;;  %v2009_v53 = vand.u32 4294901760, %v2008_v63  ;;  %v9449_v63 = vld [vmem:[#allocation41_spill] sm:$0xff] }
  0xb1   : > { %5590 = vmatmul.mubr.f32.gmra.mxu0 %v6887_v36  ;;  %5640 = vmatmul.mubr.f32.gmra.mxu1 %v6816_v30 }
  0xb2   : > { %5675 = vmatprep.subr.mxu0 %v7301_v55  ;;  %5723 = vmatprep.subr.mxu1 %v1974_v61  ;;  %v1995_v25 = vand.u32 4294901760, %v1994_v41  ;;  %v9447_v41 = vld [vmem:[#allocation32_spill] sm:$0xff] }
  0xb3   : > { %5676 = vmatpush3.msra.mxu0 %v7301_v55  ;;  %5724 = vmatpush3.msra.mxu1 %v1974_v61  ;;  %v2001_v61 = vsub.f32 %v7327_v7, %v7350_v28  ;;  %v7366_v55 = vsub.f32 %v1656_v12, %v7345_v24  ;;  %v2015_v28 = vsub.f32 %v7358_v5, %v7374_v18 }
  0xb4   : > { %5677 = vmatprep.subr.mxu0 %v7311_v50  ;;  %5725 = vmatprep.subr.mxu1 %v1981_v26 }
  0xb5   : > { %5592 = vmatprep.mubr.f32.mxu0 %v6914_v56  ;;  %5642 = vmatprep.mubr.f32.mxu1 %v6840_v39  ;;  %v7379_v12 = vand.u32 4294901760, %v7366_v55 }
  0xb6   : > { %5678 = vmatpush3.msra.mxu0 %v7311_v50  ;;  %5726 = vmatpush3.msra.mxu1 %v1981_v26  ;;  %v2002_v26 = vand.u32 4294901760, %v2001_v61 }
  0xb7   : > { %5593 = vmatmul.mubr.f32.gmra.mxu0 %v6925_v20  ;;  %5643 = vmatmul.mubr.f32.gmra.mxu1 %v6849_v59  ;;  %v2022_v61 = vsub.f32 %v7366_v55, %v7379_v12 }
  0xb8   : > { %5679 = vmatprep.subr.mxu0 %v7335_v0  ;;  %5727 = vmatprep.subr.mxu1 %v1988_v21 }
  0xb9   : > { %5680 = vmatpush3.msra.mxu0 %v7335_v0  ;;  %5728 = vmatpush3.msra.mxu1 %v1988_v21  ;;  %v9448_v21 = vld [vmem:[#allocation35_spill] sm:$0xff] }
  0xba   : > { %5681 = vmatprep.subr.mxu0 %v7345_v24  ;;  %5729 = vmatprep.subr.mxu1 %v1995_v25 }
  0xbb   : > { %5645 = vmatprep.mubr.f32.mxu1 %v6876_v6  ;;  %5682 = vmatpush3.msra.mxu0 %v7345_v24 }
  0xbc   : > { %5683 = vmatprep.mubr.f32.mxu0 %v9447_v41  ;;  %5730 = vmatpush3.msra.mxu1 %v1995_v25  ;;  %v2016_v25 = vand.u32 4294901760, %v2015_v28  ;;  %v9450_v41 = vld [vmem:[#allocation44_spill] sm:$0xff] }
  0xbd   : > { %5646 = vmatmul.mubr.f32.gmra.mxu1 %v6887_v36  ;;  %5684 = vmatmul.mubr.f32.vlgmr.msra.gmra.mxu0 %v9448_v21  ;;  %v2023_v21 = vand.u32 4294901760, %v2022_v61  ;;  %v9467_v61 = vld [vmem:[#allocation33_spill] sm:$0xff] }
  0xbe   : > { %5731 = vmatprep.subr.mxu1 %v2002_v26  ;;  %5763 = vmatprep.subr.mxu0 %v7118_v9 }
  0xbf   : > { %5732 = vmatpush3.msra.mxu1 %v2002_v26  ;;  %5764 = vmatpush3.msra.mxu0 %v7118_v9  ;;  %v9451_v9 = vld [vmem:[#allocation47_spill] sm:$0xff]  ;;  %v9465_v26 = vld [vmem:[#allocation30_spill] sm:$0xff] }
  0xc0   : > { %5733 = vmatprep.subr.mxu1 %v2009_v53  ;;  %5765 = vmatprep.subr.mxu0 %v7130_v42 }
  0xc1   : > { %5648 = vmatprep.mubr.f32.mxu1 %v6914_v56  ;;  %5686 = vmatprep.mubr.f32.mxu0 %v9449_v63 }
  0xc2   : > { %5734 = vmatpush3.msra.mxu1 %v2009_v53  ;;  %5766 = vmatpush3.msra.mxu0 %v7130_v42  ;;  %v9452_v42 = vld [vmem:[#allocation50_spill] sm:$0xff] }
  0xc3   : > { %5649 = vmatmul.mubr.f32.gmra.mxu1 %v6925_v20  ;;  %5687 = vmatmul.mubr.f32.gmra.mxu0 %v9450_v41 }
  0xc4   : > { %5735 = vmatprep.subr.mxu1 %v2016_v25  ;;  %5767 = vmatprep.subr.mxu0 %v7152_v1 }
  0xc5   : > { %5736 = vmatpush3.msra.mxu1 %v2016_v25  ;;  %5768 = vmatpush3.msra.mxu0 %v7152_v1  ;;  %v9453_v1 = vld [vmem:[#allocation53_spill] sm:$0xff] }
  0xc6   : > { %5737 = vmatprep.subr.mxu1 %v2023_v21  ;;  %5769 = vmatprep.subr.mxu0 %v7166_v34  ;;  %v9468_v25 = vld [vmem:[#allocation21_spill] sm:$0xff] }
  0xc7   : > { %5689 = vmatprep.mubr.f32.mxu0 %v9451_v9  ;;  %5738 = vmatpush3.msra.mxu1 %v2023_v21  ;;  %v9466_v21 = vld [vmem:[#allocation20_spill] sm:$0xff] }
  0xc8   : > { %5739 = vmatprep.mubr.f32.mxu1 %v9427_v45  ;;  %5770 = vmatpush3.msra.mxu0 %v7166_v34  ;;  %v9454_v34 = vld [vmem:[#allocation56_spill] sm:$0xff] }
  0xc9   : > { %5690 = vmatmul.mubr.f32.gmra.mxu0 %v9452_v42  ;;  %5740 = vmatmul.mubr.f32.vlgmr.msra.gmra.mxu1 %v9428_v16 }
  0xca   : > { %5771 = vmatprep.subr.mxu0 %v7190_v44  ;;  %5819 = vmatprep.subr.mxu1 %v7102_v27 }
  0xcb   : > { %5772 = vmatpush3.msra.mxu0 %v7190_v44  ;;  %5820 = vmatpush3.msra.mxu1 %v7102_v27  ;;  %v9455_v44 = vld [vmem:[#allocation59_spill] sm:$0xff] }
  0xcc   : > { %5773 = vmatprep.subr.mxu0 %v7204_v48  ;;  %5821 = vmatprep.subr.mxu1 %v7108_v2 }
  0xcd   : > { %5692 = vmatprep.mubr.f32.mxu0 %v9453_v1  ;;  %5742 = vmatprep.mubr.f32.mxu1 %v9431_v58 }
  0xce   : > { %5774 = vmatpush3.msra.mxu0 %v7204_v48  ;;  %5822 = vmatpush3.msra.mxu1 %v7108_v2  ;;  %v9456_v48 = vld [vmem:[#allocation62_spill] sm:$0xff] }
  0xcf   : > { %5693 = vmatmul.mubr.f32.gmra.mxu0 %v9454_v34  ;;  %5743 = vmatmul.mubr.f32.gmra.mxu1 %v9432_v8 }
  0xd0   : > { %5775 = vmatprep.subr.mxu0 %v7225_v4  ;;  %5823 = vmatprep.subr.mxu1 %v7127_v11 }
  0xd1   : > { %5776 = vmatpush3.msra.mxu0 %v7225_v4  ;;  %5824 = vmatpush3.msra.mxu1 %v7127_v11  ;;  %v9457_v4 = vld [vmem:[#allocation68_spill] sm:$0xff] }
  0xd2   : > { %5777 = vmatprep.subr.mxu0 %v7238_v10  ;;  %5825 = vmatprep.subr.mxu1 %v7136_v3 }
  0xd3   : > { %5695 = vmatprep.mubr.f32.mxu0 %v9455_v44  ;;  %5745 = vmatprep.mubr.f32.mxu1 %v9435_v43 }
  0xd4   : > { %5778 = vmatpush3.msra.mxu0 %v7238_v10  ;;  %5826 = vmatpush3.msra.mxu1 %v7136_v3  ;;  %v9461_v10 = vld [vmem:[#allocation22_spill] sm:$0xff] }
  0xd5   : > { %5696 = vmatmul.mubr.f32.gmra.mxu0 %v9456_v48  ;;  %5746 = vmatmul.mubr.f32.gmra.mxu1 %v6729_v52 }
  0xd6   : > { %5779 = vmatprep.subr.mxu0 %v7259_v51  ;;  %5827 = vmatprep.subr.mxu1 %v7161_v35 }
  0xd7   : > { %5780 = vmatpush3.msra.mxu0 %v7259_v51  ;;  %5828 = vmatpush3.msra.mxu1 %v7161_v35 }
  0xd8   : > { %5781 = vmatprep.subr.mxu0 %v7272_v62  ;;  %5829 = vmatprep.subr.mxu1 %v7172_v17 }
  0xd9   : > { %5698 = vmatprep.mubr.f32.mxu0 %v6931_v23  ;;  %5748 = vmatprep.mubr.f32.mxu1 %v6763_v47 }
  0xda   : > { %5782 = vmatpush3.msra.mxu0 %v7272_v62  ;;  %5830 = vmatpush3.msra.mxu1 %v7172_v17  ;;  %v9462_v62 = vld [vmem:[#allocation25_spill] sm:$0xff] }
  0xdb   : > { %5699 = vmatmul.mubr.f32.gmra.mxu0 %v9457_v4  ;;  %5749 = vmatmul.mubr.f32.gmra.mxu1 %v6779_v22  ;;  %v9523_v4 = vld [vmem:[#allocation72_spill] sm:$0xff] }
  0xdc   : > { %5783 = vmatprep.subr.mxu0 %v7293_v38  ;;  %5831 = vmatprep.subr.mxu1 %v7199_v19 }
  0xdd   : > { %5784 = vmatpush3.msra.mxu0 %v7293_v38  ;;  %5832 = vmatpush3.msra.mxu1 %v7199_v19  ;;  %v9459_v38 = vld [vmem:[#allocation2_spill] sm:$0xff] }
  0xde   : > { %5785 = vmatprep.subr.mxu0 %v7306_v37  ;;  %5833 = vmatprep.subr.mxu1 %v7209_v49 }
  0xdf   : > { %5701 = vmatprep.mubr.f32.mxu0 %v6963_v29  ;;  %5751 = vmatprep.mubr.f32.mxu1 %v6805_v57  ;;  %v9501_v29 = vld [vmem:[#allocation26_spill] sm:$0xff] }
  0xe0   : > { %5786 = vmatpush3.msra.mxu0 %v7306_v37  ;;  %5834 = vmatpush3.msra.mxu1 %v7209_v49  ;;  %v9463_v37 = vld [vmem:[#allocation3_spill] sm:$0xff] }
  0xe1   : > { %5702 = vmatmul.mubr.f32.gmra.mxu0 %v6972_v54  ;;  %5752 = vmatmul.mubr.f32.gmra.mxu1 %v6816_v30  ;;  %v9493_v54 = vld [vmem:[#allocation18_spill] sm:$0xff] }
  0xe2   : > { %5787 = vmatprep.subr.mxu0 %v7327_v7  ;;  %5835 = vmatprep.subr.mxu1 %v7233_v15 }
  0xe3   : > { %5788 = vmatpush3.msra.mxu0 %v7327_v7  ;;  %5836 = vmatpush3.msra.mxu1 %v7233_v15  ;;  %v9458_v7 = vld [vmem:[#allocation14_spill] sm:$0xff] }
  0xe4   : > { %5789 = vmatprep.subr.mxu0 %v7340_v33  ;;  %5837 = vmatprep.subr.mxu1 %v7243_v40 }
  0xe5   : > { %5704 = vmatprep.mubr.f32.mxu0 %v6986_v60  ;;  %5754 = vmatprep.mubr.f32.mxu1 %v6840_v39 }
  0xe6   : > { %5790 = vmatpush3.msra.mxu0 %v7340_v33  ;;  %5838 = vmatpush3.msra.mxu1 %v7243_v40  ;;  %v9464_v33 = vld [vmem:[#allocation4_spill] sm:$0xff] }
  0xe7   : > { %5705 = vmatmul.mubr.f32.gmra.mxu0 %v6992_v46  ;;  %5755 = vmatmul.mubr.f32.gmra.mxu1 %v6849_v59  ;;  %v9484_v46 = vld [vmem:[#allocation10_spill] sm:$0xff] }
  0xe8   : > { %5791 = vmatprep.subr.mxu0 %v7358_v5  ;;  %5839 = vmatprep.subr.mxu1 %v7267_v14 }
  0xe9   : > { %5792 = vmatpush3.msra.mxu0 %v7358_v5  ;;  %5840 = vmatpush3.msra.mxu1 %v7267_v14 }
  0xea   : > { %5793 = vmatprep.subr.mxu0 %v7366_v55  ;;  %5841 = vmatprep.subr.mxu1 %v7277_v31 }
  0xeb   : > { %5757 = vmatprep.mubr.f32.mxu1 %v6876_v6  ;;  %5794 = vmatpush3.msra.mxu0 %v7366_v55  ;;  %v9460_v55 = vld [vmem:[#allocation17_spill] sm:$0xff] }
  0xec   : > { %5795 = vmatprep.mubr.f32.mxu0 %v6657_v13  ;;  %5842 = vmatpush3.msra.mxu1 %v7277_v31 }
  0xed   : > { %5758 = vmatmul.mubr.f32.gmra.mxu1 %v6887_v36  ;;  %5796 = vmatmul.mubr.f32.vlgmr.msra.gmra.mxu0 %v6670_v32  ;;  %v9477_v32 = vld [vmem:[#allocation7_spill] sm:$0xff] }
  0xee   : > { %5843 = vmatprep.subr.mxu1 %v9458_v7  ;;  %5875 = vmatprep.subr.mxu0 %v9459_v38  ;;  %v7480_v51 = vpop.f32.mrf.mxu0 }
  0xef   : > { %5844 = vmatpush3.msra.mxu1 %v9458_v7  ;;  %5876 = vmatpush3.msra.mxu0 %v9459_v38 }
  0xf0   : > { %5845 = vmatprep.subr.mxu1 %v7311_v50  ;;  %5877 = vmatprep.subr.mxu0 %v9460_v55  ;;  %v7486_v5 = vpop.f32.mrf.mxu0 }
  0xf1   : > { %5760 = vmatprep.mubr.f32.mxu1 %v6914_v56  ;;  %5798 = vmatprep.mubr.f32.mxu0 %v9461_v10 }
  0xf2   : > { %5846 = vmatpush3.msra.mxu1 %v7311_v50  ;;  %5878 = vmatpush3.msra.mxu0 %v9460_v55 }
  0xf3   : > { %5761 = vmatmul.mubr.f32.gmra.mxu1 %v6925_v20  ;;  %5799 = vmatmul.mubr.f32.gmra.mxu0 %v9462_v62  ;;  %v9474_v62 = vld [vmem:[#allocation42_spill] sm:$0xff] }
  0xf4   : > { %5847 = vmatprep.subr.mxu1 %v7335_v0  ;;  %5879 = vmatprep.subr.mxu0 %v9463_v37  ;;  %v7496_v53 = vpop.f32.mrf.mxu0 }
  0xf5   : > { %5848 = vmatpush3.msra.mxu1 %v7335_v0  ;;  %5880 = vmatpush3.msra.mxu0 %v9463_v37  ;;  %v9469_v37 = vld [vmem:[#allocation5_spill] sm:$0xff] }
  0xf6   : > { %5849 = vmatprep.subr.mxu1 %v7345_v24  ;;  %5881 = vmatprep.subr.mxu0 %v9464_v33  ;;  %v7502_v28 = vpop.f32.mrf.mxu0 }
  0xf7   : > { %5801 = vmatprep.mubr.f32.mxu0 %v9465_v26  ;;  %5850 = vmatpush3.msra.mxu1 %v7345_v24 }
  0xf8   : > { %5851 = vmatprep.mubr.f32.mxu1 %v9466_v21  ;;  %5882 = vmatpush3.msra.mxu0 %v9464_v33  ;;  %v9471_v33 = vld [vmem:[#allocation6_spill] sm:$0xff] }
  0xf9   : > { %5802 = vmatmul.mubr.f32.gmra.mxu0 %v9467_v61  ;;  %5852 = vmatmul.mubr.f32.vlgmr.msra.gmra.mxu1 %v9468_v25  ;;  %v7510_v38 = vpop.f32.mrf.mxu0  ;;  %v7512_v55 = vpop.f32.mrf.mxu1  ;;  %v9472_v25 = vld [vmem:[#allocation40_spill] sm:$0xff] }
  0xfa   : > { %5883 = vmatprep.subr.mxu0 %v9469_v37  ;;  %5931 = vmatprep.subr.mxu1 %v7102_v27  ;;  %v9473_v61 = vld [vmem:[#allocation28_spill] sm:$0xff] }
  0xfb   : > { %5884 = vmatpush3.msra.mxu0 %v9469_v37  ;;  %5932 = vmatpush3.msra.mxu1 %v7102_v27  ;;  %v7518_v26 = vpop.f32.mrf.mxu0  ;;  %v7520_v21 = vpop.f32.mrf.mxu1  ;;  %v9475_v37 = vld [vmem:[#allocation31_spill] sm:$0xff] }
  0xfc   : > { %9470 = vst [vmem:[#allocation36_spill] sm:$0xff] %v7518_v26  ;;  %5885 = vmatprep.subr.mxu0 %v9471_v33  ;;  %5933 = vmatprep.subr.mxu1 %v7108_v2 }
  0xfd   : > { %5804 = vmatprep.mubr.f32.mxu0 %v9472_v25  ;;  %5854 = vmatprep.mubr.f32.mxu1 %v9473_v61  ;;  %v9482_v25 = vld [vmem:[#allocation51_spill] sm:$0xff] }
  0xfe   : > { %5886 = vmatpush3.msra.mxu0 %v9471_v33  ;;  %5934 = vmatpush3.msra.mxu1 %v7108_v2  ;;  %v9479_v2 = vld [vmem:[#allocation8_spill] sm:$0xff] }
  0xff   : > { %5805 = vmatmul.mubr.f32.gmra.mxu0 %v9474_v62  ;;  %5855 = vmatmul.mubr.f32.gmra.mxu1 %v9475_v37  ;;  %v7530_v27 = vpop.f32.mrf.mxu0  ;;  %v7532_v10 = vpop.f32.mrf.mxu1  ;;  %v9480_v37 = vld [vmem:[#allocation49_spill] sm:$0xff] }
 0x100   : > { %9476 = vst [vmem:[#allocation9_spill] sm:$0xff] %v7530_v27  ;;  %5887 = vmatprep.subr.mxu0 %v9477_v32  ;;  %5935 = vmatprep.subr.mxu1 %v7127_v11  ;;  %v9481_v62 = vld [vmem:[#allocation37_spill] sm:$0xff] }
 0x101   : > { %5888 = vmatpush3.msra.mxu0 %v9477_v32  ;;  %5936 = vmatpush3.msra.mxu1 %v7127_v11  ;;  %v7538_v61 = vpop.f32.mrf.mxu0  ;;  %v7540_v33 = vpop.f32.mrf.mxu1  ;;  %v9483_v32 = vld [vmem:[#allocation39_spill] sm:$0xff] }
 0x102   : > { %9478 = vst [vmem:[#allocation11_spill] sm:$0xff] %v7538_v61  ;;  %5889 = vmatprep.subr.mxu0 %v9479_v2  ;;  %5937 = vmatprep.subr.mxu1 %v7136_v3 }
 0x103   : > { %5807 = vmatprep.mubr.f32.mxu0 %v9480_v37  ;;  %5857 = vmatprep.mubr.f32.mxu1 %v9481_v62  ;;  %v9490_v37 = vld [vmem:[#allocation57_spill] sm:$0xff] }
 0x104   : > { %5890 = vmatpush3.msra.mxu0 %v9479_v2  ;;  %5938 = vmatpush3.msra.mxu1 %v7136_v3  ;;  %v9487_v3 = vld [vmem:[#allocation12_spill] sm:$0xff] }
 0x105   : > { %5808 = vmatmul.mubr.f32.gmra.mxu0 %v9482_v25  ;;  %5858 = vmatmul.mubr.f32.gmra.mxu1 %v9483_v32  ;;  %v5361_v11 = vpop.f32.mrf.mxu0  ;;  %v7550_v13 = vpop.f32.mrf.mxu1  ;;  %v9488_v32 = vld [vmem:[#allocation55_spill] sm:$0xff]  ;;  %v9489_v25 = vld [vmem:[#allocation45_spill] sm:$0xff] }
 0x106   : > { %5891 = vmatprep.subr.mxu0 %v9484_v46  ;;  %5939 = vmatprep.subr.mxu1 %v7161_v35 }
 0x107   : > { %5892 = vmatpush3.msra.mxu0 %v9484_v46  ;;  %5940 = vmatpush3.msra.mxu1 %v7161_v35  ;;  %v7556_v62 = vpop.f32.mrf.mxu0  ;;  %v7558_v2 = vpop.f32.mrf.mxu1  ;;  %v9491_v46 = vld [vmem:[#allocation48_spill] sm:$0xff] }
 0x108   : > { %9485 = vst [vmem:[#allocation16_spill] sm:$0xff] %v7556_v62  ;;  %9486 = vst [vmem:[#allocation41_spill] sm:$0xff] %v7558_v2  ;;  %5893 = vmatprep.subr.mxu0 %v9487_v3  ;;  %5941 = vmatprep.subr.mxu1 %v7172_v17 }
 0x109   : > { %5810 = vmatprep.mubr.f32.mxu0 %v9488_v32  ;;  %5860 = vmatprep.mubr.f32.mxu1 %v9489_v25  ;;  %v9499_v32 = vld [vmem:[#allocation63_spill] sm:$0xff] }
 0x10a   : > { %5894 = vmatpush3.msra.mxu0 %v9487_v3  ;;  %5942 = vmatpush3.msra.mxu1 %v7172_v17  ;;  %v9496_v17 = vld [vmem:[#allocation23_spill] sm:$0xff] }
 0x10b   : > { %5811 = vmatmul.mubr.f32.gmra.mxu0 %v9490_v37  ;;  %5861 = vmatmul.mubr.f32.gmra.mxu1 %v9491_v46  ;;  %v5364_v35 = vpop.f32.mrf.mxu0  ;;  %v7568_v60 = vpop.f32.mrf.mxu1  ;;  %v9497_v46 = vld [vmem:[#allocation61_spill] sm:$0xff]  ;;  %v9498_v37 = vld [vmem:[#allocation52_spill] sm:$0xff] }
 0x10c   : > { %9492 = vst [vmem:[#allocation44_spill] sm:$0xff] %v7568_v60  ;;  %5895 = vmatprep.subr.mxu0 %v9493_v54  ;;  %5943 = vmatprep.subr.mxu1 %v7199_v19 }
 0x10d   : > { %5896 = vmatpush3.msra.mxu0 %v9493_v54  ;;  %5944 = vmatpush3.msra.mxu1 %v7199_v19  ;;  %v7574_v25 = vpop.f32.mrf.mxu0  ;;  %v7576_v3 = vpop.f32.mrf.mxu1  ;;  %v9500_v54 = vld [vmem:[#allocation54_spill] sm:$0xff] }
 0x10e   : > { %9494 = vst [vmem:[#allocation47_spill] sm:$0xff] %v7574_v25  ;;  %9495 = vst [vmem:[#allocation50_spill] sm:$0xff] %v7576_v3  ;;  %5897 = vmatprep.subr.mxu0 %v9496_v17  ;;  %5945 = vmatprep.subr.mxu1 %v7209_v49 }
 0x10f   : > { %5813 = vmatprep.mubr.f32.mxu0 %v9497_v46  ;;  %5863 = vmatprep.mubr.f32.mxu1 %v9498_v37  ;;  %v9506_v37 = vld [vmem:[#allocation67_spill] sm:$0xff]  ;;  %v9509_v46 = vld [vmem:[#allocation60_spill] sm:$0xff] }
 0x110   : > { %5898 = vmatpush3.msra.mxu0 %v9496_v17  ;;  %5946 = vmatpush3.msra.mxu1 %v7209_v49  ;;  %v2989_v49 = vld [vmem:[%s9070_s3 + $0x78] sm:$0xff] }
 0x111   : > { %5814 = vmatmul.mubr.f32.gmra.mxu0 %v9499_v32  ;;  %5864 = vmatmul.mubr.f32.gmra.mxu1 %v9500_v54  ;;  %v5367_v19 = vpop.f32.mrf.mxu0  ;;  %v5417_v25 = vpop.f32.mrf.mxu1  ;;  %v9505_v54 = vld [vmem:[#allocation29_spill] sm:$0xff] }
 0x112   : > { %5899 = vmatprep.subr.mxu0 %v9501_v29  ;;  %5947 = vmatprep.subr.mxu1 %v7233_v15  ;;  %v7588_v62 = vadd.f32 %v5417_v25, %v5361_v11  ;;  %v9507_v25 = vld [vmem:[#allocation58_spill] sm:$0xff]  ;;  %v9508_v11 = vld [vmem:[#allocation69_spill] sm:$0xff] }
 0x113   : > { %5900 = vmatpush3.msra.mxu0 %v9501_v29  ;;  %5948 = vmatpush3.msra.mxu1 %v7233_v15  ;;  %v7595_v17 = vpop.f32.mrf.mxu0  ;;  %v7597_v32 = vpop.f32.mrf.mxu1  ;;  %v2988_v29 = vld [vmem:[%s9070_s3 + $0x70] sm:$0xff]  ;;  %v7608_v15 = vand.u32 4294901760, %v2989_v49 }
 0x114   : > { %9502 = vst [vmem:[#allocation53_spill] sm:$0xff] %v7588_v62  ;;  %9503 = vst [vmem:[#allocation14_spill] sm:$0xff] %v7595_v17  ;;  %5901 = vmatprep.subr.mxu0 %v9505_v54  ;;  %5949 = vmatprep.subr.mxu1 %v7243_v40 }
 0x115   : > { %9504 = vst [vmem:[#allocation2_spill] sm:$0xff] %v7597_v32  ;;  %5816 = vmatprep.mubr.f32.mxu0 %v9506_v37  ;;  %5866 = vmatprep.mubr.f32.mxu1 %v9507_v25  ;;  %v7614_v25 = vand.u32 4294901760, %v2988_v29 }
 0x116   : > { %5902 = vmatpush3.msra.mxu0 %v9505_v54  ;;  %5950 = vmatpush3.msra.mxu1 %v7243_v40  ;;  %v2987_v40 = vld [vmem:[%s9070_s3 + $0x68] sm:$0xff] }
 0x117   : > { %5817 = vmatmul.mubr.f32.gmra.mxu0 %v9508_v11  ;;  %5867 = vmatmul.mubr.f32.gmra.mxu1 %v9509_v46  ;;  %v5370_v17 = vpop.f32.mrf.mxu0  ;;  %v5420_v62 = vpop.f32.mrf.mxu1  ;;  %v7630_v11 = vsub.f32 %v2989_v49, %v7608_v15 }
 0x118   : > { %5903 = vmatprep.subr.mxu0 %v7374_v18  ;;  %5951 = vmatprep.subr.mxu1 %v7267_v14  ;;  %v7616_v37 = vadd.f32 %v5420_v62, %v5364_v35  ;;  %v9513_v62 = vld [vmem:[#allocation64_spill] sm:$0xff]  ;;  %v7642_v35 = vsub.f32 %v2988_v29, %v7614_v25  ;;  %v2985_v29 = vld [vmem:[%s9070_s3 + $0x58] sm:$0xff] }
 0x119   : > { %5904 = vmatpush3.msra.mxu0 %v7374_v18  ;;  %5952 = vmatpush3.msra.mxu1 %v7267_v14  ;;  %v7623_v54 = vpop.f32.mrf.mxu0  ;;  %v7625_v46 = vpop.f32.mrf.mxu1  ;;  %v2986_v14 = vld [vmem:[%s9070_s3 + $0x60] sm:$0xff]  ;;  %v7639_v18 = vand.u32 4294901760, %v2987_v40 }
 0x11a   : > { %9510 = vst [vmem:[#allocation17_spill] sm:$0xff] %v7616_v37  ;;  %9511 = vst [vmem:[#allocation3_spill] sm:$0xff] %v7623_v54  ;;  %5905 = vmatprep.subr.mxu0 %v7379_v12  ;;  %5953 = vmatprep.subr.mxu1 %v7277_v31  ;;  %v9515_v54 = vld [vmem:[#allocation66_spill] sm:$0xff]  ;;  %v7669_v32 = vand.u32 4294901760, %v7642_v35 }
 0x11b   : > { %9512 = vst [vmem:[#allocation4_spill] sm:$0xff] %v7625_v46  ;;  %5869 = vmatprep.mubr.f32.mxu1 %v9513_v62  ;;  %5906 = vmatpush3.msra.mxu0 %v7379_v12  ;;  %9514 = vst [vmem:[#allocation5_spill] sm:$0xff] %v7639_v18  ;;  %v7650_v12 = vand.u32 4294901760, %v2986_v14 }
 0x11c   : > { %5907 = vmatprep.mubr.f32.mxu0 %v9427_v45  ;;  %5954 = vmatpush3.msra.mxu1 %v7277_v31  ;;  %v7653_v31 = vand.u32 4294901760, %v7630_v11  ;;  %9520 = vst [vmem:[#allocation12_spill] sm:$0xff] %v7669_v32  ;;  %v3242_v3 = vsub.f32 %v7642_v35, %v7669_v32 }
 0x11d   : > { %5870 = vmatmul.mubr.f32.gmra.mxu1 %v9515_v54  ;;  %5908 = vmatmul.mubr.f32.vlgmr.msra.gmra.mxu0 %v9428_v16  ;;  %v5423_v49 = vpop.f32.mrf.mxu1  ;;  %v7646_v62 = vpop.f32.mrf.mxu0  ;;  %9516 = vst [vmem:[#allocation6_spill] sm:$0xff] %v7650_v12 }
 0x11e   : > { %5955 = vmatprep.subr.mxu1 %v9458_v7  ;;  %5987 = vmatprep.subr.mxu0 %v7608_v15  ;;  %9517 = vst [vmem:[#allocation7_spill] sm:$0xff] %v7653_v31  ;;  %v7655_v37 = vadd.f32 %v5423_v49, %v5367_v19  ;;  %v7672_v19 = vsub.f32 %v2987_v40, %v7639_v18  ;;  %v2984_v49 = vld [vmem:[%s9070_s3 + $0x50] sm:$0xff] }
 0x11f   : > { %5956 = vmatpush3.msra.mxu1 %v9458_v7  ;;  %5988 = vmatpush3.msra.mxu0 %v7608_v15  ;;  %v7662_v54 = vpop.f32.mrf.mxu1  ;;  %v7664_v46 = vpop.f32.mrf.mxu0  ;;  %v9521_v7 = vld [vmem:[#allocation70_spill] sm:$0xff]  ;;  %v7686_v40 = vsub.f32 %v2986_v14, %v7650_v12 }
 0x120   : > { %9518 = vst [vmem:[#allocation8_spill] sm:$0xff] %v7655_v37  ;;  %9519 = vst [vmem:[#allocation10_spill] sm:$0xff] %v7662_v54  ;;  %5957 = vmatprep.subr.mxu1 %v7311_v50  ;;  %5989 = vmatprep.subr.mxu0 %v7614_v25  ;;  %v7681_v37 = vand.u32 4294901760, %v2985_v29  ;;  %v3235_v54 = vsub.f32 %v7630_v11, %v7653_v31  ;;  %v7699_v31 = vand.u32 4294901760, %v7672_v19 }
 0x121   : > { %5872 = vmatprep.mubr.f32.mxu1 %v9521_v7  ;;  %5910 = vmatprep.mubr.f32.mxu0 %v9431_v58 }
 0x122   : > { %5958 = vmatpush3.msra.mxu1 %v7311_v50  ;;  %5990 = vmatpush3.msra.mxu0 %v7614_v25  ;;  %9522 = vst [vmem:[#allocation18_spill] sm:$0xff] %v7681_v37  ;;  %v7694_v50 = vand.u32 4294901760, %v2984_v49  ;;  %9525 = vst [vmem:[#allocation26_spill] sm:$0xff] %v7699_v31  ;;  %v3236_v32 = vand.u32 4294901760, %v3235_v54 }
 0x123   : > { %5873 = vmatmul.mubr.f32.gmra.mxu1 %v9523_v4  ;;  %5911 = vmatmul.mubr.f32.gmra.mxu0 %v9432_v8  ;;  %v5426_v7 = vpop.f32.mrf.mxu1  ;;  %v7690_v23 = vpop.f32.mrf.mxu0  ;;  %v2983_v4 = vld [vmem:[%s9070_s3 + $0x48] sm:$0xff] }
 0x124   : > { %5959 = vmatprep.subr.mxu1 %v7335_v0  ;;  %5991 = vmatprep.subr.mxu0 %v7639_v18  ;;  %9524 = vst [vmem:[#allocation23_spill] sm:$0xff] %v7694_v50  ;;  %v7701_v14 = vadd.f32 %v5426_v7, %v5370_v17  ;;  %v7715_v17 = vand.u32 4294901760, %v7686_v40  ;;  %v2982_v7 = vld [vmem:[%s9070_s3 + $0x40] sm:$0xff]  ;;  %v7727_v54 = vand.u32 4294901760, %v2983_v4 }
 0x125   : > { %5960 = vmatpush3.msra.mxu1 %v7335_v0  ;;  %5992 = vmatpush3.msra.mxu0 %v7639_v18  ;;  %v7708_v61 = vpop.f32.mrf.mxu1  ;;  %v7710_v48 = vpop.f32.mrf.mxu0  ;;  %v7718_v0 = vsub.f32 %v2985_v29, %v7681_v37  ;;  %v7732_v29 = vsub.f32 %v2984_v49, %v7694_v50  ;;  %v2981_v49 = vld [vmem:[%s9070_s3 + $0x38] sm:$0xff] }
 0x126   : > { %9526 = vst [vmem:[#allocation29_spill] sm:$0xff] %v7701_v14  ;;  %9527 = vst [vmem:[#allocation76_spill] sm:$0xff] %v7708_v61  ;;  %5961 = vmatprep.subr.mxu1 %v7345_v24  ;;  %5993 = vmatprep.subr.mxu0 %v7650_v12  ;;  %v3243_v14 = vand.u32 4294901760, %v3242_v3  ;;  %v3249_v61 = vsub.f32 %v7672_v19, %v7699_v31  ;;  %v7741_v3 = vand.u32 4294901760, %v2982_v7 }
 0x127   : > { %9528 = vst [vmem:[#allocation77_spill] sm:$0xff] %v7715_v17  ;;  %5913 = vmatprep.mubr.f32.mxu0 %v9435_v43  ;;  %5962 = vmatpush3.msra.mxu1 %v7345_v24  ;;  %9529 = vst [vmem:[#allocation78_spill] sm:$0xff] %v7727_v54  ;;  %v3256_v27 = vsub.f32 %v7686_v40, %v7715_v17  ;;  %v7746_v31 = vand.u32 4294901760, %v7718_v0  ;;  %v7758_v17 = vand.u32 4294901760, %v7732_v29 }
 0x128   : > { %5963 = vmatprep.mubr.f32.mxu1 %v9427_v45  ;;  %5994 = vmatpush3.msra.mxu0 %v7650_v12  ;;  %9531 = vst [vmem:[#allocation80_spill] sm:$0xff] %v7741_v3  ;;  %v7761_v18 = vsub.f32 %v2983_v4, %v7727_v54  ;;  %v7774_v4 = vsub.f32 %v2982_v7, %v7741_v3  ;;  %v2979_v7 = vld [vmem:[%s9070_s3 + $0x28] sm:$0xff] }
 0x129   : > { %5914 = vmatmul.mubr.f32.gmra.mxu0 %v6729_v52  ;;  %5964 = vmatmul.mubr.f32.vlgmr.msra.gmra.mxu1 %v9428_v16  ;;  %v7736_v24 = vpop.f32.mrf.mxu0  ;;  %v7738_v60 = vpop.f32.mrf.mxu1  ;;  %9532 = vst [vmem:[#allocation81_spill] sm:$0xff] %v7746_v31  ;;  %9534 = vst [vmem:[#allocation83_spill] sm:$0xff] %v7758_v17 }
 0x12a   : > { %9530 = vst [vmem:[#allocation79_spill] sm:$0xff] %v7736_v24  ;;  %5995 = vmatprep.subr.mxu0 %v7681_v37  ;;  %6043 = vmatprep.subr.mxu1 %v3236_v32  ;;  %v3250_v24 = vand.u32 4294901760, %v3249_v61  ;;  %v3263_v61 = vsub.f32 %v7718_v0, %v7746_v31  ;;  %v7788_v31 = vand.u32 4294901760, %v7761_v18 }
 0x12b   : > { %5996 = vmatpush3.msra.mxu0 %v7681_v37  ;;  %6044 = vmatpush3.msra.mxu1 %v3236_v32  ;;  %v7752_v44 = vpop.f32.mrf.mxu0  ;;  %v7754_v12 = vpop.f32.mrf.mxu1  ;;  %v2980_v32 = vld [vmem:[%s9070_s3 + $0x30] sm:$0xff]  ;;  %v3257_v37 = vand.u32 4294901760, %v3256_v27 }
 0x12c   : > { %9533 = vst [vmem:[#allocation82_spill] sm:$0xff] %v7752_v44  ;;  %5997 = vmatprep.subr.mxu0 %v7694_v50  ;;  %6045 = vmatprep.subr.mxu1 %v3243_v14  ;;  %v7769_v44 = vand.u32 4294901760, %v2981_v49  ;;  %v7783_v27 = vand.u32 4294901760, %v2980_v32  ;;  %9538 = vst [vmem:[#allocation87_spill] sm:$0xff] %v7788_v31 }
 0x12d   : > { %5916 = vmatprep.mubr.f32.mxu0 %v6763_v47  ;;  %5966 = vmatprep.mubr.f32.mxu1 %v9431_v58 }
 0x12e   : > { %5998 = vmatpush3.msra.mxu0 %v7694_v50  ;;  %6046 = vmatpush3.msra.mxu1 %v3243_v14  ;;  %9535 = vst [vmem:[#allocation84_spill] sm:$0xff] %v7769_v44  ;;  %9537 = vst [vmem:[#allocation86_spill] sm:$0xff] %v7783_v27  ;;  %v3270_v14 = vsub.f32 %v7732_v29, %v7758_v17  ;;  %v7800_v17 = vand.u32 4294901760, %v7774_v4  ;;  %v7803_v34 = vsub.f32 %v2981_v49, %v7769_v44 }
 0x12f   : > { %5917 = vmatmul.mubr.f32.gmra.mxu0 %v6779_v22  ;;  %5967 = vmatmul.mubr.f32.gmra.mxu1 %v9432_v8  ;;  %v7778_v2 = vpop.f32.mrf.mxu0  ;;  %v7780_v26 = vpop.f32.mrf.mxu1  ;;  %v3264_v8 = vand.u32 4294901760, %v3263_v61  ;;  %v3277_v61 = vsub.f32 %v7761_v18, %v7788_v31  ;;  %v7816_v49 = vsub.f32 %v2980_v32, %v7783_v27  ;;  %v2977_v32 = vld [vmem:[%s9070_s3 + $0x18] sm:$0xff] }
 0x130   : > { %9536 = vst [vmem:[#allocation85_spill] sm:$0xff] %v7778_v2  ;;  %5999 = vmatprep.subr.mxu0 %v7727_v54  ;;  %6047 = vmatprep.subr.mxu1 %v3250_v24  ;;  %9541 = vst [vmem:[#allocation90_spill] sm:$0xff] %v7800_v17  ;;  %v7830_v31 = vand.u32 4294901760, %v7803_v34 }
 0x131   : > { %6000 = vmatpush3.msra.mxu0 %v7727_v54  ;;  %6048 = vmatpush3.msra.mxu1 %v3250_v24  ;;  %v7794_v50 = vpop.f32.mrf.mxu0  ;;  %v7796_v2 = vpop.f32.mrf.mxu1  ;;  %v2978_v24 = vld [vmem:[%s9070_s3 + $0x20] sm:$0xff]  ;;  %v3271_v54 = vand.u32 4294901760, %v3270_v14  ;;  %v3284_v14 = vsub.f32 %v7774_v4, %v7800_v17  ;;  %v7842_v17 = vand.u32 4294901760, %v7816_v49 }
 0x132   : > { %9539 = vst [vmem:[#allocation88_spill] sm:$0xff] %v7794_v50  ;;  %9540 = vst [vmem:[#allocation89_spill] sm:$0xff] %v7796_v2  ;;  %6001 = vmatprep.subr.mxu0 %v7741_v3  ;;  %6049 = vmatprep.subr.mxu1 %v3257_v37  ;;  %v7811_v50 = vand.u32 4294901760, %v2979_v7 }
 0x133   : > { %5919 = vmatprep.mubr.f32.mxu0 %v6805_v57  ;;  %5969 = vmatprep.mubr.f32.mxu1 %v9435_v43  ;;  %9546 = vst [vmem:[#allocation95_spill] sm:$0xff] %v7830_v31  ;;  %9549 = vst [vmem:[#allocation98_spill] sm:$0xff] %v7842_v17 }
 0x134   : > { %6002 = vmatpush3.msra.mxu0 %v7741_v3  ;;  %6050 = vmatpush3.msra.mxu1 %v3257_v37  ;;  %9542 = vst [vmem:[#allocation91_spill] sm:$0xff] %v7811_v50  ;;  %v7825_v37 = vand.u32 4294901760, %v2978_v24 }
 0x135   : > { %5920 = vmatmul.mubr.f32.gmra.mxu0 %v6816_v30  ;;  %5970 = vmatmul.mubr.f32.gmra.mxu1 %v6729_v52  ;;  %v7820_v43 = vpop.f32.mrf.mxu0  ;;  %v7822_v2 = vpop.f32.mrf.mxu1  ;;  %v3278_v52 = vand.u32 4294901760, %v3277_v61  ;;  %v3291_v61 = vsub.f32 %v7803_v34, %v7830_v31 }
 0x136   : > { %9543 = vst [vmem:[#allocation92_spill] sm:$0xff] %v7820_v43  ;;  %9544 = vst [vmem:[#allocation93_spill] sm:$0xff] %v7822_v2  ;;  %6003 = vmatprep.subr.mxu0 %v7769_v44  ;;  %6051 = vmatprep.subr.mxu1 %v3264_v8  ;;  %v7845_v2 = vsub.f32 %v2979_v7, %v7811_v50  ;;  %v7858_v7 = vsub.f32 %v2978_v24, %v7825_v37  ;;  %v2975_v24 = vld [vmem:[%s9070_s3 + $0x8] sm:$0xff] }
 0x137   : > { %9545 = vst [vmem:[#allocation94_spill] sm:$0xff] %v7825_v37  ;;  %6004 = vmatpush3.msra.mxu0 %v7769_v44  ;;  %6052 = vmatpush3.msra.mxu1 %v3264_v8  ;;  %v7836_v3 = vpop.f32.mrf.mxu0  ;;  %v7838_v43 = vpop.f32.mrf.mxu1  ;;  %v2976_v8 = vld [vmem:[%s9070_s3 + $0x10] sm:$0xff]  ;;  %v3285_v44 = vand.u32 4294901760, %v3284_v14  ;;  %v3298_v14 = vsub.f32 %v7816_v49, %v7842_v17 }
 0x138   : > { %9547 = vst [vmem:[#allocation96_spill] sm:$0xff] %v7836_v3  ;;  %9548 = vst [vmem:[#allocation97_spill] sm:$0xff] %v7838_v43  ;;  %6005 = vmatprep.subr.mxu0 %v7783_v27  ;;  %6053 = vmatprep.subr.mxu1 %v3271_v54  ;;  %v7853_v3 = vand.u32 4294901760, %v2977_v32  ;;  %v7872_v31 = vand.u32 4294901760, %v7845_v2  ;;  %v7884_v17 = vand.u32 4294901760, %v7858_v7 }
 0x139   : > { %5922 = vmatprep.mubr.f32.mxu0 %v6840_v39  ;;  %5972 = vmatprep.mubr.f32.mxu1 %v6763_v47 }
 0x13a   : > { %6006 = vmatpush3.msra.mxu0 %v7783_v27  ;;  %6054 = vmatpush3.msra.mxu1 %v3271_v54  ;;  %9550 = vst [vmem:[#allocation99_spill] sm:$0xff] %v7853_v3  ;;  %v7867_v54 = vand.u32 4294901760, %v2976_v8  ;;  %9554 = vst [vmem:[#allocation103_spill] sm:$0xff] %v7872_v31 }
 0x13b   : > { %5923 = vmatmul.mubr.f32.gmra.mxu0 %v6849_v59  ;;  %5973 = vmatmul.mubr.f32.gmra.mxu1 %v6779_v22  ;;  %v7862_v47 = vpop.f32.mrf.mxu0  ;;  %v7864_v43 = vpop.f32.mrf.mxu1  ;;  %v3292_v22 = vand.u32 4294901760, %v3291_v61  ;;  %9557 = vst [vmem:[#allocation106_spill] sm:$0xff] %v7884_v17  ;;  %v3305_v61 = vsub.f32 %v7845_v2, %v7872_v31 }
 0x13c   : > { %9551 = vst [vmem:[#allocation100_spill] sm:$0xff] %v7862_v47  ;;  %9552 = vst [vmem:[#allocation101_spill] sm:$0xff] %v7864_v43  ;;  %6007 = vmatprep.subr.mxu0 %v7811_v50  ;;  %6055 = vmatprep.subr.mxu1 %v3278_v52  ;;  %v7887_v43 = vsub.f32 %v2977_v32, %v7853_v3  ;;  %v7900_v32 = vsub.f32 %v2976_v8, %v7867_v54 }
 0x13d   : > { %9553 = vst [vmem:[#allocation102_spill] sm:$0xff] %v7867_v54  ;;  %6008 = vmatpush3.msra.mxu0 %v7811_v50  ;;  %6056 = vmatpush3.msra.mxu1 %v3278_v52  ;;  %v7878_v27 = vpop.f32.mrf.mxu0  ;;  %v7880_v47 = vpop.f32.mrf.mxu1  ;;  %v2974_v52 = vld [vmem:[%s9070_s3] sm:$0xff]  ;;  %v3299_v50 = vand.u32 4294901760, %v3298_v14  ;;  %v3312_v14 = vsub.f32 %v7858_v7, %v7884_v17 }
 0x13e   : > { %9555 = vst [vmem:[#allocation104_spill] sm:$0xff] %v7878_v27  ;;  %9556 = vst [vmem:[#allocation105_spill] sm:$0xff] %v7880_v47  ;;  %6009 = vmatprep.subr.mxu0 %v7825_v37  ;;  %6057 = vmatprep.subr.mxu1 %v3285_v44  ;;  %v7895_v27 = vand.u32 4294901760, %v2975_v24  ;;  %v7914_v31 = vand.u32 4294901760, %v7887_v43 }
 0x13f   : > { %5925 = vmatprep.mubr.f32.mxu0 %v6876_v6  ;;  %5975 = vmatprep.mubr.f32.mxu1 %v6805_v57 }
 0x140   : > { %6010 = vmatpush3.msra.mxu0 %v7825_v37  ;;  %6058 = vmatpush3.msra.mxu1 %v3285_v44  ;;  %9558 = vst [vmem:[#allocation107_spill] sm:$0xff] %v7895_v27  ;;  %v7909_v44 = vand.u32 4294901760, %v2974_v52  ;;  %9562 = vst [vmem:[#allocation111_spill] sm:$0xff] %v7914_v31  ;;  %v3319_v17 = vsub.f32 %v7887_v43, %v7914_v31 }
 0x141   : > { %5926 = vmatmul.mubr.f32.gmra.mxu0 %v6887_v36  ;;  %5976 = vmatmul.mubr.f32.gmra.mxu1 %v6816_v30  ;;  %v7904_v57 = vpop.f32.mrf.mxu0  ;;  %v7906_v47 = vpop.f32.mrf.mxu1  ;;  %v7923_v30 = vand.u32 4294901760, %v7900_v32 }
 0x142   : > { %9559 = vst [vmem:[#allocation108_spill] sm:$0xff] %v7904_v57  ;;  %9560 = vst [vmem:[#allocation109_spill] sm:$0xff] %v7906_v47  ;;  %6011 = vmatprep.subr.mxu0 %v7853_v3  ;;  %6059 = vmatprep.subr.mxu1 %v3292_v22  ;;  %v3306_v57 = vand.u32 4294901760, %v3305_v61  ;;  %v7926_v47 = vsub.f32 %v2975_v24, %v7895_v27 }
 0x143   : > { %9561 = vst [vmem:[#allocation110_spill] sm:$0xff] %v7909_v44  ;;  %6012 = vmatpush3.msra.mxu0 %v7853_v3  ;;  %6060 = vmatpush3.msra.mxu1 %v3292_v22  ;;  %v7917_v8 = vpop.f32.mrf.mxu0  ;;  %v7919_v37 = vpop.f32.mrf.mxu1  ;;  %9564 = vst [vmem:[#allocation113_spill] sm:$0xff] %v7923_v30  ;;  %v3313_v22 = vand.u32 4294901760, %v3312_v14  ;;  %v7934_v3 = vsub.f32 %v2974_v52, %v7909_v44 }
 0x144   : > { %9563 = vst [vmem:[#allocation112_spill] sm:$0xff] %v7917_v8  ;;  %6013 = vmatprep.subr.mxu0 %v7867_v54  ;;  %6061 = vmatprep.subr.mxu1 %v3299_v50  ;;  %v7946_v14 = vand.u32 4294901760, %v7926_v47 }
 0x145   : > { %5928 = vmatprep.mubr.f32.mxu0 %v6914_v56  ;;  %5978 = vmatprep.mubr.f32.mxu1 %v6840_v39 }
 0x146   : > { %6014 = vmatpush3.msra.mxu0 %v7867_v54  ;;  %6062 = vmatpush3.msra.mxu1 %v3299_v50  ;;  %v3326_v50 = vsub.f32 %v7900_v32, %v7923_v30  ;;  %v3320_v54 = vand.u32 4294901760, %v3319_v17  ;;  %v9568_v30 = vld [vmem:[#allocation32_spill] sm:$0xff] }
 0x147   : > { %5929 = vmatmul.mubr.f32.gmra.mxu0 %v6925_v20  ;;  %5979 = vmatmul.mubr.f32.gmra.mxu1 %v6849_v59  ;;  %v7938_v24 = vpop.f32.mrf.mxu0  ;;  %v7940_v61 = vpop.f32.mrf.mxu1 }
 0x148   : > { %9565 = vst [vmem:[#allocation114_spill] sm:$0xff] %v7938_v24  ;;  %6015 = vmatprep.subr.mxu0 %v7895_v27  ;;  %6063 = vmatprep.subr.mxu1 %v3306_v57  ;;  %v7955_v24 = vand.u32 4294901760, %v7934_v3 }
 0x149   : > { %6016 = vmatpush3.msra.mxu0 %v7895_v27  ;;  %6064 = vmatpush3.msra.mxu1 %v3306_v57  ;;  %v7949_v52 = vpop.f32.mrf.mxu0  ;;  %v7951_v31 = vpop.f32.mrf.mxu1  ;;  %v3327_v27 = vand.u32 4294901760, %v3326_v50  ;;  %v3333_v57 = vsub.f32 %v7926_v47, %v7946_v14 }
 0x14a   : > { %9566 = vst [vmem:[#allocation115_spill] sm:$0xff] %v7949_v52  ;;  %6017 = vmatprep.subr.mxu0 %v7909_v44  ;;  %6065 = vmatprep.subr.mxu1 %v3313_v22  ;;  %9567 = vst [vmem:[#allocation116_spill] sm:$0xff] %v7955_v24  ;;  %v9569_v52 = vld [vmem:[#allocation35_spill] sm:$0xff] }
 0x14b   : > { %5981 = vmatprep.mubr.f32.mxu1 %v6876_v6  ;;  %6018 = vmatpush3.msra.mxu0 %v7909_v44  ;;  %v3340_v44 = vsub.f32 %v7934_v3, %v7955_v24  ;;  %v3334_v50 = vand.u32 4294901760, %v3333_v57 }
 0x14c   : > { %6019 = vmatprep.mubr.f32.mxu0 %v9568_v30  ;;  %6066 = vmatpush3.msra.mxu1 %v3313_v22 }
 0x14d   : > { %5982 = vmatmul.mubr.f32.gmra.mxu1 %v6887_v36  ;;  %6020 = vmatmul.mubr.f32.vlgmr.msra.gmra.mxu0 %v9569_v52  ;;  %v7964_v8 = vpop.f32.mrf.mxu1  ;;  %v5573_v17 = vpop.f32.mrf.mxu0  ;;  %v3341_v52 = vand.u32 4294901760, %v3340_v44 }
 0x14e   : > { %6067 = vmatprep.subr.mxu1 %v3320_v54  ;;  %6099 = vmatprep.subr.mxu0 %v7630_v11 }
 0x14f   : > { %6068 = vmatpush3.msra.mxu1 %v3320_v54  ;;  %6100 = vmatpush3.msra.mxu0 %v7630_v11  ;;  %v7970_v30 = vpop.f32.mrf.mxu1  ;;  %v1369_v22 = vpop.f32.mrf.mxu0  ;;  %v749_v54 = vadd.f32 %v7512_v55, %v7480_v51 }
 0x150   : > { %6069 = vmatprep.subr.mxu1 %v3327_v27  ;;  %6101 = vmatprep.subr.mxu0 %v7642_v35 }
 0x151   : > { %5984 = vmatprep.mubr.f32.mxu1 %v6914_v56  ;;  %6022 = vmatprep.mubr.f32.mxu0 %v9449_v63  ;;  %v743_v63 = vadd.f32 %v7520_v21, %v7486_v5  ;;  %v761_v5 = vadd.f32 %v7532_v10, %v7496_v53 }
 0x152   : > { %6070 = vmatpush3.msra.mxu1 %v3327_v27  ;;  %6102 = vmatpush3.msra.mxu0 %v7642_v35  ;;  %v944_v27 = vadd.f32 %v7646_v62, %v749_v54  ;;  %v9576_v54 = vld [vmem:[#allocation79_spill] sm:$0xff] }
 0x153   : > { %5985 = vmatmul.mubr.f32.gmra.mxu1 %v6925_v20  ;;  %6023 = vmatmul.mubr.f32.gmra.mxu0 %v9450_v41  ;;  %v7980_v11 = vpop.f32.mrf.mxu1  ;;  %v5576_v24 = vpop.f32.mrf.mxu0  ;;  %v937_v41 = vadd.f32 %v7664_v46, %v743_v63  ;;  %v958_v10 = vadd.f32 %v7690_v23, %v761_v5  ;;  %v773_v23 = vadd.f32 %v7550_v13, %v7510_v38 }
 0x154   : > { %6071 = vmatprep.subr.mxu1 %v3334_v50  ;;  %6103 = vmatprep.subr.mxu0 %v7672_v19  ;;  %v1139_v55 = vadd.f32 %v7738_v60, %v944_v27  ;;  %v755_v60 = vadd.f32 %v7540_v33, %v7502_v28 }
 0x155   : > { %6072 = vmatpush3.msra.mxu1 %v3334_v50  ;;  %6104 = vmatpush3.msra.mxu0 %v7672_v19  ;;  %v7987_v35 = vpop.f32.mrf.mxu1  ;;  %v1381_v51 = vpop.f32.mrf.mxu0  ;;  %v1131_v21 = vadd.f32 %v7754_v12, %v937_v41  ;;  %v1155_v19 = vadd.f32 %v7780_v26, %v958_v10  ;;  %v9572_v26 = vld [vmem:[#allocation19_spill] sm:$0xff]  ;;  %v972_v13 = vadd.f32 %v9576_v54, %v773_v23  ;;  %v9577_v41 = vld [vmem:[#allocation6_spill] sm:$0xff]  ;;  %v9583_v10 = vld [vmem:[#allocation44_spill] sm:$0xff] }
 0x156   : > { %6073 = vmatprep.subr.mxu1 %v3341_v52  ;;  %6105 = vmatprep.subr.mxu0 %v7686_v40  ;;  %v1376_v62 = vadd.f32 %v5573_v17, %v1139_v55  ;;  %v951_v12 = vadd.f32 %v7710_v48, %v755_v60  ;;  %v9571_v48 = vld [vmem:[#allocation56_spill] sm:$0xff]  ;;  %v9578_v55 = vld [vmem:[#allocation82_spill] sm:$0xff]  ;;  %v9587_v23 = vld [vmem:[#allocation11_spill] sm:$0xff] }
 0x157   : > { %6025 = vmatprep.mubr.f32.mxu0 %v9451_v9  ;;  %6074 = vmatpush3.msra.mxu1 %v3341_v52  ;;  %v1388_v57 = vadd.f32 %v5576_v24, %v1155_v19  ;;  %v9573_v17 = vld [vmem:[#allocation36_spill] sm:$0xff]  ;;  %v9585_v19 = vld [vmem:[#allocation62_spill] sm:$0xff] }
 0x158   : > { %6075 = vmatprep.mubr.f32.mxu1 %v9427_v45  ;;  %6106 = vmatpush3.msra.mxu0 %v7686_v40 }
 0x159   : > { %6026 = vmatmul.mubr.f32.gmra.mxu0 %v9452_v42  ;;  %6076 = vmatmul.mubr.f32.vlgmr.msra.gmra.mxu1 %v9428_v16  ;;  %v5579_v46 = vpop.f32.mrf.mxu0  ;;  %v5629_v9 = vpop.f32.mrf.mxu1  ;;  %v1370_v42 = vadd.f32 %v1369_v22, %v1131_v21  ;;  %v9574_v22 = vld [vmem:[#allocation41_spill] sm:$0xff] }
 0x15a   : > { %6107 = vmatprep.subr.mxu0 %v7718_v0  ;;  %6155 = vmatprep.subr.mxu1 %v7608_v15  ;;  %v1553_v53 = vadd.f32 %v5629_v9, %v1376_v62  ;;  %v9579_v21 = vld [vmem:[#allocation93_spill] sm:$0xff]  ;;  %v9580_v9 = vld [vmem:[#allocation59_spill] sm:$0xff] }
 0x15b   : > { %6108 = vmatpush3.msra.mxu0 %v7718_v0  ;;  %6156 = vmatpush3.msra.mxu1 %v7608_v15  ;;  %v1393_v28 = vpop.f32.mrf.mxu0  ;;  %v1546_v33 = vpop.f32.mrf.mxu1  ;;  %v9570_v0 = vld [vmem:[#allocation89_spill] sm:$0xff]  ;;  %v1171_v62 = vadd.f32 %v9579_v21, %v972_v13  ;;  %v9591_v13 = vld [vmem:[#allocation23_spill] sm:$0xff] }
 0x15c   : > { %6109 = vmatprep.subr.mxu0 %v7732_v29  ;;  %6157 = vmatprep.subr.mxu1 %v7614_v25  ;;  %1641 = vst [vmem:[%s8006_s26 + $0x8] sm:$0xff] %v1553_v53  ;;  %v1547_v40 = vadd.f32 %v1546_v33, %v1370_v42  ;;  %v1147_v44 = vadd.f32 %v9570_v0, %v951_v12  ;;  %v9584_v53 = vld [vmem:[#allocation97_spill] sm:$0xff]  ;;  %v9588_v0 = vld [vmem:[#allocation50_spill] sm:$0xff] }
 0x15d   : > { %6028 = vmatprep.mubr.f32.mxu0 %v9453_v1  ;;  %6078 = vmatprep.mubr.f32.mxu1 %v9431_v58  ;;  %v767_v1 = vadd.f32 %v9574_v22, %v9573_v17  ;;  %v1400_v12 = vadd.f32 %v5579_v46, %v1171_v62  ;;  %v9590_v17 = vld [vmem:[#allocation85_spill] sm:$0xff] }
 0x15e   : > { %6110 = vmatpush3.msra.mxu0 %v7732_v29  ;;  %6158 = vmatpush3.msra.mxu1 %v7614_v25  ;;  %1640 = vst [vmem:[%s8006_s26] sm:$0xff] %v1547_v40  ;;  %v9575_v29 = vld [vmem:[#allocation5_spill] sm:$0xff]  ;;  %v1382_v38 = vadd.f32 %v1381_v51, %v1147_v44  ;;  %v9581_v51 = vld [vmem:[#allocation24_spill] sm:$0xff]  ;;  %v9586_v40 = vld [vmem:[#allocation27_spill] sm:$0xff]  ;;  %v779_v44 = vadd.f32 %v9588_v0, %v9587_v23 }
 0x15f   : > { %6029 = vmatmul.mubr.f32.gmra.mxu0 %v9571_v48  ;;  %6079 = vmatmul.mubr.f32.gmra.mxu1 %v9572_v26  ;;  %v5582_v50 = vpop.f32.mrf.mxu0  ;;  %v5632_v52 = vpop.f32.mrf.mxu1  ;;  %v965_v5 = vadd.f32 %v9578_v55, %v767_v1  ;;  %v9594_v21 = vld [vmem:[#allocation65_spill] sm:$0xff]  ;;  %v9603_v23 = vld [vmem:[#allocation92_spill] sm:$0xff] }
 0x160   : > { %6111 = vmatprep.subr.mxu0 %v7761_v18  ;;  %6159 = vmatprep.subr.mxu1 %v9575_v29  ;;  %v1565_v63 = vadd.f32 %v5632_v52, %v1388_v57 }
 0x161   : > { %6112 = vmatpush3.msra.mxu0 %v7761_v18  ;;  %6160 = vmatpush3.msra.mxu1 %v9575_v29  ;;  %v1405_v24 = vpop.f32.mrf.mxu0  ;;  %v1558_v27 = vpop.f32.mrf.mxu1  ;;  %v9582_v18 = vld [vmem:[#allocation9_spill] sm:$0xff]  ;;  %v1163_v33 = vadd.f32 %v9584_v53, %v965_v5 }
 0x162   : > { %6113 = vmatprep.subr.mxu0 %v7774_v4  ;;  %6161 = vmatprep.subr.mxu1 %v9577_v41  ;;  %1643 = vst [vmem:[%s8006_s26 + $0x18] sm:$0xff] %v1565_v63  ;;  %v1559_v60 = vadd.f32 %v1558_v27, %v1382_v38  ;;  %v785_v42 = vadd.f32 %v9583_v10, %v9582_v18  ;;  %v9592_v38 = vld [vmem:[#allocation88_spill] sm:$0xff]  ;;  %v9593_v27 = vld [vmem:[#allocation101_spill] sm:$0xff]  ;;  %v9598_v18 = vld [vmem:[#allocation38_spill] sm:$0xff] }
 0x163   : > { %6031 = vmatprep.mubr.f32.mxu0 %v9580_v9  ;;  %6081 = vmatprep.mubr.f32.mxu1 %v9581_v51  ;;  %v1394_v1 = vadd.f32 %v1393_v28, %v1163_v33  ;;  %v979_v63 = vadd.f32 %v9592_v38, %v779_v44  ;;  %v9595_v28 = vld [vmem:[#allocation34_spill] sm:$0xff]  ;;  %v9597_v9 = vld [vmem:[#allocation68_spill] sm:$0xff] }
 0x164   : > { %6114 = vmatpush3.msra.mxu0 %v7774_v4  ;;  %6162 = vmatpush3.msra.mxu1 %v9577_v41  ;;  %1642 = vst [vmem:[%s8006_s26 + $0x10] sm:$0xff] %v1559_v60  ;;  %v9589_v4 = vld [vmem:[#allocation18_spill] sm:$0xff]  ;;  %v986_v22 = vadd.f32 %v9590_v17, %v785_v42  ;;  %v9599_v10 = vld [vmem:[#allocation16_spill] sm:$0xff] }
 0x165   : > { %6032 = vmatmul.mubr.f32.gmra.mxu0 %v9585_v19  ;;  %6082 = vmatmul.mubr.f32.gmra.mxu1 %v9586_v40  ;;  %v5585_v57 = vpop.f32.mrf.mxu0  ;;  %v5635_v48 = vpop.f32.mrf.mxu1  ;;  %v9600_v42 = vld [vmem:[#allocation2_spill] sm:$0xff] }
 0x166   : > { %6115 = vmatprep.subr.mxu0 %v7803_v34  ;;  %6163 = vmatprep.subr.mxu1 %v9589_v4  ;;  %v1577_v52 = vadd.f32 %v5635_v48, %v1400_v12  ;;  %v1187_v55 = vadd.f32 %v9593_v27, %v986_v22  ;;  %v791_v53 = vadd.f32 %v9600_v42, %v9599_v10  ;;  %v9601_v19 = vld [vmem:[#allocation78_spill] sm:$0xff]  ;;  %v9604_v22 = vld [vmem:[#allocation80_spill] sm:$0xff]  ;;  %v9607_v27 = vld [vmem:[#allocation71_spill] sm:$0xff] }
 0x167   : > { %6116 = vmatpush3.msra.mxu0 %v7803_v34  ;;  %6164 = vmatpush3.msra.mxu1 %v9589_v4  ;;  %v1417_v46 = vpop.f32.mrf.mxu0  ;;  %v1570_v54 = vpop.f32.mrf.mxu1  ;;  %v9596_v34 = vld [vmem:[#allocation105_spill] sm:$0xff]  ;;  %v9613_v42 = vld [vmem:[#allocation84_spill] sm:$0xff] }
 0x168   : > { %6117 = vmatprep.subr.mxu0 %v7816_v49  ;;  %6165 = vmatprep.subr.mxu1 %v9591_v13  ;;  %1645 = vst [vmem:[%s8006_s26 + $0x28] sm:$0xff] %v1577_v52  ;;  %v1571_v5 = vadd.f32 %v1570_v54, %v1394_v1  ;;  %v1179_v62 = vadd.f32 %v9596_v34, %v979_v63  ;;  %v9605_v1 = vld [vmem:[#allocation96_spill] sm:$0xff]  ;;  %v9606_v54 = vld [vmem:[#allocation109_spill] sm:$0xff]  ;;  %v9611_v34 = vld [vmem:[#allocation47_spill] sm:$0xff] }
 0x169   : > { %6034 = vmatprep.mubr.f32.mxu0 %v9594_v21  ;;  %6084 = vmatprep.mubr.f32.mxu1 %v9595_v28  ;;  %v1412_v60 = vadd.f32 %v5582_v50, %v1187_v55  ;;  %v993_v52 = vadd.f32 %v9605_v1, %v791_v53  ;;  %v9610_v21 = vld [vmem:[#allocation46_spill] sm:$0xff]  ;;  %v9615_v53 = vld [vmem:[#allocation100_spill] sm:$0xff] }
 0x16a   : > { %6118 = vmatpush3.msra.mxu0 %v7816_v49  ;;  %6166 = vmatpush3.msra.mxu1 %v9591_v13  ;;  %1644 = vst [vmem:[%s8006_s26 + $0x20] sm:$0xff] %v1571_v5  ;;  %v9602_v49 = vld [vmem:[#allocation53_spill] sm:$0xff]  ;;  %v1406_v44 = vadd.f32 %v1405_v24, %v1179_v62  ;;  %v9608_v24 = vld [vmem:[#allocation43_spill] sm:$0xff]  ;;  %v9612_v62 = vld [vmem:[#allocation4_spill] sm:$0xff] }
 0x16b   : > { %6035 = vmatmul.mubr.f32.gmra.mxu0 %v9597_v9  ;;  %6085 = vmatmul.mubr.f32.gmra.mxu1 %v9598_v18  ;;  %v5588_v33 = vpop.f32.mrf.mxu0  ;;  %v5638_v12 = vpop.f32.mrf.mxu1  ;;  %v1000_v0 = vadd.f32 %v9603_v23, %v9602_v49  ;;  %v9609_v5 = vld [vmem:[#allocation73_spill] sm:$0xff] }
 0x16c   : > { %6119 = vmatprep.subr.mxu0 %v7845_v2  ;;  %6167 = vmatprep.subr.mxu1 %v9601_v19  ;;  %v1589_v50 = vadd.f32 %v5638_v12, %v1412_v60  ;;  %v803_v60 = vadd.f32 %v9612_v62, %v9611_v34 }
 0x16d   : > { %6120 = vmatpush3.msra.mxu0 %v7845_v2  ;;  %6168 = vmatpush3.msra.mxu1 %v9601_v19  ;;  %v1429_v48 = vpop.f32.mrf.mxu0  ;;  %v1582_v17 = vpop.f32.mrf.mxu1  ;;  %v1203_v38 = vadd.f32 %v9606_v54, %v1000_v0  ;;  %v1195_v2 = vadd.f32 %v7919_v37, %v993_v52  ;;  %v9616_v0 = vld [vmem:[#allocation86_spill] sm:$0xff]  ;;  %v9619_v54 = vld [vmem:[#allocation75_spill] sm:$0xff] }
 0x16e   : > { %6121 = vmatprep.subr.mxu0 %v7858_v7  ;;  %6169 = vmatprep.subr.mxu1 %v9604_v22  ;;  %1647 = vst [vmem:[%s8006_s26 + $0x38] sm:$0xff] %v1589_v50  ;;  %v1583_v63 = vadd.f32 %v1582_v17, %v1406_v44  ;;  %v9617_v44 = vld [vmem:[#allocation104_spill] sm:$0xff]  ;;  %v9618_v52 = vld [vmem:[#allocation74_spill] sm:$0xff] }
 0x16f   : > { %6037 = vmatprep.mubr.f32.mxu0 %v9607_v27  ;;  %6087 = vmatprep.mubr.f32.mxu1 %v9608_v24  ;;  %v1424_v55 = vadd.f32 %v5585_v57, %v1203_v38  ;;  %v1418_v37 = vadd.f32 %v1417_v46, %v1195_v2  ;;  %v1007_v50 = vadd.f32 %v9617_v44, %v803_v60  ;;  %v9620_v38 = vld [vmem:[#allocation14_spill] sm:$0xff]  ;;  %v9629_v44 = vld [vmem:[#allocation3_spill] sm:$0xff] }
 0x170   : > { %6122 = vmatpush3.msra.mxu0 %v7858_v7  ;;  %6170 = vmatpush3.msra.mxu1 %v9604_v22  ;;  %1646 = vst [vmem:[%s8006_s26 + $0x30] sm:$0xff] %v1583_v63  ;;  %v9614_v7 = vld [vmem:[#allocation17_spill] sm:$0xff] }
 0x171   : > { %6038 = vmatmul.mubr.f32.gmra.mxu0 %v9609_v5  ;;  %6088 = vmatmul.mubr.f32.gmra.mxu1 %v9610_v21  ;;  %v5591_v9 = vpop.f32.mrf.mxu0  ;;  %v5641_v10 = vpop.f32.mrf.mxu1  ;;  %v1014_v12 = vadd.f32 %v9615_v53, %v9614_v7  ;;  %v9624_v5 = vld [vmem:[#allocation108_spill] sm:$0xff] }
 0x172   : > { %6123 = vmatprep.subr.mxu0 %v7887_v43  ;;  %6171 = vmatprep.subr.mxu1 %v9613_v42  ;;  %v1601_v57 = vadd.f32 %v5641_v10, %v1424_v55  ;;  %v9622_v55 = vld [vmem:[#allocation91_spill] sm:$0xff]  ;;  %v9625_v10 = vld [vmem:[#allocation94_spill] sm:$0xff]  ;;  %v9626_v7 = vld [vmem:[#allocation112_spill] sm:$0xff] }
 0x173   : > { %6124 = vmatpush3.msra.mxu0 %v7887_v43  ;;  %6172 = vmatpush3.msra.mxu1 %v9613_v42  ;;  %v1441_v49 = vpop.f32.mrf.mxu0  ;;  %v1594_v23 = vpop.f32.mrf.mxu1  ;;  %v1219_v17 = vadd.f32 %v7940_v61, %v1014_v12  ;;  %v1211_v43 = vadd.f32 %v7951_v31, %v1007_v50  ;;  %v9621_v61 = vld [vmem:[#allocation10_spill] sm:$0xff] }
 0x174   : > { %6125 = vmatprep.subr.mxu0 %v7900_v32  ;;  %6173 = vmatprep.subr.mxu1 %v9616_v0  ;;  %1649 = vst [vmem:[%s8006_s26 + $0x48] sm:$0xff] %v1601_v57  ;;  %v1595_v1 = vadd.f32 %v1594_v23, %v1418_v37  ;;  %v815_v63 = vadd.f32 %v9621_v61, %v9620_v38  ;;  %v9628_v23 = vld [vmem:[#allocation15_spill] sm:$0xff] }
 0x175   : > { %6040 = vmatprep.mubr.f32.mxu0 %v9618_v52  ;;  %6090 = vmatprep.mubr.f32.mxu1 %v6840_v39  ;;  %v1436_v46 = vadd.f32 %v5588_v33, %v1219_v17  ;;  %v1430_v31 = vadd.f32 %v1429_v48, %v1211_v43  ;;  %v9632_v52 = vld [vmem:[#allocation7_spill] sm:$0xff]  ;;  %v9633_v43 = vld [vmem:[#allocation29_spill] sm:$0xff] }
 0x176   : > { %6126 = vmatpush3.msra.mxu0 %v7900_v32  ;;  %6174 = vmatpush3.msra.mxu1 %v9616_v0  ;;  %1648 = vst [vmem:[%s8006_s26 + $0x40] sm:$0xff] %v1595_v1  ;;  %v9623_v32 = vld [vmem:[#allocation8_spill] sm:$0xff]  ;;  %v1021_v53 = vadd.f32 %v9626_v7, %v815_v63  ;;  %v9635_v63 = vld [vmem:[#allocation102_spill] sm:$0xff]  ;;  %v9639_v7 = vld [vmem:[#allocation25_spill] sm:$0xff] }
 0x177   : > { %6041 = vmatmul.mubr.f32.gmra.mxu0 %v9619_v54  ;;  %6091 = vmatmul.mubr.f32.gmra.mxu1 %v6849_v59  ;;  %v5594_v27 = vpop.f32.mrf.mxu0  ;;  %v5644_v2 = vpop.f32.mrf.mxu1  ;;  %v1028_v34 = vadd.f32 %v9624_v5, %v9623_v32  ;;  %v9637_v32 = vld [vmem:[#allocation115_spill] sm:$0xff] }
 0x178   : > { %6127 = vmatprep.subr.mxu0 %v7926_v47  ;;  %6175 = vmatprep.subr.mxu1 %v9622_v55  ;;  %v1613_v33 = vadd.f32 %v5644_v2, %v1436_v46  ;;  %v1227_v48 = vadd.f32 %v7970_v30, %v1021_v53  ;;  %v9634_v46 = vld [vmem:[#allocation114_spill] sm:$0xff]  ;;  %v9636_v2 = vld [vmem:[#allocation12_spill] sm:$0xff] }
 0x179   : > { %6128 = vmatpush3.msra.mxu0 %v7926_v47  ;;  %6176 = vmatpush3.msra.mxu1 %v9622_v55  ;;  %v1453_v62 = vpop.f32.mrf.mxu0  ;;  %v1606_v60 = vpop.f32.mrf.mxu1  ;;  %v1235_v12 = vadd.f32 %v7964_v8, %v1028_v34  ;;  %v9627_v47 = vld [vmem:[#allocation13_spill] sm:$0xff]  ;;  %v9630_v8 = vld [vmem:[#allocation76_spill] sm:$0xff]  ;;  %v1042_v30 = vadd.f32 %v9634_v46, %v9633_v43 }
 0x17a   : > { %6129 = vmatprep.subr.mxu0 %v7934_v3  ;;  %6177 = vmatprep.subr.mxu1 %v9625_v10  ;;  %1651 = vst [vmem:[%s8006_s26 + $0x58] sm:$0xff] %v1613_v33  ;;  %v1607_v37 = vadd.f32 %v1606_v60, %v1430_v31  ;;  %v827_v50 = vadd.f32 %v9630_v8, %v9629_v44  ;;  %v9644_v8 = vld [vmem:[#allocation30_spill] sm:$0xff]  ;;  %v9648_v46 = vld [vmem:[#allocation81_spill] sm:$0xff] }
 0x17b   : > { %6093 = vmatprep.mubr.f32.mxu1 %v6876_v6  ;;  %6130 = vmatpush3.msra.mxu0 %v7934_v3  ;;  %v1448_v57 = vadd.f32 %v5591_v9, %v1235_v12  ;;  %v9631_v3 = vld [vmem:[#allocation99_spill] sm:$0xff]  ;;  %v1442_v9 = vadd.f32 %v1441_v49, %v1227_v48  ;;  %v1251_v34 = vadd.f32 %v7980_v11, %v1042_v30  ;;  %v9638_v49 = vld [vmem:[#allocation22_spill] sm:$0xff] }
 0x17c   : > { %6131 = vmatprep.mubr.f32.mxu0 %v9627_v47  ;;  %6178 = vmatpush3.msra.mxu1 %v9625_v10  ;;  %1650 = vst [vmem:[%s8006_s26 + $0x50] sm:$0xff] %v1607_v37  ;;  %v1035_v5 = vadd.f32 %v9637_v32, %v827_v50  ;;  %v9640_v12 = vld [vmem:[#allocation107_spill] sm:$0xff]  ;;  %v9641_v37 = vld [vmem:[#allocation26_spill] sm:$0xff]  ;;  %v9645_v50 = vld [vmem:[#allocation20_spill] sm:$0xff] }
 0x17d   : > { %6094 = vmatmul.mubr.f32.gmra.mxu1 %v6887_v36  ;;  %6132 = vmatmul.mubr.f32.vlgmr.msra.gmra.mxu0 %v9628_v23  ;;  %v5647_v17 = vpop.f32.mrf.mxu1  ;;  %v8135_v1 = vpop.f32.mrf.mxu0  ;;  %v1460_v60 = vadd.f32 %v5594_v27, %v1251_v34  ;;  %v9643_v23 = vld [vmem:[#allocation77_spill] sm:$0xff]  ;;  %v9652_v32 = vld [vmem:[#allocation42_spill] sm:$0xff] }
 0x17e   : > { %6179 = vmatprep.subr.mxu1 %v9631_v3  ;;  %6211 = vmatprep.subr.mxu0 %v9632_v52  ;;  %v1625_v54 = vadd.f32 %v5647_v17, %v1448_v57  ;;  %v1243_v33 = vadd.f32 %v7987_v35, %v1035_v5  ;;  %v9642_v57 = vld [vmem:[#allocation110_spill] sm:$0xff]  ;;  %v9647_v17 = vld [vmem:[#allocation21_spill] sm:$0xff]  ;;  %v9653_v5 = vld [vmem:[#allocation31_spill] sm:$0xff] }
 0x17f   : > { %6180 = vmatpush3.msra.mxu1 %v9631_v3  ;;  %6212 = vmatpush3.msra.mxu0 %v9632_v52  ;;  %v1618_v38 = vpop.f32.mrf.mxu1  ;;  %v8143_v61 = vpop.f32.mrf.mxu0 }
 0x180   : > { %6181 = vmatprep.subr.mxu1 %v9635_v63  ;;  %6213 = vmatprep.subr.mxu0 %v9636_v2  ;;  %1653 = vst [vmem:[%s8006_s26 + $0x68] sm:$0xff] %v1625_v54  ;;  %v1619_v31 = vadd.f32 %v1618_v38, %v1442_v9  ;;  %v1454_v47 = vadd.f32 %v1453_v62, %v1243_v33  ;;  %v9646_v62 = vld [vmem:[#allocation33_spill] sm:$0xff]  ;;  %v9649_v54 = vld [vmem:[#allocation83_spill] sm:$0xff]  ;;  %v9650_v38 = vld [vmem:[#allocation40_spill] sm:$0xff] }
 0x181   : > { %6096 = vmatprep.mubr.f32.mxu1 %v6914_v56  ;;  %6134 = vmatprep.mubr.f32.mxu0 %v9638_v49 }
 0x182   : > { %6182 = vmatpush3.msra.mxu1 %v9635_v63  ;;  %6214 = vmatpush3.msra.mxu0 %v9636_v2  ;;  %1652 = vst [vmem:[%s8006_s26 + $0x60] sm:$0xff] %v1619_v31  ;;  %v9651_v2 = vld [vmem:[#allocation28_spill] sm:$0xff]  ;;  %v9654_v31 = vld [vmem:[#allocation87_spill] sm:$0xff] }
 0x183   : > { %6097 = vmatmul.mubr.f32.gmra.mxu1 %v6925_v20  ;;  %6135 = vmatmul.mubr.f32.gmra.mxu0 %v9639_v7  ;;  %v5650_v11 = vpop.f32.mrf.mxu1  ;;  %v8158_v53 = vpop.f32.mrf.mxu0  ;;  %v9657_v7 = vld [vmem:[#allocation37_spill] sm:$0xff] }
 0x184   : > { %6183 = vmatprep.subr.mxu1 %v9640_v12  ;;  %6215 = vmatprep.subr.mxu0 %v9641_v37  ;;  %v1637_v48 = vadd.f32 %v5650_v11, %v1460_v60  ;;  %v9656_v60 = vld [vmem:[#allocation49_spill] sm:$0xff]  ;;  %v9658_v11 = vld [vmem:[#allocation51_spill] sm:$0xff] }
 0x185   : > { %6184 = vmatpush3.msra.mxu1 %v9640_v12  ;;  %6216 = vmatpush3.msra.mxu0 %v9641_v37  ;;  %v1630_v35 = vpop.f32.mrf.mxu1  ;;  %v8164_v27 = vpop.f32.mrf.mxu0  ;;  %v9659_v37 = vld [vmem:[#allocation39_spill] sm:$0xff] }
 0x186   : > { %6185 = vmatprep.subr.mxu1 %v9642_v57  ;;  %6217 = vmatprep.subr.mxu0 %v9643_v23  ;;  %1655 = vst [vmem:[%s8006_s26 + $0x78] sm:$0xff] %v1637_v48  ;;  %v1631_v44 = vadd.f32 %v1630_v35, %v1454_v47  ;;  %v9660_v48 = vld [vmem:[#allocation95_spill] sm:$0xff] }
 0x187   : > { %6137 = vmatprep.mubr.f32.mxu0 %v9644_v8  ;;  %6186 = vmatpush3.msra.mxu1 %v9642_v57  ;;  %v9663_v8 = vld [vmem:[#allocation45_spill] sm:$0xff] }
 0x188   : > { %6187 = vmatprep.mubr.f32.mxu1 %v9645_v50  ;;  %6218 = vmatpush3.msra.mxu0 %v9643_v23  ;;  %1654 = vst [vmem:[%s8006_s26 + $0x70] sm:$0xff] %v1631_v44  ;;  %v9661_v44 = vld [vmem:[#allocation98_spill] sm:$0xff]  ;;  %v9664_v50 = vld [vmem:[#allocation57_spill] sm:$0xff] }
 0x189   : > { %6138 = vmatmul.mubr.f32.gmra.mxu0 %v9646_v62  ;;  %6188 = vmatmul.mubr.f32.vlgmr.msra.gmra.mxu1 %v9647_v17  ;;  %v8176_v52 = vpop.f32.mrf.mxu0  ;;  %v8178_v43 = vpop.f32.mrf.mxu1  ;;  %v9665_v62 = vld [vmem:[#allocation48_spill] sm:$0xff] }
 0x18a   : > { %6219 = vmatprep.subr.mxu0 %v9648_v46  ;;  %6267 = vmatprep.subr.mxu1 %v7608_v15 }
 0x18b   : > { %6220 = vmatpush3.msra.mxu0 %v9648_v46  ;;  %6268 = vmatpush3.msra.mxu1 %v7608_v15  ;;  %v8184_v30 = vpop.f32.mrf.mxu0  ;;  %v8186_v9 = vpop.f32.mrf.mxu1  ;;  %v9666_v46 = vld [vmem:[#allocation103_spill] sm:$0xff] }
 0x18c   : > { %6221 = vmatprep.subr.mxu0 %v9649_v54  ;;  %6269 = vmatprep.subr.mxu1 %v7614_v25 }
 0x18d   : > { %6140 = vmatprep.mubr.f32.mxu0 %v9650_v38  ;;  %6190 = vmatprep.mubr.f32.mxu1 %v9651_v2  ;;  %v9667_v2 = vld [vmem:[#allocation106_spill] sm:$0xff] }
 0x18e   : > { %6222 = vmatpush3.msra.mxu0 %v9649_v54  ;;  %6270 = vmatpush3.msra.mxu1 %v7614_v25  ;;  %v9655_v25 = vld [vmem:[#allocation90_spill] sm:$0xff] }
 0x18f   : > { %6141 = vmatmul.mubr.f32.gmra.mxu0 %v9652_v32  ;;  %6191 = vmatmul.mubr.f32.gmra.mxu1 %v9653_v5  ;;  %v8196_v15 = vpop.f32.mrf.mxu0  ;;  %v8198_v34 = vpop.f32.mrf.mxu1  ;;  %v9669_v32 = vld [vmem:[#allocation52_spill] sm:$0xff]  ;;  %v9670_v5 = vld [vmem:[#allocation63_spill] sm:$0xff] }
 0x190   : > { %6223 = vmatprep.subr.mxu0 %v9654_v31  ;;  %6271 = vmatprep.subr.mxu1 %v9575_v29 }
 0x191   : > { %6224 = vmatpush3.msra.mxu0 %v9654_v31  ;;  %6272 = vmatpush3.msra.mxu1 %v9575_v29  ;;  %v8204_v49 = vpop.f32.mrf.mxu0  ;;  %v8206_v33 = vpop.f32.mrf.mxu1 }
 0x192   : > { %6225 = vmatprep.subr.mxu0 %v9655_v25  ;;  %6273 = vmatprep.subr.mxu1 %v9577_v41 }
 0x193   : > { %6143 = vmatprep.mubr.f32.mxu0 %v9656_v60  ;;  %6193 = vmatprep.mubr.f32.mxu1 %v9657_v7  ;;  %v9672_v60 = vld [vmem:[#allocation111_spill] sm:$0xff] }
 0x194   : > { %6226 = vmatpush3.msra.mxu0 %v9655_v25  ;;  %6274 = vmatpush3.msra.mxu1 %v9577_v41  ;;  %v9662_v41 = vld [vmem:[#allocation55_spill] sm:$0xff] }
 0x195   : > { %6144 = vmatmul.mubr.f32.gmra.mxu0 %v9658_v11  ;;  %6194 = vmatmul.mubr.f32.gmra.mxu1 %v9659_v37  ;;  %v5697_v29 = vpop.f32.mrf.mxu0  ;;  %v8216_v47 = vpop.f32.mrf.mxu1  ;;  %v8255_v11 = vld [vmem:[%s6577_s30 + $0x10] sm:$0xff]  ;;  %v8260_v37 = vld [vmem:[%s6577_s30] sm:$0xff] }
 0x196   : > { %6227 = vmatprep.subr.mxu0 %v9660_v48  ;;  %6275 = vmatprep.subr.mxu1 %v9589_v4  ;;  %9673 = vst [vmem:[#allocation32_spill] sm:$0xff] %v8255_v11  ;;  %9674 = vst [vmem:[#allocation35_spill] sm:$0xff] %v8260_v37 }
 0x197   : > { %6228 = vmatpush3.msra.mxu0 %v9660_v48  ;;  %6276 = vmatpush3.msra.mxu1 %v9589_v4  ;;  %v1839_v35 = vpop.f32.mrf.mxu0  ;;  %v8222_v23 = vpop.f32.mrf.mxu1  ;;  %v4292_v48 = vmul.f32 %v8260_v37, %v8260_v37 }
 0x198   : > { %6229 = vmatprep.subr.mxu0 %v9661_v44  ;;  %6277 = vmatprep.subr.mxu1 %v9591_v13 }
 0x199   : > { %6146 = vmatprep.mubr.f32.mxu0 %v9662_v41  ;;  %6196 = vmatprep.mubr.f32.mxu1 %v9663_v8  ;;  %v9675_v8 = vld [vmem:[#allocation113_spill] sm:$0xff] }
 0x19a   : > { %6230 = vmatpush3.msra.mxu0 %v9661_v44  ;;  %6278 = vmatpush3.msra.mxu1 %v9591_v13  ;;  %v9668_v13 = vld [vmem:[#allocation61_spill] sm:$0xff] }
 0x19b   : > { %6147 = vmatmul.mubr.f32.gmra.mxu0 %v9664_v50  ;;  %6197 = vmatmul.mubr.f32.gmra.mxu1 %v9665_v62  ;;  %v5700_v4 = vpop.f32.mrf.mxu0  ;;  %v8232_v17 = vpop.f32.mrf.mxu1  ;;  %v9676_v50 = vld [vmem:[#allocation67_spill] sm:$0xff] }
 0x19c   : > { %6231 = vmatprep.subr.mxu0 %v9666_v46  ;;  %6279 = vmatprep.subr.mxu1 %v9601_v19 }
 0x19d   : > { %6232 = vmatpush3.msra.mxu0 %v9666_v46  ;;  %6280 = vmatpush3.msra.mxu1 %v9601_v19  ;;  %v1859_v54 = vpop.f32.mrf.mxu0  ;;  %v8238_v38 = vpop.f32.mrf.mxu1  ;;  %v9671_v19 = vld [vmem:[#allocation54_spill] sm:$0xff] }
 0x19e   : > { %6233 = vmatprep.subr.mxu0 %v9667_v2  ;;  %6281 = vmatprep.subr.mxu1 %v9604_v22 }
 0x19f   : > { %6149 = vmatprep.mubr.f32.mxu0 %v9668_v13  ;;  %6199 = vmatprep.mubr.f32.mxu1 %v9669_v32  ;;  %v9679_v13 = vld [vmem:[#allocation60_spill] sm:$0xff] }
 0x1a0   : > { %6234 = vmatpush3.msra.mxu0 %v9667_v2  ;;  %6282 = vmatpush3.msra.mxu1 %v9604_v22  ;;  %v4294_v22 = vmul.f32 %v8255_v11, %v8255_v11  ;;  %v9678_v2 = vld [vmem:[#allocation69_spill] sm:$0xff] }
 0x1a1   : > { %6150 = vmatmul.mubr.f32.gmra.mxu0 %v9670_v5  ;;  %6200 = vmatmul.mubr.f32.gmra.mxu1 %v9671_v19  ;;  %v5703_v31 = vpop.f32.mrf.mxu0  ;;  %v5753_v25 = vpop.f32.mrf.mxu1 }
 0x1a2   : > { %6235 = vmatprep.subr.mxu0 %v9672_v60  ;;  %6283 = vmatprep.subr.mxu1 %v9613_v42  ;;  %v8250_v7 = vadd.f32 %v5753_v25, %v5697_v29  ;;  %v8286_v25 = vld [vmem:[%s6577_s30 + $0x8] sm:$0xff] }
 0x1a3   : > { %6236 = vmatpush3.msra.mxu0 %v9672_v60  ;;  %6284 = vmatpush3.msra.mxu1 %v9613_v42  ;;  %v1879_v44 = vpop.f32.mrf.mxu0  ;;  %v2108_v41 = vpop.f32.mrf.mxu1  ;;  %v9677_v42 = vld [vmem:[#allocation58_spill] sm:$0xff]  ;;  %9681 = vst [vmem:[#allocation56_spill] sm:$0xff] %v8286_v25 }
 0x1a4   : > { %6237 = vmatprep.subr.mxu0 %v9675_v8  ;;  %6285 = vmatprep.subr.mxu1 %v9616_v0  ;;  %v8266_v29 = vadd.f32 %v2108_v41, %v1839_v35 }
 0x1a5   : > { %6152 = vmatprep.mubr.f32.mxu0 %v9676_v50  ;;  %6202 = vmatprep.mubr.f32.mxu1 %v9677_v42  ;;  %v9685_v50 = vld [vmem:[#allocation66_spill] sm:$0xff] }
 0x1a6   : > { %6238 = vmatpush3.msra.mxu0 %v9675_v8  ;;  %6286 = vmatpush3.msra.mxu1 %v9616_v0  ;;  %v8281_v0 = vld [vmem:[%s6577_s30 + $0x18] sm:$0xff]  ;;  %v8310_v42 = vld [vmem:[%s6577_s30 + $0x20] sm:$0xff] }
 0x1a7   : > { %4312 = vadd.xlane.f32.xlu1 %v4294_v22  ;;  %4308 = vadd.xlane.f32.xlu0 %v4292_v48  ;;  %v5706_v62 = vpop.f32.mrf.mxu0  ;;  %v5756_v46 = vpop.f32.mrf.mxu1  ;;  %9680 = vst [vmem:[#allocation89_spill] sm:$0xff] %v8281_v0  ;;  %v4295_v19 = vmul.f32 %v8281_v0, %v8281_v0  ;;  %v9682_v22 = vld [vmem:[#allocation116_spill] sm:$0xff]  ;;  %9686 = vst [vmem:[#allocation36_spill] sm:$0xff] %v8310_v42 }
 0x1a8   : > { %6153 = vmatmul.mubr.f32.gmra.mxu0 %v9678_v2  ;;  %6203 = vmatmul.mubr.f32.gmra.mxu1 %v9679_v13  ;;  %v8274_v35 = vadd.f32 %v5756_v46, %v5700_v4  ;;  %v4293_v4 = vmul.f32 %v8286_v25, %v8286_v25  ;;  %v9687_v13 = vld [vmem:[#allocation70_spill] sm:$0xff] }
 0x1a9   : > { %6239 = vmatprep.subr.mxu0 %v7946_v14  ;;  %6287 = vmatprep.subr.mxu1 %v9622_v55  ;;  %v1899_v32 = vpop.f32.mrf.mxu0  ;;  %v2120_v5 = vpop.f32.mrf.mxu1 }
 0x1aa   : > { %6240 = vmatpush3.msra.mxu0 %v7946_v14  ;;  %6288 = vmatpush3.msra.mxu1 %v9622_v55  ;;  %v8290_v60 = vadd.f32 %v2120_v5, %v1859_v54  ;;  %v9683_v14 = vld [vmem:[#allocation64_spill] sm:$0xff]  ;;  %v8301_v54 = vld [vmem:[%s6577_s30 + $0x28] sm:$0xff]  ;;  %v8325_v5 = vld [vmem:[%s6577_s30 + $0x38] sm:$0xff] }
 0x1ab   : > { %6241 = vmatprep.subr.mxu0 %v9682_v22  ;;  %6289 = vmatprep.subr.mxu1 %v9625_v10  ;;  %9684 = vst [vmem:[#allocation19_spill] sm:$0xff] %v8301_v54  ;;  %v4297_v41 = vmul.f32 %v8301_v54, %v8301_v54  ;;  %9688 = vst [vmem:[#allocation41_spill] sm:$0xff] %v8325_v5  ;;  %v2061_v54 = vadd.f32 %v8186_v9, %v8143_v61 }
 0x1ac   : > { %6205 = vmatprep.mubr.f32.mxu1 %v9683_v14  ;;  %6242 = vmatpush3.msra.mxu0 %v9682_v22  ;;  %v2073_v9 = vadd.f32 %v8206_v33, %v8164_v27 }
 0x1ad   : > { %6243 = vmatprep.mubr.f32.mxu0 %v9427_v45  ;;  %6290 = vmatpush3.msra.mxu1 %v9625_v10  ;;  %v5759_v55 = vpop.f32.mrf.mxu1  ;;  %v8298_v48 = vpop.f32.mrf.mxu0  ;;  %v4296_v10 = vmul.f32 %v8310_v42, %v8310_v42 }
 0x1ae   : > { %4314 = vadd.xlane.f32.xlu1 %v4295_v19  ;;  %4310 = vadd.xlane.f32.xlu0 %v4293_v4  ;;  %v8305_v8 = vadd.f32 %v5759_v55, %v5703_v31  ;;  %v4299_v19 = vmul.f32 %v8325_v5, %v8325_v5  ;;  %v2067_v5 = vadd.f32 %v8178_v43, %v8135_v1 }
 0x1af   : > { %6206 = vmatmul.mubr.f32.gmra.mxu1 %v9685_v50  ;;  %6244 = vmatmul.mubr.f32.vlgmr.msra.gmra.mxu0 %v9428_v16  ;;  %v2132_v46 = vpop.f32.mrf.mxu1  ;;  %v8314_v2 = vpop.f32.mrf.mxu0 }
 0x1b0   : > { %6291 = vmatprep.subr.mxu1 %v9631_v3  ;;  %6208 = vmatprep.mubr.f32.mxu1 %v9687_v13  ;;  %v8318_v31 = vadd.f32 %v2132_v46, %v1879_v44  ;;  %v9689_v44 = vld [vmem:[#allocation72_spill] sm:$0xff]  ;;  %v8356_v46 = vld [vmem:[%s6577_s30 + $0x40] sm:$0xff]  ;;  %v2262_v25 = vadd.f32 %v8298_v48, %v2067_v5  ;;  %v2255_v11 = vadd.f32 %v8314_v2, %v2061_v54 }
 0x1b1   : > { %6292 = vmatpush3.msra.mxu1 %v9631_v3  ;;  %6246 = vmatprep.mubr.f32.mxu0 %v9431_v58  ;;  %v8334_v3 = vld [vmem:[%s6577_s30 + $0x30] sm:$0xff]  ;;  %9693 = vst [vmem:[#allocation82_spill] sm:$0xff] %v8356_v46 }
 0x1b2   : > { %6293 = vmatprep.subr.mxu1 %v9635_v63  ;;  %4318 = vadd.xlane.f32.xlu1 %v4297_v41  ;;  %9690 = vst [vmem:[#allocation5_spill] sm:$0xff] %v8334_v3 }
 0x1b3   : > { %6294 = vmatpush3.msra.mxu1 %v9635_v63  ;;  %4316 = vadd.xlane.f32.xlu0 %v4296_v10  ;;  %v5762_v4 = vpop.f32.mrf.mxu1  ;;  %v8329_v22 = vpop.f32.mrf.mxu0  ;;  %v4298_v63 = vmul.f32 %v8334_v3, %v8334_v3  ;;  %v8350_v10 = vld [vmem:[%s6577_s30 + $0x48] sm:$0xff] }
 0x1b4   : > { %6209 = vmatmul.mubr.f32.gmra.mxu1 %v9689_v44  ;;  %6247 = vmatmul.mubr.f32.gmra.mxu0 %v9572_v26  ;;  %v8338_v14 = vadd.f32 %v5762_v4, %v5706_v62  ;;  %9692 = vst [vmem:[#allocation6_spill] sm:$0xff] %v8350_v10  ;;  %v4301_v62 = vmul.f32 %v8350_v10, %v8350_v10 }
 0x1b5   : > { %6295 = vmatprep.subr.mxu1 %v9640_v12  ;;  %6249 = vmatprep.mubr.f32.mxu0 %v9581_v51  ;;  %v2144_v55 = vpop.f32.mrf.mxu1  ;;  %v8342_v41 = vpop.f32.mrf.mxu0 }
 0x1b6   : > { %6296 = vmatpush3.msra.mxu1 %v9640_v12  ;;  %6299 = vmatprep.mubr.f32.mxu1 %v9427_v45  ;;  %v8346_v50 = vadd.f32 %v2144_v55, %v1899_v32  ;;  %v4300_v45 = vmul.f32 %v8356_v46, %v8356_v46 }
 0x1b7   : > { %6297 = vmatprep.subr.mxu1 %v9642_v57  ;;  %4322 = vadd.xlane.f32.xlu1 %v4299_v19 }
 0x1b8   : > { %9691 = vst [vmem:[#allocation79_spill] sm:$0xff] %v8346_v50  ;;  %6298 = vmatpush3.msra.mxu1 %v9642_v57  ;;  %4320 = vadd.xlane.f32.xlu0 %v4298_v63  ;;  %v8369_v57 = vld [vmem:[%s6577_s30 + $0x58] sm:$0xff]  ;;  %v2079_v50 = vadd.f32 %v8198_v34, %v8158_v53 }
 0x1b9   : > { %6250 = vmatmul.mubr.f32.gmra.mxu0 %v9586_v40  ;;  %6300 = vmatmul.mubr.f32.vlgmr.msra.gmra.mxu1 %v9428_v16  ;;  %v8362_v12 = vpop.f32.mrf.mxu0  ;;  %v8364_v32 = vpop.f32.mrf.mxu1  ;;  %9694 = vst [vmem:[#allocation93_spill] sm:$0xff] %v8369_v57  ;;  %v4303_v13 = vmul.f32 %v8369_v57, %v8369_v57  ;;  %v8378_v16 = vld [vmem:[%s6577_s30 + $0x50] sm:$0xff] }
 0x1ba   : > { %6252 = vmatprep.mubr.f32.mxu0 %v9595_v28  ;;  %6302 = vmatprep.mubr.f32.mxu1 %v9431_v58  ;;  %9695 = vst [vmem:[#allocation59_spill] sm:$0xff] %v8378_v16  ;;  %v4302_v44 = vmul.f32 %v8378_v16, %v8378_v16  ;;  %v8387_v58 = vld [vmem:[%s6577_s30 + $0x68] sm:$0xff]  ;;  %v6410_v57 = vld [vmem:[%s6577_s30 + $0x70] sm:$0xff] }
 0x1bb   : > { %4326 = vadd.xlane.f32.xlu1 %v4301_v62  ;;  %v8373_v19 = vpop.f32.mrf.mxu0  ;;  %v8375_v4 = vpop.f32.mrf.mxu1  ;;  %9696 = vst [vmem:[#allocation24_spill] sm:$0xff] %v8387_v58  ;;  %v4305_v63 = vmul.f32 %v8387_v58, %v8387_v58 }
 0x1bc   : > { %4324 = vadd.xlane.f32.xlu0 %v4300_v45  ;;  %v6408_v45 = vld [vmem:[%s6577_s30 + $0x60] sm:$0xff]  ;;  %v2449_v1 = vadd.f32 %v8375_v4, %v2255_v11  ;;  %v2269_v11 = vadd.f32 %v8342_v41, %v2073_v9 }
 0x1bd   : > { %6253 = vmatmul.mubr.f32.gmra.mxu0 %v9598_v18  ;;  %6303 = vmatmul.mubr.f32.gmra.mxu1 %v9572_v26  ;;  %v4304_v16 = vmul.f32 %v6408_v45, %v6408_v45 }
 0x1be   : > { %6255 = vmatprep.mubr.f32.mxu0 %v9608_v24  ;;  %6305 = vmatprep.mubr.f32.mxu1 %v9581_v51 }
 0x1bf   : > { %4330 = vadd.xlane.f32.xlu1 %v4303_v13  ;;  %v8391_v55 = vpop.f32.mrf.mxu0  ;;  %v8393_v62 = vpop.f32.mrf.mxu1  ;;  %v6409_v13 = vld [vmem:[%s6577_s30 + $0x78] sm:$0xff] }
 0x1c0   : > { %4328 = vadd.xlane.f32.xlu0 %v4302_v44  ;;  %v4307_v58 = vmul.f32 %v6409_v13, %v6409_v13  ;;  %v4306_v44 = vmul.f32 %v6410_v57, %v6410_v57 }
 0x1c1   : > { %6256 = vmatmul.mubr.f32.gmra.mxu0 %v9610_v21  ;;  %6306 = vmatmul.mubr.f32.gmra.mxu1 %v9586_v40  ;;  %v8398_v26 = vpop.f32.mrf.mxu0  ;;  %v8400_v51 = vpop.f32.mrf.mxu1 }
 0x1c2   : > { %6258 = vmatprep.mubr.f32.mxu0 %v6840_v39  ;;  %6308 = vmatprep.mubr.f32.mxu1 %v9595_v28 }
 0x1c3   : > { %4334 = vadd.xlane.f32.xlu1 %v4305_v63 }
 0x1c4   : > { %4332 = vadd.xlane.f32.xlu0 %v4304_v16 }
 0x1c5   : > { %6259 = vmatmul.mubr.f32.gmra.mxu0 %v6849_v59  ;;  %6309 = vmatmul.mubr.f32.gmra.mxu1 %v9598_v18  ;;  %v8408_v45 = vpop.f32.mrf.mxu0  ;;  %v8410_v40 = vpop.f32.mrf.mxu1 }
 0x1c6   : > { %6261 = vmatprep.mubr.f32.mxu0 %v6876_v6  ;;  %6311 = vmatprep.mubr.f32.mxu1 %v9608_v24 }
 0x1c7   : > { %4338 = vadd.xlane.f32.xlu1 %v4307_v58  ;;  %v8414_v28 = vpop.f32.mrf.mxu0  ;;  %v8416_v63 = vpop.f32.mrf.mxu1 }
 0x1c8   : > { %4336 = vadd.xlane.f32.xlu0 %v4306_v44 }
 0x1c9   : > { %6262 = vmatmul.mubr.f32.gmra.mxu0 %v6887_v36  ;;  %6312 = vmatmul.mubr.f32.gmra.mxu1 %v9610_v21 }
 0x1ca   : > { %6264 = vmatprep.mubr.f32.mxu0 %v6914_v56  ;;  %6314 = vmatprep.mubr.f32.mxu1 %v6840_v39 }
 0x1cb   : > { %v8422_v18 = vpop.f32.mrf.mxu0  ;;  %v8424_v57 = vpop.f32.mrf.mxu1 }
 0x1cd   : > { %6265 = vmatmul.mubr.f32.gmra.mxu0 %v6925_v20  ;;  %6315 = vmatmul.mubr.f32.gmra.mxu1 %v6849_v59  ;;  %v8428_v24 = vpop.f32.mrf.mxu0  ;;  %v8430_v16 = vpop.f32.mrf.mxu1 }
 0x1ce   : > { %6317 = vmatprep.mubr.f32.mxu1 %v6876_v6 }
 0x1d1   : > { %6318 = vmatmul.mubr.f32.gmra.mxu1 %v6887_v36  ;;  %v8434_v21 = vpop.f32.mrf.mxu0  ;;  %v8436_v58 = vpop.f32.mrf.mxu1 }
 0x1d2   : > { %6320 = vmatprep.mubr.f32.mxu1 %v6914_v56 }
 0x1d3   : > { %v8439_v39 = vpop.f32.mrf.mxu0  ;;  %v8441_v13 = vpop.f32.mrf.mxu1 }
 0x1d5   : > { %6321 = vmatmul.mubr.f32.gmra.mxu1 %v6925_v20 }
 0x1d7   : > { %v8444_v59 = vpop.f32.mrf.mxu0  ;;  %v8446_v44 = vpop.f32.mrf.mxu1 }
 0x1d9   : > { %v8448_v46 = vpop.f32.mrf.mxu0  ;;  %v8450_v6 = vpop.f32.mrf.mxu1 }
 0x1da   : > { %9697 = vst [vmem:[#allocation9_spill] sm:$0xff] %v8448_v46  ;;  %v2457_v46 = vadd.f32 %v8364_v32, %v2262_v25  ;;  %v2276_v25 = vadd.f32 %v8329_v22, %v2079_v50  ;;  %v2085_v22 = vadd.f32 %v8222_v23, %v8184_v30 }
 0x1dc   : > { %v2473_v2 = vadd.f32 %v8393_v62, %v2276_v25 }
 0x1dd   : > { %v8452_v36 = vpop.f32.mrf.mxu1  ;;  %v5909_v10 = vpop.f32.mrf.mxu0 }
 0x1de   : > { %v2694_v43 = vadd.f32 %v5909_v10, %v2457_v46  ;;  %v2091_v10 = vadd.f32 %v8216_v47, %v8176_v52  ;;  %v2465_v46 = vadd.f32 %v8400_v51, %v2269_v11  ;;  %v2103_v51 = vadd.f32 %v8232_v17, %v8196_v15 }
 0x1df   : > { %v8454_v3 = vpop.f32.mrf.mxu1  ;;  %v2687_v56 = vpop.f32.mrf.mxu0 }
 0x1e0   : > { %v2688_v48 = vadd.f32 %v2687_v56, %v2449_v1  ;;  %v2290_v41 = vadd.f32 %v8362_v12, %v2091_v10  ;;  %v2283_v1 = vadd.f32 %v8373_v19, %v2085_v22  ;;  %v2304_v12 = vadd.f32 %v8391_v55, %v2103_v51 }
 0x1e1   : > { %v9700_v51 = vld [vmem:[#allocation9_spill] sm:$0xff] }
 0x1e2   : > { %v2489_v52 = vadd.f32 %v8410_v40, %v2290_v41  ;;  %v2505_v15 = vadd.f32 %v8424_v57, %v2304_v12 }
 0x1e3   : > { %v8458_v42 = vpop.f32.mrf.mxu1  ;;  %v5912_v20 = vpop.f32.mrf.mxu0 }
 0x1e4   : > { %9698 = vst [vmem:[#allocation44_spill] sm:$0xff] %v8458_v42  ;;  %v2706_v32 = vadd.f32 %v5912_v20, %v2473_v2  ;;  %v2481_v20 = vadd.f32 %v8416_v63, %v2283_v1 }
 0x1e5   : > { %v8463_v0 = vpop.f32.mrf.mxu1  ;;  %v2699_v37 = vpop.f32.mrf.mxu0 }
 0x1e6   : > { %v2700_v50 = vadd.f32 %v2699_v37, %v2465_v46  ;;  %v2097_v37 = vadd.f32 %v8238_v38, %v8204_v49  ;;  %v2318_v38 = vadd.f32 %v8408_v45, %v8250_v7  ;;  %v2332_v7 = vadd.f32 %v8422_v18, %v8274_v35 }
 0x1e7   : > { %v2346_v35 = vadd.f32 %v8434_v21, %v8305_v8  ;;  %v2360_v8 = vadd.f32 %v8444_v59, %v8338_v14 }
 0x1e8   : > { %v2297_v25 = vadd.f32 %v8398_v26, %v2097_v37  ;;  %v2311_v26 = vadd.f32 %v8414_v28, %v8266_v29  ;;  %v2521_v57 = vadd.f32 %v8436_v58, %v2318_v38  ;;  %v2325_v29 = vadd.f32 %v8428_v24, %v8290_v60 }
 0x1e9   : > { %v5915_v42 = vpop.f32.mrf.mxu0  ;;  %v5965_v61 = vpop.f32.mrf.mxu1  ;;  %v2537_v28 = vadd.f32 %v8446_v44, %v2332_v7  ;;  %v2339_v60 = vadd.f32 %v8439_v39, %v8318_v31  ;;  %v2553_v24 = vadd.f32 %v8452_v36, %v2346_v35  ;;  %v9699_v36 = vld [vmem:[#allocation79_spill] sm:$0xff] }
 0x1ea   : > { %v2871_v54 = vadd.f32 %v5965_v61, %v2694_v43  ;;  %v2718_v43 = vadd.f32 %v5915_v42, %v2489_v52  ;;  %v2497_v42 = vadd.f32 %v8430_v16, %v2297_v25  ;;  %v2513_v11 = vadd.f32 %v8441_v13, %v2311_v26 }
 0x1eb   : > { %v2711_v53 = vpop.f32.mrf.mxu0  ;;  %v2864_v34 = vpop.f32.mrf.mxu1  ;;  %v2529_v13 = vadd.f32 %v8450_v6, %v2325_v29  ;;  %v2545_v6 = vadd.f32 %v8454_v3, %v2339_v60  ;;  %v9701_v3 = vld [vmem:[#allocation44_spill] sm:$0xff] }
 0x1ec   : > { %2959 = vst [vmem:[%s8474_s29 + $0x8] sm:$0xff] %v2871_v54  ;;  %v2865_v5 = vadd.f32 %v2864_v34, %v2688_v48  ;;  %v2712_v19 = vadd.f32 %v2711_v53, %v2481_v20  ;;  %v2353_v20 = vadd.f32 %v9700_v51, %v9699_v36 }
 0x1ee   : > { %2958 = vst [vmem:[%s8474_s29] sm:$0xff] %v2865_v5 }
 0x1ef   : > { %v5918_v27 = vpop.f32.mrf.mxu0  ;;  %v5968_v33 = vpop.f32.mrf.mxu1 }
 0x1f0   : > { %v2883_v4 = vadd.f32 %v5968_v33, %v2706_v32  ;;  %v2730_v63 = vadd.f32 %v5918_v27, %v2505_v15 }
 0x1f1   : > { %v2723_v62 = vpop.f32.mrf.mxu0  ;;  %v2876_v56 = vpop.f32.mrf.mxu1 }
 0x1f2   : > { %2961 = vst [vmem:[%s8474_s29 + $0x18] sm:$0xff] %v2883_v4  ;;  %v2877_v47 = vadd.f32 %v2876_v56, %v2700_v50  ;;  %v2724_v55 = vadd.f32 %v2723_v62, %v2497_v42 }
 0x1f4   : > { %2960 = vst [vmem:[%s8474_s29 + $0x10] sm:$0xff] %v2877_v47 }
 0x1f5   : > { %v5921_v30 = vpop.f32.mrf.mxu0  ;;  %v5971_v23 = vpop.f32.mrf.mxu1 }
 0x1f6   : > { %v2895_v40 = vadd.f32 %v5971_v23, %v2718_v43  ;;  %v2742_v2 = vadd.f32 %v5921_v30, %v2521_v57  ;;  %v2569_v43 = vadd.f32 %v9701_v3, %v2360_v8  ;;  %v2561_v23 = vadd.f32 %v8463_v0, %v2353_v20 }
 0x1f7   : > { %v2735_v61 = vpop.f32.mrf.mxu0  ;;  %v2888_v9 = vpop.f32.mrf.mxu1 }
 0x1f8   : > { %2963 = vst [vmem:[%s8474_s29 + $0x28] sm:$0xff] %v2895_v40  ;;  %v2889_v17 = vadd.f32 %v2888_v9, %v2712_v19  ;;  %v2736_v45 = vadd.f32 %v2735_v61, %v2513_v11 }
 0x1fa   : > { %2962 = vst [vmem:[%s8474_s29 + $0x20] sm:$0xff] %v2889_v17 }
 0x1fb   : > { %v5924_v48 = vpop.f32.mrf.mxu0  ;;  %v5974_v49 = vpop.f32.mrf.mxu1 }
 0x1fc   : > { %v2907_v54 = vadd.f32 %v5974_v49, %v2730_v63  ;;  %v2754_v33 = vadd.f32 %v5924_v48, %v2537_v28 }
 0x1fd   : > { %v2747_v53 = vpop.f32.mrf.mxu0  ;;  %v2900_v34 = vpop.f32.mrf.mxu1 }
 0x1fe   : > { %2965 = vst [vmem:[%s8474_s29 + $0x38] sm:$0xff] %v2907_v54  ;;  %v2901_v16 = vadd.f32 %v2900_v34, %v2724_v55  ;;  %v2748_v18 = vadd.f32 %v2747_v53, %v2529_v13 }
 0x200   : > { %2964 = vst [vmem:[%s8474_s29 + $0x30] sm:$0xff] %v2901_v16 }
 0x201   : > { %v5927_v5 = vpop.f32.mrf.mxu0  ;;  %v5977_v10 = vpop.f32.mrf.mxu1 }
 0x202   : > { %v2919_v46 = vadd.f32 %v5977_v10, %v2742_v2  ;;  %v2766_v56 = vadd.f32 %v5927_v5, %v2553_v24 }
 0x203   : > { %v2759_v32 = vpop.f32.mrf.mxu0  ;;  %v2912_v27 = vpop.f32.mrf.mxu1 }
 0x204   : > { %2967 = vst [vmem:[%s8474_s29 + $0x48] sm:$0xff] %v2919_v46  ;;  %v2913_v58 = vadd.f32 %v2912_v27, %v2736_v45  ;;  %v2760_v21 = vadd.f32 %v2759_v32, %v2545_v6 }
 0x206   : > { %2966 = vst [vmem:[%s8474_s29 + $0x40] sm:$0xff] %v2913_v58 }
 0x207   : > { %v5930_v22 = vpop.f32.mrf.mxu0  ;;  %v5980_v41 = vpop.f32.mrf.mxu1 }
 0x208   : > { %v2931_v50 = vadd.f32 %v5980_v41, %v2754_v33  ;;  %v2778_v37 = vadd.f32 %v5930_v22, %v2569_v43 }
 0x209   : > { %v2771_v4 = vpop.f32.mrf.mxu0  ;;  %v2924_v62 = vpop.f32.mrf.mxu1 }
 0x20a   : > { %2969 = vst [vmem:[%s8474_s29 + $0x58] sm:$0xff] %v2931_v50  ;;  %v2925_v44 = vadd.f32 %v2924_v62, %v2748_v18  ;;  %v2772_v59 = vadd.f32 %v2771_v4, %v2561_v23 }
 0x20c   : > { %2968 = vst [vmem:[%s8474_s29 + $0x50] sm:$0xff] %v2925_v44 }
 0x20d   : > { %v5983_v1 = vpop.f32.mrf.mxu1  ;;  %v8528_v52 = vpop.f32.mrf.mxu0 }
 0x20e   : > { %v2943_v47 = vadd.f32 %v5983_v1, %v2766_v56 }
 0x20f   : > { %v2936_v31 = vpop.f32.mrf.mxu1  ;;  %v8532_v39 = vpop.f32.mrf.mxu0 }
 0x210   : > { %2971 = vst [vmem:[%s8474_s29 + $0x68] sm:$0xff] %v2943_v47  ;;  %v2937_v30 = vadd.f32 %v2936_v31, %v2760_v21 }
 0x212   : > { %2970 = vst [vmem:[%s8474_s29 + $0x60] sm:$0xff] %v2937_v30 }
 0x213   : > { %v5986_v12 = vpop.f32.mrf.mxu1  ;;  %v8540_v14 = vpop.f32.mrf.mxu0 }
 0x214   : > { %v2955_v19 = vadd.f32 %v5986_v12, %v2778_v37 }
 0x215   : > { %v2948_v40 = vpop.f32.mrf.mxu1  ;;  %v8542_v61 = vpop.f32.mrf.mxu0 }
 0x216   : > { %2973 = vst [vmem:[%s8474_s29 + $0x78] sm:$0xff] %v2955_v19  ;;  %v2949_v9 = vadd.f32 %v2948_v40, %v2772_v59 }
 0x218   : > { %2972 = vst [vmem:[%s8474_s29 + $0x70] sm:$0xff] %v2949_v9 }
 0x219   : > { %v8546_v25 = vpop.f32.mrf.mxu0  ;;  %v8548_v15 = vpop.f32.mrf.mxu1 }
 0x21b   : > { %v8550_v17 = vpop.f32.mrf.mxu0  ;;  %v8552_v0 = vpop.f32.mrf.mxu1 }
 0x21f   : > { %v8554_v42 = vpop.f32.mrf.mxu0  ;;  %v8556_v63 = vpop.f32.mrf.mxu1 }
 0x221   : > { %v8558_v48 = vpop.f32.mrf.mxu0  ;;  %v8560_v49 = vpop.f32.mrf.mxu1 }
 0x225   : > { %v8562_v38 = vpop.f32.mrf.mxu0  ;;  %v8564_v55 = vpop.f32.mrf.mxu1 }
 0x227   : > { %v8566_v54 = vpop.f32.mrf.mxu0  ;;  %v8568_v53 = vpop.f32.mrf.mxu1 }
 0x228   : > { %9702 = vst [vmem:[#allocation97_spill] sm:$0xff] %v8566_v54 }
 0x22b   : > { %v8570_v34 = vpop.f32.mrf.mxu0  ;;  %v8572_v26 = vpop.f32.mrf.mxu1 }
 0x22c   : > { %9703 = vst [vmem:[#allocation62_spill] sm:$0xff] %v8570_v34 }
 0x22d   : > { %v8574_v57 = vpop.f32.mrf.mxu0  ;;  %v8576_v16 = vpop.f32.mrf.mxu1 }
 0x22e   : > { %9704 = vst [vmem:[#allocation27_spill] sm:$0xff] %v8574_v57 }
 0x230   : > { %v4313_v11 = vpop.xlane.xlu1 %4312  ;;  %v4309_v2 = vpop.xlane.xlu0 %4308 }
 0x231   : > { %6331 = vrsqrt.f32 %v4313_v11  ;;  %v8578_v5 = vpop.f32.mrf.mxu0  ;;  %v8580_v10 = vpop.f32.mrf.mxu1  ;;  %vm4356_vm0 = vcmp.eq.f32.partialorder %v4313_v11, inf  ;;  %v4359_v18 = vand.u32 2147483648, %v4313_v11  ;;  %vm4358_vm1 = vcmp.eq.f32.partialorder %v4313_v11, 0.0 }
 0x232   : > { %9705 = vst [vmem:[#allocation11_spill] sm:$0xff] %v8578_v5  ;;  %6333 = vrsqrt.f32 %v4309_v2  ;;  %vm4342_vm2 = vcmp.eq.f32.partialorder %v4309_v2, inf  ;;  %v4345_v62 = vand.u32 2147483648, %v4309_v2  ;;  %vm4344_vm3 = vcmp.eq.f32.partialorder %v4309_v2, 0.0 }
 0x233   : > { %v8582_v7 = vpop.f32.mrf.mxu0  ;;  %v8584_v45 = vpop.f32.mrf.mxu1 }
 0x234   : > { %9706 = vst [vmem:[#allocation50_spill] sm:$0xff] %v8582_v7  ;;  %9707 = vst [vmem:[#allocation18_spill] sm:$0xff] %v8584_v45 }
 0x237   : > { %v8586_v46 = vpop.xlane.xlu1 %4314  ;;  %v8588_v32 = vpop.xlane.xlu0 %4310 }
 0x238   : > { %6335 = vrsqrt.f32 %v8586_v46  ;;  %v8591_v27 = vpop.f32.mrf.mxu0  ;;  %v8593_v29 = vpop.f32.mrf.mxu1  ;;  %vm4363_vm4 = vcmp.eq.f32.partialorder %v8586_v46, inf  ;;  %vm4365_vm5 = vcmp.eq.f32.partialorder %v8586_v46, 0.0  ;;  %v4366_v3 = vand.u32 2147483648, %v8586_v46 }
 0x239   : > { %9708 = vst [vmem:[#allocation85_spill] sm:$0xff] %v8591_v27  ;;  %9709 = vst [vmem:[#allocation23_spill] sm:$0xff] %v8593_v29  ;;  %6337 = vrsqrt.f32 %v8588_v32  ;;  %vm4349_vm6 = vcmp.eq.f32.partialorder %v8588_v32, inf  ;;  %vm4351_vm7 = vcmp.eq.f32.partialorder %v8588_v32, 0.0  ;;  %v4352_v23 = vand.u32 2147483648, %v8588_v32 }
 0x23a   : > { %v8596_v28 = vpop.f32.mrf.mxu0  ;;  %v8598_v58 = vpop.f32.mrf.mxu1 }
 0x23b   : > { %9710 = vst [vmem:[#allocation88_spill] sm:$0xff] %v8596_v28  ;;  %9711 = vst [vmem:[#allocation101_spill] sm:$0xff] %v8598_v58  ;;  %v8600_v13 = vpop.xlane.xlu1 %4318 }
 0x23c   : > { %6339 = vrsqrt.f32 %v8600_v13  ;;  %v8603_v33 = vpop.xlane.xlu0 %4316  ;;  %vm4377_vm8 = vcmp.eq.f32.partialorder %v8600_v13, inf  ;;  %vm4379_vm9 = vcmp.eq.f32.partialorder %v8600_v13, 0.0  ;;  %v4380_v19 = vand.u32 2147483648, %v8600_v13 }
 0x23d   : > { %6341 = vrsqrt.f32 %v8603_v33  ;;  %v8606_v22 = vpop.f32.mrf.mxu1  ;;  %v8608_v41 = vpop.f32.mrf.mxu0  ;;  %vm4370_vm10 = vcmp.eq.f32.partialorder %v8603_v33, inf  ;;  %vm4372_vm11 = vcmp.eq.f32.partialorder %v8603_v33, 0.0 }
 0x23e   : > { %9712 = vst [vmem:[#allocation65_spill] sm:$0xff] %v8606_v22  ;;  %v6332_v35 = vpop.eup %6331 }
 0x23f   : > { %v6334_v50 = vpop.eup %6333  ;;  %v4355_v4 = vmul.f32 %v6332_v35, %v4313_v11  ;;  %v8610_v60 = vpop.f32.mrf.mxu1 }
 0x240   : > { %9713 = vst [vmem:[#allocation34_spill] sm:$0xff] %v8610_v60  ;;  %v8612_v24 = vpop.f32.mrf.mxu0  ;;  %v4341_v44 = vmul.f32 %v6334_v50, %v4309_v2  ;;  %v8614_v6 = vpop.xlane.xlu1 %4322 }
 0x241   : > { %v4357_v56 = vsel %vm4356_vm0, %v4313_v11, %v4355_v4  ;;  %6343 = vrsqrt.f32 %v8614_v6  ;;  %v8617_v1 = vpop.xlane.xlu0 %4320  ;;  %vm4391_vm12 = vcmp.eq.f32.partialorder %v8614_v6, inf  ;;  %vm4393_vm13 = vcmp.eq.f32.partialorder %v8614_v6, 0.0 }
 0x242   : > { %v8619_v8 = vsel %vm4358_vm1, %v4359_v18, %v4357_v56  ;;  %v4343_v21 = vsel %vm4342_vm2, %v4309_v2, %v4341_v44  ;;  %6345 = vrsqrt.f32 %v8617_v1  ;;  %v4373_v2 = vand.u32 2147483648, %v8603_v33 }
 0x243   : > { %v9321_v47 = vmax.f32 %v8619_v8, 1e-12  ;;  %v8623_v31 = vsel %vm4344_vm3, %v4345_v62, %v4343_v21  ;;  %v8627_v36 = vpop.f32.mrf.mxu1  ;;  %v8629_v51 = vpop.f32.mrf.mxu0  ;;  %v4394_v44 = vand.u32 2147483648, %v8614_v6  ;;  %vm4384_vm14 = vcmp.eq.f32.partialorder %v8617_v1, inf }
 0x244   : > { %9714 = vst [vmem:[#allocation105_spill] sm:$0xff] %v8627_v36  ;;  %v9319_v20 = vmax.f32 %v8623_v31, 1e-12  ;;  %v8635_v43 = vpop.xlane.xlu1 %4326  ;;  %vm4386_vm15 = vcmp.eq.f32.partialorder %v8617_v1, 0.0  ;;  %v9719_v58 = vmax.f32 %v8619_v8, 1e-12 }
 0x245   : > { %v6336_v30 = vpop.eup %6335  ;;  %6347 = vrcp.f32 %v9321_v47  ;;  %v8642_v37 = vpop.xlane.xlu0 %4324  ;;  %vm4405_vm0 = vcmp.eq.f32.partialorder %v8635_v43, inf  ;;  %vm4407_vm1 = vcmp.eq.f32.partialorder %v8635_v43, 0.0 }
 0x246   : > { %v6338_v12 = vpop.eup %6337  ;;  %6349 = vrcp.f32 %v9319_v20  ;;  %v4362_v59 = vmul.f32 %v6336_v30, %v8586_v46  ;;  %v8649_v40 = vpop.f32.mrf.mxu1  ;;  %vm4398_vm2 = vcmp.eq.f32.partialorder %v8642_v37, inf  ;;  %vm4400_vm3 = vcmp.eq.f32.partialorder %v8642_v37, 0.0 }
 0x247   : > { %9715 = vst [vmem:[#allocation68_spill] sm:$0xff] %v8649_v40  ;;  %v8651_v9 = vpop.f32.mrf.mxu0  ;;  %v4348_v11 = vmul.f32 %v6338_v12, %v8588_v32  ;;  %6351 = vrsqrt.f32 %v8635_v43 }
 0x248   : > { %v4364_v35 = vsel %vm4363_vm4, %v8586_v46, %v4362_v59  ;;  %6353 = vrsqrt.f32 %v8642_v37  ;;  %v8663_v18 = vpop.xlane.xlu1 %4330 }
 0x249   : > { %v6340_v50 = vpop.eup %6339  ;;  %v8667_v4 = vsel %vm4365_vm5, %v4366_v3, %v4364_v35  ;;  %v4350_v62 = vsel %vm4349_vm6, %v8588_v32, %v4348_v11  ;;  %6355 = vrsqrt.f32 %v8663_v18  ;;  %v8674_v56 = vpop.xlane.xlu0 %4328  ;;  %vm4419_vm4 = vcmp.eq.f32.partialorder %v8663_v18, inf }
 0x24a   : > { %v8676_v21 = vpop.f32.mrf.mxu0  ;;  %v6342_v30 = vpop.eup %6341  ;;  %v9320_v12 = vmax.f32 %v8667_v4, 1e-12  ;;  %v8681_v46 = vsel %vm4351_vm7, %v4352_v23, %v4350_v62  ;;  %v4376_v3 = vmul.f32 %v6340_v50, %v8600_v13  ;;  %6357 = vrsqrt.f32 %v8674_v56 }
 0x24b   : > { %v8685_v59 = vpop.f32.mrf.mxu1  ;;  %v9322_v11 = vmax.f32 %v8681_v46, 1e-12  ;;  %v4369_v35 = vmul.f32 %v6342_v30, %v8603_v33  ;;  %v4387_v23 = vand.u32 2147483648, %v8617_v1  ;;  %vm4421_vm5 = vcmp.eq.f32.partialorder %v8663_v18, 0.0 }
 0x24c   : > { %v8691_v20 = vpop.f32.mrf.mxu0  ;;  %6359 = vrcp.f32 %v9320_v12  ;;  %v4378_v32 = vsel %vm4377_vm8, %v8600_v13, %v4376_v3  ;;  %v8700_v50 = vpop.xlane.xlu1 %4334  ;;  %v4422_v27 = vand.u32 2147483648, %v8663_v18  ;;  %vm4412_vm6 = vcmp.eq.f32.partialorder %v8674_v56, inf }
 0x24d   : > { %v8702_v62 = vpop.f32.mrf.mxu1  ;;  %6361 = vrcp.f32 %v9322_v11  ;;  %v8708_v30 = vsel %vm4379_vm9, %v4380_v19, %v4378_v32  ;;  %v4371_v12 = vsel %vm4370_vm10, %v8603_v33, %v4369_v35  ;;  %v8714_v3 = vpop.xlane.xlu0 %4332  ;;  %v4408_v11 = vand.u32 2147483648, %v8635_v43 }
 0x24e   : > { %v6344_v47 = vpop.eup %6343  ;;  %v8719_v28 = vsel %vm4372_vm11, %v4373_v2, %v4371_v12  ;;  %6363 = vrsqrt.f32 %v8700_v50  ;;  %v9716_v33 = vmax.f32 %v8708_v30, 1e-12  ;;  %v4401_v12 = vand.u32 2147483648, %v8642_v37 }
 0x24f   : > { %v6346_v13 = vpop.eup %6345  ;;  %v4390_v35 = vmul.f32 %v6344_v47, %v8614_v6  ;;  %v8727_v32 = vpop.f32.mrf.mxu0  ;;  %v9717_v47 = vmax.f32 %v8719_v28, 1e-12  ;;  %vm4414_vm7 = vcmp.eq.f32.partialorder %v8674_v56, 0.0  ;;  %vm4433_vm8 = vcmp.eq.f32.partialorder %v8700_v50, inf }
 0x250   : > { %v8729_v40 = vpop.f32.mrf.mxu1  ;;  %6365 = vrcp.f32 %v9716_v33  ;;  %v4383_v2 = vmul.f32 %v6346_v13, %v8617_v1  ;;  %v8736_v19 = vpop.xlane.xlu1 %4338  ;;  %vm4435_vm9 = vcmp.eq.f32.partialorder %v8700_v50, 0.0  ;;  %vm4426_vm10 = vcmp.eq.f32.partialorder %v8714_v3, inf }
 0x251   : > { %6367 = vrcp.f32 %v9717_v47  ;;  %v4392_v36 = vsel %vm4391_vm12, %v8614_v6, %v4390_v35  ;;  %v8745_v33 = vpop.xlane.xlu0 %4336  ;;  %v8747_v13 = vpop.f32.mrf.mxu0  ;;  %vm4428_vm11 = vcmp.eq.f32.partialorder %v8714_v3, 0.0  ;;  %vm4447_vm12 = vcmp.eq.f32.partialorder %v8736_v19, inf }
 0x252   : > { %9718 = vst [vmem:[#allocation38_spill] sm:$0xff] %v8747_v13  ;;  %v6348_v60 = vpop.eup %6347  ;;  %v8751_v7 = vsel %vm4393_vm13, %v4394_v44, %v4392_v36  ;;  %v4385_v47 = vsel %vm4384_vm14, %v8617_v1, %v4383_v2  ;;  %6369 = vrsqrt.f32 %v8714_v3  ;;  %v8759_v22 = vpop.f32.mrf.mxu1  ;;  %v9720_v2 = vmax.f32 %v8623_v31, 1e-12 }
 0x253   : > { %v6350_v5 = vpop.eup %6349  ;;  %v4486_v57 = vmul.f32 %v6348_v60, %v9719_v58  ;;  %v9323_v6 = vmax.f32 %v8751_v7, 1e-12  ;;  %v8766_v36 = vsel %vm4386_vm15, %v4387_v23, %v4385_v47  ;;  %6371 = vrsqrt.f32 %v8736_v19 }
 0x254   : > { %v6352_v44 = vpop.eup %6351  ;;  %v4484_v35 = vmul.f32 %v6350_v5, %v9720_v2  ;;  %v9324_v29 = vmax.f32 %v8766_v36, 1e-12  ;;  %6373 = vrsqrt.f32 %v8745_v33  ;;  %vm4449_vm13 = vcmp.eq.f32.partialorder %v8736_v19, 0.0 }
 0x255   : > { %v6354_v58 = vpop.eup %6353  ;;  %v4502_v8 = vsub.f32 2.0, %v4486_v57  ;;  %6375 = vrcp.f32 %v9323_v6  ;;  %v4404_v1 = vmul.f32 %v6352_v44, %v8635_v43  ;;  %v8779_v23 = vpop.f32.mrf.mxu0  ;;  %v4436_v57 = vand.u32 2147483648, %v8700_v50 }
 0x256   : > { %9721 = vst [vmem:[#allocation16_spill] sm:$0xff] %v8779_v23  ;;  %v8781_v31 = vpop.f32.mrf.mxu1  ;;  %v6356_v47 = vpop.eup %6355  ;;  %v4500_v2 = vsub.f32 2.0, %v4484_v35  ;;  %6377 = vrcp.f32 %v9324_v29  ;;  %v4397_v34 = vmul.f32 %v6354_v58, %v8642_v37  ;;  %v9723_v23 = vld [vmem:[#allocation32_spill] sm:$0xff]  ;;  %vm4440_vm14 = vcmp.eq.f32.partialorder %v8745_v33, inf }
 0x257   : > { %v4518_v45 = vmul.f32 %v6348_v60, %v4502_v8  ;;  %v4406_v44 = vsel %vm4405_vm0, %v8635_v43, %v4404_v1  ;;  %v4418_v6 = vmul.f32 %v6356_v47, %v8663_v18  ;;  %v8793_v54 = vpop.f32.mrf.mxu0  ;;  %v6358_v29 = vpop.eup %6357  ;;  %v9725_v1 = vmax.f32 %v8667_v4, 1e-12 }
 0x258   : > { %9722 = vst [vmem:[#allocation2_spill] sm:$0xff] %v8793_v54  ;;  %v8795_v35 = vpop.f32.mrf.mxu1  ;;  %v4516_v60 = vmul.f32 %v6350_v5, %v4500_v2  ;;  %v8805_v58 = vsel %vm4407_vm1, %v4408_v11, %v4406_v44  ;;  %v4399_v8 = vsel %vm4398_vm2, %v8642_v37, %v4397_v34  ;;  %v9724_v2 = vld [vmem:[#allocation35_spill] sm:$0xff]  ;;  %v4411_v4 = vmul.f32 %v6358_v29, %v8674_v56 }
 0x259   : > { %v6360_v47 = vpop.eup %6359  ;;  %v4534_v54 = vmul.f32 %v9723_v23, %v4518_v45  ;;  %v9327_v5 = vmax.f32 %v8805_v58, 1e-12  ;;  %v8817_v43 = vsel %vm4400_vm3, %v4401_v12, %v4399_v8  ;;  %v4420_v34 = vsel %vm4419_vm4, %v8663_v18, %v4418_v6 }
 0x25a   : > { %v6362_v11 = vpop.eup %6361  ;;  %v4532_v44 = vmul.f32 %v9724_v2, %v4516_v60  ;;  %v4487_v13 = vmul.f32 %v6360_v47, %v9725_v1  ;;  %v9325_v45 = vmax.f32 %v8817_v43, 1e-12  ;;  %v8829_v37 = vsel %vm4421_vm5, %v4422_v27, %v4420_v34 }
 0x25b   : > { %v6364_v12 = vpop.eup %6363  ;;  %4550 = vst [vmem:[%s8801_s10 + $0x10] sm:$0xff] %v4534_v54  ;;  %v9726_v6 = vmax.f32 %v8681_v46, 1e-12  ;;  %6379 = vrcp.f32 %v9327_v5  ;;  %v9326_v60 = vmax.f32 %v8829_v37, 1e-12  ;;  %v8839_v8 = vpop.f32.mrf.mxu0  ;;  %vm4442_vm15 = vcmp.eq.f32.partialorder %v8745_v33, 0.0 }
 0x25c   : > { %9727 = vst [vmem:[#allocation78_spill] sm:$0xff] %v8839_v8  ;;  %v8841_v1 = vpop.f32.mrf.mxu1  ;;  %4548 = vst [vmem:[%s8801_s10] sm:$0xff] %v4532_v44  ;;  %v4503_v27 = vsub.f32 2.0, %v4487_v13  ;;  %6381 = vrcp.f32 %v9325_v45  ;;  %v4432_v54 = vmul.f32 %v6364_v12, %v8700_v50  ;;  %v4413_v29 = vsel %vm4412_vm6, %v8674_v56, %v4411_v4 }
 0x25d   : > { %v4485_v23 = vmul.f32 %v6362_v11, %v9726_v6  ;;  %v6366_v18 = vpop.eup %6365  ;;  %6383 = vrcp.f32 %v9326_v60  ;;  %v4443_v34 = vand.u32 2147483648, %v8745_v33  ;;  %v8854_v2 = vpop.f32.mrf.mxu0  ;;  %v9730_v12 = vmax.f32 %v8708_v30, 1e-12 }
 0x25e   : > { %9728 = vst [vmem:[#allocation53_spill] sm:$0xff] %v8854_v2  ;;  %v8856_v13 = vpop.f32.mrf.mxu1  ;;  %v6368_v44 = vpop.eup %6367  ;;  %v4519_v6 = vmul.f32 %v6360_v47, %v4503_v27  ;;  %v4434_v4 = vsel %vm4433_vm8, %v8700_v50, %v4432_v54  ;;  %v9732_v2 = vmax.f32 %v8719_v28, 1e-12 }
 0x25f   : > { %v4501_v46 = vsub.f32 2.0, %v4485_v23  ;;  %9729 = vst [vmem:[#allocation92_spill] sm:$0xff] %v8856_v13  ;;  %v4489_v45 = vmul.f32 %v6366_v18, %v9730_v12  ;;  %v9731_v23 = vand.u32 2147483648, %v8674_v56  ;;  %v6370_v5 = vpop.eup %6369  ;;  %v8874_v30 = vsel %vm4435_vm9, %v4436_v57, %v4434_v4  ;;  %v9733_v56 = vld [vmem:[#allocation89_spill] sm:$0xff] }
 0x260   : > { %v4488_v13 = vmul.f32 %v6368_v44, %v9732_v2  ;;  %v6372_v27 = vpop.eup %6371  ;;  %v4425_v54 = vmul.f32 %v6370_v5, %v8714_v3 }
 0x261   : > { %v8864_v60 = vsel %vm4414_vm7, %v9731_v23, %v4413_v29  ;;  %v4517_v8 = vmul.f32 %v6362_v11, %v4501_v46  ;;  %v4535_v29 = vmul.f32 %v9733_v56, %v4519_v6  ;;  %v4505_v12 = vsub.f32 2.0, %v4489_v45  ;;  %v6374_v11 = vpop.eup %6373  ;;  %v9734_v46 = vld [vmem:[#allocation56_spill] sm:$0xff]  ;;  %v8883_v57 = vpop.f32.mrf.mxu0 }
 0x262   : > { %v9328_v47 = vmax.f32 %v8864_v60, 1e-12  ;;  %v9329_v23 = vmax.f32 %v8874_v30, 1e-12  ;;  %v4504_v2 = vsub.f32 2.0, %v4488_v13  ;;  %v4446_v50 = vmul.f32 %v6372_v27, %v8736_v19  ;;  %v8885_v4 = vpop.f32.mrf.mxu1  ;;  %v6376_v6 = vpop.eup %6375 }
 0x263   : > { %v4533_v28 = vmul.f32 %v9734_v46, %v4517_v8  ;;  %4551 = vst [vmem:[%s8801_s10 + $0x18] sm:$0xff] %v4535_v29  ;;  %v4521_v45 = vmul.f32 %v6366_v18, %v4505_v12  ;;  %v4427_v5 = vsel %vm4426_vm10, %v8714_v3, %v4425_v54  ;;  %v4439_v8 = vmul.f32 %v6374_v11, %v8745_v33  ;;  %v6378_v13 = vpop.eup %6377  ;;  %v9737_v12 = vld [vmem:[#allocation19_spill] sm:$0xff] }
 0x264   : > { %6385 = vrcp.f32 %v9328_v47  ;;  %v4520_v27 = vmul.f32 %v6368_v44, %v4504_v2  ;;  %v9735_v56 = vmax.f32 %v8751_v7, 1e-12  ;;  %v9736_v47 = vand.u32 2147483648, %v8714_v3  ;;  %v8916_v3 = vpop.f32.mrf.mxu0 }
 0x265   : > { %6387 = vrcp.f32 %v9329_v23  ;;  %4549 = vst [vmem:[%s8801_s10 + $0x8] sm:$0xff] %v4533_v28  ;;  %v4448_v29 = vsel %vm4447_vm12, %v8736_v19, %v4446_v50  ;;  %v4537_v54 = vmul.f32 %v9737_v12, %v4521_v45  ;;  %v9738_v11 = vmax.f32 %v8766_v36, 1e-12  ;;  %9740 = vst [vmem:[#allocation80_spill] sm:$0xff] %v8916_v3 }
 0x266   : > { %v4491_v46 = vmul.f32 %v6376_v6, %v9735_v56  ;;  %v8901_v18 = vsel %vm4428_vm11, %v9736_v47, %v4427_v5  ;;  %v9739_v7 = vand.u32 2147483648, %v8736_v19  ;;  %v8918_v47 = vpop.f32.mrf.mxu1  ;;  %v9741_v5 = vld [vmem:[#allocation36_spill] sm:$0xff]  ;;  %v4441_v36 = vsel %vm4440_vm14, %v8745_v33, %v4439_v8 }
 0x267   : > { %v4490_v28 = vmul.f32 %v6378_v13, %v9738_v11  ;;  %v4464_v44 = vmax.f32 %v8901_v18, 1e-12  ;;  %v4536_v56 = vmul.f32 %v9741_v5, %v4520_v27  ;;  %4553 = vst [vmem:[%s8801_s10 + $0x28] sm:$0xff] %v4537_v54  ;;  %v8928_v19 = vsel %vm4442_vm15, %v4443_v34, %v4441_v36  ;;  %v9743_v54 = vld [vmem:[#allocation41_spill] sm:$0xff] }
 0x268   : > { %v8914_v2 = vsel %vm4449_vm13, %v9739_v7, %v4448_v29  ;;  %v4507_v50 = vsub.f32 2.0, %v4491_v46  ;;  %v4466_v27 = vmax.f32 %v8928_v19, 1e-12  ;;  %v6380_v46 = vpop.eup %6379  ;;  %v8932_v11 = vpop.f32.mrf.mxu0  ;;  %v9744_v33 = vmax.f32 %v8805_v58, 1e-12  ;;  %v9745_v5 = vld [vmem:[#allocation5_spill] sm:$0xff] }
 0x269   : > { %v4467_v45 = vmax.f32 %v8914_v2, 1e-12  ;;  %v4506_v18 = vsub.f32 2.0, %v4490_v28  ;;  %6389 = vrcp.f32 %v4464_v44  ;;  %4552 = vst [vmem:[%s8801_s10 + $0x20] sm:$0xff] %v4536_v56  ;;  %9742 = vst [vmem:[#allocation96_spill] sm:$0xff] %v8932_v11  ;;  %v8934_v7 = vpop.f32.mrf.mxu1  ;;  %v6382_v8 = vpop.eup %6381  ;;  %v9751_v11 = vld [vmem:[#allocation82_spill] sm:$0xff] }
 0x26a   : > { %v4523_v29 = vmul.f32 %v6376_v6, %v4507_v50  ;;  %v4493_v34 = vmul.f32 %v6380_v46, %v9744_v33  ;;  %v6384_v2 = vpop.eup %6383  ;;  %v9746_v56 = vmax.f32 %v8817_v43, 1e-12  ;;  %v8945_v19 = vpop.f32.mrf.mxu0  ;;  %v9749_v43 = vld [vmem:[#allocation6_spill] sm:$0xff] }
 0x26b   : > { %6391 = vrcp.f32 %v4467_v45  ;;  %v4522_v12 = vmul.f32 %v6378_v13, %v4506_v18  ;;  %v9747_v13 = vmax.f32 %v8829_v37, 1e-12  ;;  %9748 = vst [vmem:[#allocation109_spill] sm:$0xff] %v8945_v19  ;;  %v8947_v23 = vpop.f32.mrf.mxu1  ;;  %v9750_v37 = vmax.f32 %v8864_v60, 1e-12 }
 0x26c   : > { %v4539_v28 = vmul.f32 %v9743_v54, %v4523_v29  ;;  %6393 = vrcp.f32 %v4466_v27  ;;  %v4492_v50 = vmul.f32 %v6382_v8, %v9746_v56  ;;  %v4509_v36 = vsub.f32 2.0, %v4493_v34 }
 0x26d   : > { %v4538_v6 = vmul.f32 %v9745_v5, %v4522_v12  ;;  %v4495_v18 = vmul.f32 %v6384_v2, %v9747_v13 }
 0x26e   : > { %4555 = vst [vmem:[%s8801_s10 + $0x38] sm:$0xff] %v4539_v28  ;;  %v4508_v58 = vsub.f32 2.0, %v4492_v50  ;;  %v4525_v29 = vmul.f32 %v6380_v46, %v4509_v36  ;;  %v9753_v50 = vld [vmem:[#allocation93_spill] sm:$0xff] }
 0x26f   : > { %4554 = vst [vmem:[%s8801_s10 + $0x30] sm:$0xff] %v4538_v6  ;;  %v4511_v54 = vsub.f32 2.0, %v4495_v18  ;;  %v8953_v13 = vpop.f32.mrf.mxu1  ;;  %v6245_v19 = vpop.f32.mrf.mxu0  ;;  %v9752_v6 = vmax.f32 %v8874_v30, 1e-12  ;;  %v3379_v30 = vadd.f32 %v8552_v0, %v8532_v39 }
 0x270   : > { %v4524_v12 = vmul.f32 %v6382_v8, %v4508_v58  ;;  %v4541_v56 = vmul.f32 %v9749_v43, %v4525_v29 }
 0x271   : > { %v6386_v33 = vpop.eup %6385  ;;  %v4527_v28 = vmul.f32 %v6384_v2, %v4511_v54  ;;  %v8960_v18 = vpop.f32.mrf.mxu1  ;;  %v3385_v2 = vadd.f32 %v8548_v15, %v8528_v52  ;;  %v3397_v52 = vadd.f32 %v8556_v63, %v8540_v14  ;;  %v9754_v15 = vld [vmem:[#allocation59_spill] sm:$0xff]  ;;  %v3573_v39 = vadd.f32 %v8612_v24, %v3379_v30 }
 0x272   : > { %v6388_v5 = vpop.eup %6387  ;;  %v4494_v34 = vmul.f32 %v6386_v33, %v9750_v37  ;;  %v4540_v3 = vmul.f32 %v9751_v11, %v4524_v12  ;;  %4557 = vst [vmem:[%s8801_s10 + $0x48] sm:$0xff] %v4541_v56  ;;  %v4005_v58 = vpop.f32.mrf.mxu0 }
 0x273   : > { %v4497_v46 = vmul.f32 %v6388_v5, %v9752_v6  ;;  %v4543_v36 = vmul.f32 %v9753_v50, %v4527_v28  ;;  %v3580_v56 = vadd.f32 %v8608_v41, %v3385_v2  ;;  %v9755_v6 = vld [vmem:[#allocation24_spill] sm:$0xff]  ;;  %v3767_v24 = vadd.f32 %v8702_v62, %v3573_v39 }
 0x274   : > { %v4510_v8 = vsub.f32 2.0, %v4494_v34  ;;  %4556 = vst [vmem:[%s8801_s10 + $0x40] sm:$0xff] %v4540_v3  ;;  %v8969_v28 = vpop.f32.mrf.mxu1  ;;  %v6248_v37 = vpop.f32.mrf.mxu0 }
 0x275   : > { %v4513_v60 = vsub.f32 2.0, %v4497_v46  ;;  %4559 = vst [vmem:[%s8801_s10 + $0x58] sm:$0xff] %v4543_v36  ;;  %v3775_v0 = vadd.f32 %v8685_v59, %v3580_v56  ;;  %v3594_v36 = vadd.f32 %v8629_v51, %v3397_v52  ;;  %v3409_v59 = vadd.f32 %v8564_v55, %v8546_v25  ;;  %v6411_v51 = vld [vmem:[%s6577_s30 + $0x60] sm:$0xff] }
 0x276   : > { %v6390_v29 = vpop.eup %6389  ;;  %v4526_v54 = vmul.f32 %v6386_v33, %v4510_v8  ;;  %v4017_v41 = vpop.f32.mrf.mxu0  ;;  %v3403_v55 = vadd.f32 %v8568_v53, %v8550_v17  ;;  %v3421_v52 = vadd.f32 %v8572_v26, %v8554_v42  ;;  %v6413_v17 = vld [vmem:[%s6577_s30 + $0x70] sm:$0xff] }
 0x277   : > { %v4529_v11 = vmul.f32 %v6388_v5, %v4513_v60  ;;  %v4496_v12 = vmul.f32 %v6390_v29, %v4464_v44  ;;  %v8977_v44 = vpop.f32.mrf.mxu1  ;;  %v3391_v5 = vadd.f32 %v8560_v49, %v8542_v61  ;;  %v4012_v8 = vadd.f32 %v6245_v19, %v3775_v0 }
 0x278   : > { %v6392_v43 = vpop.eup %6391  ;;  %v4542_v3 = vmul.f32 %v9754_v15, %v4526_v54  ;;  %v3791_v62 = vadd.f32 %v8729_v40, %v3594_v36  ;;  %v4006_v19 = vadd.f32 %v4005_v58, %v3767_v24  ;;  %v3622_v26 = vadd.f32 %v8727_v32, %v3421_v52  ;;  %v9757_v32 = vld [vmem:[#allocation97_spill] sm:$0xff]  ;;  %v9759_v24 = vld [vmem:[#allocation16_spill] sm:$0xff]  ;;  %v9767_v52 = vld [vmem:[#allocation11_spill] sm:$0xff] }
 0x279   : > { %v4499_v34 = vmul.f32 %v6392_v43, %v4467_v45  ;;  %v6394_v33 = vpop.eup %6393  ;;  %v4545_v46 = vmul.f32 %v9755_v6, %v4529_v11  ;;  %v4512_v50 = vsub.f32 2.0, %v4496_v12  ;;  %v3587_v61 = vadd.f32 %v8651_v9, %v3391_v5  ;;  %v6251_v49 = vpop.f32.mrf.mxu0  ;;  %v6412_v9 = vld [vmem:[%s6577_s30 + $0x78] sm:$0xff] }
 0x27a   : > { %4558 = vst [vmem:[%s8801_s10 + $0x50] sm:$0xff] %v4542_v3  ;;  %v4498_v63 = vmul.f32 %v6394_v33, %v4466_v27  ;;  %v6301_v27 = vpop.f32.mrf.mxu1  ;;  %v3608_v12 = vadd.f32 %v8676_v21, %v3409_v59  ;;  %v4024_v40 = vadd.f32 %v6248_v37, %v3791_v62  ;;  %v3415_v37 = vadd.f32 %v8576_v16, %v8558_v48  ;;  %v9760_v59 = vld [vmem:[#allocation92_spill] sm:$0xff] }
 0x27b   : > { %v4515_v14 = vsub.f32 2.0, %v4499_v34  ;;  %4561 = vst [vmem:[%s8801_s10 + $0x68] sm:$0xff] %v4545_v46  ;;  %v4528_v45 = vmul.f32 %v6390_v29, %v4512_v50  ;;  %v4189_v25 = vadd.f32 %v6301_v27, %v4012_v8  ;;  %v4029_v30 = vpop.f32.mrf.mxu0  ;;  %v3783_v56 = vadd.f32 %v8759_v22, %v3587_v61  ;;  %v9762_v61 = vld [vmem:[#allocation23_spill] sm:$0xff] }
 0x27c   : > { %v4514_v60 = vsub.f32 2.0, %v4498_v63  ;;  %v4182_v11 = vpop.f32.mrf.mxu1  ;;  %v3601_v34 = vadd.f32 %v8691_v20, %v3403_v55  ;;  %v3823_v48 = vadd.f32 %v8841_v1, %v3622_v26  ;;  %v9758_v63 = vld [vmem:[#allocation18_spill] sm:$0xff]  ;;  %v9764_v55 = vld [vmem:[#allocation27_spill] sm:$0xff] }
 0x27d   : > { %v4531_v2 = vmul.f32 %v6392_v43, %v4515_v14  ;;  %v4544_v29 = vmul.f32 %v6411_v51, %v4528_v45  ;;  %4277 = vst [vmem:[%s8992_s13 + $0x8] sm:$0xff] %v4189_v25  ;;  %v4183_v58 = vadd.f32 %v4182_v11, %v4006_v19  ;;  %v6254_v15 = vpop.f32.mrf.mxu0  ;;  %v4018_v21 = vadd.f32 %v4017_v41, %v3783_v56  ;;  %v9756_v41 = vld [vmem:[#allocation38_spill] sm:$0xff] }
 0x27e   : > { %v4530_v43 = vmul.f32 %v6394_v33, %v4514_v60  ;;  %v6304_v3 = vpop.f32.mrf.mxu1  ;;  %v3807_v33 = vadd.f32 %v8781_v31, %v3608_v12  ;;  %v3799_v46 = vadd.f32 %v8795_v35, %v3601_v34  ;;  %v3433_v31 = vadd.f32 %v8580_v10, %v8562_v38  ;;  %v9761_v60 = vld [vmem:[#allocation62_spill] sm:$0xff] }
 0x27f   : > { %v4547_v54 = vmul.f32 %v6412_v9, %v4531_v2  ;;  %4560 = vst [vmem:[%s8801_s10 + $0x60] sm:$0xff] %v4544_v29  ;;  %4276 = vst [vmem:[%s8992_s13] sm:$0xff] %v4183_v58  ;;  %v4201_v22 = vadd.f32 %v6304_v3, %v4024_v40  ;;  %v4041_v6 = vpop.f32.mrf.mxu0  ;;  %v3615_v5 = vadd.f32 %v9756_v41, %v3415_v37  ;;  %v9763_v51 = vld [vmem:[#allocation2_spill] sm:$0xff]  ;;  %v9765_v9 = vld [vmem:[#allocation101_spill] sm:$0xff] }
 0x280   : > { %v4546_v53 = vmul.f32 %v6413_v17, %v4530_v43  ;;  %v4194_v42 = vpop.f32.mrf.mxu1  ;;  %v4036_v50 = vadd.f32 %v6251_v49, %v3807_v33  ;;  %v4030_v16 = vadd.f32 %v4029_v30, %v3799_v46  ;;  %v3427_v35 = vadd.f32 %v9758_v63, %v9757_v32  ;;  %v9766_v11 = vld [vmem:[#allocation78_spill] sm:$0xff]  ;;  %v9768_v17 = vld [vmem:[#allocation65_spill] sm:$0xff]  ;;  %v9775_v63 = vld [vmem:[#allocation88_spill] sm:$0xff] }
 0x281   : > { %4563 = vst [vmem:[%s8801_s10 + $0x78] sm:$0xff] %v4547_v54  ;;  %4279 = vst [vmem:[%s8992_s13 + $0x18] sm:$0xff] %v4201_v22  ;;  %v4195_v20 = vadd.f32 %v4194_v42, %v4018_v21  ;;  %v6257_v39 = vpop.f32.mrf.mxu0  ;;  %v3636_v8 = vadd.f32 %v9759_v24, %v3433_v31  ;;  %v3815_v2 = vadd.f32 %v9760_v59, %v3615_v5  ;;  %v9769_v3 = vld [vmem:[#allocation53_spill] sm:$0xff]  ;;  %v9770_v37 = vld [vmem:[#allocation50_spill] sm:$0xff] }
 0x282   : > { %4562 = vst [vmem:[%s8801_s10 + $0x70] sm:$0xff] %v4546_v53  ;;  %v6307_v0 = vpop.f32.mrf.mxu1  ;;  %v4048_v38 = vadd.f32 %v6254_v15, %v3823_v48  ;;  %v3445_v1 = vadd.f32 %v9762_v61, %v9761_v60  ;;  %v3629_v29 = vadd.f32 %v9763_v51, %v3427_v35  ;;  %v3439_v54 = vadd.f32 %v9765_v9, %v9764_v55  ;;  %v9774_v5 = vld [vmem:[#allocation80_spill] sm:$0xff] }
 0x283   : > { %4278 = vst [vmem:[%s8992_s13 + $0x10] sm:$0xff] %v4195_v20  ;;  %v4213_v14 = vadd.f32 %v6307_v0, %v4036_v50  ;;  %v4053_v45 = vpop.f32.mrf.mxu0  ;;  %v3839_v62 = vadd.f32 %v8885_v4, %v3636_v8  ;;  %v4042_v19 = vadd.f32 %v4041_v6, %v3815_v2  ;;  %v3457_v4 = vadd.f32 %v9768_v17, %v9767_v52  ;;  %v9771_v6 = vld [vmem:[#allocation34_spill] sm:$0xff]  ;;  %v9773_v0 = vld [vmem:[#allocation105_spill] sm:$0xff] }
 0x284   : > { %v4206_v36 = vpop.f32.mrf.mxu1  ;;  %v3650_v12 = vadd.f32 %v9766_v11, %v3445_v1  ;;  %v3831_v56 = vadd.f32 %v8918_v47, %v3629_v29  ;;  %v3643_v34 = vadd.f32 %v9769_v3, %v3439_v54  ;;  %v3451_v47 = vadd.f32 %v9771_v6, %v9770_v37 }
 0x285   : > { %4281 = vst [vmem:[%s8992_s13 + $0x28] sm:$0xff] %v4213_v14  ;;  %v4207_v10 = vadd.f32 %v4206_v36, %v4030_v16  ;;  %v6260_v49 = vpop.f32.mrf.mxu0  ;;  %v4060_v40 = vadd.f32 %v6257_v39, %v3839_v62  ;;  %v3664_v46 = vadd.f32 %v8883_v57, %v3457_v4  ;;  %v9772_v39 = vld [vmem:[#allocation85_spill] sm:$0xff]  ;;  %v9776_v57 = vld [vmem:[#allocation68_spill] sm:$0xff] }
 0x286   : > { %v6310_v27 = vpop.f32.mrf.mxu1  ;;  %v3855_v33 = vadd.f32 %v8934_v7, %v3650_v12  ;;  %v4054_v21 = vadd.f32 %v4053_v45, %v3831_v56  ;;  %v3847_v50 = vadd.f32 %v8947_v23, %v3643_v34  ;;  %v3469_v7 = vadd.f32 %v9773_v0, %v9772_v39  ;;  %v9777_v36 = vld [vmem:[#allocation96_spill] sm:$0xff] }
 0x287   : > { %4280 = vst [vmem:[%s8992_s13 + $0x20] sm:$0xff] %v4207_v10  ;;  %v4225_v25 = vadd.f32 %v6310_v27, %v4048_v38  ;;  %v4065_v43 = vpop.f32.mrf.mxu0  ;;  %v3657_v48 = vadd.f32 %v9774_v5, %v3451_v47  ;;  %v3871_v16 = vadd.f32 %v8953_v13, %v3664_v46  ;;  %v3463_v35 = vadd.f32 %v9776_v57, %v9775_v63  ;;  %v9778_v13 = vld [vmem:[#allocation109_spill] sm:$0xff] }
 0x288   : > { %v4218_v30 = vpop.f32.mrf.mxu1  ;;  %v4072_v20 = vadd.f32 %v6260_v49, %v3855_v33  ;;  %v4066_v14 = vadd.f32 %v4065_v43, %v3847_v50  ;;  %v3678_v24 = vadd.f32 %v9777_v36, %v3469_v7 }
 0x289   : > { %4283 = vst [vmem:[%s8992_s13 + $0x38] sm:$0xff] %v4225_v25  ;;  %v4219_v58 = vadd.f32 %v4218_v30, %v4042_v19  ;;  %v6263_v53 = vpop.f32.mrf.mxu0  ;;  %v3863_v8 = vadd.f32 %v8960_v18, %v3657_v48  ;;  %v3671_v10 = vadd.f32 %v9778_v13, %v3463_v35 }
 0x28a   : > { %v6313_v15 = vpop.f32.mrf.mxu1  ;;  %v4084_v59 = vadd.f32 %v6263_v53, %v3871_v16  ;;  %v3887_v60 = vadd.f32 %v8969_v28, %v3678_v24 }
 0x28b   : > { %4282 = vst [vmem:[%s8992_s13 + $0x30] sm:$0xff] %v4219_v58  ;;  %v4237_v22 = vadd.f32 %v6313_v15, %v4060_v40  ;;  %v4077_v42 = vpop.f32.mrf.mxu0  ;;  %v3879_v51 = vadd.f32 %v8977_v44, %v3671_v10 }
 0x28c   : > { %v4230_v26 = vpop.f32.mrf.mxu1  ;;  %v4078_v61 = vadd.f32 %v4077_v42, %v3863_v8 }
 0x28d   : > { %4285 = vst [vmem:[%s8992_s13 + $0x48] sm:$0xff] %v4237_v22  ;;  %v4231_v31 = vadd.f32 %v4230_v26, %v4054_v21  ;;  %v6266_v23 = vpop.f32.mrf.mxu0 }
 0x28e   : > { %v6316_v41 = vpop.f32.mrf.mxu1  ;;  %v4096_v29 = vadd.f32 %v6266_v23, %v3887_v60 }
 0x28f   : > { %4284 = vst [vmem:[%s8992_s13 + $0x40] sm:$0xff] %v4231_v31  ;;  %v4249_v32 = vadd.f32 %v6316_v41, %v4072_v20  ;;  %v4089_v49 = vpop.f32.mrf.mxu0 }
 0x290   : > { %v4242_v45 = vpop.f32.mrf.mxu1  ;;  %v4090_v19 = vadd.f32 %v4089_v49, %v3879_v51 }
 0x291   : > { %4287 = vst [vmem:[%s8992_s13 + $0x58] sm:$0xff] %v4249_v32  ;;  %v4243_v2 = vadd.f32 %v4242_v45, %v4066_v14 }
 0x292   : > { %v6319_v38 = vpop.f32.mrf.mxu1 }
 0x293   : > { %4286 = vst [vmem:[%s8992_s13 + $0x50] sm:$0xff] %v4243_v2  ;;  %v4261_v1 = vadd.f32 %v6319_v38, %v4084_v59 }
 0x294   : > { %v4254_v27 = vpop.f32.mrf.mxu1 }
 0x295   : > { %4289 = vst [vmem:[%s8992_s13 + $0x68] sm:$0xff] %v4261_v1  ;;  %v4255_v18 = vadd.f32 %v4254_v27, %v4078_v61 }
 0x296   : > { %v6322_v62 = vpop.f32.mrf.mxu1 }
 0x297   : > { %4288 = vst [vmem:[%s8992_s13 + $0x60] sm:$0xff] %v4255_v18  ;;  %v4273_v25 = vadd.f32 %v6322_v62, %v4096_v29 }
 0x298   : > { %v4266_v55 = vpop.f32.mrf.mxu1 }
 0x299   : > { %4291 = vst [vmem:[%s8992_s13 + $0x78] sm:$0xff] %v4273_v25  ;;  %v4267_v9 = vadd.f32 %v4266_v55, %v4090_v19 }
 0x29b   : > { %4290 = vst [vmem:[%s8992_s13 + $0x70] sm:$0xff] %v4267_v9 }
 0x29c PF: > { %s18_s24 = sadd.s32 1, %s6420_s24  }
 0x29d   : > { %p15_p4 = scmp.ge.s32.totalorder %s18_s24, 4  }
 0x29f   :  { %17 = sbr.rel (!%p15_p4) target bundleno = 1 (0x1), region = 102 }

// kernel: self_attention_forward.4
= control target key start
LH: loop header
LB: loop body
LE: loop exit
PB: predicated region body
PF: predicated region fallthrough
CT: control target
= control target key end

     0   :  { %s14490_s0 = inlined_call_operand.vmem [shape: f32[128,128], index: 0, kind: input, shape index: {}]   ;;  %s14491_s1 = inlined_call_operand.vmem [shape: f32[256,128], index: 1, kind: input, shape index: {}]   ;;  %s14492_s2 = inlined_call_operand.vmem [shape: f32[256,128], index: 2, kind: input, shape index: {}]   ;;  %s14493_s3 = inlined_call_operand.vmem [shape: f32[256,128], index: 3, kind: input, shape index: {}]   ;;  %s14494_s4 = inlined_call_operand.vmem [shape: f32[256,128], index: 4, kind: input, shape index: {}, may-alias: {4,5}]   ;;  %s14495_s5 = inlined_call_operand.vmem [shape: f32[256,128], index: 5, kind: input, shape index: {}, may-alias: {4,5}]   ;;  %s14496_s6 = inlined_call_operand.vmem [shape: f32[128,128], index: 6, kind: input, shape index: {}]   ;;  %s14497_s7 = inlined_call_operand.vmem [shape: f32[1,128], index: 7, kind: input, shape index: {}]   ;;  %s14498_s8 = inlined_call_operand.vmem [shape: f32[256,128], index: 8, kind: output, shape index: {0}]   ;;  %s14499_s9 = inlined_call_operand.hbm [shape: f32[256,256], index: 9, kind: output, shape index: {1}]   ;;  %s14500_s10 = inlined_call_operand.vmem [shape: f32[256,1], index: 10, kind: output, shape index: {2}]  }
   0x1   :  { %14851 = sst [smem:[#allocation120_spill]] %s14499_s9 }
   0x2   :  { %16 = vsyncpa [#allocation8], 0 }
   0x3   :  { %18 = vsyncpa [#allocation8 + $0x1], 0  ;;  %s10207_s13 = smov 0   ;;  %s10209_s14 = smov 0  }
   0x4   :  { %s10211_s15 = smov 0   ;;  %s10213_s16 = smov 0  }
   0x5   :  { %s10215_s17 = smov 0   ;;  %s10217_s18 = smov 0  }
   0x6   :  { %s10219_s19 = smov 0   ;;  %s10221_s20 = smov 0  }
   0x7 LB: > { %14852 = sst [smem:[#allocation10_spill]] %s10113_s13  ;;  %s33_s21 = sadd.s32 1, %s10133_s18  ;;  %s10141_s20 = sphi %s10221_s20, %s24_s20   ;;  %s10137_s19 = sphi %s10219_s19, %s15413_s19   ;;  %s10133_s18 = sphi %s10217_s18, %s15412_s18   ;;  %s10129_s17 = sphi %s10215_s17, %s15411_s17   ;;  %s10125_s16 = sphi %s10213_s16, %s15410_s16   ;;  %s10121_s15 = sphi %s10211_s15, %s15409_s15   ;;  %s10117_s14 = sphi %s10209_s14, %s15415_s14   ;;  %s10113_s13 = sphi %s10207_s13, %s15414_s13  }
   0x8   : > { %14853 = sst [smem:[#allocation11_spill]] %s10121_s15  ;;  %s36_s22 = sadd.s32 1, %s10137_s19 }
   0x9   : > { %14854 = sst [smem:[#allocation12_spill]] %s10133_s18  ;;  %p34_p0 = scmp.ge.s32.totalorder %s33_s21, 2 }
   0xa   : > { %14855 = sst [smem:[#allocation13_spill]] %s10137_s19  ;;  %s316_s23 = sadd.s32 %s10133_s18, %s36_s22 }
   0xb   : > { %14856 = sst [smem:[#allocation14_spill]] %s10141_s20  ;;  %s7637_s24 = sadd.s32 4294967295, %s10141_s20  }
   0xc   : > { %s318_s25 = ssub.s32 0, %s316_s23  ;;  %s15417_s21 = smov (%p34_p0, %s33_s21), 0 }
   0xd   : > { %14857 = sst [smem:[#allocation15_spill]] %s15417_s21  ;;  %s15419_s22 = smov (!%p34_p0, %s36_s22), %s10137_s19 }
   0xe   : > { %s7651_s26 = smin.u32 %s318_s25, %s316_s23  ;;  %p38_p1 = scmp.ge.s32.totalorder %s15419_s22, 2 }
   0xf   : > { %s320_s27 = sand.u32 1, %s7651_s26   ;;  %s7638_s28 = sadd.s32 4294967294, %s10141_s20  }
  0x10   : > { %s15421_s22 = smov (%p38_p1, %s15419_s22), 0  ;;  %p358_p2 = scmp.ne.s32.totalorder %s10121_s15, %s10117_s14 }
  0x11   : > { %14858 = sst [smem:[#allocation16_spill]] %s15421_s22  ;;  %s329_s29 = sadd.s32 1, %s15421_s22 }
  0x12   : > { %p7653_p3 = scmp.lt.s32.totalorder %s320_s27, 0  ;;  %s327_s30 = sadd.s32 2, %s320_s27 }
  0x13   : > { %s330_s11 = sadd.s32 %s329_s29, %s15417_s21  ;;  %p359_p4 = scmp.eq.s32.totalorder %s7637_s24, 3 }
  0x14   : > { %s15423_s30 = smov (!%p7653_p3, %s327_s30), %s320_s27  ;;  %s332_s12 = ssub.s32 0, %s330_s11 }
  0x15   : > { %s7654_s23 = smin.u32 %s332_s12, %s330_s11  ;;  %p10261_p5 = por %p359_p4, %p358_p2 }
  0x16   : > { %s334_s26 = sand.u32 1, %s7654_s23   ;;  %p364_p6 = scmp.ne.s32.totalorder %s10117_s14, %s10113_s13 }
  0x17   : > { %s14859_s25 = scalar_select %p10261_p5, 1, 0 }
  0x18   : > { %p365_p7 = scmp.eq.s32.totalorder %s7638_s28, 3  ;;  %p7659_p9 = scmp.ge.s32.totalorder %s10141_s20, 1 }
  0x19   : > { %14860 = sst [smem:[#allocation17_spill]] %s14859_s25  ;;  %p7656_p10 = scmp.lt.s32.totalorder %s334_s26, 0 }
  0x1a   : > { %p10267_p8 = por %p365_p7, %p364_p6  ;;  %s341_s29 = sadd.s32 2, %s334_s26 }
  0x1b   : > { %s343_s24 = ssub.s32 %s10137_s19, %s15421_s22  ;;  %p519_p11 = scmp.lt.s32.totalorder %s10141_s20, 5 }
  0x1c   : > { %s14861_s18 = scalar_select %p10267_p8, 1, 0 }
  0x1d   : > { %s15425_s29 = smov (!%p7656_p10, %s341_s29), %s334_s26  ;;  %p520_p12 = pnand %p7659_p9, %p519_p11 }
  0x1e   : > { %14862 = sst [smem:[#allocation18_spill]] %s14861_s18  ;;  %s344_s27 = ssub.s32 %s15423_s30, %s15425_s29 }
  0x1f   : > { %s345_s11 = sor.u32 %s344_s27, %s343_s24  ;;  %s348_s12 = sadd.s32 1, %s10121_s15 }
  0x20   : > { %p346_p13 = scmp.eq.s32.totalorder %s345_s11, 0  ;;  %523 = sbr.rel (%p520_p12) target bundleno = 1900 (0x76c), region = 52 }
  0x22   : > { %s10277_s21 = scalar_select %p346_p13, %s10121_s15, %s348_s12  }
  0x24   : > { %14863 = sst [smem:[#allocation19_spill]] %s10277_s21 }
  0x25   : > { %s14507_s28 = sand.u32 1, %s10117_s14   ;;  %s7661_s23 = sshll.u32 %s10129_s17, 4 }
  0x26   : > { %s7660_s22 = sshll.u32 %s14507_s28, 7  ;;  %p616_p0 = scmp.lt.s32.totalorder %s7661_s23, 31 }
  0x27   : > { %s621_s26 = sadd.s32 1, %s10129_s17  ;;  %p728_p1 = scmp.eq.s32.totalorder %s10125_s16, 1 }
  0x28   : > { %s15427_s23 = smov (!%p616_p0, %s7661_s23), 31  ;;  %s622_s30 = sadd.s32 %s10125_s16, %s621_s26 }
  0x29   : > { %s7662_s29 = sshll.u32 %s15427_s23, 3  ;;  %p623_p2 = scmp.lt.s32.totalorder %s622_s30, 0 }
  0x2a   : > { %s10289_s11 = scalar_lea.vmem %s14491_s1, %s7662_s29  ;;  %s624_s12 = ssub.s32 0, %s622_s30 }
  0x2b   : > { %s7663_s19 = smin.u32 %s624_s12, %s622_s30  ;;  %s10294_s18 = scalar_lea.vmem %s14493_s3, %s7662_s29 }
  0x2c   : > { %s626_s28 = sand.u32 1, %s7663_s19   ;;  %s10299_s26 = scalar_lea.vmem %s14494_s4, %s7662_s29 }
  0x2d   : > { %s627_s23 = ssub.s32 0, %s626_s28  ;;  %s10304_s24 = scalar_lea.vmem %s14498_s8, %s7662_s29 }
  0x2e   : > { %s15429_s23 = smov (!%p623_p2, %s627_s23), %s626_s28  ;;  %s10309_s12 = scalar_lea.vmem %s14500_s10, %s7662_s29 }
  0x2f   : > { %p7665_p3 = scmp.lt.s32.totalorder %s15429_s23, 0  ;;  %s633_s15 = sadd.s32 2, %s15429_s23 }
  0x30   : > { %s10324_s29 = scalar_lea.vmem [#allocation7], %s7660_s22  ;;  %p7681_p6 = scmp.ne.s32.totalorder %s10125_s16, 0 }
  0x31   : > { %s15431_s15 = smov (!%p7665_p3, %s633_s15), %s15429_s23 }
  0x32   : > { %s7666_s13 = sshll.u32 %s15431_s15, 4 }
  0x33   : > { %p636_p4 = scmp.lt.s32.totalorder %s7666_s13, 31  ;;  %732 = sbr.rel (%p7681_p6) target bundleno = 97 (0x61), region = 56 }
  0x35   : > { %s15433_s13 = smov (!%p636_p4, %s7666_s13), 31 }
  0x36   : > { %s7667_s19 = sshll.u32 %s15433_s13, 3 }
  0x37   : > { %s10317_s9 = scalar_lea.vmem %s14492_s2, %s7667_s19  ;;  %s10322_s27 = scalar_lea.vmem %s14495_s5, %s7667_s19 }
  0x38   : > { %vm733_vm0 = vcmask 7168   ;;  %v10143_v0 = vmov -1e+30   ;;  %v10144_v1 = vmov 0.0  }
  0x39   : > { %734 = vst.msk [vmem:[#allocation2] sm:$0xff] %vm733_vm0, %v10143_v0  ;;  %735 = vst.msk [vmem:[#allocation2 + $0x8] sm:$0xff] %vm733_vm0, %v10143_v0 }
  0x3a   : > { %736 = vst.msk [vmem:[#allocation2 + $0x10] sm:$0xff] %vm733_vm0, %v10143_v0  ;;  %737 = vst.msk [vmem:[#allocation2 + $0x18] sm:$0xff] %vm733_vm0, %v10143_v0 }
  0x3b   : > { %738 = vst.msk [vmem:[#allocation2 + $0x20] sm:$0xff] %vm733_vm0, %v10143_v0  ;;  %739 = vst.msk [vmem:[#allocation2 + $0x28] sm:$0xff] %vm733_vm0, %v10143_v0 }
  0x3c   : > { %740 = vst.msk [vmem:[#allocation2 + $0x30] sm:$0xff] %vm733_vm0, %v10143_v0  ;;  %741 = vst.msk [vmem:[#allocation2 + $0x38] sm:$0xff] %vm733_vm0, %v10143_v0 }
  0x3d   : > { %742 = vst.msk [vmem:[#allocation2 + $0x40] sm:$0xff] %vm733_vm0, %v10143_v0  ;;  %743 = vst.msk [vmem:[#allocation2 + $0x48] sm:$0xff] %vm733_vm0, %v10143_v0 }
  0x3e   : > { %744 = vst.msk [vmem:[#allocation2 + $0x50] sm:$0xff] %vm733_vm0, %v10143_v0  ;;  %745 = vst.msk [vmem:[#allocation2 + $0x58] sm:$0xff] %vm733_vm0, %v10143_v0 }
  0x3f   : > { %746 = vst.msk [vmem:[#allocation2 + $0x60] sm:$0xff] %vm733_vm0, %v10143_v0  ;;  %747 = vst.msk [vmem:[#allocation2 + $0x68] sm:$0xff] %vm733_vm0, %v10143_v0 }
  0x40   : > { %748 = vst.msk [vmem:[#allocation2 + $0x70] sm:$0xff] %vm733_vm0, %v10143_v0  ;;  %749 = vst.msk [vmem:[#allocation2 + $0x78] sm:$0xff] %vm733_vm0, %v10143_v0 }
  0x41   : > { %750 = vst.msk [vmem:[#allocation3] sm:$0xff] %vm733_vm0, %v10144_v1  ;;  %751 = vst.msk [vmem:[#allocation3 + $0x8] sm:$0xff] %vm733_vm0, %v10144_v1 }
  0x42   : > { %752 = vst.msk [vmem:[#allocation3 + $0x10] sm:$0xff] %vm733_vm0, %v10144_v1  ;;  %753 = vst.msk [vmem:[#allocation3 + $0x18] sm:$0xff] %vm733_vm0, %v10144_v1 }
  0x43   : > { %754 = vst.msk [vmem:[#allocation3 + $0x20] sm:$0xff] %vm733_vm0, %v10144_v1  ;;  %755 = vst.msk [vmem:[#allocation3 + $0x28] sm:$0xff] %vm733_vm0, %v10144_v1 }
  0x44   : > { %756 = vst.msk [vmem:[#allocation3 + $0x30] sm:$0xff] %vm733_vm0, %v10144_v1  ;;  %757 = vst.msk [vmem:[#allocation3 + $0x38] sm:$0xff] %vm733_vm0, %v10144_v1 }
  0x45   : > { %758 = vst.msk [vmem:[#allocation3 + $0x40] sm:$0xff] %vm733_vm0, %v10144_v1  ;;  %759 = vst.msk [vmem:[#allocation3 + $0x48] sm:$0xff] %vm733_vm0, %v10144_v1 }
  0x46   : > { %760 = vst.msk [vmem:[#allocation3 + $0x50] sm:$0xff] %vm733_vm0, %v10144_v1  ;;  %761 = vst.msk [vmem:[#allocation3 + $0x58] sm:$0xff] %vm733_vm0, %v10144_v1 }
  0x47   : > { %762 = vst.msk [vmem:[#allocation3 + $0x60] sm:$0xff] %vm733_vm0, %v10144_v1  ;;  %763 = vst.msk [vmem:[#allocation3 + $0x68] sm:$0xff] %vm733_vm0, %v10144_v1 }
  0x48   : > { %764 = vst.msk [vmem:[#allocation3 + $0x70] sm:$0xff] %vm733_vm0, %v10144_v1  ;;  %765 = vst.msk [vmem:[#allocation3 + $0x78] sm:$0xff] %vm733_vm0, %v10144_v1 }
  0x49   : > { %766 = vst.msk [vmem:[#allocation4] sm:$0xff] %vm733_vm0, %v10144_v1  ;;  %767 = vst.msk [vmem:[#allocation4 + $0x8] sm:$0xff] %vm733_vm0, %v10144_v1 }
  0x4a   : > { %768 = vst.msk [vmem:[#allocation4 + $0x10] sm:$0xff] %vm733_vm0, %v10144_v1  ;;  %769 = vst.msk [vmem:[#allocation4 + $0x18] sm:$0xff] %vm733_vm0, %v10144_v1 }
  0x4b   : > { %770 = vst.msk [vmem:[#allocation4 + $0x20] sm:$0xff] %vm733_vm0, %v10144_v1  ;;  %771 = vst.msk [vmem:[#allocation4 + $0x28] sm:$0xff] %vm733_vm0, %v10144_v1 }
  0x4c   : > { %772 = vst.msk [vmem:[#allocation4 + $0x30] sm:$0xff] %vm733_vm0, %v10144_v1  ;;  %773 = vst.msk [vmem:[#allocation4 + $0x38] sm:$0xff] %vm733_vm0, %v10144_v1 }
  0x4d   : > { %774 = vst.msk [vmem:[#allocation4 + $0x40] sm:$0xff] %vm733_vm0, %v10144_v1  ;;  %775 = vst.msk [vmem:[#allocation4 + $0x48] sm:$0xff] %vm733_vm0, %v10144_v1 }
  0x4e   : > { %776 = vst.msk [vmem:[#allocation4 + $0x50] sm:$0xff] %vm733_vm0, %v10144_v1  ;;  %777 = vst.msk [vmem:[#allocation4 + $0x58] sm:$0xff] %vm733_vm0, %v10144_v1 }
  0x4f   : > { %778 = vst.msk [vmem:[#allocation4 + $0x60] sm:$0xff] %vm733_vm0, %v10144_v1  ;;  %779 = vst.msk [vmem:[#allocation4 + $0x68] sm:$0xff] %vm733_vm0, %v10144_v1 }
  0x50   : > { %780 = vst.msk [vmem:[#allocation4 + $0x70] sm:$0xff] %vm733_vm0, %v10144_v1  ;;  %781 = vst.msk [vmem:[#allocation4 + $0x78] sm:$0xff] %vm733_vm0, %v10144_v1 }
  0x51   : > { %782 = vst.msk [vmem:[#allocation5] sm:$0xff] %vm733_vm0, %v10144_v1  ;;  %783 = vst.msk [vmem:[#allocation5 + $0x8] sm:$0xff] %vm733_vm0, %v10144_v1 }
  0x52   : > { %784 = vst.msk [vmem:[#allocation5 + $0x10] sm:$0xff] %vm733_vm0, %v10144_v1  ;;  %785 = vst.msk [vmem:[#allocation5 + $0x18] sm:$0xff] %vm733_vm0, %v10144_v1 }
  0x53   : > { %786 = vst.msk [vmem:[#allocation5 + $0x20] sm:$0xff] %vm733_vm0, %v10144_v1  ;;  %787 = vst.msk [vmem:[#allocation5 + $0x28] sm:$0xff] %vm733_vm0, %v10144_v1 }
  0x54   : > { %788 = vst.msk [vmem:[#allocation5 + $0x30] sm:$0xff] %vm733_vm0, %v10144_v1  ;;  %789 = vst.msk [vmem:[#allocation5 + $0x38] sm:$0xff] %vm733_vm0, %v10144_v1 }
  0x55   : > { %790 = vst.msk [vmem:[#allocation5 + $0x40] sm:$0xff] %vm733_vm0, %v10144_v1  ;;  %791 = vst.msk [vmem:[#allocation5 + $0x48] sm:$0xff] %vm733_vm0, %v10144_v1 }
  0x56   : > { %792 = vst.msk [vmem:[#allocation5 + $0x50] sm:$0xff] %vm733_vm0, %v10144_v1  ;;  %793 = vst.msk [vmem:[#allocation5 + $0x58] sm:$0xff] %vm733_vm0, %v10144_v1 }
  0x57   : > { %794 = vst.msk [vmem:[#allocation5 + $0x60] sm:$0xff] %vm733_vm0, %v10144_v1  ;;  %795 = vst.msk [vmem:[#allocation5 + $0x68] sm:$0xff] %vm733_vm0, %v10144_v1 }
  0x58   : > { %796 = vst.msk [vmem:[#allocation5 + $0x70] sm:$0xff] %vm733_vm0, %v10144_v1  ;;  %797 = vst.msk [vmem:[#allocation5 + $0x78] sm:$0xff] %vm733_vm0, %v10144_v1 }
  0x59   : > { %798 = vst.msk [vmem:[#allocation6] sm:$0xff] %vm733_vm0, %v10144_v1  ;;  %799 = vst.msk [vmem:[#allocation6 + $0x8] sm:$0xff] %vm733_vm0, %v10144_v1 }
  0x5a   : > { %800 = vst.msk [vmem:[#allocation6 + $0x10] sm:$0xff] %vm733_vm0, %v10144_v1  ;;  %801 = vst.msk [vmem:[#allocation6 + $0x18] sm:$0xff] %vm733_vm0, %v10144_v1 }
  0x5b   : > { %802 = vst.msk [vmem:[#allocation6 + $0x20] sm:$0xff] %vm733_vm0, %v10144_v1  ;;  %803 = vst.msk [vmem:[#allocation6 + $0x28] sm:$0xff] %vm733_vm0, %v10144_v1 }
  0x5c   : > { %804 = vst.msk [vmem:[#allocation6 + $0x30] sm:$0xff] %vm733_vm0, %v10144_v1  ;;  %805 = vst.msk [vmem:[#allocation6 + $0x38] sm:$0xff] %vm733_vm0, %v10144_v1 }
  0x5d   : > { %806 = vst.msk [vmem:[#allocation6 + $0x40] sm:$0xff] %vm733_vm0, %v10144_v1  ;;  %807 = vst.msk [vmem:[#allocation6 + $0x48] sm:$0xff] %vm733_vm0, %v10144_v1 }
  0x5e   : > { %808 = vst.msk [vmem:[#allocation6 + $0x50] sm:$0xff] %vm733_vm0, %v10144_v1  ;;  %809 = vst.msk [vmem:[#allocation6 + $0x58] sm:$0xff] %vm733_vm0, %v10144_v1 }
  0x5f   : > { %810 = vst.msk [vmem:[#allocation6 + $0x60] sm:$0xff] %vm733_vm0, %v10144_v1  ;;  %811 = vst.msk [vmem:[#allocation6 + $0x68] sm:$0xff] %vm733_vm0, %v10144_v1 }
  0x60   : > { %812 = vst.msk [vmem:[#allocation6 + $0x70] sm:$0xff] %vm733_vm0, %v10144_v1  ;;  %813 = vst.msk [vmem:[#allocation6 + $0x78] sm:$0xff] %vm733_vm0, %v10144_v1 }
  0x61 PF: > { %v861_v2 = vld [vmem:[%s10317_s9 + $0x78] sm:$0xff]  ;;  %v860_v3 = vld [vmem:[%s10317_s9 + $0x70] sm:$0xff]  ;;  %v859_v4 = vld [vmem:[%s10317_s9 + $0x68] sm:$0xff]  ;;  %v10145_v5 = vmov 0.0   ;;  %vm3869_vm1 = vcmask 7168   ;;  %p7682_p7 = scmp.ne.s32.totalorder %s10125_s16, 1 }
  0x62   : > { %814 = vst [vmem:[%s10324_s29] sm:$0xff] %v10145_v5  ;;  %815 = vst [vmem:[%s10324_s29 + $0x8] sm:$0xff] %v10145_v5  ;;  %v10490_v6 = vand.u32 4294901760, %v861_v2  ;;  %v10492_v7 = vand.u32 4294901760, %v860_v3  ;;  %v10494_v8 = vand.u32 4294901760, %v859_v4  ;;  %v858_v9 = vld [vmem:[%s10317_s9 + $0x60] sm:$0xff]  ;;  %v857_v10 = vld [vmem:[%s10317_s9 + $0x58] sm:$0xff] }
  0x63   : > { %816 = vst [vmem:[%s10324_s29 + $0x10] sm:$0xff] %v10145_v5  ;;  %817 = vst [vmem:[%s10324_s29 + $0x18] sm:$0xff] %v10145_v5  ;;  %v10498_v11 = vand.u32 4294901760, %v858_v9  ;;  %v10511_v15 = vand.u32 4294901760, %v857_v10  ;;  %v856_v19 = vld [vmem:[%s10317_s9 + $0x50] sm:$0xff]  ;;  %v855_v29 = vld [vmem:[%s10317_s9 + $0x48] sm:$0xff] }
  0x64   : > { %818 = vst [vmem:[%s10324_s29 + $0x20] sm:$0xff] %v10145_v5  ;;  %819 = vst [vmem:[%s10324_s29 + $0x28] sm:$0xff] %v10145_v5  ;;  %8462 = vmatprep.subr.mxu0 %v10490_v6  ;;  %v10502_v12 = vsub.f32 %v861_v2, %v10490_v6  ;;  %v10505_v13 = vsub.f32 %v860_v3, %v10492_v7  ;;  %v10508_v14 = vsub.f32 %v859_v4, %v10494_v8  ;;  %v854_v34 = vld [vmem:[%s10317_s9 + $0x40] sm:$0xff]  ;;  %v853_v42 = vld [vmem:[%s10317_s9 + $0x38] sm:$0xff]  ;;  %s3498_s22 = scalar_select %p728_p1, 1, 0 }
  0x65   : > { %820 = vst [vmem:[%s10324_s29 + $0x30] sm:$0xff] %v10145_v5  ;;  %821 = vst [vmem:[%s10324_s29 + $0x38] sm:$0xff] %v10145_v5  ;;  %8463 = vmatpush3.xpose.msra.mxu0 %v10490_v6  ;;  %v10525_v20 = vsub.f32 %v858_v9, %v10498_v11  ;;  %v10532_v23 = vand.u32 4294901760, %v856_v19  ;;  %v10535_v24 = vsub.f32 %v857_v10, %v10511_v15  ;;  %v10545_v30 = vand.u32 4294901760, %v855_v29  ;;  %v830_v36 = vld [vmem:[%s10289_s11] sm:$0xff]  ;;  %v852_v50 = vld [vmem:[%s10317_s9 + $0x30] sm:$0xff] }
  0x66   : > { %822 = vst [vmem:[%s10324_s29 + $0x40] sm:$0xff] %v10145_v5  ;;  %823 = vst [vmem:[%s10324_s29 + $0x48] sm:$0xff] %v10145_v5  ;;  %8464 = vmatprep.subr.mxu0 %v10492_v7  ;;  %v10515_v16 = vand.u32 4294901760, %v10502_v12  ;;  %v10518_v17 = vand.u32 4294901760, %v10505_v13  ;;  %v10521_v18 = vand.u32 4294901760, %v10508_v14  ;;  %v10559_v37 = vand.u32 4294901760, %v854_v34 }
  0x67   : > { %824 = vst [vmem:[%s10324_s29 + $0x50] sm:$0xff] %v10145_v5  ;;  %825 = vst [vmem:[%s10324_s29 + $0x58] sm:$0xff] %v10145_v5  ;;  %v10541_v28 = vand.u32 4294901760, %v10525_v20  ;;  %v10551_v33 = vand.u32 4294901760, %v10535_v24  ;;  %v10555_v35 = vsub.f32 %v856_v19, %v10532_v23  ;;  %v10561_v38 = vand.u32 4294901760, %v830_v36  ;;  %v851_v58 = vld [vmem:[%s10317_s9 + $0x28] sm:$0xff] }
  0x68   : > { %826 = vst [vmem:[%s10324_s29 + $0x60] sm:$0xff] %v10145_v5  ;;  %827 = vst [vmem:[%s10324_s29 + $0x68] sm:$0xff] %v10145_v5  ;;  %v1107_v21 = vsub.f32 %v10502_v12, %v10515_v16  ;;  %v1114_v22 = vsub.f32 %v10505_v13, %v10518_v17  ;;  %v1121_v27 = vsub.f32 %v10508_v14, %v10521_v18  ;;  %v10578_v45 = vand.u32 4294901760, %v853_v42  ;;  %v850_v0 = vld [vmem:[%s10317_s9 + $0x20] sm:$0xff]  ;;  %v849_v9 = vld [vmem:[%s10317_s9 + $0x18] sm:$0xff] }
  0x69   : > { %828 = vst [vmem:[%s10324_s29 + $0x70] sm:$0xff] %v10145_v5  ;;  %829 = vst [vmem:[%s10324_s29 + $0x78] sm:$0xff] %v10145_v5  ;;  %8465 = vmatpush3.xpose.msra.mxu0 %v10492_v7  ;;  %v1128_v32 = vsub.f32 %v10525_v20, %v10541_v28  ;;  %v1135_v40 = vsub.f32 %v10535_v24, %v10551_v33  ;;  %v10567_v41 = vand.u32 4294901760, %v10555_v35  ;;  %8550 = vmatprep.mubr.f32.mxu1 %v10561_v38 }
  0x6a   : > { %14864 = vst [vmem:[#allocation20_spill] sm:$0xff] %v10515_v16  ;;  %14865 = vst [vmem:[#allocation21_spill] sm:$0xff] %v10518_v17  ;;  %8466 = vmatprep.subr.mxu0 %v10494_v8  ;;  %v1108_v25 = vand.u32 4294901760, %v1107_v21  ;;  %v1115_v26 = vand.u32 4294901760, %v1114_v22  ;;  %v1122_v31 = vand.u32 4294901760, %v1121_v27  ;;  %v10571_v43 = vsub.f32 %v855_v29, %v10545_v30 }
  0x6b   : > { %14866 = vst [vmem:[#allocation22_spill] sm:$0xff] %v10521_v18  ;;  %14867 = vst [vmem:[#allocation23_spill] sm:$0xff] %v10541_v28  ;;  %v1129_v39 = vand.u32 4294901760, %v1128_v32  ;;  %v10574_v44 = vsub.f32 %v830_v36, %v10561_v38  ;;  %v1136_v47 = vand.u32 4294901760, %v1135_v40  ;;  %v1142_v48 = vsub.f32 %v10555_v35, %v10567_v41  ;;  %v847_v36 = vld [vmem:[%s10317_s9 + $0x8] sm:$0xff] }
  0x6c   : > { %8518 = vmatprep.subr.mxu1 %v1108_v25  ;;  %14868 = vst [vmem:[#allocation24_spill] sm:$0xff] %v10551_v33  ;;  %14869 = vst [vmem:[#allocation25_spill] sm:$0xff] %v10561_v38  ;;  %v10585_v49 = vand.u32 4294901760, %v10571_v43  ;;  %v10589_v51 = vsub.f32 %v854_v34, %v10559_v37  ;;  %v10595_v53 = vand.u32 4294901760, %v852_v50  ;;  %v10605_v59 = vsub.f32 %v853_v42, %v10578_v45  ;;  %v831_v42 = vld [vmem:[%s10289_s11 + $0x8] sm:$0xff] }
  0x6d   : > { %8467 = vmatpush3.xpose.msra.mxu0 %v10494_v8  ;;  %8519 = vmatpush3.xpose.msra.mxu1 %v1108_v25  ;;  %14870 = vst [vmem:[#allocation26_spill] sm:$0xff] %v10567_v41  ;;  %v14514_v46 = vand.u32 4294901760, %v10574_v44  ;;  %v1143_v55 = vand.u32 4294901760, %v1142_v48  ;;  %v10608_v60 = vand.u32 4294901760, %v851_v58  ;;  %v10621_v2 = vand.u32 4294901760, %v850_v0  ;;  %v839_v41 = vld [vmem:[%s10289_s11 + $0x48] sm:$0xff] }
  0x6e   : > { %8468 = vmatprep.subr.mxu0 %v10498_v11  ;;  %8520 = vmatprep.subr.mxu1 %v1115_v26  ;;  %14871 = vst [vmem:[#allocation27_spill] sm:$0xff] %v10585_v49  ;;  %v1149_v56 = vsub.f32 %v10571_v43, %v10585_v49  ;;  %v10601_v57 = vand.u32 4294901760, %v10589_v51  ;;  %v10614_v63 = vand.u32 4294901760, %v10605_v59  ;;  %v10618_v1 = vsub.f32 %v852_v50, %v10595_v53  ;;  %v838_v49 = vld [vmem:[%s10289_s11 + $0x40] sm:$0xff] }
  0x6f   : > { %v946_v52 = vsub.f32 %v10574_v44, %v14514_v46  ;;  %v10631_v10 = vsub.f32 %v851_v58, %v10608_v60  ;;  %v10634_v19 = vand.u32 4294901760, %v849_v9  ;;  %v10644_v27 = vsub.f32 %v850_v0, %v10621_v2 }
  0x70   : > { %14872 = vst [vmem:[#allocation28_spill] sm:$0xff] %v10601_v57  ;;  %v1150_v61 = vand.u32 4294901760, %v1149_v56  ;;  %v1156_v62 = vsub.f32 %v10589_v51, %v10601_v57  ;;  %14873 = vst [vmem:[#allocation29_spill] sm:$0xff] %v10614_v63  ;;  %v1163_v4 = vsub.f32 %v10605_v59, %v10614_v63  ;;  %v10627_v5 = vand.u32 4294901760, %v10618_v1  ;;  %v832_v56 = vld [vmem:[%s10289_s11 + $0x10] sm:$0xff] }
  0x71   : > { %8469 = vmatpush3.xpose.msra.mxu0 %v10498_v11  ;;  %8521 = vmatpush3.xpose.msra.mxu1 %v1115_v26  ;;  %v947_v54 = vand.u32 4294901760, %v946_v52  ;;  %v10640_v25 = vand.u32 4294901760, %v10631_v10  ;;  %v848_v26 = vld [vmem:[%s10317_s9 + $0x10] sm:$0xff]  ;;  %v10653_v34 = vand.u32 4294901760, %v10644_v27  ;;  %v10660_v40 = vand.u32 4294901760, %v847_v36 }
  0x72   : > { %8470 = vmatprep.subr.mxu0 %v10511_v15  ;;  %8522 = vmatprep.subr.mxu1 %v1122_v31  ;;  %v1157_v3 = vand.u32 4294901760, %v1156_v62  ;;  %14874 = vst [vmem:[#allocation30_spill] sm:$0xff] %v10627_v5  ;;  %v1164_v21 = vand.u32 4294901760, %v1163_v4  ;;  %v1170_v22 = vsub.f32 %v10618_v1, %v10627_v5  ;;  %v10647_v29 = vand.u32 4294901760, %v848_v26 }
  0x73   : > { %8494 = vmatprep.mubr.f32.mxu0 %v947_v54  ;;  %14875 = vst [vmem:[#allocation31_spill] sm:$0xff] %v10640_v25  ;;  %v1177_v32 = vsub.f32 %v10631_v10, %v10640_v25  ;;  %14877 = vst [vmem:[#allocation33_spill] sm:$0xff] %v10653_v34  ;;  %v1184_v48 = vsub.f32 %v10644_v27, %v10653_v34  ;;  %v846_v54 = vld [vmem:[%s10317_s9] sm:$0xff]  ;;  %v10678_v58 = vsub.f32 %v847_v36, %v10660_v40  ;;  %v837_v34 = vld [vmem:[%s10289_s11 + $0x38] sm:$0xff] }
  0x74   : > { %14876 = vst [vmem:[#allocation32_spill] sm:$0xff] %v10647_v29  ;;  %14878 = vst [vmem:[#allocation34_spill] sm:$0xff] %v10660_v40  ;;  %v10670_v52 = vsub.f32 %v848_v26, %v10647_v29  ;;  %v834_v26 = vld [vmem:[%s10289_s11 + $0x20] sm:$0xff]  ;;  %v10759_v28 = vand.u32 4294901760, %v838_v49 }
  0x75   : > { %8471 = vmatpush3.xpose.msra.mxu0 %v10511_v15  ;;  %8523 = vmatpush3.xpose.msra.mxu1 %v1122_v31  ;;  %v1171_v31 = vand.u32 4294901760, %v1170_v22  ;;  %v1185_v62 = vand.u32 4294901760, %v1184_v48 }
  0x76   : > { %8472 = vmatprep.subr.mxu0 %v10532_v23  ;;  %8524 = vmatprep.subr.mxu1 %v1129_v39  ;;  %v10687_v4 = vand.u32 4294901760, %v10670_v52 }
  0x78   : > { %14881 = vst [vmem:[#allocation37_spill] sm:$0xff] %v10687_v4  ;;  %v1198_v48 = vsub.f32 %v10670_v52, %v10687_v4 }
  0x79   : > { %8473 = vmatpush3.xpose.msra.mxu0 %v10532_v23  ;;  %8525 = vmatpush3.xpose.msra.mxu1 %v1129_v39  ;;  %v10657_v39 = vsub.f32 %v849_v9, %v10634_v19  ;;  %v10689_v9 = vand.u32 4294901760, %v832_v56 }
  0x7a   : > { %8474 = vmatprep.subr.mxu0 %v10545_v30  ;;  %8526 = vmatprep.subr.mxu1 %v1136_v47 }
  0x7b   : > { %v10667_v50 = vand.u32 4294901760, %v10657_v39  ;;  %v10709_v46 = vsub.f32 %v832_v56, %v10689_v9  ;;  %v1199_v56 = vand.u32 4294901760, %v1198_v48 }
  0x7d   : > { %8475 = vmatpush3.xpose.msra.mxu0 %v10545_v30  ;;  %8527 = vmatpush3.xpose.msra.mxu1 %v1136_v47  ;;  %v1178_v47 = vand.u32 4294901760, %v1177_v32  ;;  %14879 = vst [vmem:[#allocation35_spill] sm:$0xff] %v10667_v50  ;;  %v1191_v0 = vsub.f32 %v10657_v39, %v10667_v50  ;;  %v835_v32 = vld [vmem:[%s10289_s11 + $0x28] sm:$0xff]  ;;  %14884 = vst [vmem:[#allocation40_spill] sm:$0xff] %v10709_v46  ;;  %v10711_v50 = vand.u32 4294901760, %v834_v26  ;;  %v14891_v57 = vand.u32 4294901760, %v10709_v46 }
  0x7e   : > { %8476 = vmatprep.subr.mxu0 %v10559_v37  ;;  %8528 = vmatprep.subr.mxu1 %v1143_v55 }
  0x7f   : > { %v1192_v36 = vand.u32 4294901760, %v1191_v0  ;;  %v10719_v0 = vand.u32 4294901760, %v835_v32  ;;  %v10734_v63 = vsub.f32 %v834_v26, %v10711_v50  ;;  %v966_v33 = vsub.f32 %v10709_v46, %v14891_v57 }
  0x80   : > { %v10777_v46 = vsub.f32 %v838_v49, %v10759_v28  ;;  %v843_v49 = vld [vmem:[%s10289_s11 + $0x68] sm:$0xff] }
  0x81   : > { %8477 = vmatpush3.xpose.msra.mxu0 %v10559_v37  ;;  %8529 = vmatpush3.xpose.msra.mxu1 %v1143_v55  ;;  %v10673_v55 = vand.u32 4294901760, %v831_v42  ;;  %14887 = vst [vmem:[#allocation43_spill] sm:$0xff] %v10734_v63  ;;  %v10741_v48 = vsub.f32 %v835_v32, %v10719_v0 }
  0x82   : > { %8478 = vmatprep.subr.mxu0 %v10578_v45  ;;  %8530 = vmatprep.subr.mxu1 %v1150_v61 }
  0x83   : > { %14889 = vst [vmem:[#allocation44_spill] sm:$0xff] %v10741_v48  ;;  %v14894_v16 = vand.u32 4294901760, %v10741_v48 }
  0x85   : > { %8479 = vmatpush3.xpose.msra.mxu0 %v10578_v45  ;;  %8531 = vmatpush3.xpose.msra.mxu1 %v1150_v61  ;;  %v833_v61 = vld [vmem:[%s10289_s11 + $0x18] sm:$0xff] }
  0x86   : > { %8480 = vmatprep.subr.mxu0 %v10595_v53  ;;  %8532 = vmatprep.subr.mxu1 %v1157_v3  ;;  %v10694_v22 = vand.u32 4294901760, %v833_v61 }
  0x88   : > { %v10717_v5 = vsub.f32 %v833_v61, %v10694_v22  ;;  %v10730_v61 = vand.u32 4294901760, %v837_v34 }
  0x89   : > { %8481 = vmatpush3.xpose.msra.mxu0 %v10595_v53  ;;  %8533 = vmatpush3.xpose.msra.mxu1 %v1157_v3  ;;  %v10684_v3 = vand.u32 4294901760, %v846_v54 }
  0x8a   : > { %8482 = vmatprep.subr.mxu0 %v10608_v60  ;;  %8534 = vmatprep.subr.mxu1 %v1164_v21  ;;  %14885 = vst [vmem:[#allocation41_spill] sm:$0xff] %v10717_v5  ;;  %v10753_v32 = vsub.f32 %v837_v34, %v10730_v61  ;;  %v841_v34 = vld [vmem:[%s10289_s11 + $0x58] sm:$0xff] }
  0x8b   : > { %14880 = vst [vmem:[#allocation36_spill] sm:$0xff] %v10684_v3 }
  0x8d   : > { %8483 = vmatpush3.xpose.msra.mxu0 %v10608_v60  ;;  %8535 = vmatpush3.xpose.msra.mxu1 %v1164_v21  ;;  %v10692_v21 = vsub.f32 %v831_v42, %v10673_v55  ;;  %v10706_v42 = vsub.f32 %v846_v54, %v10684_v3 }
  0x8e   : > { %8484 = vmatprep.subr.mxu0 %v10621_v2  ;;  %8536 = vmatprep.subr.mxu1 %v1171_v31 }
  0x8f   : > { %14882 = vst [vmem:[#allocation38_spill] sm:$0xff] %v10692_v21  ;;  %v10726_v4 = vand.u32 4294901760, %v10706_v42 }
  0x91   : > { %8485 = vmatpush3.xpose.msra.mxu0 %v10621_v2  ;;  %8537 = vmatpush3.xpose.msra.mxu1 %v1171_v31  ;;  %v10699_v31 = vand.u32 4294901760, %v10678_v58  ;;  %14886 = vst [vmem:[#allocation42_spill] sm:$0xff] %v10726_v4  ;;  %v1212_v38 = vsub.f32 %v10706_v42, %v10726_v4  ;;  %v14893_v4 = vand.u32 4294901760, %v10734_v63 }
  0x92   : > { %8486 = vmatprep.subr.mxu0 %v10634_v19  ;;  %8538 = vmatprep.subr.mxu1 %v1178_v47 }
  0x93   : > { %14883 = vst [vmem:[#allocation39_spill] sm:$0xff] %v10699_v31  ;;  %v1205_v54 = vsub.f32 %v10678_v58, %v10699_v31  ;;  %v1213_v57 = vand.u32 4294901760, %v1212_v38  ;;  %v996_v38 = vsub.f32 %v10741_v48, %v14894_v16  ;;  %v14896_v16 = vand.u32 4294901760, %v10753_v32 }
  0x95   : > { %8487 = vmatpush3.xpose.msra.mxu0 %v10634_v19  ;;  %8539 = vmatpush3.xpose.msra.mxu1 %v1178_v47  ;;  %v836_v47 = vld [vmem:[%s10289_s11 + $0x30] sm:$0xff]  ;;  %v1206_v26 = vand.u32 4294901760, %v1205_v54  ;;  %v14892_v54 = vand.u32 4294901760, %v10717_v5 }
  0x96   : > { %8488 = vmatprep.subr.mxu0 %v10647_v29  ;;  %8540 = vmatprep.subr.mxu1 %v1185_v62  ;;  %v10728_v25 = vand.u32 4294901760, %v836_v47 }
  0x97   : > { %v976_v17 = vsub.f32 %v10717_v5, %v14892_v54  ;;  %v967_v54 = vand.u32 4294901760, %v966_v33  ;;  %v986_v5 = vsub.f32 %v10734_v63, %v14893_v4  ;;  %v842_v33 = vld [vmem:[%s10289_s11 + $0x60] sm:$0xff]  ;;  %v997_v63 = vand.u32 4294901760, %v996_v38 }
  0x98   : > { %v10803_v48 = vand.u32 4294901760, %v842_v33 }
  0x99   : > { %8489 = vmatpush3.xpose.msra.mxu0 %v10647_v29  ;;  %8541 = vmatpush3.xpose.msra.mxu1 %v1185_v62  ;;  %v14888_v62 = vand.u32 4294901760, %v10692_v21  ;;  %v987_v4 = vand.u32 4294901760, %v986_v5  ;;  %v845_v5 = vld [vmem:[%s10289_s11 + $0x78] sm:$0xff] }
  0x9a   : > { %8490 = vmatprep.subr.mxu0 %v10660_v40  ;;  %8542 = vmatprep.subr.mxu1 %v1192_v36  ;;  %v10821_v38 = vsub.f32 %v842_v33, %v10803_v48 }
  0x9b   : > { %v956_v31 = vsub.f32 %v10692_v21, %v14888_v62  ;;  %v10750_v62 = vsub.f32 %v836_v47, %v10728_v25  ;;  %v10765_v47 = vand.u32 4294901760, %v839_v41  ;;  %v840_v21 = vld [vmem:[%s10289_s11 + $0x50] sm:$0xff] }
  0x9d   : > { %8491 = vmatpush3.xpose.msra.mxu0 %v10660_v40  ;;  %8543 = vmatpush3.xpose.msra.mxu1 %v1192_v36  ;;  %14890 = vst [vmem:[#allocation45_spill] sm:$0xff] %v10750_v62  ;;  %v957_v18 = vand.u32 4294901760, %v956_v31  ;;  %v10785_v31 = vsub.f32 %v839_v41, %v10765_v47  ;;  %v10787_v36 = vand.u32 4294901760, %v841_v34  ;;  %v1016_v41 = vsub.f32 %v10753_v32, %v14896_v16 }
  0x9e   : > { %8492 = vmatprep.subr.mxu0 %v10684_v3  ;;  %8544 = vmatprep.subr.mxu1 %v1199_v56 }
  0x9f   : > { %v14567_v40 = vand.u32 4294901760, %v10785_v31  ;;  %v10807_v29 = vsub.f32 %v841_v34, %v10787_v36 }
  0xa1   : > { %8493 = vmatpush3.xpose.msra.mxu0 %v10684_v3  ;;  %8545 = vmatpush3.xpose.msra.mxu1 %v1199_v56  ;;  %v10779_v56 = vand.u32 4294901760, %v840_v21  ;;  %v977_v3 = vand.u32 4294901760, %v976_v17  ;;  %v14895_v17 = vand.u32 4294901760, %v10750_v62 }
  0xa2   : > { %8546 = vmatprep.subr.mxu1 %v1206_v26  ;;  %8574 = vmatprep.subr.mxu0 %v10502_v12 }
  0xa4   : > { %8495 = vmatmul.mubr.f32.vlgmr.msra.gmra.mxu0 %v957_v18  ;;  %v1006_v18 = vsub.f32 %v10750_v62, %v14895_v17  ;;  %v10809_v17 = vand.u32 4294901760, %v843_v49  ;;  %v844_v62 = vld [vmem:[%s10289_s11 + $0x70] sm:$0xff]  ;;  %s3499_s11 = scvt.s32.f32 %s3498_s22 }
  0xa5   : > { %8547 = vmatpush3.xpose.msra.mxu1 %v1206_v26  ;;  %8575 = vmatpush3.xpose.msra.mxu0 %v10502_v12  ;;  %v1025_v26 = vand.u32 4294901760, %v10777_v46  ;;  %v10801_v12 = vsub.f32 %v840_v21, %v10779_v56 }
  0xa6   : > { %8548 = vmatprep.subr.mxu1 %v1213_v57  ;;  %8576 = vmatprep.subr.mxu0 %v10505_v13  ;;  %v1007_v21 = vand.u32 4294901760, %v1006_v18  ;;  %v14568_v18 = vand.u32 4294901760, %v10807_v29  ;;  %v10831_v16 = vsub.f32 %v843_v49, %v10809_v17  ;;  %v1065_v49 = vand.u32 4294901760, %v10821_v38 }
  0xa7   : > { %8497 = vmatprep.mubr.f32.mxu0 %v967_v54  ;;  %v1017_v54 = vand.u32 4294901760, %v1016_v41  ;;  %v1045_v34 = vand.u32 4294901760, %v10801_v12  ;;  %v10833_v41 = vand.u32 4294901760, %v845_v5 }
  0xa8   : > { %8498 = vmatmul.mubr.f32.gmra.mxu0 %v977_v3  ;;  %v1026_v3 = vsub.f32 %v10777_v46, %v1025_v26 }
  0xa9   : > { %8549 = vmatpush3.xpose.msra.mxu1 %v1213_v57  ;;  %8577 = vmatpush3.xpose.msra.mxu0 %v10505_v13  ;;  %v10823_v57 = vand.u32 4294901760, %v844_v62  ;;  %v1036_v13 = vsub.f32 %v10785_v31, %v14567_v40  ;;  %v1046_v33 = vsub.f32 %v10801_v12, %v1045_v34  ;;  %v1056_v40 = vsub.f32 %v10807_v29, %v14568_v18 }
  0xaa   : > { %8578 = vmatprep.subr.mxu0 %v10508_v14  ;;  %8630 = vmatprep.subr.mxu1 %v10490_v6 }
  0xab   : > { %8500 = vmatprep.mubr.f32.mxu0 %v987_v4  ;;  %v10845_v4 = vsub.f32 %v844_v62, %v10823_v57  ;;  %v1047_v62 = vand.u32 4294901760, %v1046_v33 }
  0xac   : > { %8551 = vmatmul.mubr.f32.vlgmr.msra.gmra.mxu1 %v10673_v55  ;;  %8501 = vmatmul.mubr.f32.gmra.mxu0 %v997_v63  ;;  %v1027_v63 = vand.u32 4294901760, %v1026_v3  ;;  %v10853_v3 = vsub.f32 %v845_v5, %v10833_v41 }
  0xad   : > { %8579 = vmatpush3.xpose.msra.mxu0 %v10508_v14  ;;  %8631 = vmatpush3.xpose.msra.mxu1 %v10490_v6  ;;  %v1037_v14 = vand.u32 4294901760, %v1036_v13  ;;  %v1085_v13 = vand.u32 4294901760, %v10845_v4 }
  0xae   : > { %8580 = vmatprep.subr.mxu0 %v10525_v20  ;;  %8632 = vmatprep.subr.mxu1 %v10492_v7  ;;  %v1095_v18 = vand.u32 4294901760, %v10853_v3 }
  0xaf   : > { %8553 = vmatprep.mubr.f32.mxu1 %v10689_v9  ;;  %8503 = vmatprep.mubr.f32.mxu0 %v1007_v21  ;;  %v1075_v21 = vand.u32 4294901760, %v10831_v16 }
  0xb0   : > { %8554 = vmatmul.mubr.f32.gmra.mxu1 %v10694_v22  ;;  %8504 = vmatmul.mubr.f32.gmra.mxu0 %v1017_v54  ;;  %v1066_v54 = vsub.f32 %v10821_v38, %v1065_v49 }
  0xb1   : > { %8581 = vmatpush3.xpose.msra.mxu0 %v10525_v20  ;;  %8633 = vmatpush3.xpose.msra.mxu1 %v10492_v7  ;;  %v1057_v20 = vand.u32 4294901760, %v1056_v40  ;;  %v1076_v5 = vsub.f32 %v10831_v16, %v1075_v21  ;;  %v1086_v40 = vsub.f32 %v10845_v4, %v1085_v13 }
  0xb2   : > { %8582 = vmatprep.subr.mxu0 %v10535_v24  ;;  %8634 = vmatprep.subr.mxu1 %v10494_v8 }
  0xb3   : > { %8556 = vmatprep.mubr.f32.mxu1 %v10711_v50  ;;  %8506 = vmatprep.mubr.f32.mxu0 %v1027_v63  ;;  %v1067_v63 = vand.u32 4294901760, %v1066_v54  ;;  %v1077_v33 = vand.u32 4294901760, %v1076_v5 }
  0xb4   : > { %8557 = vmatmul.mubr.f32.gmra.mxu1 %v10719_v0  ;;  %8507 = vmatmul.mubr.f32.gmra.mxu0 %v1037_v14  ;;  %v1087_v14 = vand.u32 4294901760, %v1086_v40 }
  0xb5   : > { %8583 = vmatpush3.xpose.msra.mxu0 %v10535_v24  ;;  %8635 = vmatpush3.xpose.msra.mxu1 %v10494_v8  ;;  %v1096_v24 = vsub.f32 %v10853_v3, %v1095_v18 }
  0xb6   : > { %8584 = vmatprep.subr.mxu0 %v10555_v35  ;;  %8636 = vmatprep.subr.mxu1 %v10498_v11 }
  0xb7   : > { %8559 = vmatprep.mubr.f32.mxu1 %v10728_v25  ;;  %8509 = vmatprep.mubr.f32.mxu0 %v1047_v62  ;;  %v1097_v62 = vand.u32 4294901760, %v1096_v24 }
  0xb8   : > { %8560 = vmatmul.mubr.f32.gmra.mxu1 %v10730_v61  ;;  %8510 = vmatmul.mubr.f32.gmra.mxu0 %v1057_v20  ;;  %v14910_v20 = vld [vmem:[#allocation45_spill] sm:$0xff] }
  0xb9   : > { %8585 = vmatpush3.xpose.msra.mxu0 %v10555_v35  ;;  %8637 = vmatpush3.xpose.msra.mxu1 %v10498_v11  ;;  %v14897_v35 = vand.u32 4294901760, %v10574_v44 }
  0xba   : > { %8586 = vmatprep.subr.mxu0 %v10571_v43  ;;  %8638 = vmatprep.subr.mxu1 %v10511_v15 }
  0xbb   : > { %8562 = vmatprep.mubr.f32.mxu1 %v10759_v28  ;;  %8512 = vmatprep.mubr.f32.mxu0 %v1067_v63  ;;  %v14912_v63 = vld [vmem:[#allocation23_spill] sm:$0xff] }
  0xbc   : > { %8563 = vmatmul.mubr.f32.gmra.mxu1 %v10765_v47  ;;  %8513 = vmatmul.mubr.f32.gmra.mxu0 %v1077_v33  ;;  %v14915_v33 = vld [vmem:[#allocation24_spill] sm:$0xff] }
  0xbd   : > { %8587 = vmatpush3.xpose.msra.mxu0 %v10571_v43  ;;  %8639 = vmatpush3.xpose.msra.mxu1 %v10511_v15  ;;  %v14898_v43 = vld [vmem:[#allocation32_spill] sm:$0xff] }
  0xbe   : > { %8588 = vmatprep.subr.mxu0 %v10589_v51  ;;  %8640 = vmatprep.subr.mxu1 %v10532_v23 }
  0xbf   : > { %8565 = vmatprep.mubr.f32.mxu1 %v10779_v56  ;;  %8515 = vmatprep.mubr.f32.mxu0 %v1087_v14  ;;  %v14918_v14 = vld [vmem:[#allocation26_spill] sm:$0xff] }
  0xc0   : > { %8566 = vmatmul.mubr.f32.gmra.mxu1 %v10787_v36  ;;  %8516 = vmatmul.mubr.f32.gmra.mxu0 %v1097_v62  ;;  %v14919_v62 = vand.u32 4294901760, %v10753_v32 }
  0xc1   : > { %8589 = vmatpush3.xpose.msra.mxu0 %v10589_v51  ;;  %8641 = vmatpush3.xpose.msra.mxu1 %v10532_v23  ;;  %v14900_v51 = vld [vmem:[#allocation20_spill] sm:$0xff] }
  0xc2   : > { %8590 = vmatprep.subr.mxu0 %v10605_v59  ;;  %8642 = vmatprep.subr.mxu1 %v10545_v30 }
  0xc3   : > { %8568 = vmatprep.mubr.f32.mxu1 %v10803_v48  ;;  %8606 = vmatprep.mubr.f32.mxu0 %v10574_v44  ;;  %v14899_v44 = vld [vmem:[#allocation34_spill] sm:$0xff] }
  0xc4   : > { %8569 = vmatmul.mubr.f32.gmra.mxu1 %v10809_v17 }
  0xc5   : > { %8591 = vmatpush3.xpose.msra.mxu0 %v10605_v59  ;;  %8643 = vmatpush3.xpose.msra.mxu1 %v10545_v30  ;;  %v14901_v59 = vld [vmem:[#allocation38_spill] sm:$0xff] }
  0xc6   : > { %8592 = vmatprep.subr.mxu0 %v10618_v1  ;;  %8644 = vmatprep.subr.mxu1 %v10559_v37  ;;  %v14909_v54 = vand.u32 4294901760, %v14901_v59 }
  0xc7   : > { %8571 = vmatprep.mubr.f32.mxu1 %v10823_v57 }
  0xc8   : > { %8572 = vmatmul.mubr.f32.gmra.mxu1 %v10833_v41 }
  0xc9   : > { %8593 = vmatpush3.xpose.msra.mxu0 %v10618_v1  ;;  %8645 = vmatpush3.xpose.msra.mxu1 %v10559_v37  ;;  %v14902_v1 = vld [vmem:[#allocation40_spill] sm:$0xff] }
  0xca   : > { %8594 = vmatprep.subr.mxu0 %v10631_v10  ;;  %8646 = vmatprep.subr.mxu1 %v10578_v45  ;;  %v14911_v5 = vand.u32 4294901760, %v14902_v1 }
  0xcb   : > { %8662 = vmatprep.mubr.f32.mxu1 %v14897_v35  ;;  %v14921_v35 = vand.u32 4294901760, %v10785_v31 }
  0xcd   : > { %8595 = vmatpush3.xpose.msra.mxu0 %v10631_v10  ;;  %8647 = vmatpush3.xpose.msra.mxu1 %v10578_v45  ;;  %v14903_v10 = vld [vmem:[#allocation36_spill] sm:$0xff] }
  0xce   : > { %8596 = vmatprep.subr.mxu0 %v10644_v27  ;;  %8648 = vmatprep.subr.mxu1 %v10595_v53 }
  0xd1   : > { %8597 = vmatpush3.xpose.msra.mxu0 %v10644_v27  ;;  %8649 = vmatpush3.xpose.msra.mxu1 %v10595_v53  ;;  %v14904_v27 = vld [vmem:[#allocation21_spill] sm:$0xff] }
  0xd2   : > { %8598 = vmatprep.subr.mxu0 %v10657_v39  ;;  %8650 = vmatprep.subr.mxu1 %v10608_v60 }
  0xd5   : > { %8599 = vmatpush3.xpose.msra.mxu0 %v10657_v39  ;;  %8651 = vmatpush3.xpose.msra.mxu1 %v10608_v60  ;;  %v14905_v39 = vld [vmem:[#allocation41_spill] sm:$0xff] }
  0xd6   : > { %8600 = vmatprep.subr.mxu0 %v10670_v52  ;;  %8652 = vmatprep.subr.mxu1 %v10621_v2  ;;  %v14913_v40 = vand.u32 4294901760, %v14905_v39 }
  0xd9   : > { %8601 = vmatpush3.xpose.msra.mxu0 %v10670_v52  ;;  %8653 = vmatpush3.xpose.msra.mxu1 %v10621_v2  ;;  %v14906_v52 = vld [vmem:[#allocation43_spill] sm:$0xff] }
  0xda   : > { %8602 = vmatprep.subr.mxu0 %v10678_v58  ;;  %8654 = vmatprep.subr.mxu1 %v10634_v19 }
  0xdd   : > { %8603 = vmatpush3.xpose.msra.mxu0 %v10678_v58  ;;  %8655 = vmatpush3.xpose.msra.mxu1 %v10634_v19  ;;  %v14907_v58 = vld [vmem:[#allocation22_spill] sm:$0xff] }
  0xde   : > { %8604 = vmatprep.subr.mxu0 %v10706_v42  ;;  %8656 = vmatprep.subr.mxu1 %v14898_v43 }
  0xe1   : > { %8605 = vmatpush3.xpose.msra.mxu0 %v10706_v42  ;;  %8657 = vmatpush3.xpose.msra.mxu1 %v14898_v43  ;;  %v14908_v42 = vld [vmem:[#allocation44_spill] sm:$0xff] }
  0xe2   : > { %8658 = vmatprep.subr.mxu1 %v14899_v44  ;;  %8686 = vmatprep.subr.mxu0 %v14900_v51  ;;  %v14916_v24 = vand.u32 4294901760, %v14908_v42 }
  0xe4   : > { %8607 = vmatmul.mubr.f32.vlgmr.msra.gmra.mxu0 %v14901_v59 }
  0xe5   : > { %8659 = vmatpush3.xpose.msra.mxu1 %v14899_v44  ;;  %8687 = vmatpush3.xpose.msra.mxu0 %v14900_v51 }
  0xe6   : > { %8609 = vmatprep.mubr.f32.mxu0 %v14902_v1  ;;  %8660 = vmatprep.subr.mxu1 %v14903_v10 }
  0xe7   : > { %8688 = vmatprep.subr.mxu0 %v14904_v27 }
  0xe8   : > { %8610 = vmatmul.mubr.f32.gmra.mxu0 %v14905_v39  ;;  %v2174_v39 = vld [vmem:[%s10322_s27 + $0x50] sm:$0xff] }
  0xe9   : > { %8661 = vmatpush3.xpose.msra.mxu1 %v14903_v10  ;;  %8689 = vmatpush3.xpose.msra.mxu0 %v14904_v27 }
  0xea   : > { %8612 = vmatprep.mubr.f32.mxu0 %v14906_v52  ;;  %8690 = vmatprep.subr.mxu0 %v14907_v58 }
  0xeb   : > { %8742 = vmatprep.subr.mxu1 %v10490_v6 }
  0xec   : > { %8613 = vmatmul.mubr.f32.gmra.mxu0 %v14908_v42  ;;  %8663 = vmatmul.mubr.f32.vlgmr.msra.gmra.mxu1 %v14909_v54 }
  0xed   : > { %8691 = vmatpush3.xpose.msra.mxu0 %v14907_v58  ;;  %8743 = vmatpush3.xpose.msra.mxu1 %v10490_v6  ;;  %v14914_v6 = vand.u32 4294901760, %v14906_v52 }
  0xee   : > { %8615 = vmatprep.mubr.f32.mxu0 %v14910_v20  ;;  %8665 = vmatprep.mubr.f32.mxu1 %v14911_v5  ;;  %v2148_v5 = vld [vmem:[%s10299_s26] sm:$0xff] }
  0xef   : > { %8692 = vmatprep.subr.mxu0 %v14912_v63  ;;  %8744 = vmatprep.subr.mxu1 %v10492_v7 }
  0xf0   : > { %8616 = vmatmul.mubr.f32.gmra.mxu0 %v10753_v32  ;;  %8666 = vmatmul.mubr.f32.gmra.mxu1 %v14913_v40  ;;  %v14925_v32 = vld [vmem:[#allocation25_spill] sm:$0xff] }
  0xf1   : > { %8693 = vmatpush3.xpose.msra.mxu0 %v14912_v63  ;;  %8745 = vmatpush3.xpose.msra.mxu1 %v10492_v7  ;;  %v14917_v7 = vand.u32 4294901760, %v14910_v20  ;;  %v11107_v20 = vand.u32 4294901760, %v2174_v39 }
  0xf2   : > { %8618 = vmatprep.mubr.f32.mxu0 %v10777_v46  ;;  %8668 = vmatprep.mubr.f32.mxu1 %v14914_v6  ;;  %v14923_v46 = vand.u32 4294901760, %v10807_v29 }
  0xf3   : > { %8694 = vmatprep.subr.mxu0 %v14915_v33  ;;  %8746 = vmatprep.subr.mxu1 %v10494_v8 }
  0xf4   : > { %8619 = vmatmul.mubr.f32.gmra.mxu0 %v10785_v31  ;;  %8669 = vmatmul.mubr.f32.gmra.mxu1 %v14916_v24  ;;  %v2179_v31 = vld [vmem:[%s10322_s27 + $0x78] sm:$0xff]  ;;  %v11127_v24 = vand.u32 4294901760, %v2148_v5 }
  0xf5   : > { %8695 = vmatpush3.xpose.msra.mxu0 %v14915_v33  ;;  %8747 = vmatpush3.xpose.msra.mxu1 %v10494_v8  ;;  %v14920_v8 = vld [vmem:[#allocation27_spill] sm:$0xff]  ;;  %v11125_v33 = vsub.f32 %v2174_v39, %v11107_v20 }
  0xf6   : > { %8621 = vmatprep.mubr.f32.mxu0 %v10801_v12  ;;  %8671 = vmatprep.mubr.f32.mxu1 %v14917_v7  ;;  %v2178_v12 = vld [vmem:[%s10322_s27 + $0x70] sm:$0xff]  ;;  %14938 = vst [vmem:[#allocation36_spill] sm:$0xff] %v11127_v24  ;;  %v2167_v39 = vld [vmem:[%s10322_s27 + $0x18] sm:$0xff] }
  0xf7   : > { %8696 = vmatprep.subr.mxu0 %v14918_v14  ;;  %8748 = vmatprep.subr.mxu1 %v10498_v11 }
  0xf8   : > { %8622 = vmatmul.mubr.f32.gmra.mxu0 %v10807_v29  ;;  %8672 = vmatmul.mubr.f32.gmra.mxu1 %v14919_v62  ;;  %v14927_v29 = vld [vmem:[#allocation31_spill] sm:$0xff] }
  0xf9   : > { %8697 = vmatpush3.xpose.msra.mxu0 %v14918_v14  ;;  %8749 = vmatpush3.xpose.msra.mxu1 %v10498_v11  ;;  %v14922_v11 = vld [vmem:[#allocation28_spill] sm:$0xff]  ;;  %v2171_v62 = vld [vmem:[%s10322_s27 + $0x38] sm:$0xff] }
  0xfa   : > { %8624 = vmatprep.mubr.f32.mxu0 %v10821_v38  ;;  %8674 = vmatprep.mubr.f32.mxu1 %v1025_v26  ;;  %v14930_v26 = vld [vmem:[#allocation37_spill] sm:$0xff] }
  0xfb   : > { %8698 = vmatprep.subr.mxu0 %v14920_v8  ;;  %8750 = vmatprep.subr.mxu1 %v10511_v15  ;;  %v2177_v38 = vld [vmem:[%s10322_s27 + $0x68] sm:$0xff] }
  0xfc   : > { %8625 = vmatmul.mubr.f32.gmra.mxu0 %v10831_v16  ;;  %8675 = vmatmul.mubr.f32.gmra.mxu1 %v14921_v35 }
  0xfd   : > { %8699 = vmatpush3.xpose.msra.mxu0 %v14920_v8  ;;  %8751 = vmatpush3.xpose.msra.mxu1 %v10511_v15  ;;  %v14924_v15 = vld [vmem:[#allocation29_spill] sm:$0xff] }
  0xfe   : > { %8627 = vmatprep.mubr.f32.mxu0 %v10845_v4  ;;  %8677 = vmatprep.mubr.f32.mxu1 %v1045_v34  ;;  %v11043_v34 = vand.u32 4294901760, %v2178_v12 }
  0xff   : > { %8700 = vmatprep.subr.mxu0 %v14922_v11  ;;  %8752 = vmatprep.subr.mxu1 %v10532_v23 }
 0x100   : > { %8628 = vmatmul.mubr.f32.gmra.mxu0 %v10853_v3  ;;  %8678 = vmatmul.mubr.f32.gmra.mxu1 %v14923_v46  ;;  %v11060_v4 = vsub.f32 %v2178_v12, %v11043_v34 }
 0x101   : > { %8701 = vmatpush3.xpose.msra.mxu0 %v14922_v11  ;;  %8753 = vmatpush3.xpose.msra.mxu1 %v10532_v23  ;;  %v14926_v23 = vld [vmem:[#allocation30_spill] sm:$0xff]  ;;  %v11148_v11 = vsub.f32 %v2148_v5, %v11127_v24 }
 0x102   : > { %8680 = vmatprep.mubr.f32.mxu1 %v1065_v49  ;;  %8702 = vmatprep.subr.mxu0 %v14924_v15  ;;  %v2176_v49 = vld [vmem:[%s10322_s27 + $0x60] sm:$0xff]  ;;  %v11071_v3 = vand.u32 4294901760, %v11060_v4  ;;  %v2166_v5 = vld [vmem:[%s10322_s27 + $0x10] sm:$0xff] }
 0x103   : > { %8754 = vmatprep.subr.mxu1 %v10545_v30  ;;  %8718 = vmatprep.mubr.f32.mxu0 %v14925_v32 }
 0x104   : > { %8681 = vmatmul.mubr.f32.gmra.mxu1 %v1075_v21  ;;  %14934 = vst [vmem:[#allocation34_spill] sm:$0xff] %v11071_v3  ;;  %v2432_v27 = vsub.f32 %v11060_v4, %v11071_v3 }
 0x105   : > { %8703 = vmatpush3.xpose.msra.mxu0 %v14924_v15  ;;  %8755 = vmatpush3.xpose.msra.mxu1 %v10545_v30  ;;  %v14928_v30 = vld [vmem:[#allocation33_spill] sm:$0xff] }
 0x106   : > { %8683 = vmatprep.mubr.f32.mxu1 %v1085_v13  ;;  %8704 = vmatprep.subr.mxu0 %v14926_v23  ;;  %v2175_v13 = vld [vmem:[%s10322_s27 + $0x58] sm:$0xff]  ;;  %v2433_v42 = vand.u32 4294901760, %v2432_v27 }
 0x107   : > { %8756 = vmatprep.subr.mxu1 %v10559_v37 }
 0x108   : > { %8684 = vmatmul.mubr.f32.gmra.mxu1 %v1095_v18  ;;  %v14932_v18 = vld [vmem:[#allocation42_spill] sm:$0xff] }
 0x109   : > { %8705 = vmatpush3.xpose.msra.mxu0 %v14926_v23  ;;  %8757 = vmatpush3.xpose.msra.mxu1 %v10559_v37  ;;  %v14929_v37 = vld [vmem:[#allocation35_spill] sm:$0xff] }
 0x10a   : > { %8706 = vmatprep.subr.mxu0 %v14927_v29  ;;  %8758 = vmatprep.subr.mxu1 %v10578_v45 }
 0x10b   : > { %8774 = vmatprep.mubr.f32.mxu1 %v14925_v32 }
 0x10d   : > { %8707 = vmatpush3.xpose.msra.mxu0 %v14927_v29  ;;  %8759 = vmatpush3.xpose.msra.mxu1 %v10578_v45  ;;  %v11036_v45 = vand.u32 4294901760, %v2179_v31  ;;  %v14569_v29 = vand.u32 4294901760, %v11148_v11 }
 0x10e   : > { %8708 = vmatprep.subr.mxu0 %v14928_v30  ;;  %8760 = vmatprep.subr.mxu1 %v10595_v53 }
 0x10f   : > { %v2264_v12 = vsub.f32 %v11148_v11, %v14569_v29 }
 0x111   : > { %8709 = vmatpush3.xpose.msra.mxu0 %v14928_v30  ;;  %8761 = vmatpush3.xpose.msra.mxu1 %v10595_v53  ;;  %v14931_v53 = vld [vmem:[#allocation39_spill] sm:$0xff] }
 0x112   : > { %8710 = vmatprep.subr.mxu0 %v14929_v37  ;;  %8762 = vmatprep.subr.mxu1 %v10608_v60 }
 0x115   : > { %8711 = vmatpush3.xpose.msra.mxu0 %v14929_v37  ;;  %8763 = vmatpush3.xpose.msra.mxu1 %v10608_v60  ;;  %v11046_v60 = vsub.f32 %v2179_v31, %v11036_v45 }
 0x116   : > { %8712 = vmatprep.subr.mxu0 %v14930_v26  ;;  %8764 = vmatprep.subr.mxu1 %v10621_v2 }
 0x117   : > { %v11056_v16 = vand.u32 4294901760, %v11046_v60 }
 0x119   : > { %8713 = vmatpush3.xpose.msra.mxu0 %v14930_v26  ;;  %8765 = vmatpush3.xpose.msra.mxu1 %v10621_v2  ;;  %v11053_v2 = vand.u32 4294901760, %v2177_v38  ;;  %14933 = vst [vmem:[#allocation32_spill] sm:$0xff] %v11056_v16  ;;  %v2425_v21 = vsub.f32 %v11046_v60, %v11056_v16  ;;  %v2169_v26 = vld [vmem:[%s10322_s27 + $0x28] sm:$0xff] }
 0x11a   : > { %8714 = vmatprep.subr.mxu0 %v14931_v53  ;;  %8766 = vmatprep.subr.mxu1 %v10634_v19 }
 0x11b   : > { %v11075_v51 = vsub.f32 %v2177_v38, %v11053_v2  ;;  %v2426_v1 = vand.u32 4294901760, %v2425_v21  ;;  %v2265_v21 = vand.u32 4294901760, %v2264_v12  ;;  %v2150_v12 = vld [vmem:[%s10299_s26 + $0x10] sm:$0xff] }
 0x11d   : > { %8715 = vmatpush3.xpose.msra.mxu0 %v14931_v53  ;;  %8767 = vmatpush3.xpose.msra.mxu1 %v10634_v19  ;;  %v11066_v19 = vand.u32 4294901760, %v2176_v49  ;;  %v11196_v53 = vand.u32 4294901760, %v2169_v26 }
 0x11e   : > { %8716 = vmatprep.subr.mxu0 %v14932_v18  ;;  %8768 = vmatprep.subr.mxu1 %v14898_v43 }
 0x11f   : > { %v11085_v59 = vsub.f32 %v2176_v49, %v11066_v19  ;;  %v2168_v49 = vld [vmem:[%s10322_s27 + $0x20] sm:$0xff]  ;;  %v11218_v27 = vsub.f32 %v2169_v26, %v11196_v53 }
 0x121   : > { %8717 = vmatpush3.xpose.msra.mxu0 %v14932_v18  ;;  %8769 = vmatpush3.xpose.msra.mxu1 %v14898_v43  ;;  %v11082_v43 = vand.u32 4294901760, %v2175_v13  ;;  %v11100_v52 = vand.u32 4294901760, %v11085_v59 }
 0x122   : > { %8770 = vmatprep.subr.mxu1 %v14899_v44  ;;  %8798 = vmatprep.subr.mxu0 %v11036_v45 }
 0x123   : > { %14936 = vst [vmem:[#allocation38_spill] sm:$0xff] %v11100_v52  ;;  %v11103_v58 = vsub.f32 %v2175_v13, %v11082_v43  ;;  %v2446_v63 = vsub.f32 %v11085_v59, %v11100_v52  ;;  %v11212_v13 = vand.u32 4294901760, %v2168_v49 }
 0x124   : > { %8719 = vmatmul.mubr.f32.vlgmr.msra.gmra.mxu0 %v10673_v55 }
 0x125   : > { %8771 = vmatpush3.xpose.msra.mxu1 %v14899_v44  ;;  %8799 = vmatpush3.xpose.msra.mxu0 %v11036_v45  ;;  %v11091_v44 = vand.u32 4294901760, %v11075_v51  ;;  %v11119_v40 = vand.u32 4294901760, %v11103_v58  ;;  %v2447_v7 = vand.u32 4294901760, %v2446_v63 }
 0x126   : > { %8721 = vmatprep.mubr.f32.mxu0 %v10689_v9  ;;  %8772 = vmatprep.subr.mxu1 %v14903_v10 }
 0x127   : > { %8800 = vmatprep.subr.mxu0 %v11043_v34  ;;  %14935 = vst [vmem:[#allocation20_spill] sm:$0xff] %v11091_v44  ;;  %v2439_v54 = vsub.f32 %v11075_v51, %v11091_v44  ;;  %14937 = vst [vmem:[#allocation40_spill] sm:$0xff] %v11119_v40  ;;  %v2453_v14 = vsub.f32 %v11103_v58, %v11119_v40 }
 0x128   : > { %8722 = vmatmul.mubr.f32.gmra.mxu0 %v10694_v22 }
 0x129   : > { %8773 = vmatpush3.xpose.msra.mxu1 %v14903_v10  ;;  %8801 = vmatpush3.xpose.msra.mxu0 %v11043_v34  ;;  %v2173_v10 = vld [vmem:[%s10322_s27 + $0x48] sm:$0xff]  ;;  %v2454_v46 = vand.u32 4294901760, %v2453_v14 }
 0x12a   : > { %8724 = vmatprep.mubr.f32.mxu0 %v10711_v50  ;;  %8802 = vmatprep.subr.mxu0 %v11053_v2  ;;  %v11122_v6 = vand.u32 4294901760, %v2173_v10 }
 0x12b   : > { %8854 = vmatprep.subr.mxu1 %v2426_v1 }
 0x12c   : > { %8725 = vmatmul.mubr.f32.gmra.mxu0 %v10719_v0  ;;  %8775 = vmatmul.mubr.f32.vlgmr.msra.gmra.mxu1 %v10673_v55  ;;  %v2440_v55 = vand.u32 4294901760, %v2439_v54  ;;  %v11145_v35 = vsub.f32 %v2173_v10, %v11122_v6  ;;  %v11227_v54 = vand.u32 4294901760, %v2167_v39  ;;  %v11230_v10 = vand.u32 4294901760, %v11218_v27 }
 0x12d   : > { %8803 = vmatpush3.xpose.msra.mxu0 %v11053_v2  ;;  %8855 = vmatpush3.xpose.msra.mxu1 %v2426_v1 }
 0x12e   : > { %8727 = vmatprep.mubr.f32.mxu0 %v10728_v25  ;;  %8777 = vmatprep.mubr.f32.mxu1 %v10689_v9  ;;  %v2172_v9 = vld [vmem:[%s10322_s27 + $0x40] sm:$0xff]  ;;  %v11161_v32 = vand.u32 4294901760, %v11145_v35  ;;  %14944 = vst [vmem:[#allocation45_spill] sm:$0xff] %v11230_v10 }
 0x12f   : > { %8804 = vmatprep.subr.mxu0 %v11066_v19  ;;  %8856 = vmatprep.subr.mxu1 %v2433_v42  ;;  %v11139_v8 = vand.u32 4294901760, %v2172_v9 }
 0x130   : > { %8728 = vmatmul.mubr.f32.gmra.mxu0 %v10730_v61  ;;  %8778 = vmatmul.mubr.f32.gmra.mxu1 %v10694_v22  ;;  %v11142_v22 = vand.u32 4294901760, %v11125_v33  ;;  %14940 = vst [vmem:[#allocation41_spill] sm:$0xff] %v11161_v32  ;;  %v2467_v31 = vsub.f32 %v11145_v35, %v11161_v32  ;;  %v2156_v32 = vld [vmem:[%s10299_s26 + $0x40] sm:$0xff] }
 0x131   : > { %8805 = vmatpush3.xpose.msra.mxu0 %v11066_v19  ;;  %8857 = vmatpush3.xpose.msra.mxu1 %v2433_v42  ;;  %v11165_v23 = vsub.f32 %v2172_v9, %v11139_v8  ;;  %v11351_v52 = vand.u32 4294901760, %v2156_v32 }
 0x132   : > { %8730 = vmatprep.mubr.f32.mxu0 %v10759_v28  ;;  %8780 = vmatprep.mubr.f32.mxu1 %v10711_v50  ;;  %14939 = vst [vmem:[#allocation21_spill] sm:$0xff] %v11142_v22  ;;  %v11153_v50 = vand.u32 4294901760, %v2171_v62  ;;  %v2460_v15 = vsub.f32 %v11125_v33, %v11142_v22  ;;  %v2468_v18 = vand.u32 4294901760, %v2467_v31  ;;  %v2164_v31 = vld [vmem:[%s10322_s27] sm:$0xff]  ;;  %v2157_v22 = vld [vmem:[%s10299_s26 + $0x48] sm:$0xff] }
 0x133   : > { %8806 = vmatprep.subr.mxu0 %v11082_v43  ;;  %8858 = vmatprep.subr.mxu1 %v2440_v55 }
 0x134   : > { %8731 = vmatmul.mubr.f32.gmra.mxu0 %v10765_v47  ;;  %8781 = vmatmul.mubr.f32.gmra.mxu1 %v10719_v0  ;;  %v2170_v0 = vld [vmem:[%s10322_s27 + $0x30] sm:$0xff]  ;;  %v2461_v37 = vand.u32 4294901760, %v2460_v15 }
 0x135   : > { %8807 = vmatpush3.xpose.msra.mxu0 %v11082_v43  ;;  %8859 = vmatpush3.xpose.msra.mxu1 %v2440_v55  ;;  %v11176_v30 = vand.u32 4294901760, %v2170_v0  ;;  %v2495_v55 = vsub.f32 %v11218_v27, %v11230_v10 }
 0x136   : > { %8733 = vmatprep.mubr.f32.mxu0 %v10779_v56  ;;  %8783 = vmatprep.mubr.f32.mxu1 %v10728_v25  ;;  %v11172_v25 = vsub.f32 %v2171_v62, %v11153_v50  ;;  %v2149_v62 = vld [vmem:[%s10299_s26 + $0x8] sm:$0xff] }
 0x137   : > { %8808 = vmatprep.subr.mxu0 %v11107_v20  ;;  %8860 = vmatprep.subr.mxu1 %v2447_v7  ;;  %v11199_v38 = vsub.f32 %v2170_v0, %v11176_v30  ;;  %v11265_v26 = vand.u32 4294901760, %v2149_v62 }
 0x138   : > { %8734 = vmatmul.mubr.f32.gmra.mxu0 %v10787_v36  ;;  %8784 = vmatmul.mubr.f32.gmra.mxu1 %v10730_v61  ;;  %v11182_v61 = vand.u32 4294901760, %v11165_v23 }
 0x139   : > { %8809 = vmatpush3.xpose.msra.mxu0 %v11107_v20  ;;  %8861 = vmatpush3.xpose.msra.mxu1 %v2447_v7  ;;  %v11215_v1 = vand.u32 4294901760, %v11199_v38  ;;  %v11247_v7 = vsub.f32 %v2167_v39, %v11227_v54  ;;  %v11281_v39 = vand.u32 4294901760, %v2150_v12 }
 0x13a   : > { %8736 = vmatprep.mubr.f32.mxu0 %v10803_v48  ;;  %8786 = vmatprep.mubr.f32.mxu1 %v10759_v28  ;;  %14941 = vst [vmem:[#allocation43_spill] sm:$0xff] %v11182_v61  ;;  %v11192_v28 = vand.u32 4294901760, %v11172_v25 }
 0x13b   : > { %8810 = vmatprep.subr.mxu0 %v11122_v6  ;;  %8862 = vmatprep.subr.mxu1 %v2454_v46  ;;  %14943 = vst [vmem:[#allocation44_spill] sm:$0xff] %v11215_v1  ;;  %v2488_v42 = vsub.f32 %v11199_v38, %v11215_v1  ;;  %v11301_v29 = vsub.f32 %v2150_v12, %v11281_v39 }
 0x13c   : > { %8737 = vmatmul.mubr.f32.gmra.mxu0 %v10809_v17  ;;  %8787 = vmatmul.mubr.f32.gmra.mxu1 %v10765_v47  ;;  %14942 = vst [vmem:[#allocation22_spill] sm:$0xff] %v11192_v28  ;;  %v2474_v47 = vsub.f32 %v11165_v23, %v11182_v61 }
 0x13d   : > { %8811 = vmatpush3.xpose.msra.mxu0 %v11122_v6  ;;  %8863 = vmatpush3.xpose.msra.mxu1 %v2454_v46  ;;  %v2489_v63 = vand.u32 4294901760, %v2488_v42  ;;  %v2496_v46 = vand.u32 4294901760, %v2495_v55  ;;  %v2153_v55 = vld [vmem:[%s10299_s26 + $0x28] sm:$0xff]  ;;  %14953 = vst [vmem:[#allocation31_spill] sm:$0xff] %v11301_v29  ;;  %v14960_v61 = vand.u32 4294901760, %v11301_v29 }
 0x13e   : > { %8739 = vmatprep.mubr.f32.mxu0 %v10823_v57  ;;  %8789 = vmatprep.mubr.f32.mxu1 %v10779_v56  ;;  %v2481_v56 = vsub.f32 %v11172_v25, %v11192_v28 }
 0x13f   : > { %8812 = vmatprep.subr.mxu0 %v11139_v8  ;;  %8864 = vmatprep.subr.mxu1 %v2461_v37  ;;  %v2284_v40 = vsub.f32 %v11301_v29, %v14960_v61  ;;  %v11369_v29 = vsub.f32 %v2156_v32, %v11351_v52 }
 0x140   : > { %8740 = vmatmul.mubr.f32.gmra.mxu0 %v10833_v41  ;;  %8790 = vmatmul.mubr.f32.gmra.mxu1 %v10787_v36  ;;  %v2475_v36 = vand.u32 4294901760, %v2474_v47  ;;  %v2151_v47 = vld [vmem:[%s10299_s26 + $0x18] sm:$0xff] }
 0x141   : > { %8813 = vmatpush3.xpose.msra.mxu0 %v11139_v8  ;;  %8865 = vmatpush3.xpose.msra.mxu1 %v2461_v37  ;;  %v11262_v37 = vand.u32 4294901760, %v11247_v7  ;;  %v11286_v42 = vand.u32 4294901760, %v2151_v47 }
 0x142   : > { %8792 = vmatprep.mubr.f32.mxu1 %v10803_v48  ;;  %8814 = vmatprep.subr.mxu0 %v11153_v50  ;;  %v2482_v48 = vand.u32 4294901760, %v2481_v56  ;;  %v11276_v56 = vand.u32 4294901760, %v2164_v31 }
 0x143   : > { %8866 = vmatprep.subr.mxu1 %v2468_v18  ;;  %8830 = vmatprep.mubr.f32.mxu0 %v2265_v21  ;;  %14948 = vst [vmem:[#allocation27_spill] sm:$0xff] %v11262_v37  ;;  %v2509_v21 = vsub.f32 %v11247_v7, %v11262_v37  ;;  %v11309_v10 = vsub.f32 %v2151_v47, %v11286_v42 }
 0x144   : > { %8793 = vmatmul.mubr.f32.gmra.mxu1 %v10809_v17  ;;  %v11234_v17 = vsub.f32 %v2168_v49, %v11212_v13  ;;  %14950 = vst [vmem:[#allocation29_spill] sm:$0xff] %v11276_v56 }
 0x145   : > { %8815 = vmatpush3.xpose.msra.mxu0 %v11153_v50  ;;  %8867 = vmatpush3.xpose.msra.mxu1 %v2468_v18  ;;  %14954 = vst [vmem:[#allocation33_spill] sm:$0xff] %v11309_v10 }
 0x146   : > { %8795 = vmatprep.mubr.f32.mxu1 %v10823_v57  ;;  %8816 = vmatprep.subr.mxu0 %v11176_v30  ;;  %v11238_v57 = vand.u32 4294901760, %v2166_v5  ;;  %v11244_v9 = vand.u32 4294901760, %v11234_v17 }
 0x147   : > { %8868 = vmatprep.subr.mxu1 %v2475_v36 }
 0x148   : > { %8796 = vmatmul.mubr.f32.gmra.mxu1 %v10833_v41  ;;  %14945 = vst [vmem:[#allocation23_spill] sm:$0xff] %v11238_v57  ;;  %14946 = vst [vmem:[#allocation24_spill] sm:$0xff] %v11244_v9  ;;  %v2165_v41 = vld [vmem:[%s10322_s27 + $0x8] sm:$0xff]  ;;  %v11253_v14 = vsub.f32 %v2166_v5, %v11238_v57  ;;  %v2502_v15 = vsub.f32 %v11234_v17, %v11244_v9  ;;  %v2152_v5 = vld [vmem:[%s10299_s26 + $0x20] sm:$0xff] }
 0x149   : > { %8817 = vmatpush3.xpose.msra.mxu0 %v11176_v30  ;;  %8869 = vmatpush3.xpose.msra.mxu1 %v2475_v36  ;;  %v11259_v0 = vand.u32 4294901760, %v2165_v41  ;;  %v11303_v37 = vand.u32 4294901760, %v2152_v5  ;;  %v2155_v9 = vld [vmem:[%s10299_s26 + $0x38] sm:$0xff] }
 0x14a   : > { %8818 = vmatprep.subr.mxu0 %v11196_v53  ;;  %8870 = vmatprep.subr.mxu1 %v2482_v48  ;;  %v11270_v18 = vand.u32 4294901760, %v11253_v14  ;;  %v2503_v49 = vand.u32 4294901760, %v2502_v15  ;;  %v11322_v47 = vand.u32 4294901760, %v2155_v9 }
 0x14b   : > { %8886 = vmatprep.mubr.f32.mxu1 %v11127_v24  ;;  %14947 = vst [vmem:[#allocation26_spill] sm:$0xff] %v11259_v0  ;;  %v11279_v36 = vsub.f32 %v2165_v41, %v11259_v0  ;;  %v2510_v41 = vand.u32 4294901760, %v2509_v21  ;;  %v11311_v21 = vand.u32 4294901760, %v2153_v55  ;;  %v11326_v28 = vsub.f32 %v2152_v5, %v11303_v37 }
 0x14c   : > { %14949 = vst [vmem:[#allocation28_spill] sm:$0xff] %v11270_v18 }
 0x14d   : > { %8819 = vmatpush3.xpose.msra.mxu0 %v11196_v53  ;;  %8871 = vmatpush3.xpose.msra.mxu1 %v2482_v48  ;;  %v11284_v48 = vsub.f32 %v2149_v62, %v11265_v26  ;;  %v11295_v15 = vand.u32 4294901760, %v11279_v36  ;;  %v11298_v62 = vsub.f32 %v2164_v31, %v11276_v56  ;;  %14956 = vst [vmem:[#allocation37_spill] sm:$0xff] %v11326_v28 }
 0x14e   : > { %8820 = vmatprep.subr.mxu0 %v11212_v13  ;;  %8872 = vmatprep.subr.mxu1 %v2489_v63 }
 0x14f   : > { %14951 = vst [vmem:[#allocation25_spill] sm:$0xff] %v11284_v48  ;;  %14952 = vst [vmem:[#allocation30_spill] sm:$0xff] %v11295_v15  ;;  %v2523_v12 = vsub.f32 %v11279_v36, %v11295_v15  ;;  %v11318_v1 = vand.u32 4294901760, %v11298_v62  ;;  %v11333_v15 = vsub.f32 %v2153_v55, %v11311_v21  ;;  %v11345_v55 = vsub.f32 %v2155_v9, %v11322_v47  ;;  %v2159_v9 = vld [vmem:[%s10299_s26 + $0x58] sm:$0xff] }
 0x151   : > { %8821 = vmatpush3.xpose.msra.mxu0 %v11212_v13  ;;  %8873 = vmatpush3.xpose.msra.mxu1 %v2489_v63  ;;  %v2516_v63 = vsub.f32 %v11253_v14, %v11270_v18  ;;  %14955 = vst [vmem:[#allocation35_spill] sm:$0xff] %v11318_v1  ;;  %14958 = vst [vmem:[#allocation39_spill] sm:$0xff] %v11333_v15  ;;  %v2524_v5 = vand.u32 4294901760, %v2523_v12  ;;  %v2530_v24 = vsub.f32 %v11298_v62, %v11318_v1 }
 0x152   : > { %8822 = vmatprep.subr.mxu0 %v11227_v54  ;;  %8874 = vmatprep.subr.mxu1 %v2496_v46  ;;  %v14961_v12 = vand.u32 4294901760, %v11309_v10  ;;  %v14962_v1 = vand.u32 4294901760, %v11326_v28  ;;  %v14963_v16 = vand.u32 4294901760, %v11333_v15 }
 0x153   : > { %v2517_v31 = vand.u32 4294901760, %v2516_v63  ;;  %v2531_v61 = vand.u32 4294901760, %v2530_v24 }
 0x154   : > { %v2294_v3 = vsub.f32 %v11309_v10, %v14961_v12  ;;  %v2285_v12 = vand.u32 4294901760, %v2284_v40  ;;  %v2304_v10 = vsub.f32 %v11326_v28, %v14962_v1  ;;  %v2314_v24 = vsub.f32 %v11333_v15, %v14963_v16  ;;  %v2160_v40 = vld [vmem:[%s10299_s26 + $0x60] sm:$0xff]  ;;  %v2161_v1 = vld [vmem:[%s10299_s26 + $0x68] sm:$0xff] }
 0x155   : > { %8823 = vmatpush3.xpose.msra.mxu0 %v11227_v54  ;;  %8875 = vmatpush3.xpose.msra.mxu1 %v2496_v46  ;;  %v2154_v46 = vld [vmem:[%s10299_s26 + $0x30] sm:$0xff]  ;;  %v14966_v16 = vand.u32 4294901760, %v11345_v55  ;;  %v11395_v15 = vand.u32 4294901760, %v2160_v40 }
 0x156   : > { %8824 = vmatprep.subr.mxu0 %v11238_v57  ;;  %8876 = vmatprep.subr.mxu1 %v2503_v49  ;;  %v11320_v18 = vand.u32 4294901760, %v2154_v46  ;;  %v2305_v32 = vand.u32 4294901760, %v2304_v10  ;;  %v2163_v10 = vld [vmem:[%s10299_s26 + $0x78] sm:$0xff] }
 0x157   : > { %14967 = vst [vmem:[#allocation47_spill] sm:$0xff] %v11395_v15 }
 0x159   : > { %8825 = vmatpush3.xpose.msra.mxu0 %v11238_v57  ;;  %8877 = vmatpush3.xpose.msra.mxu1 %v2503_v49  ;;  %v14957_v49 = vand.u32 4294901760, %v11284_v48  ;;  %v11403_v57 = vand.u32 4294901760, %v2161_v1 }
 0x15a   : > { %8826 = vmatprep.subr.mxu0 %v11259_v0  ;;  %8878 = vmatprep.subr.mxu1 %v2510_v41 }
 0x15b   : > { %v2274_v63 = vsub.f32 %v11284_v48, %v14957_v49  ;;  %v11342_v49 = vsub.f32 %v2154_v46, %v11320_v18  ;;  %v11357_v46 = vand.u32 4294901760, %v2157_v22  ;;  %v2158_v48 = vld [vmem:[%s10299_s26 + $0x50] sm:$0xff]  ;;  %14968 = vst [vmem:[#allocation48_spill] sm:$0xff] %v11403_v57 }
 0x15d   : > { %8827 = vmatpush3.xpose.msra.mxu0 %v11259_v0  ;;  %8879 = vmatpush3.xpose.msra.mxu1 %v2510_v41  ;;  %14959 = vst [vmem:[#allocation42_spill] sm:$0xff] %v11342_v49  ;;  %v2275_v44 = vand.u32 4294901760, %v2274_v63  ;;  %v11377_v63 = vsub.f32 %v2157_v22, %v11357_v46  ;;  %v11379_v41 = vand.u32 4294901760, %v2159_v9  ;;  %v2334_v22 = vsub.f32 %v11345_v55, %v14966_v16 }
 0x15e   : > { %8828 = vmatprep.subr.mxu0 %v11276_v56  ;;  %8880 = vmatprep.subr.mxu1 %v2517_v31  ;;  %v2315_v0 = vand.u32 4294901760, %v2314_v24  ;;  %v11415_v24 = vsub.f32 %v2160_v40, %v11395_v15 }
 0x15f   : > { %14964 = vst [vmem:[#allocation46_spill] sm:$0xff] %v11379_v41  ;;  %v2335_v16 = vand.u32 4294901760, %v2334_v22 }
 0x161   : > { %8829 = vmatpush3.xpose.msra.mxu0 %v11276_v56  ;;  %8881 = vmatpush3.xpose.msra.mxu1 %v2517_v31  ;;  %v11371_v31 = vand.u32 4294901760, %v2158_v48  ;;  %v2295_v56 = vand.u32 4294901760, %v2294_v3  ;;  %v14965_v3 = vand.u32 4294901760, %v11342_v49 }
 0x162   : > { %8882 = vmatprep.subr.mxu1 %v2524_v5  ;;  %8910 = vmatprep.subr.mxu0 %v11046_v60 }
 0x164   : > { %8831 = vmatmul.mubr.f32.vlgmr.msra.gmra.mxu0 %v2275_v44  ;;  %v2324_v44 = vsub.f32 %v11342_v49, %v14965_v3  ;;  %v11397_v28 = vpop.f32.mrf.mxu0  ;;  %v14623_v3 = vand.u32 4294901760, %v11377_v63  ;;  %v11401_v49 = vsub.f32 %v2159_v9, %v11379_v41 }
 0x165   : > { %8883 = vmatpush3.xpose.msra.mxu1 %v2524_v5  ;;  %8911 = vmatpush3.xpose.msra.mxu0 %v11046_v60  ;;  %v14622_v5 = vand.u32 4294901760, %v11369_v29  ;;  %v11393_v60 = vsub.f32 %v2158_v48, %v11371_v31 }
 0x166   : > { %8884 = vmatprep.subr.mxu1 %v2531_v61  ;;  %8912 = vmatprep.subr.mxu0 %v11060_v4  ;;  %v2325_v48 = vand.u32 4294901760, %v2324_v44  ;;  %v2354_v44 = vsub.f32 %v11377_v63, %v14623_v3  ;;  %v14626_v3 = vand.u32 4294901760, %v11415_v24 }
 0x167   : > { %8833 = vmatprep.mubr.f32.mxu0 %v2285_v12  ;;  %v2162_v12 = vld [vmem:[%s10299_s26 + $0x70] sm:$0xff]  ;;  %v14624_v9 = vand.u32 4294901760, %v11393_v60 }
 0x168   : > { %8834 = vmatmul.mubr.f32.gmra.mxu0 %v2295_v56  ;;  %v2344_v56 = vsub.f32 %v11369_v29, %v14622_v5  ;;  %v11429_v5 = vand.u32 4294901760, %v2163_v10  ;;  %v2355_v22 = vand.u32 4294901760, %v2354_v44 }
 0x169   : > { %8885 = vmatpush3.xpose.msra.mxu1 %v2531_v61  ;;  %8913 = vmatpush3.xpose.msra.mxu0 %v11060_v4  ;;  %v11417_v61 = vand.u32 4294901760, %v2162_v12  ;;  %v11419_v4 = vpop.f32.mrf.mxu0 }
 0x16a   : > { %8914 = vmatprep.subr.mxu0 %v11075_v51  ;;  %8966 = vmatprep.subr.mxu1 %v11036_v45  ;;  %14970 = vst [vmem:[#allocation50_spill] sm:$0xff] %v11419_v4  ;;  %14971 = vst [vmem:[#allocation51_spill] sm:$0xff] %v11429_v5  ;;  %v2345_v40 = vand.u32 4294901760, %v2344_v56  ;;  %v14973_v4 = vand.u32 4294901760, %v11401_v49  ;;  %v11451_v56 = vsub.f32 %v2163_v10, %v11429_v5 }
 0x16b   : > { %8836 = vmatprep.mubr.f32.mxu0 %v2305_v32  ;;  %14969 = vst [vmem:[#allocation49_spill] sm:$0xff] %v11417_v61  ;;  %v11427_v32 = vsub.f32 %v2161_v1, %v11403_v57  ;;  %v2364_v1 = vsub.f32 %v11393_v60, %v14624_v9  ;;  %v2384_v10 = vsub.f32 %v11415_v24, %v14626_v3 }
 0x16c   : > { %8887 = vmatmul.mubr.f32.vlgmr.msra.gmra.mxu1 %v11265_v26  ;;  %8837 = vmatmul.mubr.f32.gmra.mxu0 %v2315_v0  ;;  %v11435_v0 = vpop.f32.mrf.mxu0  ;;  %v11455_v9 = vpop.f32.mrf.mxu1 }
 0x16d   : > { %8915 = vmatpush3.xpose.msra.mxu0 %v11075_v51  ;;  %8967 = vmatpush3.xpose.msra.mxu1 %v11036_v45  ;;  %14972 = vst [vmem:[#allocation52_spill] sm:$0xff] %v11435_v0  ;;  %v11443_v51 = vsub.f32 %v2162_v12, %v11417_v61  ;;  %v2374_v0 = vsub.f32 %v11401_v49, %v14973_v4 }
 0x16e   : > { %8916 = vmatprep.subr.mxu0 %v11085_v59  ;;  %8968 = vmatprep.subr.mxu1 %v11043_v34  ;;  %v11459_v12 = vpop.f32.mrf.mxu0 }
 0x16f   : > { %8889 = vmatprep.mubr.f32.mxu1 %v11281_v39  ;;  %8839 = vmatprep.mubr.f32.mxu0 %v2325_v48  ;;  %v14625_v48 = vand.u32 4294901760, %v11427_v32  ;;  %14974 = vst [vmem:[#allocation53_spill] sm:$0xff] %v11459_v12  ;;  %v2375_v4 = vand.u32 4294901760, %v2374_v0  ;;  %v14627_v12 = vand.u32 4294901760, %v11451_v56 }
 0x170   : > { %8890 = vmatmul.mubr.f32.gmra.mxu1 %v11286_v42  ;;  %8840 = vmatmul.mubr.f32.gmra.mxu0 %v2335_v16  ;;  %v2365_v16 = vand.u32 4294901760, %v2364_v1  ;;  %v11477_v1 = vpop.f32.mrf.mxu0 }
 0x171   : > { %8917 = vmatpush3.xpose.msra.mxu0 %v11085_v59  ;;  %8969 = vmatpush3.xpose.msra.mxu1 %v11043_v34  ;;  %v14628_v59 = vand.u32 4294901760, %v11443_v51  ;;  %v2394_v44 = vsub.f32 %v11427_v32, %v14625_v48  ;;  %v2414_v3 = vsub.f32 %v11451_v56, %v14627_v12 }
 0x172   : > { %8918 = vmatprep.subr.mxu0 %v11103_v58  ;;  %8970 = vmatprep.subr.mxu1 %v11053_v2 }
 0x173   : > { %8892 = vmatprep.mubr.f32.mxu1 %v11303_v37  ;;  %8842 = vmatprep.mubr.f32.mxu0 %v2345_v40  ;;  %v11473_v40 = vpop.f32.mrf.mxu1  ;;  %v2404_v0 = vsub.f32 %v11443_v51, %v14628_v59 }
 0x174   : > { %8893 = vmatmul.mubr.f32.gmra.mxu1 %v11311_v21  ;;  %8843 = vmatmul.mubr.f32.gmra.mxu0 %v2355_v22  ;;  %v2385_v22 = vand.u32 4294901760, %v2384_v10 }
 0x175   : > { %8919 = vmatpush3.xpose.msra.mxu0 %v11103_v58  ;;  %8971 = vmatpush3.xpose.msra.mxu1 %v11053_v2  ;;  %v11483_v48 = vpop.f32.mrf.mxu1  ;;  %v2395_v58 = vand.u32 4294901760, %v2394_v44  ;;  %v2405_v10 = vand.u32 4294901760, %v2404_v0  ;;  %v2415_v44 = vand.u32 4294901760, %v2414_v3 }
 0x176   : > { %8920 = vmatprep.subr.mxu0 %v11125_v33  ;;  %8972 = vmatprep.subr.mxu1 %v11066_v19 }
 0x177   : > { %8895 = vmatprep.mubr.f32.mxu1 %v11320_v18  ;;  %8845 = vmatprep.mubr.f32.mxu0 %v2365_v16  ;;  %v11493_v16 = vpop.f32.mrf.mxu0 }
 0x178   : > { %8896 = vmatmul.mubr.f32.gmra.mxu1 %v11322_v47  ;;  %8846 = vmatmul.mubr.f32.gmra.mxu0 %v2375_v4  ;;  %v11496_v4 = vpop.f32.mrf.mxu1 }
 0x179   : > { %8921 = vmatpush3.xpose.msra.mxu0 %v11125_v33  ;;  %8973 = vmatpush3.xpose.msra.mxu1 %v11066_v19  ;;  %v11503_v33 = vpop.f32.mrf.mxu0 }
 0x17a   : > { %8922 = vmatprep.subr.mxu0 %v11145_v35  ;;  %8974 = vmatprep.subr.mxu1 %v11082_v43 }
 0x17b   : > { %8898 = vmatprep.mubr.f32.mxu1 %v11351_v52  ;;  %8848 = vmatprep.mubr.f32.mxu0 %v2385_v22  ;;  %v11506_v22 = vpop.f32.mrf.mxu1 }
 0x17c   : > { %8899 = vmatmul.mubr.f32.gmra.mxu1 %v11357_v46  ;;  %8849 = vmatmul.mubr.f32.gmra.mxu0 %v2395_v58  ;;  %v14976_v58 = vand.u32 4294901760, %v11148_v11 }
 0x17d   : > { %8923 = vmatpush3.xpose.msra.mxu0 %v11145_v35  ;;  %8975 = vmatpush3.xpose.msra.mxu1 %v11082_v43  ;;  %v11513_v35 = vpop.f32.mrf.mxu0  ;;  %v11517_v3 = vpop.f32.mrf.mxu1 }
 0x17e   : > { %8924 = vmatprep.subr.mxu0 %v11165_v23  ;;  %8976 = vmatprep.subr.mxu1 %v11107_v20 }
 0x17f   : > { %8901 = vmatprep.mubr.f32.mxu1 %v11371_v31  ;;  %8851 = vmatprep.mubr.f32.mxu0 %v2405_v10  ;;  %v11527_v0 = vpop.f32.mrf.mxu1 }
 0x180   : > { %8902 = vmatmul.mubr.f32.gmra.mxu1 %v11379_v41  ;;  %8852 = vmatmul.mubr.f32.gmra.mxu0 %v2415_v44 }
 0x181   : > { %8925 = vmatpush3.xpose.msra.mxu0 %v11165_v23  ;;  %8977 = vmatpush3.xpose.msra.mxu1 %v11107_v20  ;;  %v11524_v23 = vpop.f32.mrf.mxu0  ;;  %v11538_v10 = vpop.f32.mrf.mxu1 }
 0x182   : > { %8926 = vmatprep.subr.mxu0 %v11172_v25  ;;  %8978 = vmatprep.subr.mxu1 %v11122_v6  ;;  %14975 = vst [vmem:[#allocation54_spill] sm:$0xff] %v11524_v23 }
 0x183   : > { %8904 = vmatprep.mubr.f32.mxu1 %v11395_v15  ;;  %8942 = vmatprep.mubr.f32.mxu0 %v11148_v11  ;;  %v11546_v44 = vpop.f32.mrf.mxu1 }
 0x184   : > { %8905 = vmatmul.mubr.f32.gmra.mxu1 %v11403_v57  ;;  %14978 = vst [vmem:[#allocation56_spill] sm:$0xff] %v11546_v44  ;;  %v14991_v57 = vld [vmem:[#allocation25_spill] sm:$0xff]  ;;  %v15002_v44 = vld [vmem:[#allocation38_spill] sm:$0xff] }
 0x185   : > { %8927 = vmatpush3.xpose.msra.mxu0 %v11172_v25  ;;  %8979 = vmatpush3.xpose.msra.mxu1 %v11122_v6  ;;  %v11534_v25 = vpop.f32.mrf.mxu0  ;;  %v15000_v15 = vand.u32 4294901760, %v14991_v57 }
 0x186   : > { %8928 = vmatprep.subr.mxu0 %v11199_v38  ;;  %8980 = vmatprep.subr.mxu1 %v11139_v8 }
 0x187   : > { %8907 = vmatprep.mubr.f32.mxu1 %v11417_v61  ;;  %v14989_v61 = vld [vmem:[#allocation32_spill] sm:$0xff] }
 0x188   : > { %8908 = vmatmul.mubr.f32.gmra.mxu1 %v11429_v5  ;;  %v14985_v5 = vld [vmem:[#allocation23_spill] sm:$0xff] }
 0x189   : > { %8929 = vmatpush3.xpose.msra.mxu0 %v11199_v38  ;;  %8981 = vmatpush3.xpose.msra.mxu1 %v11139_v8  ;;  %v11544_v38 = vpop.f32.mrf.mxu0 }
 0x18a   : > { %8930 = vmatprep.subr.mxu0 %v11218_v27  ;;  %8982 = vmatprep.subr.mxu1 %v11153_v50  ;;  %14977 = vst [vmem:[#allocation55_spill] sm:$0xff] %v11544_v38  ;;  %v14996_v38 = vld [vmem:[#allocation33_spill] sm:$0xff] }
 0x18b   : > { %8998 = vmatprep.mubr.f32.mxu1 %v14976_v58  ;;  %v11552_v11 = vpop.f32.mrf.mxu0 }
 0x18c   : > { %14979 = vst [vmem:[#allocation57_spill] sm:$0xff] %v11552_v11 }
 0x18d   : > { %8931 = vmatpush3.xpose.msra.mxu0 %v11218_v27  ;;  %8983 = vmatpush3.xpose.msra.mxu1 %v11153_v50  ;;  %v11554_v27 = vpop.f32.mrf.mxu1  ;;  %v11560_v58 = vpop.f32.mrf.mxu0 }
 0x18e   : > { %8932 = vmatprep.subr.mxu0 %v11234_v17  ;;  %8984 = vmatprep.subr.mxu1 %v11176_v30  ;;  %14980 = vst [vmem:[#allocation58_spill] sm:$0xff] %v11560_v58 }
 0x18f   : > { %v11568_v12 = vpop.f32.mrf.mxu0 }
 0x190   : > { %14982 = vst [vmem:[#allocation60_spill] sm:$0xff] %v11568_v12  ;;  %v14988_v12 = vld [vmem:[#allocation26_spill] sm:$0xff] }
 0x191   : > { %8933 = vmatpush3.xpose.msra.mxu0 %v11234_v17  ;;  %8985 = vmatpush3.xpose.msra.mxu1 %v11176_v30  ;;  %v11562_v17 = vpop.f32.mrf.mxu1  ;;  %v11574_v59 = vpop.f32.mrf.mxu0 }
 0x192   : > { %8934 = vmatprep.subr.mxu0 %v11247_v7  ;;  %8986 = vmatprep.subr.mxu1 %v11196_v53  ;;  %14981 = vst [vmem:[#allocation59_spill] sm:$0xff] %v11562_v17  ;;  %14984 = vst [vmem:[#allocation62_spill] sm:$0xff] %v11574_v59  ;;  %v14994_v17 = vld [vmem:[#allocation31_spill] sm:$0xff] }
 0x193   : > { %v11582_v58 = vpop.f32.mrf.mxu0  ;;  %v15003_v23 = vand.u32 4294901760, %v14994_v17 }
 0x194   : > { %14987 = vst [vmem:[#allocation63_spill] sm:$0xff] %v11582_v58 }
 0x195   : > { %8935 = vmatpush3.xpose.msra.mxu0 %v11247_v7  ;;  %8987 = vmatpush3.xpose.msra.mxu1 %v11196_v53  ;;  %v11570_v7 = vpop.f32.mrf.mxu1 }
 0x196   : > { %8936 = vmatprep.subr.mxu0 %v11253_v14  ;;  %8988 = vmatprep.subr.mxu1 %v11212_v13  ;;  %14983 = vst [vmem:[#allocation61_spill] sm:$0xff] %v11570_v7  ;;  %v14997_v7 = vld [vmem:[#allocation20_spill] sm:$0xff] }
 0x199   : > { %8937 = vmatpush3.xpose.msra.mxu0 %v11253_v14  ;;  %8989 = vmatpush3.xpose.msra.mxu1 %v11212_v13  ;;  %v11578_v14 = vpop.f32.mrf.mxu1 }
 0x19a   : > { %8938 = vmatprep.subr.mxu0 %v11279_v36  ;;  %8990 = vmatprep.subr.mxu1 %v11227_v54  ;;  %14986 = vst [vmem:[#allocation23_spill] sm:$0xff] %v11578_v14  ;;  %v14992_v14 = vld [vmem:[#allocation29_spill] sm:$0xff] }
 0x19d   : > { %8939 = vmatpush3.xpose.msra.mxu0 %v11279_v36  ;;  %8991 = vmatpush3.xpose.msra.mxu1 %v11227_v54  ;;  %v11586_v36 = vpop.f32.mrf.mxu1 }
 0x19e   : > { %8940 = vmatprep.subr.mxu0 %v11298_v62  ;;  %8992 = vmatprep.subr.mxu1 %v14985_v5  ;;  %14990 = vst [vmem:[#allocation26_spill] sm:$0xff] %v11586_v36 }
 0x19f   : > { %v11596_v58 = vpop.f32.mrf.mxu1 }
 0x1a0   : > { %14995 = vst [vmem:[#allocation32_spill] sm:$0xff] %v11596_v58  ;;  %v15001_v58 = vld [vmem:[#allocation39_spill] sm:$0xff] }
 0x1a1   : > { %8941 = vmatpush3.xpose.msra.mxu0 %v11298_v62  ;;  %8993 = vmatpush3.xpose.msra.mxu1 %v14985_v5  ;;  %v14993_v62 = vld [vmem:[#allocation34_spill] sm:$0xff]  ;;  %v11606_v11 = vpop.f32.mrf.mxu1 }
 0x1a2   : > { %8994 = vmatprep.subr.mxu1 %v14988_v12  ;;  %9022 = vmatprep.subr.mxu0 %v14989_v61  ;;  %14999 = vst [vmem:[#allocation25_spill] sm:$0xff] %v11606_v11  ;;  %v15004_v11 = vld [vmem:[#allocation42_spill] sm:$0xff] }
 0x1a4   : > { %8943 = vmatmul.mubr.f32.vlgmr.msra.gmra.mxu0 %v14991_v57  ;;  %v11591_v59 = vpop.f32.mrf.mxu0  ;;  %v15005_v57 = vand.u32 4294901760, %v14996_v38 }
 0x1a5   : > { %8995 = vmatpush3.xpose.msra.mxu1 %v14988_v12  ;;  %9023 = vmatpush3.xpose.msra.mxu0 %v14989_v61  ;;  %v14998_v61 = vld [vmem:[#allocation37_spill] sm:$0xff] }
 0x1a6   : > { %8996 = vmatprep.subr.mxu1 %v14992_v14  ;;  %9024 = vmatprep.subr.mxu0 %v14993_v62  ;;  %v11601_v36 = vpop.f32.mrf.mxu0 }
 0x1a7   : > { %8945 = vmatprep.mubr.f32.mxu0 %v14994_v17  ;;  %v15009_v17 = vld [vmem:[#allocation21_spill] sm:$0xff] }
 0x1a8   : > { %8946 = vmatmul.mubr.f32.gmra.mxu0 %v14996_v38  ;;  %v15008_v38 = vand.u32 4294901760, %v15001_v58 }
 0x1a9   : > { %8997 = vmatpush3.xpose.msra.mxu1 %v14992_v14  ;;  %9025 = vmatpush3.xpose.msra.mxu0 %v14993_v62  ;;  %v11613_v62 = vpop.f32.mrf.mxu0 }
 0x1aa   : > { %9026 = vmatprep.subr.mxu0 %v14997_v7  ;;  %9078 = vmatprep.subr.mxu1 %v11036_v45 }
 0x1ab   : > { %8948 = vmatprep.mubr.f32.mxu0 %v14998_v61 }
 0x1ac   : > { %8999 = vmatmul.mubr.f32.vlgmr.msra.gmra.mxu1 %v15000_v15  ;;  %8949 = vmatmul.mubr.f32.gmra.mxu0 %v15001_v58  ;;  %v11615_v41 = vpop.f32.mrf.mxu1  ;;  %v15011_v58 = vand.u32 4294901760, %v11345_v55 }
 0x1ad   : > { %9027 = vmatpush3.xpose.msra.mxu0 %v14997_v7  ;;  %9079 = vmatpush3.xpose.msra.mxu1 %v11036_v45  ;;  %v11627_v45 = vpop.f32.mrf.mxu0  ;;  %v15006_v7 = vld [vmem:[#allocation40_spill] sm:$0xff] }
 0x1ae   : > { %9028 = vmatprep.subr.mxu0 %v15002_v44  ;;  %9080 = vmatprep.subr.mxu1 %v11043_v34  ;;  %v11629_v15 = vpop.f32.mrf.mxu1 }
 0x1af   : > { %9001 = vmatprep.mubr.f32.mxu1 %v15003_v23  ;;  %8951 = vmatprep.mubr.f32.mxu0 %v15004_v11  ;;  %v15007_v23 = vand.u32 4294901760, %v14998_v61  ;;  %v15010_v61 = vand.u32 4294901760, %v15004_v11  ;;  %v15013_v11 = vand.u32 4294901760, %v11369_v29 }
 0x1b0   : > { %9002 = vmatmul.mubr.f32.gmra.mxu1 %v15005_v57  ;;  %8952 = vmatmul.mubr.f32.gmra.mxu0 %v11345_v55  ;;  %v15014_v55 = vand.u32 4294901760, %v11377_v63 }
 0x1b1   : > { %9029 = vmatpush3.xpose.msra.mxu0 %v15002_v44  ;;  %9081 = vmatpush3.xpose.msra.mxu1 %v11043_v34  ;;  %v11641_v34 = vpop.f32.mrf.mxu0  ;;  %v11643_v44 = vpop.f32.mrf.mxu1 }
 0x1b2   : > { %9030 = vmatprep.subr.mxu0 %v15006_v7  ;;  %9082 = vmatprep.subr.mxu1 %v11053_v2 }
 0x1b3   : > { %9004 = vmatprep.mubr.f32.mxu1 %v15007_v23  ;;  %8954 = vmatprep.mubr.f32.mxu0 %v11369_v29  ;;  %v11657_v57 = vpop.f32.mrf.mxu1  ;;  %v15016_v29 = vand.u32 4294901760, %v11393_v60 }
 0x1b4   : > { %9005 = vmatmul.mubr.f32.gmra.mxu1 %v15008_v38  ;;  %8955 = vmatmul.mubr.f32.gmra.mxu0 %v11377_v63  ;;  %v15015_v38 = vld [vmem:[#allocation43_spill] sm:$0xff]  ;;  %v15017_v63 = vand.u32 4294901760, %v11401_v49 }
 0x1b5   : > { %9031 = vmatpush3.xpose.msra.mxu0 %v15006_v7  ;;  %9083 = vmatpush3.xpose.msra.mxu1 %v11053_v2  ;;  %v11655_v2 = vpop.f32.mrf.mxu0  ;;  %v15012_v7 = vld [vmem:[#allocation41_spill] sm:$0xff]  ;;  %v11671_v23 = vpop.f32.mrf.mxu1 }
 0x1b6   : > { %9032 = vmatprep.subr.mxu0 %v15009_v17  ;;  %9084 = vmatprep.subr.mxu1 %v11066_v19 }
 0x1b7   : > { %9007 = vmatprep.mubr.f32.mxu1 %v15010_v61  ;;  %8957 = vmatprep.mubr.f32.mxu0 %v11393_v60  ;;  %v15018_v61 = vld [vmem:[#allocation22_spill] sm:$0xff]  ;;  %v15019_v60 = vand.u32 4294901760, %v11415_v24 }
 0x1b8   : > { %9008 = vmatmul.mubr.f32.gmra.mxu1 %v15011_v58  ;;  %8958 = vmatmul.mubr.f32.gmra.mxu0 %v11401_v49  ;;  %v15020_v58 = vld [vmem:[#allocation36_spill] sm:$0xff]  ;;  %v15021_v49 = vand.u32 4294901760, %v11427_v32 }
 0x1b9   : > { %9033 = vmatpush3.xpose.msra.mxu0 %v15009_v17  ;;  %9085 = vmatpush3.xpose.msra.mxu1 %v11066_v19  ;;  %v11669_v19 = vpop.f32.mrf.mxu0  ;;  %v11685_v17 = vpop.f32.mrf.mxu1 }
 0x1ba   : > { %9034 = vmatprep.subr.mxu0 %v15012_v7  ;;  %9086 = vmatprep.subr.mxu1 %v11082_v43 }
 0x1bb   : > { %9010 = vmatprep.mubr.f32.mxu1 %v15013_v11  ;;  %8960 = vmatprep.mubr.f32.mxu0 %v11415_v24  ;;  %v15022_v11 = vld [vmem:[#allocation44_spill] sm:$0xff]  ;;  %v15023_v24 = vand.u32 4294901760, %v11443_v51 }
 0x1bc   : > { %9011 = vmatmul.mubr.f32.gmra.mxu1 %v15014_v55  ;;  %8961 = vmatmul.mubr.f32.gmra.mxu0 %v11427_v32  ;;  %v15024_v55 = vand.u32 4294901760, %v11451_v56 }
 0x1bd   : > { %9035 = vmatpush3.xpose.msra.mxu0 %v15012_v7  ;;  %9087 = vmatpush3.xpose.msra.mxu1 %v11082_v43  ;;  %v11683_v43 = vpop.f32.mrf.mxu0  ;;  %v11698_v7 = vpop.f32.mrf.mxu1 }
 0x1be   : > { %9036 = vmatprep.subr.mxu0 %v15015_v38  ;;  %9088 = vmatprep.subr.mxu1 %v11107_v20 }
 0x1bf   : > { %9013 = vmatprep.mubr.f32.mxu1 %v15016_v29  ;;  %8963 = vmatprep.mubr.f32.mxu0 %v11443_v51  ;;  %v15026_v29 = vld [vmem:[#allocation24_spill] sm:$0xff] }
 0x1c0   : > { %9014 = vmatmul.mubr.f32.gmra.mxu1 %v15017_v63  ;;  %8964 = vmatmul.mubr.f32.gmra.mxu0 %v11451_v56 }
 0x1c1   : > { %9037 = vmatpush3.xpose.msra.mxu0 %v15015_v38  ;;  %9089 = vmatpush3.xpose.msra.mxu1 %v11107_v20  ;;  %v11696_v20 = vpop.f32.mrf.mxu0  ;;  %v15025_v38 = vld [vmem:[#allocation45_spill] sm:$0xff] }
 0x1c2   : > { %9038 = vmatprep.subr.mxu0 %v15018_v61  ;;  %9090 = vmatprep.subr.mxu1 %v11122_v6 }
 0x1c3   : > { %9016 = vmatprep.mubr.f32.mxu1 %v15019_v60  ;;  %9054 = vmatprep.mubr.f32.mxu0 %v15020_v58  ;;  %v11708_v32 = vpop.f32.mrf.mxu0 }
 0x1c4   : > { %9017 = vmatmul.mubr.f32.gmra.mxu1 %v15021_v49 }
 0x1c5   : > { %9039 = vmatpush3.xpose.msra.mxu0 %v15018_v61  ;;  %9091 = vmatpush3.xpose.msra.mxu1 %v11122_v6  ;;  %v11710_v6 = vpop.f32.mrf.mxu1  ;;  %v11717_v51 = vpop.f32.mrf.mxu0  ;;  %v15027_v61 = vld [vmem:[#allocation27_spill] sm:$0xff] }
 0x1c6   : > { %9040 = vmatprep.subr.mxu0 %v15022_v11  ;;  %9092 = vmatprep.subr.mxu1 %v11139_v8 }
 0x1c7   : > { %9019 = vmatprep.mubr.f32.mxu1 %v15023_v24  ;;  %v11719_v56 = vpop.f32.mrf.mxu1 }
 0x1c8   : > { %9020 = vmatmul.mubr.f32.gmra.mxu1 %v15024_v55  ;;  %v15033_v55 = vld [vmem:[#allocation35_spill] sm:$0xff] }
 0x1c9   : > { %9041 = vmatpush3.xpose.msra.mxu0 %v15022_v11  ;;  %9093 = vmatpush3.xpose.msra.mxu1 %v11139_v8  ;;  %v11725_v8 = vpop.f32.mrf.mxu0  ;;  %v11727_v63 = vpop.f32.mrf.mxu1  ;;  %v15030_v11 = vld [vmem:[#allocation30_spill] sm:$0xff] }
 0x1ca   : > { %9042 = vmatprep.subr.mxu0 %v15025_v38  ;;  %9094 = vmatprep.subr.mxu1 %v11153_v50 }
 0x1cb   : > { %9110 = vmatprep.mubr.f32.mxu1 %v15020_v58  ;;  %v11735_v60 = vpop.f32.mrf.mxu1  ;;  %v15029_v58 = vld [vmem:[#allocation28_spill] sm:$0xff] }
 0x1cd   : > { %9043 = vmatpush3.xpose.msra.mxu0 %v15025_v38  ;;  %9095 = vmatpush3.xpose.msra.mxu1 %v11153_v50  ;;  %v11733_v50 = vpop.f32.mrf.mxu0  ;;  %v11743_v49 = vpop.f32.mrf.mxu1 }
 0x1ce   : > { %9044 = vmatprep.subr.mxu0 %v15026_v29  ;;  %9096 = vmatprep.subr.mxu1 %v11176_v30  ;;  %15028 = vst [vmem:[#allocation29_spill] sm:$0xff] %v11733_v50 }
 0x1cf   : > { %v11751_v24 = vpop.f32.mrf.mxu1 }
 0x1d0   : > { %15032 = vst [vmem:[#allocation31_spill] sm:$0xff] %v11751_v24  ;;  %v15038_v24 = vld [vmem:[#allocation52_spill] sm:$0xff] }
 0x1d1   : > { %9045 = vmatpush3.xpose.msra.mxu0 %v15026_v29  ;;  %9097 = vmatpush3.xpose.msra.mxu1 %v11176_v30  ;;  %v11741_v30 = vpop.f32.mrf.mxu0  ;;  %v11759_v38 = vpop.f32.mrf.mxu1 }
 0x1d2   : > { %9046 = vmatprep.subr.mxu0 %v15027_v61  ;;  %9098 = vmatprep.subr.mxu1 %v11196_v53  ;;  %15035 = vst [vmem:[#allocation20_spill] sm:$0xff] %v11759_v38  ;;  %v15039_v38 = vld [vmem:[#allocation53_spill] sm:$0xff] }
 0x1d5   : > { %9047 = vmatpush3.xpose.msra.mxu0 %v15027_v61  ;;  %9099 = vmatpush3.xpose.msra.mxu1 %v11196_v53  ;;  %v11749_v53 = vpop.f32.mrf.mxu0  ;;  %v11767_v61 = vpop.f32.mrf.mxu1 }
 0x1d6   : > { %9048 = vmatprep.subr.mxu0 %v15029_v58  ;;  %9100 = vmatprep.subr.mxu1 %v11212_v13  ;;  %15031 = vst [vmem:[#allocation34_spill] sm:$0xff] %v11749_v53  ;;  %15036 = vst [vmem:[#allocation37_spill] sm:$0xff] %v11767_v61 }
 0x1d9   : > { %9049 = vmatpush3.xpose.msra.mxu0 %v15029_v58  ;;  %9101 = vmatpush3.xpose.msra.mxu1 %v11212_v13  ;;  %v11757_v13 = vpop.f32.mrf.mxu0 }
 0x1da   : > { %9050 = vmatprep.subr.mxu0 %v15030_v11  ;;  %9102 = vmatprep.subr.mxu1 %v11227_v54  ;;  %15034 = vst [vmem:[#allocation33_spill] sm:$0xff] %v11757_v13 }
 0x1dd   : > { %9051 = vmatpush3.xpose.msra.mxu0 %v15030_v11  ;;  %9103 = vmatpush3.xpose.msra.mxu1 %v11227_v54  ;;  %v1257_v54 = vadd.f32 %v11455_v9, %v11397_v28  ;;  %v1269_v28 = vadd.f32 %v11483_v48, %v15038_v24 }
 0x1de   : > { %9052 = vmatprep.subr.mxu0 %v15033_v55  ;;  %9104 = vmatprep.subr.mxu1 %v14985_v5 }
 0x1e1   : > { %9053 = vmatpush3.xpose.msra.mxu0 %v15033_v55  ;;  %9105 = vmatpush3.xpose.msra.mxu1 %v14985_v5  ;;  %v1452_v5 = vadd.f32 %v11591_v59, %v1257_v54  ;;  %v15037_v55 = vld [vmem:[#allocation50_spill] sm:$0xff]  ;;  %v1466_v54 = vadd.f32 %v11613_v62, %v1269_v28 }
 0x1e2   : > { %9106 = vmatprep.subr.mxu1 %v14988_v12  ;;  %v1251_v53 = vadd.f32 %v11473_v40, %v15037_v55  ;;  %v1263_v40 = vadd.f32 %v11496_v4, %v15039_v38 }
 0x1e3   : > { %v1647_v9 = vadd.f32 %v11615_v41, %v1452_v5  ;;  %v1663_v48 = vadd.f32 %v11643_v44, %v1466_v54  ;;  %v15047_v54 = vld [vmem:[#allocation46_spill] sm:$0xff] }
 0x1e4   : > { %v8720_v29 = vpop.f32.mrf.mxu0  ;;  %9055 = vmatmul.mubr.f32.vlgmr.msra.gmra.mxu0 %v11265_v26  ;;  %v1445_v59 = vadd.f32 %v11601_v36, %v1251_v53  ;;  %v1275_v36 = vadd.f32 %v11517_v3, %v11493_v16  ;;  %v1459_v53 = vadd.f32 %v11627_v45, %v1263_v40  ;;  %v15050_v40 = vld [vmem:[#allocation57_spill] sm:$0xff] }
 0x1e5   : > { %9107 = vmatpush3.xpose.msra.mxu1 %v14988_v12  ;;  %9057 = vmatprep.mubr.f32.mxu0 %v11281_v39  ;;  %v11779_v12 = vpop.f32.mrf.mxu1  ;;  %v1884_v13 = vadd.f32 %v8720_v29, %v1647_v9 }
 0x1e6   : > { %v1877_v58 = vpop.f32.mrf.mxu0  ;;  %9108 = vmatprep.subr.mxu1 %v14992_v14  ;;  %v1639_v41 = vadd.f32 %v11629_v15, %v1445_v59  ;;  %v1473_v15 = vadd.f32 %v11655_v2, %v1275_v36 }
 0x1e8   : > { %v8723_v11 = vpop.f32.mrf.mxu0  ;;  %9058 = vmatmul.mubr.f32.gmra.mxu0 %v11286_v42  ;;  %v1878_v24 = vadd.f32 %v1877_v58, %v1639_v41 }
 0x1e9   : > { %9109 = vmatpush3.xpose.msra.mxu1 %v14992_v14  ;;  %9060 = vmatprep.mubr.f32.mxu0 %v11303_v37  ;;  %v1896_v38 = vadd.f32 %v8723_v11, %v1663_v48  ;;  %v15046_v11 = vld [vmem:[#allocation56_spill] sm:$0xff] }
 0x1ea   : > { %v1889_v61 = vpop.f32.mrf.mxu0 }
 0x1ec   : > { %v8726_v55 = vpop.f32.mrf.mxu0  ;;  %v8776_v50 = vpop.f32.mrf.mxu1  ;;  %9061 = vmatmul.mubr.f32.gmra.mxu0 %v11311_v21  ;;  %9111 = vmatmul.mubr.f32.vlgmr.msra.gmra.mxu1 %v11265_v26  ;;  %v1281_v26 = vadd.f32 %v11506_v22, %v11477_v1  ;;  %v1287_v1 = vadd.f32 %v11538_v10, %v11513_v35 }
 0x1ed   : > { %v11789_v14 = vadd.f32 %v8776_v50, %v1884_v13  ;;  %9063 = vmatprep.mubr.f32.mxu0 %v11320_v18  ;;  %9113 = vmatprep.mubr.f32.mxu1 %v11281_v39  ;;  %v1655_v39 = vadd.f32 %v11657_v57, %v1459_v53  ;;  %v1671_v13 = vadd.f32 %v11685_v17, %v1473_v15  ;;  %v15053_v53 = vld [vmem:[#allocation55_spill] sm:$0xff] }
 0x1ee   : > { %v1901_v4 = vpop.f32.mrf.mxu0  ;;  %v2054_v62 = vpop.f32.mrf.mxu1  ;;  %v1480_v2 = vadd.f32 %v11641_v34, %v1281_v26  ;;  %v1293_v57 = vadd.f32 %v11527_v0, %v11503_v33  ;;  %v1487_v29 = vadd.f32 %v11683_v43, %v1287_v1  ;;  %v1299_v33 = vadd.f32 %v11554_v27, %v11534_v25  ;;  %v15058_v1 = vld [vmem:[#allocation60_spill] sm:$0xff] }
 0x1ef   : > { %15040 = vst [vmem:[#allocation39_spill] sm:$0xff] %v11789_v14  ;;  %3567 = vmax.xlane.f32.xlu0 %v11789_v14  ;;  %v11803_v16 = vadd.f32 %v2054_v62, %v1878_v24  ;;  %v1902_v10 = vadd.f32 %v1901_v4, %v1671_v13  ;;  %v10146_v4 = vmov 0   ;;  %v15054_v24 = vld [vmem:[#allocation59_spill] sm:$0xff] }
 0x1f0   : > { %v8729_v44 = vpop.f32.mrf.mxu0  ;;  %v8779_v50 = vpop.f32.mrf.mxu1  ;;  %9064 = vmatmul.mubr.f32.gmra.mxu0 %v11322_v47  ;;  %9114 = vmatmul.mubr.f32.gmra.mxu1 %v11286_v42  ;;  %v1890_v42 = vadd.f32 %v1889_v61, %v1655_v39  ;;  %v1679_v35 = vadd.f32 %v11671_v23, %v1480_v2  ;;  %v1494_v17 = vadd.f32 %v11669_v19, %v1293_v57  ;;  %v15045_v23 = vld [vmem:[#allocation54_spill] sm:$0xff]  ;;  %v15057_v39 = vld [vmem:[#allocation49_spill] sm:$0xff] }
 0x1f1   : > { %15041 = vst [vmem:[#allocation38_spill] sm:$0xff] %v11803_v16  ;;  %v11805_v3 = vadd.f32 %v8779_v50, %v1896_v38  ;;  %9066 = vmatprep.mubr.f32.mxu0 %v11351_v52  ;;  %9116 = vmatprep.mubr.f32.mxu1 %v11303_v37  ;;  %v1687_v61 = vadd.f32 %v11710_v6, %v1487_v29  ;;  %v15049_v6 = vld [vmem:[#allocation47_spill] sm:$0xff]  ;;  %v15055_v50 = vld [vmem:[#allocation48_spill] sm:$0xff]  ;;  %v15061_v57 = vld [vmem:[#allocation58_spill] sm:$0xff] }
 0x1f2   : > { %v1913_v22 = vpop.f32.mrf.mxu0  ;;  %v2066_v45 = vpop.f32.mrf.mxu1  ;;  %v1908_v5 = vadd.f32 %v8726_v55, %v1679_v35  ;;  %v1305_v28 = vadd.f32 %v15046_v11, %v15045_v23  ;;  %v1501_v9 = vadd.f32 %v11708_v32, %v1299_v33  ;;  %v1695_v25 = vadd.f32 %v11698_v7, %v1494_v17  ;;  %v15051_v55 = vld [vmem:[#allocation61_spill] sm:$0xff]  ;;  %9885 = vset.pattern.permute.xlu1 %v10146_v4  ;;  %v15062_v29 = vld [vmem:[#allocation23_spill] sm:$0xff]  ;;  %v15068_v23 = vld [vmem:[#allocation20_spill] sm:$0xff] }
 0x1f3   : > { %15042 = vst [vmem:[#allocation42_spill] sm:$0xff] %v11805_v3  ;;  %3571 = vmax.xlane.f32.xlu1 %v11805_v3  ;;  %3565 = vmax.xlane.f32.xlu0 %v11803_v16  ;;  %v11821_v34 = vadd.f32 %v2066_v45, %v1890_v42  ;;  %v1914_v27 = vadd.f32 %v1913_v22, %v1687_v61  ;;  %v15059_v22 = vld [vmem:[#allocation26_spill] sm:$0xff]  ;;  %v15063_v33 = vld [vmem:[#allocation51_spill] sm:$0xff] }
 0x1f4   : > { %v8732_v37 = vpop.f32.mrf.mxu0  ;;  %v8782_v58 = vpop.f32.mrf.mxu1  ;;  %9067 = vmatmul.mubr.f32.gmra.mxu0 %v11357_v46  ;;  %9117 = vmatmul.mubr.f32.gmra.mxu1 %v11311_v21  ;;  %v1311_v41 = vadd.f32 %v15051_v55, %v15050_v40  ;;  %v1508_v32 = vadd.f32 %v11696_v20, %v1305_v28  ;;  %v1920_v7 = vadd.f32 %v8729_v44, %v1695_v25  ;;  %v15072_v25 = vld [vmem:[#allocation33_spill] sm:$0xff]  ;;  %v15073_v40 = vld [vmem:[#allocation31_spill] sm:$0xff] }
 0x1f5   : > { %15043 = vst [vmem:[#allocation40_spill] sm:$0xff] %v11821_v34  ;;  %9069 = vmatprep.mubr.f32.mxu0 %v11371_v31  ;;  %9119 = vmatprep.mubr.f32.mxu1 %v11320_v18  ;;  %v11838_v19 = vadd.f32 %v8782_v58, %v1908_v5  ;;  %v1317_v38 = vadd.f32 %v15054_v24, %v15053_v53 }
 0x1f6   : > { %v1925_v0 = vpop.f32.mrf.mxu0  ;;  %v2078_v43 = vpop.f32.mrf.mxu1  ;;  %9886 = vset.pattern.permute.xlu0 %v10146_v4  ;;  %v1515_v26 = vadd.f32 %v11725_v8, %v1311_v41  ;;  %v1323_v45 = vadd.f32 %v15059_v22, %v15058_v1  ;;  %v1329_v58 = vadd.f32 %v15062_v29, %v15061_v57 }
 0x1f7   : > { %v11829_v21 = vadd.f32 %v2078_v43, %v1902_v10  ;;  %3569 = vmax.xlane.f32.xlu1 %v11821_v34  ;;  %15048 = vst [vmem:[#allocation41_spill] sm:$0xff] %v11838_v19  ;;  %v1522_v13 = vadd.f32 %v11717_v51, %v1317_v38  ;;  %v15077_v38 = vld [vmem:[#allocation37_spill] sm:$0xff]  ;;  %v3539_v34 = vld [vmem:[#allocation2 + $0x30] sm:$0xff] }
 0x1f8   : > { %v8735_v18 = vpop.f32.mrf.mxu0  ;;  %v8785_v59 = vpop.f32.mrf.mxu1  ;;  %9070 = vmatmul.mubr.f32.gmra.mxu0 %v15047_v54  ;;  %9120 = vmatmul.mubr.f32.gmra.mxu1 %v11322_v47  ;;  %v1703_v47 = vadd.f32 %v11727_v63, %v1501_v9  ;;  %v1529_v35 = vadd.f32 %v11741_v30, %v1323_v45  ;;  %v15067_v30 = vld [vmem:[#allocation29_spill] sm:$0xff] }
 0x1f9   : > { %15044 = vst [vmem:[#allocation21_spill] sm:$0xff] %v11829_v21  ;;  %3573 = vmax.xlane.f32.xlu0 %v11829_v21  ;;  %9072 = vmatprep.mubr.f32.mxu0 %v15049_v6  ;;  %v11856_v44 = vadd.f32 %v8785_v59, %v1920_v7  ;;  %v1536_v5 = vadd.f32 %v15067_v30, %v1329_v58  ;;  %v15071_v59 = vld [vmem:[#allocation32_spill] sm:$0xff] }
 0x1fa   : > { %v1937_v48 = vpop.f32.mrf.mxu0  ;;  %v2090_v36 = vpop.f32.mrf.mxu1  ;;  %9122 = vmatprep.mubr.f32.mxu1 %v11351_v52  ;;  %v1711_v52 = vadd.f32 %v11719_v56, %v1508_v32  ;;  %v1926_v63 = vadd.f32 %v1925_v0, %v1703_v47  ;;  %v1735_v11 = vadd.f32 %v15068_v23, %v1529_v35 }
 0x1fb   : > { %v11847_v62 = vadd.f32 %v2090_v36, %v1914_v27  ;;  %3575 = vmax.xlane.f32.xlu1 %v11838_v19  ;;  %15056 = vst [vmem:[#allocation22_spill] sm:$0xff] %v11856_v44  ;;  %v1743_v55 = vadd.f32 %v15073_v40, %v1536_v5  ;;  %v15075_v36 = vld [vmem:[#allocation34_spill] sm:$0xff] }
 0x1fc   : > { %v8738_v20 = vpop.f32.mrf.mxu0  ;;  %v8788_v15 = vpop.f32.mrf.mxu1  ;;  %9073 = vmatmul.mubr.f32.gmra.mxu0 %v15055_v50  ;;  %9123 = vmatmul.mubr.f32.gmra.mxu1 %v11357_v46  ;;  %v1719_v46 = vadd.f32 %v11743_v49, %v1515_v26  ;;  %v1932_v42 = vadd.f32 %v8732_v37, %v1711_v52  ;;  %v15065_v49 = vld [vmem:[#allocation63_spill] sm:$0xff]  ;;  %v15066_v37 = vld [vmem:[#allocation25_spill] sm:$0xff] }
 0x1fd   : > { %15052 = vst [vmem:[#allocation43_spill] sm:$0xff] %v11847_v62  ;;  %3577 = vmax.xlane.f32.xlu0 %v11847_v62  ;;  %9075 = vmatprep.mubr.f32.mxu0 %v15057_v39  ;;  %v1335_v43 = vadd.f32 %v15066_v37, %v15065_v49  ;;  %v1956_v7 = vadd.f32 %v8738_v20, %v1743_v55 }
 0x1fe   : > { %v1949_v2 = vpop.f32.mrf.mxu0  ;;  %v2102_v8 = vpop.f32.mrf.mxu1  ;;  %9125 = vmatprep.mubr.f32.mxu1 %v11371_v31  ;;  %v1727_v31 = vadd.f32 %v11735_v60, %v1522_v13  ;;  %v1938_v51 = vadd.f32 %v1937_v48, %v1719_v46  ;;  %v11874_v0 = vadd.f32 %v8788_v15, %v1932_v42  ;;  %v15070_v60 = vld [vmem:[#allocation62_spill] sm:$0xff] }
 0x1ff   : > { %v11865_v56 = vadd.f32 %v2102_v8, %v1926_v63  ;;  %3579 = vmax.xlane.f32.xlu1 %v11856_v44  ;;  %v1543_v27 = vadd.f32 %v15072_v25, %v1335_v43  ;;  %v1950_v41 = vadd.f32 %v1949_v2, %v1735_v11 }
 0x200   : > { %v8791_v10 = vpop.f32.mrf.mxu1  ;;  %9076 = vmatmul.mubr.f32.gmra.mxu0 %v15063_v33  ;;  %9126 = vmatmul.mubr.f32.gmra.mxu1 %v15047_v54  ;;  %15064 = vst [vmem:[#allocation44_spill] sm:$0xff] %v11874_v0  ;;  %v8741_v17 = vpop.f32.mrf.mxu0  ;;  %v1944_v28 = vadd.f32 %v8735_v18, %v1727_v31  ;;  %v1341_v54 = vadd.f32 %v15071_v59, %v15070_v60 }
 0x201   : > { %15060 = vst [vmem:[#allocation36_spill] sm:$0xff] %v11865_v56  ;;  %3581 = vmax.xlane.f32.xlu0 %v11865_v56  ;;  %9128 = vmatprep.mubr.f32.mxu1 %v15049_v6  ;;  %v1751_v47 = vadd.f32 %v11779_v12, %v1543_v27 }
 0x202   : > { %v2114_v61 = vpop.f32.mrf.mxu1  ;;  %v11890_v32 = vadd.f32 %v8791_v10, %v1944_v28  ;;  %v1961_v18 = vpop.f32.mrf.mxu0  ;;  %v1550_v4 = vadd.f32 %v15075_v36, %v1341_v54 }
 0x203   : > { %v11882_v9 = vadd.f32 %v2114_v61, %v1938_v51  ;;  %3583 = vmax.xlane.f32.xlu1 %v11874_v0  ;;  %v1962_v15 = vadd.f32 %v1961_v18, %v1751_v47  ;;  %v3535_v0 = vld [vmem:[#allocation2 + $0x10] sm:$0xff] }
 0x204   : > { %v8794_v6 = vpop.f32.mrf.mxu1  ;;  %9129 = vmatmul.mubr.f32.gmra.mxu1 %v15055_v50  ;;  %15074 = vst [vmem:[#allocation24_spill] sm:$0xff] %v11890_v32  ;;  %v1759_v26 = vadd.f32 %v15077_v38, %v1550_v4 }
 0x205   : > { %15069 = vst [vmem:[#allocation45_spill] sm:$0xff] %v11882_v9  ;;  %3585 = vmax.xlane.f32.xlu0 %v11882_v9  ;;  %9131 = vmatprep.mubr.f32.mxu1 %v15057_v39  ;;  %v11901_v50 = vadd.f32 %v8794_v6, %v1956_v7 }
 0x206   : > { %v2126_v48 = vpop.f32.mrf.mxu1  ;;  %v1968_v63 = vadd.f32 %v8741_v17, %v1759_v26 }
 0x207   : > { %v11896_v53 = vadd.f32 %v2126_v48, %v1950_v41  ;;  %3587 = vmax.xlane.f32.xlu1 %v11890_v32  ;;  %15078 = vst [vmem:[#allocation28_spill] sm:$0xff] %v11901_v50 }
 0x208   : > { %v8797_v24 = vpop.f32.mrf.mxu1  ;;  %9132 = vmatmul.mubr.f32.gmra.mxu1 %v15063_v33 }
 0x209   : > { %15076 = vst [vmem:[#allocation27_spill] sm:$0xff] %v11896_v53  ;;  %3589 = vmax.xlane.f32.xlu0 %v11896_v53  ;;  %v11907_v12 = vadd.f32 %v8797_v24, %v1968_v63 }
 0x20a   : > { %v2138_v52 = vpop.f32.mrf.mxu1 }
 0x20b   : > { %v11904_v39 = vadd.f32 %v2138_v52, %v1962_v15  ;;  %3591 = vmax.xlane.f32.xlu1 %v11901_v50  ;;  %15080 = vst [vmem:[#allocation35_spill] sm:$0xff] %v11907_v12 }
 0x20d   : > { %15079 = vst [vmem:[#allocation30_spill] sm:$0xff] %v11904_v39  ;;  %3593 = vmax.xlane.f32.xlu0 %v11904_v39 }
 0x20f   : > { %3595 = vmax.xlane.f32.xlu1 %v11907_v12 }
 0x224   : > { %v8832_v20 = vpop.f32.mrf.mxu0 }
 0x226   : > { %v11911_v1 = vpop.f32.mrf.mxu0 }
 0x228   : > { %v8835_v22 = vpop.f32.mrf.mxu0 }
 0x22a   : > { %v11913_v45 = vpop.f32.mrf.mxu0 }
 0x22c   : > { %v8888_v2 = vpop.f32.mrf.mxu1  ;;  %v8838_v8 = vpop.f32.mrf.mxu0 }
 0x22d   : > { %v11915_v13 = vadd.f32 %v8888_v2, %v8832_v20 }
 0x22e   : > { %v11917_v46 = vpop.f32.mrf.mxu1  ;;  %v11919_v42 = vpop.f32.mrf.mxu0 }
 0x230   : > { %v8891_v57 = vpop.f32.mrf.mxu1  ;;  %v8841_v29 = vpop.f32.mrf.mxu0 }
 0x231   : > { %v11921_v58 = vadd.f32 %v8891_v57, %v8835_v22 }
 0x232   : > { %v11923_v35 = vpop.f32.mrf.mxu1  ;;  %v11925_v10 = vpop.f32.mrf.mxu0 }
 0x234   : > { %v8894_v33 = vpop.f32.mrf.mxu1  ;;  %v8844_v31 = vpop.f32.mrf.mxu0 }
 0x235   : > { %v11927_v51 = vadd.f32 %v8894_v33, %v8838_v8 }
 0x236   : > { %v11929_v49 = vpop.f32.mrf.mxu1  ;;  %v11931_v37 = vpop.f32.mrf.mxu0 }
 0x238   : > { %v8897_v43 = vpop.f32.mrf.mxu1  ;;  %v8847_v17 = vpop.f32.mrf.mxu0 }
 0x239   : > { %v11933_v61 = vadd.f32 %v8897_v43, %v8841_v29 }
 0x23a   : > { %v11935_v30 = vpop.f32.mrf.mxu1  ;;  %v11937_v5 = vpop.f32.mrf.mxu0 }
 0x23c   : > { %v8900_v23 = vpop.f32.mrf.mxu1  ;;  %v8850_v60 = vpop.f32.mrf.mxu0 }
 0x23d   : > { %v11939_v11 = vadd.f32 %v8900_v23, %v8844_v31  ;;  %v3534_v31 = vld [vmem:[#allocation2 + $0x8] sm:$0xff] }
 0x23e   : > { %v11941_v28 = vpop.f32.mrf.mxu1  ;;  %v11945_v25 = vpop.f32.mrf.mxu0 }
 0x240   : > { %v8903_v59 = vpop.f32.mrf.mxu1  ;;  %v8853_v55 = vpop.f32.mrf.mxu0 }
 0x241   : > { %v11943_v54 = vadd.f32 %v8903_v59, %v8847_v17 }
 0x242   : > { %v11947_v27 = vpop.f32.mrf.mxu1  ;;  %v2407_v36 = vpop.f32.mrf.mxu0 }
 0x244   : > { %v8906_v6 = vpop.f32.mrf.mxu1 }
 0x245   : > { %v11949_v40 = vadd.f32 %v8906_v6, %v8850_v60 }
 0x246   : > { %v11951_v41 = vpop.f32.mrf.mxu1 }
 0x247   : > { %15081 = vst [vmem:[#allocation50_spill] sm:$0xff] %v11949_v40  ;;  %v3543_v40 = vld [vmem:[#allocation2 + $0x50] sm:$0xff] }
 0x248   : > { %v8909_v18 = vpop.f32.mrf.mxu1 }
 0x249   : > { %v2659_v48 = vadd.f32 %v8909_v18, %v8853_v55  ;;  %v3536_v55 = vld [vmem:[#allocation2 + $0x18] sm:$0xff]  ;;  %v3533_v18 = vld [vmem:[#allocation2] sm:$0xff] }
 0x24a   : > { %v2652_v4 = vpop.f32.mrf.mxu1 }
 0x24b   : > { %v2653_v47 = vadd.f32 %v2652_v4, %v2407_v36 }
 0x264   : > { %v11953_v7 = vpop.f32.mrf.mxu0 }
 0x266   : > { %v11955_v24 = vpop.f32.mrf.mxu0 }
 0x268   : > { %v11957_v38 = vpop.f32.mrf.mxu0 }
 0x26a   : > { %v11959_v26 = vpop.f32.mrf.mxu0 }
 0x26c   : > { %v11961_v15 = vpop.f32.mrf.mxu1  ;;  %v11963_v52 = vpop.f32.mrf.mxu0 }
 0x26e   : > { %v11965_v63 = vpop.f32.mrf.mxu1  ;;  %v11967_v20 = vpop.f32.mrf.mxu0 }
 0x270   : > { %v11969_v22 = vpop.f32.mrf.mxu1  ;;  %v11971_v2 = vpop.f32.mrf.mxu0 }
 0x272   : > { %v11973_v8 = vpop.f32.mrf.mxu1  ;;  %v11975_v57 = vpop.f32.mrf.mxu0 }
 0x274   : > { %v11977_v29 = vpop.f32.mrf.mxu1  ;;  %v11979_v33 = vpop.f32.mrf.mxu0 }
 0x276   : > { %v11981_v43 = vpop.f32.mrf.mxu1  ;;  %v11983_v17 = vpop.f32.mrf.mxu0 }
 0x278   : > { %v3568_v23 = vpop.xlane.xlu0 %3567  ;;  %v11985_v60 = vpop.f32.mrf.mxu1 }
 0x279   : > { %v3598_v59 = vmax.f32 %v3534_v31, %v3568_v23  ;;  %v11987_v6 = vpop.f32.mrf.mxu0 }
 0x27a   : > { %15082 = vst [vmem:[#allocation52_spill] sm:$0xff] %v11987_v6  ;;  %v11989_v36 = vpop.f32.mrf.mxu1  ;;  %v3544_v6 = vld [vmem:[#allocation2 + $0x58] sm:$0xff] }
 0x27b   : > { %v11991_v4 = vsub.f32 %v3534_v31, %v3598_v59  ;;  %4223 = vst.msk [vmem:[#allocation2 + $0x8] sm:$0xff] %vm3869_vm1, %v3598_v59  ;;  %3668 = vperm.xlu1 %9885, %v3598_v59   ;;  %v11994_v12 = vpop.f32.mrf.mxu0 }
 0x27c   : > { %v3572_v39 = vpop.xlane.xlu1 %3571  ;;  %v3566_v50 = vpop.xlane.xlu0 %3565 }
 0x27d   : > { %15083 = vst [vmem:[#allocation53_spill] sm:$0xff] %v11991_v4  ;;  %v3600_v53 = vmax.f32 %v3536_v55, %v3572_v39  ;;  %v3597_v32 = vmax.f32 %v3533_v18, %v3566_v50  ;;  %v11996_v9 = vpop.f32.mrf.mxu1  ;;  %v11998_v23 = vpop.f32.mrf.mxu0  ;;  %v3537_v39 = vld [vmem:[#allocation2 + $0x20] sm:$0xff] }
 0x27e   : > { %15084 = vst [vmem:[#allocation54_spill] sm:$0xff] %v11996_v9  ;;  %15085 = vst [vmem:[#allocation56_spill] sm:$0xff] %v11998_v23  ;;  %v3541_v23 = vld [vmem:[#allocation2 + $0x40] sm:$0xff] }
 0x27f   : > { %v12000_v56 = vsub.f32 %v3536_v55, %v3600_v53  ;;  %4225 = vst.msk [vmem:[#allocation2 + $0x18] sm:$0xff] %vm3869_vm1, %v3600_v53  ;;  %v12003_v31 = vsub.f32 %v3533_v18, %v3597_v32  ;;  %4222 = vst.msk [vmem:[#allocation2] sm:$0xff] %vm3869_vm1, %v3597_v32  ;;  %3678 = vperm.xlu1 %9885, %v3600_v53   ;;  %3663 = vperm.xlu0 %9886, %v3597_v32   ;;  %v12006_v59 = vpop.f32.mrf.mxu1  ;;  %v12008_v4 = vpop.f32.mrf.mxu0 }
 0x280   : > { %v3570_v50 = vpop.xlane.xlu1 %3569 }
 0x281   : > { %15086 = vst [vmem:[#allocation46_spill] sm:$0xff] %v12000_v56  ;;  %15087 = vst [vmem:[#allocation47_spill] sm:$0xff] %v12003_v31  ;;  %v3599_v44 = vmax.f32 %v3535_v0, %v3570_v50  ;;  %v12010_v62 = vpop.f32.mrf.mxu1  ;;  %v8965_v19 = vpop.f32.mrf.mxu0  ;;  %v3538_v56 = vld [vmem:[#allocation2 + $0x28] sm:$0xff] }
 0x282   : > { %15088 = vst [vmem:[#allocation57_spill] sm:$0xff] %v12010_v62  ;;  %v3574_v55 = vpop.xlane.xlu0 %3573  ;;  %v2868_v21 = vadd.f32 %v8965_v19, %v2659_v48 }
 0x283   : > { %v12012_v3 = vsub.f32 %v3535_v0, %v3599_v44  ;;  %4224 = vst.msk [vmem:[#allocation2 + $0x10] sm:$0xff] %vm3869_vm1, %v3599_v44  ;;  %v3601_v18 = vmax.f32 %v3537_v39, %v3574_v55  ;;  %3673 = vperm.xlu1 %9885, %v3599_v44   ;;  %v12015_v32 = vpop.f32.mrf.mxu1  ;;  %v2860_v53 = vpop.f32.mrf.mxu0  ;;  %v3540_v0 = vld [vmem:[#allocation2 + $0x38] sm:$0xff] }
 0x284   : > { %v3576_v31 = vpop.xlane.xlu1 %3575  ;;  %v2861_v16 = vadd.f32 %v2860_v53, %v2653_v47 }
 0x285   : > { %15089 = vst [vmem:[#allocation61_spill] sm:$0xff] %v12012_v3  ;;  %v12017_v14 = vsub.f32 %v3537_v39, %v3601_v18  ;;  %4226 = vst.msk [vmem:[#allocation2 + $0x20] sm:$0xff] %vm3869_vm1, %v3601_v18  ;;  %v3602_v50 = vmax.f32 %v3538_v56, %v3576_v31  ;;  %v12020_v62 = vpop.f32.mrf.mxu1 }
 0x286   : > { %15091 = vst [vmem:[#allocation59_spill] sm:$0xff] %v12020_v62  ;;  %v3578_v19 = vpop.xlane.xlu0 %3577 }
 0x287   : > { %15090 = vst [vmem:[#allocation55_spill] sm:$0xff] %v12017_v14  ;;  %v12022_v48 = vsub.f32 %v3538_v56, %v3602_v50  ;;  %4227 = vst.msk [vmem:[#allocation2 + $0x28] sm:$0xff] %vm3869_vm1, %v3602_v50  ;;  %v3603_v44 = vmax.f32 %v3539_v34, %v3578_v19  ;;  %3688 = vperm.xlu1 %9885, %v3602_v50   ;;  %v12025_v55 = vpop.f32.mrf.mxu1  ;;  %v3542_v14 = vld [vmem:[#allocation2 + $0x48] sm:$0xff] }
 0x288   : > { %v3580_v3 = vpop.xlane.xlu1 %3579 }
 0x289   : > { %15092 = vst [vmem:[#allocation48_spill] sm:$0xff] %v12022_v48  ;;  %v12027_v47 = vsub.f32 %v3539_v34, %v3603_v44  ;;  %4228 = vst.msk [vmem:[#allocation2 + $0x30] sm:$0xff] %vm3869_vm1, %v3603_v44  ;;  %v3604_v39 = vmax.f32 %v3540_v0, %v3580_v3  ;;  %v9021_v31 = vpop.f32.mrf.mxu1 }
 0x28a   : > { %v3582_v53 = vpop.xlane.xlu0 %3581  ;;  %v12030_v62 = vadd.f32 %v9021_v31, %v2868_v21  ;;  %v3545_v31 = vld [vmem:[#allocation2 + $0x60] sm:$0xff] }
 0x28b   : > { %15093 = vst [vmem:[#allocation49_spill] sm:$0xff] %v12027_v47  ;;  %v12032_v56 = vsub.f32 %v3540_v0, %v3604_v39  ;;  %4229 = vst.msk [vmem:[#allocation2 + $0x38] sm:$0xff] %vm3869_vm1, %v3604_v39  ;;  %v3605_v19 = vmax.f32 %v3541_v23, %v3582_v53  ;;  %3683 = vperm.xlu1 %9885, %v3601_v18   ;;  %v3068_v50 = vpop.f32.mrf.mxu1 }
 0x28c   : > { %v3584_v48 = vpop.xlane.xlu1 %3583  ;;  %v12035_v9 = vadd.f32 %v3068_v50, %v2861_v16  ;;  %v3546_v50 = vld [vmem:[#allocation2 + $0x68] sm:$0xff] }
 0x28d   : > { %v12037_v34 = vsub.f32 %v3541_v23, %v3605_v19  ;;  %4230 = vst.msk [vmem:[#allocation2 + $0x40] sm:$0xff] %vm3869_vm1, %v3605_v19  ;;  %v3606_v3 = vmax.f32 %v3542_v14, %v3584_v48 }
 0x28e   : > { %v3586_v47 = vpop.xlane.xlu0 %3585 }
 0x28f   : > { %15094 = vst [vmem:[#allocation60_spill] sm:$0xff] %v12037_v34  ;;  %v12040_v21 = vsub.f32 %v3542_v14, %v3606_v3  ;;  %4231 = vst.msk [vmem:[#allocation2 + $0x48] sm:$0xff] %vm3869_vm1, %v3606_v3  ;;  %v3607_v0 = vmax.f32 %v3543_v40, %v3586_v47  ;;  %3698 = vperm.xlu1 %9885, %v3604_v39   ;;  %3708 = vperm.xlu0 %9886, %v3606_v3   ;;  %v3547_v47 = vld [vmem:[#allocation2 + $0x70] sm:$0xff] }
 0x290   : > { %v3588_v18 = vpop.xlane.xlu1 %3587 }
 0x291   : > { %15095 = vst [vmem:[#allocation26_spill] sm:$0xff] %v12040_v21  ;;  %v12043_v53 = vsub.f32 %v3543_v40, %v3607_v0  ;;  %4232 = vst.msk [vmem:[#allocation2 + $0x50] sm:$0xff] %vm3869_vm1, %v3607_v0  ;;  %v3608_v16 = vmax.f32 %v3544_v6, %v3588_v18 }
 0x292   : > { %v3590_v23 = vpop.xlane.xlu0 %3589 }
 0x293   : > { %15096 = vst [vmem:[#allocation58_spill] sm:$0xff] %v12043_v53  ;;  %v12046_v34 = vsub.f32 %v3544_v6, %v3608_v16  ;;  %4233 = vst.msk [vmem:[#allocation2 + $0x58] sm:$0xff] %vm3869_vm1, %v3608_v16  ;;  %v3609_v14 = vmax.f32 %v3545_v31, %v3590_v23  ;;  %3693 = vperm.xlu1 %9885, %v3603_v44   ;;  %3718 = vperm.xlu0 %9886, %v3608_v16   ;;  %v3548_v53 = vld [vmem:[#allocation2 + $0x78] sm:$0xff] }
 0x294   : > { %v3592_v48 = vpop.xlane.xlu1 %3591 }
 0x295   : > { %v12049_v39 = vsub.f32 %v3545_v31, %v3609_v14  ;;  %4234 = vst.msk [vmem:[#allocation2 + $0x60] sm:$0xff] %vm3869_vm1, %v3609_v14  ;;  %v3610_v40 = vmax.f32 %v3546_v50, %v3592_v48  ;;  %v2581_v48 = vadd.f32 %v11923_v35, %v11913_v45  ;;  %v12083_v45 = vld [vmem:[%s14490_s0] sm:$0xff] }
 0x296   : > { %v3594_v3 = vpop.xlane.xlu0 %3593  ;;  %15098 = vst [vmem:[#allocation51_spill] sm:$0xff] %v12083_v45 }
 0x297   : > { %v12052_v21 = vsub.f32 %v3546_v50, %v3610_v40  ;;  %4235 = vst.msk [vmem:[#allocation2 + $0x68] sm:$0xff] %vm3869_vm1, %v3610_v40  ;;  %v3611_v6 = vmax.f32 %v3547_v47, %v3594_v3  ;;  %3703 = vperm.xlu1 %9885, %v3605_v19   ;;  %3728 = vperm.xlu0 %9886, %v3610_v40  }
 0x298   : > { %v3596_v18 = vpop.xlane.xlu1 %3595  ;;  %v2569_v19 = vadd.f32 %v11917_v46, %v11911_v1  ;;  %v2777_v3 = vadd.f32 %v11959_v26, %v2581_v48 }
 0x299   : > { %v12055_v44 = vsub.f32 %v3547_v47, %v3611_v6  ;;  %4236 = vst.msk [vmem:[#allocation2 + $0x70] sm:$0xff] %vm3869_vm1, %v3611_v6  ;;  %v3612_v31 = vmax.f32 %v3548_v53, %v3596_v18  ;;  %v12085_v18 = vstv %s3499_s11 }
 0x29b   : > { %v12058_v16 = vsub.f32 %v3548_v53, %v3612_v31  ;;  %4237 = vst.msk [vmem:[#allocation2 + $0x78] sm:$0xff] %vm3869_vm1, %v3612_v31  ;;  %3713 = vperm.xlu1 %9885, %v3607_v0   ;;  %3738 = vperm.xlu0 %9886, %v3612_v31   ;;  %v2763_v53 = vadd.f32 %v11955_v24, %v2569_v19 }
 0x29c   : > { %v2593_v0 = vadd.f32 %v11929_v49, %v11919_v42  ;;  %v3501_v42 = vmul.f32 %v12085_v18, %v12083_v45  ;;  %v2605_v49 = vadd.f32 %v11935_v30, %v11925_v10  ;;  %v2617_v10 = vadd.f32 %v11941_v28, %v11931_v37 }
 0x29d   : > { %15097 = vst [vmem:[#allocation23_spill] sm:$0xff] %v12058_v16  ;;  %v2770_v37 = vadd.f32 %v11953_v7, %v11915_v13  ;;  %v12132_v13 = vld [vmem:[%s14490_s0 + $0x30] sm:$0xff]  ;;  %v12137_v7 = vld [vmem:[%s14490_s0 + $0x18] sm:$0xff] }
 0x29e   : > { %v2791_v26 = vadd.f32 %v11967_v20, %v2593_v0  ;;  %v3517_v30 = vsub.f32 1.0, %v3501_v42  ;;  %v2805_v0 = vadd.f32 %v11975_v57, %v2605_v49  ;;  %v12124_v57 = vld [vmem:[%s14490_s0 + $0x8] sm:$0xff] }
 0x29f   : > { %3723 = vperm.xlu1 %9885, %v3609_v14   ;;  %v2957_v14 = vadd.f32 %v11965_v63, %v2763_v53  ;;  %v2973_v63 = vadd.f32 %v11973_v8, %v2777_v3  ;;  %v12109_v8 = vld [vmem:[%s14490_s0 + $0x20] sm:$0xff] }
 0x2a0   : > { %15100 = vst [vmem:[#allocation25_spill] sm:$0xff] %v12109_v8  ;;  %v2989_v3 = vadd.f32 %v11981_v43, %v2791_v26  ;;  %v3505_v16 = vmul.f32 %v12085_v18, %v12109_v8  ;;  %v2629_v43 = vadd.f32 %v11947_v27, %v11937_v5 }
 0x2a3   : > { %3733 = vperm.xlu1 %9885, %v3611_v6  }
 0x2a4   : > { %v12061_v23 = vpop.f32.mrf.mxu0 }
 0x2a6   : > { %v3195_v50 = vpop.f32.mrf.mxu0 }
 0x2a7   : > { %v3196_v35 = vadd.f32 %v3195_v50, %v2957_v14  ;;  %v12100_v50 = vld [vmem:[%s14490_s0 + $0x10] sm:$0xff] }
 0x2a8   : > { %v12069_v47 = vpop.f32.mrf.mxu0  ;;  %15099 = vst [vmem:[#allocation63_spill] sm:$0xff] %v12100_v50  ;;  %v3503_v20 = vmul.f32 %v12085_v18, %v12100_v50 }
 0x2aa   : > { %v3207_v40 = vpop.f32.mrf.mxu0  ;;  %v3519_v49 = vsub.f32 1.0, %v3503_v20  ;;  %v12151_v20 = vmul.f32 %v12085_v18, %v12124_v57 }
 0x2ab   : > { %v3208_v53 = vadd.f32 %v3207_v40, %v2973_v63 }
 0x2ac   : > { %v12076_v1 = vpop.f32.mrf.mxu0  ;;  %v12078_v46 = vpop.f32.mrf.mxu1 }
 0x2ae   : > { %v3219_v24 = vpop.f32.mrf.mxu0  ;;  %v3372_v6 = vpop.f32.mrf.mxu1 }
 0x2af   : > { %v3373_v31 = vadd.f32 %v3372_v6, %v3196_v35  ;;  %v3220_v28 = vadd.f32 %v3219_v24, %v2989_v3  ;;  %v3005_v24 = vadd.f32 %v11989_v36, %v2805_v0  ;;  %v3507_v0 = vmul.f32 %v12085_v18, %v12132_v13 }
 0x2b0   : > { %v12093_v19 = vpop.f32.mrf.mxu0  ;;  %v12095_v48 = vpop.f32.mrf.mxu1 }
 0x2b1   : > { %v3466_v35 = vsub.f32 1.0, %v3373_v31 }
 0x2b2   : > { %v3231_v14 = vpop.f32.mrf.mxu0  ;;  %v3384_v45 = vpop.f32.mrf.mxu1 }
 0x2b3   : > { %v3385_v40 = vadd.f32 %v3384_v45, %v3208_v53  ;;  %v2819_v45 = vadd.f32 %v11983_v17, %v2617_v10  ;;  %v12144_v27 = vmul.f32 %v3517_v30, %v3466_v35  ;;  %v2965_v17 = vadd.f32 %v11961_v15, %v2770_v37 }
 0x2b4   : > { %v12113_v6 = vpop.f32.mrf.mxu0  ;;  %v12115_v63 = vpop.f32.mrf.mxu1  ;;  %v2784_v10 = vadd.f32 %v11957_v38, %v11921_v58  ;;  %v3232_v3 = vadd.f32 %v3231_v14, %v3005_v24  ;;  %v12158_v30 = vmul.f32 %v12085_v18, %v12137_v7  ;;  %v2641_v58 = vadd.f32 %v11951_v41, %v11945_v25 }
 0x2b5   : > { %v3468_v26 = vsub.f32 1.0, %v3385_v40  ;;  %v2798_v38 = vadd.f32 %v11963_v52, %v11927_v51  ;;  %v2833_v15 = vadd.f32 %v11994_v12, %v2629_v43  ;;  %v3202_v14 = vadd.f32 %v12061_v23, %v2965_v17  ;;  %v12181_v12 = vld [vmem:[%s14490_s0 + $0x40] sm:$0xff]  ;;  %v12203_v17 = vld [vmem:[%s14490_s0 + $0x78] sm:$0xff] }
 0x2b6   : > { %v3243_v42 = vpop.f32.mrf.mxu0  ;;  %v3396_v50 = vpop.f32.mrf.mxu1  ;;  %v3021_v35 = vadd.f32 %v12006_v59, %v2819_v45  ;;  %v2981_v51 = vadd.f32 %v11969_v22, %v2784_v10  ;;  %v3518_v52 = vsub.f32 1.0, %v12151_v20  ;;  %v3523_v45 = vsub.f32 1.0, %v3507_v0  ;;  %15102 = vst [vmem:[#allocation20_spill] sm:$0xff] %v12203_v17 }
 0x2b7   : > { %v3397_v31 = vadd.f32 %v3396_v50, %v3220_v28  ;;  %v3521_v50 = vsub.f32 1.0, %v3505_v16  ;;  %v12169_v16 = vld [vmem:[%s14490_s0 + $0x28] sm:$0xff]  ;;  %v12176_v25 = vmul.f32 %v3519_v49, %v3468_v26  ;;  %v3379_v41 = vadd.f32 %v12078_v46, %v3202_v14  ;;  %v12191_v26 = vld [vmem:[%s14490_s0 + $0x50] sm:$0xff] }
 0x2b8   : > { %v12140_v53 = vpop.f32.mrf.mxu0  ;;  %v12142_v5 = vpop.f32.mrf.mxu1  ;;  %v3244_v59 = vadd.f32 %v3243_v42, %v3021_v35  ;;  %v3520_v49 = vsub.f32 1.0, %v12158_v30  ;;  %15101 = vst [vmem:[#allocation29_spill] sm:$0xff] %v12191_v26  ;;  %v12195_v22 = vmul.f32 %v12085_v18, %v12169_v16  ;;  %v2997_v46 = vadd.f32 %v11977_v29, %v2798_v38  ;;  %v12215_v29 = vld [vmem:[%s14490_s0 + $0x38] sm:$0xff] }
 0x2b9   : > { %v3470_v40 = vsub.f32 1.0, %v3397_v31  ;;  %v2847_v42 = vadd.f32 %v12008_v4, %v2641_v58  ;;  %v3214_v31 = vadd.f32 %v12069_v47, %v2981_v51  ;;  %v3509_v10 = vmul.f32 %v12085_v18, %v12181_v12 }
 0x2ba   : > { %v3255_v8 = vpop.f32.mrf.mxu0  ;;  %v3408_v36 = vpop.f32.mrf.mxu1  ;;  %4158 = vadd.xlane.f32.xlu0 %v12144_v27  ;;  %v3037_v20 = vadd.f32 %v12015_v32, %v2833_v15  ;;  %v2812_v4 = vadd.f32 %v11971_v2, %v11933_v61  ;;  %v3467_v47 = vsub.f32 1.0, %v3379_v41  ;;  %v3511_v32 = vmul.f32 %v12085_v18, %v12191_v26 }
 0x2bb   : > { %v3409_v37 = vadd.f32 %v3408_v36, %v3232_v3  ;;  %v12210_v30 = vmul.f32 %v3521_v50, %v3470_v40  ;;  %v3391_v58 = vadd.f32 %v12095_v48, %v3214_v31  ;;  %v3226_v38 = vadd.f32 %v12076_v1, %v2997_v46  ;;  %v12233_v48 = vld [vmem:[%s14490_s0 + $0x70] sm:$0xff] }
 0x2bc   : > { %v12172_v28 = vpop.f32.mrf.mxu0  ;;  %v12174_v24 = vpop.f32.mrf.mxu1  ;;  %v3256_v15 = vadd.f32 %v3255_v8, %v3037_v20  ;;  %v3516_v35 = vmul.f32 %v12085_v18, %v12203_v17  ;;  %v3522_v40 = vsub.f32 1.0, %v12195_v22  ;;  %v2826_v61 = vadd.f32 %v11979_v33, %v11939_v11  ;;  %15103 = vst [vmem:[#allocation62_spill] sm:$0xff] %v12233_v48  ;;  %v12238_v8 = vld [vmem:[%s14490_s0 + $0x60] sm:$0xff] }
 0x2bd   : > { %v3472_v3 = vsub.f32 1.0, %v3409_v37  ;;  %v3053_v2 = vadd.f32 %v12025_v55, %v2847_v42  ;;  %v3525_v1 = vsub.f32 1.0, %v3509_v10  ;;  %15104 = vst [vmem:[#allocation32_spill] sm:$0xff] %v12238_v8  ;;  %v12242_v37 = vmul.f32 %v12085_v18, %v12215_v29 }
 0x2be   : > { %v3267_v23 = vpop.f32.mrf.mxu0  ;;  %v3420_v43 = vpop.f32.mrf.mxu1  ;;  %4162 = vadd.xlane.f32.xlu0 %v12176_v25  ;;  %v3403_v51 = vadd.f32 %v12115_v63, %v3226_v38  ;;  %v12250_v22 = vmul.f32 %v3518_v52, %v3467_v47  ;;  %v3527_v46 = vsub.f32 1.0, %v3511_v32  ;;  %v3532_v20 = vsub.f32 1.0, %v3516_v35  ;;  %v12266_v47 = vld [vmem:[%s14490_s0 + $0x48] sm:$0xff] }
 0x2bf   : > { %v3421_v36 = vadd.f32 %v3420_v43, %v3244_v59  ;;  %v12247_v41 = vmul.f32 %v3523_v45, %v3472_v3  ;;  %v3013_v59 = vadd.f32 %v11985_v60, %v2812_v4  ;;  %v3469_v43 = vsub.f32 1.0, %v3391_v58  ;;  %v15105_v45 = vld [vmem:[#allocation52_spill] sm:$0xff]  ;;  %v15106_v60 = vld [vmem:[#allocation54_spill] sm:$0xff]  ;;  %15107 = vst [vmem:[#allocation33_spill] sm:$0xff] %v12266_v47 }
 0x2c0   : > { %v12208_v0 = vpop.f32.mrf.mxu1  ;;  %v9077_v14 = vpop.f32.mrf.mxu0  ;;  %v3268_v42 = vadd.f32 %v3267_v23, %v3053_v2  ;;  %v3515_v63 = vmul.f32 %v12085_v18, %v12233_v48  ;;  %v2840_v3 = vadd.f32 %v15105_v45, %v11943_v54  ;;  %v3029_v4 = vadd.f32 %v15106_v60, %v2826_v61 }
 0x2c1   : > { %v3474_v11 = vsub.f32 1.0, %v3421_v36  ;;  %v3513_v36 = vmul.f32 %v12085_v18, %v12238_v8  ;;  %v3238_v52 = vadd.f32 %v12093_v19, %v3013_v59  ;;  %v3286_v23 = vadd.f32 %v9077_v14, %v12030_v62 }
 0x2c2   : > { %v3432_v50 = vpop.f32.mrf.mxu1  ;;  %4166 = vadd.xlane.f32.xlu0 %v12210_v30  ;;  %v3279_v31 = vpop.f32.mrf.mxu0  ;;  %v3471_v58 = vsub.f32 1.0, %v3403_v51  ;;  %v12272_v61 = vmul.f32 %v3520_v49, %v3469_v43  ;;  %v3531_v14 = vsub.f32 1.0, %v3515_v63  ;;  %v3524_v59 = vsub.f32 1.0, %v12242_v37  ;;  %v15110_v49 = vld [vmem:[#allocation57_spill] sm:$0xff] }
 0x2c3   : > { %v3433_v33 = vadd.f32 %v3432_v50, %v3256_v15  ;;  %v12268_v50 = vmul.f32 %v3525_v1, %v3474_v11  ;;  %v3415_v54 = vadd.f32 %v12142_v5, %v3238_v52  ;;  %v3280_v35 = vadd.f32 %v3279_v31, %v12035_v9  ;;  %v15109_v1 = vld [vmem:[#allocation56_spill] sm:$0xff] }
 0x2c4   : > { %v12245_v55 = vpop.f32.mrf.mxu1  ;;  %v3529_v2 = vsub.f32 1.0, %v3513_v36  ;;  %v3510_v51 = vmul.f32 %v12085_v18, %v12266_v47  ;;  %v3250_v5 = vadd.f32 %v12113_v6, %v3029_v4  ;;  %v3045_v43 = vadd.f32 %v15110_v49, %v2840_v3  ;;  %v12293_v6 = vld [vmem:[%s14490_s0 + $0x58] sm:$0xff]  ;;  %v15116_v49 = vld [vmem:[#allocation40_spill] sm:$0xff] }
 0x2c5   : > { %v3476_v32 = vsub.f32 1.0, %v3433_v33  ;;  %v15108_v33 = vld [vmem:[#allocation50_spill] sm:$0xff]  ;;  %v12285_v63 = vmul.f32 %v3522_v40, %v3471_v58  ;;  %v3473_v37 = vsub.f32 1.0, %v3415_v54  ;;  %15111 = vst [vmem:[#allocation31_spill] sm:$0xff] %v12293_v6 }
 0x2c6   : > { %v3444_v10 = vpop.f32.mrf.mxu1  ;;  %4170 = vadd.xlane.f32.xlu0 %v12247_v41  ;;  %v2854_v11 = vadd.f32 %v15109_v1, %v15108_v33  ;;  %v3427_v36 = vadd.f32 %v12174_v24, %v3250_v5  ;;  %v3262_v3 = vadd.f32 %v12140_v53, %v3045_v43  ;;  %v3512_v24 = vmul.f32 %v12085_v18, %v12293_v6  ;;  %v12312_v53 = vld [vmem:[%s14490_s0 + $0x68] sm:$0xff] }
 0x2c7   : > { %4160 = vadd.xlane.f32.xlu1 %v12250_v22  ;;  %v3445_v38 = vadd.f32 %v3444_v10, %v3268_v42  ;;  %v12283_v10 = vmul.f32 %v3527_v46, %v3476_v32  ;;  %v3526_v46 = vsub.f32 1.0, %v3510_v51  ;;  %v12306_v32 = vmul.f32 %v3524_v59, %v3473_v37  ;;  %15113 = vst [vmem:[#allocation34_spill] sm:$0xff] %v12312_v53  ;;  %v15114_v51 = vld [vmem:[#allocation39_spill] sm:$0xff] }
 0x2c8   : > { %v9133_v15 = vpop.f32.mrf.mxu1  ;;  %v3439_v58 = vadd.f32 %v12208_v0, %v3262_v3  ;;  %v3514_v0 = vmul.f32 %v12085_v18, %v12312_v53  ;;  %v15115_v18 = vld [vmem:[#allocation38_spill] sm:$0xff] }
 0x2c9   : > { %v3463_v19 = vadd.f32 %v9133_v15, %v3286_v23  ;;  %v3478_v31 = vsub.f32 1.0, %v3445_v38  ;;  %v3475_v23 = vsub.f32 1.0, %v3427_v36  ;;  %v3528_v15 = vsub.f32 1.0, %v3512_v24 }
 0x2ca   : > { %v3456_v62 = vpop.f32.mrf.mxu1  ;;  %4174 = vadd.xlane.f32.xlu0 %v12268_v50  ;;  %v3477_v54 = vsub.f32 1.0, %v3439_v58 }
 0x2cb   : > { %v3481_v42 = vsub.f32 1.0, %v3463_v19  ;;  %v3457_v9 = vadd.f32 %v3456_v62, %v3280_v35  ;;  %4164 = vadd.xlane.f32.xlu1 %v12272_v61  ;;  %v12300_v40 = vmul.f32 %v3529_v2, %v3478_v31  ;;  %v12317_v19 = vmul.f32 %v3526_v46, %v3475_v23  ;;  %v15117_v31 = vld [vmem:[#allocation42_spill] sm:$0xff] }
 0x2cc   : > { %v3530_v2 = vsub.f32 1.0, %v3514_v0 }
 0x2cd   : > { %v12288_v45 = vmul.f32 %v3532_v20, %v3481_v42  ;;  %v3480_v60 = vsub.f32 1.0, %v3457_v9  ;;  %v15112_v20 = vld [vmem:[#allocation59_spill] sm:$0xff] }
 0x2ce   : > { %4178 = vadd.xlane.f32.xlu0 %v12283_v10  ;;  %v3061_v52 = vadd.f32 %v15112_v20, %v2854_v11 }
 0x2cf   : > { %v12297_v4 = vmul.f32 %v3531_v14, %v3480_v60  ;;  %4168 = vadd.xlane.f32.xlu1 %v12285_v63  ;;  %v12322_v14 = vmul.f32 %v3528_v15, %v3477_v54 }
 0x2d0   : > { %v3274_v38 = vadd.f32 %v12172_v28, %v3061_v52  ;;  %v15118_v52 = vld [vmem:[#allocation21_spill] sm:$0xff] }
 0x2d2   : > { %4182 = vadd.xlane.f32.xlu0 %v12300_v40  ;;  %v3451_v35 = vadd.f32 %v12245_v55, %v3274_v38  ;;  %v15119_v38 = vld [vmem:[#allocation41_spill] sm:$0xff] }
 0x2d3   : > { %4172 = vadd.xlane.f32.xlu1 %v12306_v32 }
 0x2d4   : > { %v3479_v62 = vsub.f32 1.0, %v3451_v35 }
 0x2d6   : > { %v12325_v28 = vmul.f32 %v3530_v2, %v3479_v62 }
 0x2d7   : > { %4176 = vadd.xlane.f32.xlu1 %v12317_v19 }
 0x2db   : > { %4180 = vadd.xlane.f32.xlu1 %v12322_v14 }
 0x2df   : > { %4184 = vadd.xlane.f32.xlu1 %v12325_v28 }
 0x2f6   : > { %v3669_v59 = vpop.permute.xlu1 %3668 }
 0x2f7   : > { %v3742_v55 = vsub.f32 %v15114_v51, %v3669_v59 }
 0x2f9   : > { %v3759_v33 = vmul.f32 1.442695, %v3742_v55 }
 0x2fa   : > { %v3679_v1 = vpop.permute.xlu1 %3678  ;;  %v3664_v11 = vpop.permute.xlu0 %3663 }
 0x2fb   : > { %9887 = vpow2.f32 %v3759_v33  ;;  %v3741_v5 = vsub.f32 %v15115_v18, %v3664_v11  ;;  %v3744_v37 = vsub.f32 %v15117_v31, %v3679_v1  ;;  %v15120_v1 = vld [vmem:[#allocation43_spill] sm:$0xff]  ;;  %v15121_v18 = vld [vmem:[#allocation22_spill] sm:$0xff] }
 0x2fd   : > { %v3757_v42 = vmul.f32 1.442695, %v3741_v5  ;;  %v3763_v46 = vmul.f32 1.442695, %v3744_v37 }
 0x2fe   : > { %v3674_v9 = vpop.permute.xlu1 %3673 }
 0x2ff   : > { %9889 = vpow2.f32 %v3757_v42  ;;  %v3743_v43 = vsub.f32 %v15116_v49, %v3674_v9 }
 0x301   : > { %v3761_v60 = vmul.f32 1.442695, %v3743_v43 }
 0x302   : > { %v3689_v36 = vpop.permute.xlu1 %3688 }
 0x303   : > { %9891 = vpow2.f32 %v3761_v60  ;;  %v3746_v15 = vsub.f32 %v15119_v38, %v3689_v36 }
 0x304   : > { %9893 = vpow2.f32 %v3763_v46  ;;  %v15122_v46 = vld [vmem:[#allocation36_spill] sm:$0xff] }
 0x305   : > { %v3767_v2 = vmul.f32 1.442695, %v3746_v15 }
 0x306   : > { %v3684_v24 = vpop.permute.xlu1 %3683 }
 0x307   : > { %v3745_v23 = vsub.f32 %v15118_v52, %v3684_v24  ;;  %v15123_v52 = vld [vmem:[#allocation44_spill] sm:$0xff] }
 0x308   : > { %v12332_v3 = vpop.eup %9887 }
 0x309   : > { %3823 = vadd.xlane.f32.xlu0 %v12332_v3  ;;  %v3951_v54 = vmul.f32 %v12332_v3, %v3742_v55  ;;  %v3765_v0 = vmul.f32 1.442695, %v3745_v23  ;;  %v4063_v59 = vmul.f32 %v12332_v3, %v12250_v22 }
 0x30a   : > { %v3699_v35 = vpop.permute.xlu1 %3698 }
 0x30b   : > { %9895 = vpow2.f32 %v3765_v0 }
 0x30c   : > { %v12335_v20 = vpop.eup %9889  ;;  %9897 = vpow2.f32 %v3767_v2 }
 0x30d   : > { %3821 = vadd.xlane.f32.xlu1 %v12335_v20  ;;  %v3950_v58 = vmul.f32 %v12335_v20, %v3741_v5  ;;  %v4062_v62 = vmul.f32 %v12335_v20, %v12144_v27  ;;  %v3748_v5 = vsub.f32 %v15121_v18, %v3699_v35 }
 0x30e   : > { %v3694_v33 = vpop.permute.xlu1 %3693 }
 0x30f   : > { %3966 = vadd.xlane.f32.xlu0 %v3950_v58  ;;  %v3747_v11 = vsub.f32 %v15120_v1, %v3694_v33  ;;  %v3771_v49 = vmul.f32 1.442695, %v3748_v5  ;;  %v15125_v1 = vld [vmem:[#allocation24_spill] sm:$0xff] }
 0x310   : > { %v12346_v51 = vpop.eup %9891 }
 0x311   : > { %3968 = vadd.xlane.f32.xlu1 %v3951_v54  ;;  %v12349_v55 = vpop.eup %9893  ;;  %v3952_v27 = vmul.f32 %v12346_v51, %v3743_v43  ;;  %v3769_v42 = vmul.f32 1.442695, %v3747_v11  ;;  %v4064_v9 = vmul.f32 %v12346_v51, %v12176_v25 }
 0x312   : > { %v3953_v22 = vmul.f32 %v12349_v55, %v3744_v37  ;;  %v4065_v31 = vmul.f32 %v12349_v55, %v12272_v61  ;;  %v3704_v43 = vpop.permute.xlu1 %3703  ;;  %v3709_v37 = vpop.permute.xlu0 %3708 }
 0x313   : > { %4078 = vadd.xlane.f32.xlu0 %v4062_v62  ;;  %9899 = vpow2.f32 %v3769_v42  ;;  %v3749_v24 = vsub.f32 %v15122_v46, %v3704_v43  ;;  %v3750_v58 = vsub.f32 %v15123_v52, %v3709_v37  ;;  %v15126_v43 = vld [vmem:[#allocation27_spill] sm:$0xff] }
 0x314   : > { %9901 = vpow2.f32 %v3771_v49 }
 0x315   : > { %4080 = vadd.xlane.f32.xlu1 %v4063_v59  ;;  %v3773_v38 = vmul.f32 1.442695, %v3749_v24  ;;  %v3775_v35 = vmul.f32 1.442695, %v3750_v58  ;;  %v15124_v59 = vld [vmem:[#allocation45_spill] sm:$0xff] }
 0x317   : > { %3825 = vadd.xlane.f32.xlu0 %v12346_v51  ;;  %9903 = vpow2.f32 %v3773_v38 }
 0x318   : > { %v12360_v36 = vpop.eup %9895  ;;  %9905 = vpow2.f32 %v3775_v35 }
 0x319   : > { %3827 = vadd.xlane.f32.xlu1 %v12349_v55  ;;  %v12363_v60 = vpop.eup %9897  ;;  %v3954_v25 = vmul.f32 %v12360_v36, %v3745_v23  ;;  %v4066_v54 = vmul.f32 %v12360_v36, %v12210_v30  ;;  %v3714_v23 = vpop.permute.xlu1 %3713 }
 0x31a   : > { %v3955_v61 = vmul.f32 %v12363_v60, %v3746_v15  ;;  %v4067_v0 = vmul.f32 %v12363_v60, %v12285_v63  ;;  %v3719_v15 = vpop.permute.xlu0 %3718  ;;  %v3751_v33 = vsub.f32 %v15124_v59, %v3714_v23 }
 0x31b   : > { %3970 = vadd.xlane.f32.xlu0 %v3952_v27  ;;  %v3752_v27 = vsub.f32 %v15125_v1, %v3719_v15  ;;  %v4144_v15 = vld [vmem:[#allocation6 + $0x10] sm:$0xff] }
 0x31c   : > { %v3777_v18 = vmul.f32 1.442695, %v3751_v33 }
 0x31d   : > { %3972 = vadd.xlane.f32.xlu1 %v3953_v22  ;;  %v3779_v42 = vmul.f32 1.442695, %v3752_v27 }
 0x31e   : > { %v3729_v49 = vpop.permute.xlu0 %3728  ;;  %9907 = vpow2.f32 %v3777_v18  ;;  %v15129_v18 = vld [vmem:[#allocation30_spill] sm:$0xff] }
 0x31f   : > { %4082 = vadd.xlane.f32.xlu0 %v4064_v9  ;;  %9909 = vpow2.f32 %v3779_v42 }
 0x320   : > { %v12374_v62 = vpop.eup %9899 }
 0x321   : > { %4084 = vadd.xlane.f32.xlu1 %v4065_v31  ;;  %v12377_v2 = vpop.eup %9901  ;;  %v3956_v30 = vmul.f32 %v12374_v62, %v3747_v11  ;;  %v4068_v22 = vmul.f32 %v12374_v62, %v12247_v41  ;;  %v3724_v11 = vpop.permute.xlu1 %3723 }
 0x322   : > { %v3957_v63 = vmul.f32 %v12377_v2, %v3748_v5  ;;  %v4069_v9 = vmul.f32 %v12377_v2, %v12306_v32  ;;  %v12394_v37 = vsub.f32 %v15126_v43, %v3724_v11  ;;  %v3739_v46 = vpop.permute.xlu0 %3738  ;;  %v15127_v32 = vld [vmem:[#allocation28_spill] sm:$0xff] }
 0x323   : > { %3829 = vadd.xlane.f32.xlu0 %v12360_v36 }
 0x324   : > { %v12388_v31 = vpop.eup %9903  ;;  %v3781_v38 = vmul.f32 1.442695, %v12394_v37 }
 0x325   : > { %3831 = vadd.xlane.f32.xlu1 %v12363_v60  ;;  %v12391_v5 = vpop.eup %9905  ;;  %v3958_v41 = vmul.f32 %v12388_v31, %v3749_v24  ;;  %v3734_v59 = vpop.permute.xlu1 %3733 }
 0x326   : > { %v3959_v52 = vmul.f32 %v12391_v5, %v3750_v58  ;;  %v4071_v24 = vmul.f32 %v12391_v5, %v12317_v19  ;;  %9911 = vpow2.f32 %v3781_v38 }
 0x327   : > { %3974 = vadd.xlane.f32.xlu0 %v3954_v25  ;;  %v12399_v25 = vsub.f32 %v15127_v32, %v3729_v49 }
 0x329   : > { %3976 = vadd.xlane.f32.xlu1 %v3955_v61  ;;  %v4142_v61 = vld [vmem:[#allocation6] sm:$0xff] }
 0x32b   : > { %4086 = vadd.xlane.f32.xlu0 %v4066_v54  ;;  %v4070_v54 = vmul.f32 %v12388_v31, %v12268_v50  ;;  %v12409_v58 = vpop.eup %9907 }
 0x32c   : > { %15128 = vst [vmem:[#allocation37_spill] sm:$0xff] %v12409_v58  ;;  %v12412_v1 = vpop.eup %9909  ;;  %v3960_v19 = vmul.f32 %v12409_v58, %v3751_v33 }
 0x32d   : > { %4088 = vadd.xlane.f32.xlu1 %v4067_v0  ;;  %v3783_v0 = vmul.f32 1.442695, %v12399_v25  ;;  %v3961_v43 = vmul.f32 %v12412_v1, %v3752_v27 }
 0x32f   : > { %3833 = vadd.xlane.f32.xlu0 %v12374_v62  ;;  %9913 = vpow2.f32 %v3783_v0  ;;  %v4150_v0 = vld [vmem:[#allocation6 + $0x40] sm:$0xff] }
 0x331   : > { %3835 = vadd.xlane.f32.xlu1 %v12377_v2 }
 0x333   : > { %3978 = vadd.xlane.f32.xlu0 %v3956_v30 }
 0x335   : > { %3980 = vadd.xlane.f32.xlu1 %v3957_v63  ;;  %v4146_v63 = vld [vmem:[#allocation6 + $0x20] sm:$0xff] }
 0x337   : > { %4090 = vadd.xlane.f32.xlu0 %v4068_v22  ;;  %v12415_v22 = vsub.f32 %v15129_v18, %v3734_v59  ;;  %v4147_v18 = vld [vmem:[#allocation6 + $0x28] sm:$0xff] }
 0x339   : > { %4092 = vadd.xlane.f32.xlu1 %v4069_v9  ;;  %v15130_v9 = vld [vmem:[#allocation35_spill] sm:$0xff]  ;;  %v3785_v32 = vmul.f32 1.442695, %v12415_v22 }
 0x33a   : > { %v12421_v49 = vsub.f32 %v15130_v9, %v3739_v46 }
 0x33b   : > { %3837 = vadd.xlane.f32.xlu0 %v12388_v31  ;;  %9915 = vpow2.f32 %v3785_v32 }
 0x33c   : > { %v3787_v33 = vmul.f32 1.442695, %v12421_v49 }
 0x33d   : > { %3839 = vadd.xlane.f32.xlu1 %v12391_v5 }
 0x33e   : > { %9917 = vpow2.f32 %v3787_v33 }
 0x33f   : > { %3982 = vadd.xlane.f32.xlu0 %v3958_v41  ;;  %v4148_v41 = vld [vmem:[#allocation6 + $0x30] sm:$0xff] }
 0x341   : > { %3984 = vadd.xlane.f32.xlu1 %v3959_v52  ;;  %v4072_v52 = vmul.f32 %v12409_v58, %v12283_v10 }
 0x343   : > { %v4159_v35 = vpop.xlane.xlu0 %4158  ;;  %4094 = vadd.xlane.f32.xlu0 %v4070_v54 }
 0x344   : > { %v4190_v23 = vadd.f32 %v4159_v35, %v4142_v61  ;;  %v4143_v61 = vld [vmem:[#allocation6 + $0x8] sm:$0xff]  ;;  %v4073_v35 = vmul.f32 %v12412_v1, %v12322_v14 }
 0x345   : > { %4096 = vadd.xlane.f32.xlu1 %v4071_v24  ;;  %v12432_v24 = vpop.eup %9911 }
 0x346   : > { %4206 = vst.msk [vmem:[#allocation6] sm:$0xff] %vm3869_vm1, %v4190_v23  ;;  %v4145_v23 = vld [vmem:[#allocation6 + $0x18] sm:$0xff]  ;;  %15131 = vst [vmem:[#allocation52_spill] sm:$0xff] %v12432_v24  ;;  %v4074_v32 = vmul.f32 %v12432_v24, %v12300_v40 }
 0x347   : > { %v4163_v30 = vpop.xlane.xlu0 %4162  ;;  %3841 = vadd.xlane.f32.xlu0 %v12409_v58 }
 0x348   : > { %v4192_v50 = vadd.f32 %v4163_v30, %v4144_v15  ;;  %v12436_v30 = vpop.eup %9913 }
 0x349   : > { %3843 = vadd.xlane.f32.xlu1 %v12412_v1  ;;  %15132 = vst [vmem:[#allocation54_spill] sm:$0xff] %v12436_v30  ;;  %v4075_v33 = vmul.f32 %v12436_v30, %v12325_v28 }
 0x34a   : > { %4208 = vst.msk [vmem:[#allocation6 + $0x10] sm:$0xff] %vm3869_vm1, %v4192_v50  ;;  %v4152_v50 = vld [vmem:[#allocation6 + $0x50] sm:$0xff] }
 0x34b   : > { %v4167_v42 = vpop.xlane.xlu0 %4166  ;;  %3986 = vadd.xlane.f32.xlu0 %v3960_v19 }
 0x34c   : > { %v4194_v11 = vadd.f32 %v4167_v42, %v4146_v63  ;;  %v3962_v63 = vmul.f32 %v12432_v24, %v12394_v37 }
 0x34d   : > { %3988 = vadd.xlane.f32.xlu1 %v3961_v43 }
 0x34e   : > { %4210 = vst.msk [vmem:[#allocation6 + $0x20] sm:$0xff] %vm3869_vm1, %v4194_v11  ;;  %v3963_v11 = vmul.f32 %v12436_v30, %v12399_v25  ;;  %v4151_v25 = vld [vmem:[#allocation6 + $0x48] sm:$0xff] }
 0x34f   : > { %v4171_v38 = vpop.xlane.xlu0 %4170  ;;  %4098 = vadd.xlane.f32.xlu0 %v4072_v52  ;;  %v4149_v52 = vld [vmem:[#allocation6 + $0x38] sm:$0xff] }
 0x350   : > { %v4196_v46 = vadd.f32 %v4171_v38, %v4148_v41  ;;  %v4161_v54 = vpop.xlane.xlu1 %4160  ;;  %v4154_v41 = vld [vmem:[#allocation6 + $0x60] sm:$0xff] }
 0x351   : > { %v4191_v27 = vadd.f32 %v4161_v54, %v4143_v61  ;;  %4100 = vadd.xlane.f32.xlu1 %v4073_v35  ;;  %v12452_v54 = vpop.eup %9915 }
 0x352   : > { %4212 = vst.msk [vmem:[#allocation6 + $0x30] sm:$0xff] %vm3869_vm1, %v4196_v46  ;;  %15133 = vst [vmem:[#allocation50_spill] sm:$0xff] %v12452_v54  ;;  %v12456_v35 = vpop.eup %9917  ;;  %v3964_v28 = vmul.f32 %v12452_v54, %v12415_v22 }
 0x353   : > { %4207 = vst.msk [vmem:[#allocation6 + $0x8] sm:$0xff] %vm3869_vm1, %v4191_v27  ;;  %v4175_v10 = vpop.xlane.xlu0 %4174  ;;  %3845 = vadd.xlane.f32.xlu0 %v12432_v24  ;;  %15134 = vst [vmem:[#allocation56_spill] sm:$0xff] %v12456_v35  ;;  %v4077_v22 = vmul.f32 %v12456_v35, %v12288_v45 }
 0x354   : > { %v4198_v15 = vadd.f32 %v4175_v10, %v4150_v0  ;;  %v4165_v59 = vpop.xlane.xlu1 %4164  ;;  %v4153_v0 = vld [vmem:[#allocation6 + $0x58] sm:$0xff]  ;;  %v3965_v10 = vmul.f32 %v12456_v35, %v12421_v49  ;;  %v15135_v49 = vld [vmem:[#allocation53_spill] sm:$0xff] }
 0x355   : > { %v4193_v14 = vadd.f32 %v4165_v59, %v4145_v23  ;;  %3847 = vadd.xlane.f32.xlu1 %v12436_v30  ;;  %v4076_v59 = vmul.f32 %v12452_v54, %v12297_v4 }
 0x356   : > { %4214 = vst.msk [vmem:[#allocation6 + $0x40] sm:$0xff] %vm3869_vm1, %v4198_v15 }
 0x357   : > { %4209 = vst.msk [vmem:[#allocation6 + $0x18] sm:$0xff] %vm3869_vm1, %v4193_v14  ;;  %v4179_v19 = vpop.xlane.xlu0 %4178  ;;  %3990 = vadd.xlane.f32.xlu0 %v3962_v63  ;;  %v4155_v14 = vld [vmem:[#allocation6 + $0x68] sm:$0xff] }
 0x358   : > { %v4200_v42 = vadd.f32 %v4179_v19, %v4152_v50  ;;  %v4169_v9 = vpop.xlane.xlu1 %4168  ;;  %v15136_v19 = vld [vmem:[#allocation47_spill] sm:$0xff] }
 0x359   : > { %v4195_v43 = vadd.f32 %v4169_v9, %v4147_v18  ;;  %3992 = vadd.xlane.f32.xlu1 %v3963_v11  ;;  %v3631_v18 = vmul.f32 1.442695, %v15135_v49  ;;  %v15137_v9 = vld [vmem:[#allocation61_spill] sm:$0xff] }
 0x35a   : > { %4216 = vst.msk [vmem:[#allocation6 + $0x50] sm:$0xff] %vm3869_vm1, %v4200_v42  ;;  %v3629_v42 = vmul.f32 1.442695, %v15136_v19  ;;  %v3633_v11 = vmul.f32 1.442695, %v15137_v9 }
 0x35b   : > { %4211 = vst.msk [vmem:[#allocation6 + $0x28] sm:$0xff] %vm3869_vm1, %v4195_v43  ;;  %v4183_v37 = vpop.xlane.xlu0 %4182  ;;  %4102 = vadd.xlane.f32.xlu0 %v4074_v32  ;;  %9919 = vpow2.f32 %v3631_v18 }
 0x35c   : > { %v4202_v61 = vadd.f32 %v4183_v37, %v4154_v41  ;;  %v4173_v38 = vpop.xlane.xlu1 %4172  ;;  %9921 = vpow2.f32 %v3629_v42  ;;  %v15138_v41 = vld [vmem:[#allocation46_spill] sm:$0xff]  ;;  %v3550_v37 = vld [vmem:[#allocation3 + $0x8] sm:$0xff] }
 0x35d   : > { %v4197_v46 = vadd.f32 %v4173_v38, %v4149_v52  ;;  %4104 = vadd.xlane.f32.xlu1 %v4075_v33  ;;  %v3635_v32 = vmul.f32 1.442695, %v15138_v41  ;;  %v3549_v52 = vld [vmem:[#allocation3] sm:$0xff]  ;;  %9923 = vpow2.f32 %v3633_v11  ;;  %v4031_v11 = vld [vmem:[#allocation5 + $0x8] sm:$0xff] }
 0x35e   : > { %4218 = vst.msk [vmem:[#allocation6 + $0x60] sm:$0xff] %vm3869_vm1, %v4202_v61 }
 0x35f   : > { %4213 = vst.msk [vmem:[#allocation6 + $0x38] sm:$0xff] %vm3869_vm1, %v4197_v46  ;;  %3849 = vadd.xlane.f32.xlu0 %v12452_v54  ;;  %9925 = vpow2.f32 %v3635_v32  ;;  %v3886_v46 = vld [vmem:[#allocation4] sm:$0xff]  ;;  %v3551_v32 = vld [vmem:[#allocation3 + $0x10] sm:$0xff] }
 0x360   : > { %v4177_v40 = vpop.xlane.xlu1 %4176 }
 0x361   : > { %v4199_v27 = vadd.f32 %v4177_v40, %v4151_v25  ;;  %3851 = vadd.xlane.f32.xlu1 %v12456_v35  ;;  %v3903_v25 = vmul.f32 %v15135_v49, %v3550_v37  ;;  %v3887_v40 = vld [vmem:[#allocation4 + $0x8] sm:$0xff] }
 0x363   : > { %4215 = vst.msk [vmem:[#allocation6 + $0x48] sm:$0xff] %vm3869_vm1, %v4199_v27  ;;  %3994 = vadd.xlane.f32.xlu0 %v3964_v28 }
 0x364   : > { %v4181_v23 = vpop.xlane.xlu1 %4180 }
 0x365   : > { %v4201_v15 = vadd.f32 %v4181_v23, %v4153_v0  ;;  %3996 = vadd.xlane.f32.xlu1 %v3965_v10  ;;  %v15139_v23 = vld [vmem:[#allocation55_spill] sm:$0xff] }
 0x366   : > { %v3637_v10 = vmul.f32 1.442695, %v15139_v23 }
 0x367   : > { %4217 = vst.msk [vmem:[#allocation6 + $0x58] sm:$0xff] %vm3869_vm1, %v4201_v15  ;;  %4106 = vadd.xlane.f32.xlu0 %v4076_v59 }
 0x368   : > { %v4185_v50 = vpop.xlane.xlu1 %4184  ;;  %v9920_v43 = vpop.eup %9919  ;;  %9927 = vpow2.f32 %v3637_v10 }
 0x369   : > { %v4203_v63 = vadd.f32 %v4185_v50, %v4155_v14  ;;  %4108 = vadd.xlane.f32.xlu1 %v4077_v22  ;;  %v3806_v61 = vmul.f32 %v9920_v43, %v3550_v37  ;;  %v3919_v14 = vadd.f32 %v3903_v25, %v3887_v40  ;;  %v4030_v22 = vld [vmem:[#allocation5] sm:$0xff]  ;;  %v3904_v25 = vmul.f32 %v15137_v9, %v3551_v32 }
 0x36b   : > { %4219 = vst.msk [vmem:[#allocation6 + $0x68] sm:$0xff] %vm3869_vm1, %v4203_v63  ;;  %4186 = vadd.xlane.f32.xlu0 %v12297_v4  ;;  %v3902_v4 = vmul.f32 %v15136_v19, %v3549_v52  ;;  %v15140_v63 = vld [vmem:[#allocation48_spill] sm:$0xff]  ;;  %v3935_v42 = vmul.f32 %v9920_v43, %v3919_v14 }
 0x36c   : > { %v3639_v18 = vmul.f32 1.442695, %v15140_v63 }
 0x36d   : > { %4188 = vadd.xlane.f32.xlu1 %v12288_v45  ;;  %v9922_v45 = vpop.eup %9921  ;;  %v3918_v28 = vadd.f32 %v3902_v4, %v3886_v46  ;;  %v3552_v4 = vld [vmem:[#allocation3 + $0x18] sm:$0xff]  ;;  %v4047_v46 = vmul.f32 %v9920_v43, %v4031_v11  ;;  %v15141_v43 = vld [vmem:[#allocation49_spill] sm:$0xff] }
 0x36e   : > { %v3805_v27 = vmul.f32 %v9922_v45, %v3549_v52  ;;  %v4046_v37 = vmul.f32 %v9922_v45, %v4030_v22  ;;  %9929 = vpow2.f32 %v3639_v18 }
 0x36f   : > { %v3934_v59 = vmul.f32 %v9922_v45, %v3918_v28  ;;  %v3888_v28 = vld [vmem:[#allocation4 + $0x10] sm:$0xff] }
 0x370   : > { %v3920_v22 = vadd.f32 %v3904_v25, %v3888_v28 }
 0x392   : > { %v3824_v38 = vpop.xlane.xlu0 %3823 }
 0x393   : > { %v3854_v33 = vadd.f32 %v3824_v38, %v3806_v61  ;;  %v9924_v61 = vpop.eup %9923 }
 0x394   : > { %v9926_v40 = vpop.eup %9925  ;;  %v3807_v10 = vmul.f32 %v9924_v61, %v3551_v32  ;;  %v3643_v32 = vmul.f32 1.442695, %v12032_v56 }
 0x395   : > { %3871 = vst.msk [vmem:[#allocation3 + $0x8] sm:$0xff] %vm3869_vm1, %v3854_v33 }
 0x396   : > { %v3822_v0 = vpop.xlane.xlu1 %3821 }
 0x397   : > { %v3853_v15 = vadd.f32 %v3822_v0, %v3805_v27 }
 0x398   : > { %v3967_v50 = vpop.xlane.xlu0 %3966 }
 0x399   : > { %3870 = vst.msk [vmem:[#allocation3] sm:$0xff] %vm3869_vm1, %v3853_v15  ;;  %v3998_v19 = vadd.f32 %v3967_v50, %v3934_v59  ;;  %v3905_v15 = vmul.f32 %v15138_v41, %v3552_v4  ;;  %v3889_v59 = vld [vmem:[#allocation4 + $0x18] sm:$0xff]  ;;  %v3808_v50 = vmul.f32 %v9926_v40, %v3552_v4  ;;  %v3553_v4 = vld [vmem:[#allocation3 + $0x20] sm:$0xff] }
 0x39a   : > { %v3969_v49 = vpop.xlane.xlu1 %3968 }
 0x39b   : > { %4014 = vst.msk [vmem:[#allocation4] sm:$0xff] %vm3869_vm1, %v3998_v19  ;;  %v3999_v52 = vadd.f32 %v3969_v49, %v3935_v42  ;;  %v3641_v19 = vmul.f32 1.442695, %v15141_v43  ;;  %v3936_v42 = vmul.f32 %v9924_v61, %v3920_v22  ;;  %v3921_v49 = vadd.f32 %v3905_v15, %v3889_v59 }
 0x39c   : > { %v4079_v38 = vpop.xlane.xlu0 %4078 }
 0x39d   : > { %4015 = vst.msk [vmem:[#allocation4 + $0x8] sm:$0xff] %vm3869_vm1, %v3999_v52  ;;  %v4110_v33 = vadd.f32 %v4079_v38, %v4046_v37  ;;  %v4032_v52 = vld [vmem:[#allocation5 + $0x10] sm:$0xff]  ;;  %v3937_v37 = vmul.f32 %v9926_v40, %v3921_v49  ;;  %9931 = vpow2.f32 %v3641_v19 }
 0x39e   : > { %v4081_v27 = vpop.xlane.xlu1 %4080  ;;  %v4048_v25 = vmul.f32 %v9924_v61, %v4032_v52  ;;  %9933 = vpow2.f32 %v3643_v32 }
 0x39f   : > { %4126 = vst.msk [vmem:[#allocation5] sm:$0xff] %vm3869_vm1, %v4110_v33  ;;  %v4111_v0 = vadd.f32 %v4081_v27, %v4047_v46  ;;  %v4033_v33 = vld [vmem:[#allocation5 + $0x18] sm:$0xff]  ;;  %v9928_v27 = vpop.eup %9927 }
 0x3a0   : > { %v3826_v45 = vpop.xlane.xlu0 %3825  ;;  %v4049_v15 = vmul.f32 %v9926_v40, %v4033_v33  ;;  %v9930_v59 = vpop.eup %9929  ;;  %v15142_v40 = vld [vmem:[#allocation60_spill] sm:$0xff] }
 0x3a1   : > { %4127 = vst.msk [vmem:[#allocation5 + $0x8] sm:$0xff] %vm3869_vm1, %v4111_v0  ;;  %v3855_v14 = vadd.f32 %v3826_v45, %v3807_v10  ;;  %v3554_v0 = vld [vmem:[#allocation3 + $0x28] sm:$0xff]  ;;  %v3906_v45 = vmul.f32 %v15139_v23, %v3553_v4  ;;  %v3645_v32 = vmul.f32 1.442695, %v15142_v40  ;;  %v4034_v33 = vld [vmem:[#allocation5 + $0x20] sm:$0xff] }
 0x3a2   : > { %v3828_v18 = vpop.xlane.xlu1 %3827  ;;  %v3907_v19 = vmul.f32 %v15140_v63, %v3554_v0  ;;  %v3810_v49 = vmul.f32 %v9930_v59, %v3554_v0  ;;  %v3555_v0 = vld [vmem:[#allocation3 + $0x30] sm:$0xff] }
 0x3a3   : > { %3872 = vst.msk [vmem:[#allocation3 + $0x10] sm:$0xff] %vm3869_vm1, %v3855_v14  ;;  %v3856_v9 = vadd.f32 %v3828_v18, %v3808_v50  ;;  %v3890_v50 = vld [vmem:[#allocation4 + $0x20] sm:$0xff]  ;;  %v3809_v18 = vmul.f32 %v9928_v27, %v3553_v4  ;;  %v15143_v4 = vld [vmem:[#allocation26_spill] sm:$0xff]  ;;  %9935 = vpow2.f32 %v3645_v32 }
 0x3a4   : > { %v3971_v11 = vpop.xlane.xlu0 %3970 }
 0x3a5   : > { %3873 = vst.msk [vmem:[#allocation3 + $0x18] sm:$0xff] %vm3869_vm1, %v3856_v9  ;;  %v4000_v41 = vadd.f32 %v3971_v11, %v3936_v42  ;;  %v3891_v9 = vld [vmem:[#allocation4 + $0x28] sm:$0xff]  ;;  %v3922_v11 = vadd.f32 %v3906_v45, %v3890_v50  ;;  %v4050_v45 = vmul.f32 %v9928_v27, %v4034_v33 }
 0x3a6   : > { %v3973_v38 = vpop.xlane.xlu1 %3972 }
 0x3a7   : > { %4016 = vst.msk [vmem:[#allocation4 + $0x10] sm:$0xff] %vm3869_vm1, %v4000_v41  ;;  %v4001_v46 = vadd.f32 %v3973_v38, %v3937_v37  ;;  %v3938_v41 = vmul.f32 %v9928_v27, %v3922_v11  ;;  %v3923_v37 = vadd.f32 %v3907_v19, %v3891_v9 }
 0x3a8   : > { %v4083_v28 = vpop.xlane.xlu0 %4082 }
 0x3a9   : > { %4017 = vst.msk [vmem:[#allocation4 + $0x18] sm:$0xff] %vm3869_vm1, %v4001_v46  ;;  %v4112_v10 = vadd.f32 %v4083_v28, %v4048_v25  ;;  %v3647_v46 = vmul.f32 1.442695, %v15143_v4  ;;  %v3939_v25 = vmul.f32 %v9930_v59, %v3923_v37 }
 0x3aa   : > { %v4085_v14 = vpop.xlane.xlu1 %4084 }
 0x3ab   : > { %4128 = vst.msk [vmem:[#allocation5 + $0x10] sm:$0xff] %vm3869_vm1, %v4112_v10  ;;  %v4113_v22 = vadd.f32 %v4085_v14, %v4049_v15  ;;  %v4035_v10 = vld [vmem:[#allocation5 + $0x28] sm:$0xff]  ;;  %v9932_v14 = vpop.eup %9931  ;;  %9937 = vpow2.f32 %v3647_v46 }
 0x3ac   : > { %v3830_v61 = vpop.xlane.xlu0 %3829  ;;  %v4051_v19 = vmul.f32 %v9930_v59, %v4035_v10  ;;  %v9934_v9 = vpop.eup %9933  ;;  %v15144_v59 = vld [vmem:[#allocation58_spill] sm:$0xff] }
 0x3ad   : > { %4129 = vst.msk [vmem:[#allocation5 + $0x18] sm:$0xff] %vm3869_vm1, %v4113_v22  ;;  %v3857_v42 = vadd.f32 %v3830_v61, %v3809_v18  ;;  %v3556_v22 = vld [vmem:[#allocation3 + $0x38] sm:$0xff]  ;;  %v3908_v61 = vmul.f32 %v15141_v43, %v3555_v0  ;;  %v3649_v46 = vmul.f32 1.442695, %v15144_v59  ;;  %v4036_v10 = vld [vmem:[#allocation5 + $0x30] sm:$0xff] }
 0x3ae   : > { %v3832_v52 = vpop.xlane.xlu1 %3831  ;;  %v3909_v32 = vmul.f32 %v12032_v56, %v3556_v22  ;;  %v3812_v37 = vmul.f32 %v9934_v9, %v3556_v22  ;;  %v3557_v22 = vld [vmem:[#allocation3 + $0x40] sm:$0xff] }
 0x3af   : > { %3874 = vst.msk [vmem:[#allocation3 + $0x20] sm:$0xff] %vm3869_vm1, %v3857_v42  ;;  %v3858_v23 = vadd.f32 %v3832_v52, %v3810_v49  ;;  %v3892_v49 = vld [vmem:[#allocation4 + $0x30] sm:$0xff]  ;;  %v3811_v52 = vmul.f32 %v9932_v14, %v3555_v0  ;;  %v3651_v0 = vmul.f32 1.442695, %v12046_v34  ;;  %9939 = vpow2.f32 %v3649_v46  ;;  %v3895_v46 = vld [vmem:[#allocation4 + $0x48] sm:$0xff] }
 0x3b0   : > { %v3975_v38 = vpop.xlane.xlu0 %3974 }
 0x3b1   : > { %3875 = vst.msk [vmem:[#allocation3 + $0x28] sm:$0xff] %vm3869_vm1, %v3858_v23  ;;  %v4002_v63 = vadd.f32 %v3975_v38, %v3938_v41  ;;  %v3893_v23 = vld [vmem:[#allocation4 + $0x38] sm:$0xff]  ;;  %v3924_v38 = vadd.f32 %v3908_v61, %v3892_v49  ;;  %v9936_v61 = vpop.eup %9935  ;;  %v3558_v49 = vld [vmem:[#allocation3 + $0x48] sm:$0xff]  ;;  %9941 = vpow2.f32 %v3651_v0 }
 0x3b2   : > { %v3977_v28 = vpop.xlane.xlu1 %3976 }
 0x3b3   : > { %4018 = vst.msk [vmem:[#allocation4 + $0x20] sm:$0xff] %vm3869_vm1, %v4002_v63  ;;  %v4003_v15 = vadd.f32 %v3977_v28, %v3939_v25  ;;  %v3940_v63 = vmul.f32 %v9932_v14, %v3924_v38  ;;  %v3925_v25 = vadd.f32 %v3909_v32, %v3893_v23  ;;  %v3910_v32 = vmul.f32 %v15142_v40, %v3557_v22 }
 0x3b4   : > { %v4087_v50 = vpop.xlane.xlu0 %4086  ;;  %v3813_v38 = vmul.f32 %v9936_v61, %v3557_v22 }
 0x3b5   : > { %4019 = vst.msk [vmem:[#allocation4 + $0x28] sm:$0xff] %vm3869_vm1, %v4003_v15  ;;  %v4114_v18 = vadd.f32 %v4087_v50, %v4050_v45  ;;  %v3941_v15 = vmul.f32 %v9934_v9, %v3925_v25  ;;  %v4037_v50 = vld [vmem:[#allocation5 + $0x38] sm:$0xff] }
 0x3b6   : > { %v4089_v42 = vpop.xlane.xlu1 %4088 }
 0x3b7   : > { %4130 = vst.msk [vmem:[#allocation5 + $0x20] sm:$0xff] %vm3869_vm1, %v4114_v18  ;;  %v4115_v11 = vadd.f32 %v4089_v42, %v4051_v19  ;;  %v4052_v19 = vmul.f32 %v9932_v14, %v4036_v10 }
 0x3b8   : > { %v3834_v27 = vpop.xlane.xlu0 %3833 }
 0x3b9   : > { %4131 = vst.msk [vmem:[#allocation5 + $0x28] sm:$0xff] %vm3869_vm1, %v4115_v11  ;;  %v3859_v41 = vadd.f32 %v3834_v27, %v3811_v52  ;;  %v4053_v52 = vmul.f32 %v9934_v9, %v4037_v50  ;;  %v9938_v27 = vpop.eup %9937  ;;  %v3653_v9 = vmul.f32 1.442695, %v12049_v39 }
 0x3ba   : > { %v3836_v33 = vpop.xlane.xlu1 %3835 }
 0x3bb   : > { %3876 = vst.msk [vmem:[#allocation3 + $0x30] sm:$0xff] %vm3869_vm1, %v3859_v41  ;;  %v3860_v43 = vadd.f32 %v3836_v33, %v3812_v37  ;;  %v3894_v41 = vld [vmem:[#allocation4 + $0x40] sm:$0xff]  ;;  %v3911_v33 = vmul.f32 %v15143_v4, %v3558_v49  ;;  %9943 = vpow2.f32 %v3653_v9 }
 0x3bc   : > { %v3979_v28 = vpop.xlane.xlu0 %3978  ;;  %v3926_v25 = vadd.f32 %v3910_v32, %v3894_v41  ;;  %v3560_v32 = vld [vmem:[#allocation3 + $0x58] sm:$0xff] }
 0x3bd   : > { %3877 = vst.msk [vmem:[#allocation3 + $0x38] sm:$0xff] %vm3869_vm1, %v3860_v43  ;;  %v4004_v56 = vadd.f32 %v3979_v28, %v3940_v63  ;;  %v3814_v63 = vmul.f32 %v9938_v27, %v3558_v49  ;;  %v3927_v0 = vadd.f32 %v3911_v33, %v3895_v46 }
 0x3be   : > { %v3981_v45 = vpop.xlane.xlu1 %3980  ;;  %v3942_v10 = vmul.f32 %v9936_v61, %v3926_v25  ;;  %v3897_v25 = vld [vmem:[#allocation4 + $0x58] sm:$0xff] }
 0x3bf   : > { %4020 = vst.msk [vmem:[#allocation4 + $0x30] sm:$0xff] %vm3869_vm1, %v4004_v56  ;;  %v4005_v18 = vadd.f32 %v3981_v45, %v3941_v15  ;;  %v4038_v15 = vld [vmem:[#allocation5 + $0x40] sm:$0xff]  ;;  %v3655_v45 = vmul.f32 1.442695, %v12052_v21  ;;  %v3943_v50 = vmul.f32 %v9938_v27, %v3927_v0 }
 0x3c0   : > { %v4091_v42 = vpop.xlane.xlu0 %4090  ;;  %v4054_v49 = vmul.f32 %v9936_v61, %v4038_v15 }
 0x3c1   : > { %4021 = vst.msk [vmem:[#allocation4 + $0x38] sm:$0xff] %vm3869_vm1, %v4005_v18  ;;  %v4116_v11 = vadd.f32 %v4091_v42, %v4052_v19  ;;  %v4039_v18 = vld [vmem:[#allocation5 + $0x48] sm:$0xff]  ;;  %v3559_v19 = vld [vmem:[#allocation3 + $0x50] sm:$0xff]  ;;  %9945 = vpow2.f32 %v3655_v45 }
 0x3c2   : > { %v4093_v23 = vpop.xlane.xlu1 %4092  ;;  %v4055_v41 = vmul.f32 %v9938_v27, %v4039_v18  ;;  %v3657_v27 = vmul.f32 1.442695, %v12055_v44  ;;  %v4040_v45 = vld [vmem:[#allocation5 + $0x50] sm:$0xff] }
 0x3c3   : > { %4132 = vst.msk [vmem:[#allocation5 + $0x30] sm:$0xff] %vm3869_vm1, %v4116_v11  ;;  %v4117_v37 = vadd.f32 %v4093_v23, %v4053_v52  ;;  %v9940_v11 = vpop.eup %9939 }
 0x3c4   : > { %v3838_v14 = vpop.xlane.xlu0 %3837  ;;  %9947 = vpow2.f32 %v3657_v27 }
 0x3c5   : > { %4133 = vst.msk [vmem:[#allocation5 + $0x38] sm:$0xff] %vm3869_vm1, %v4117_v37  ;;  %v3861_v43 = vadd.f32 %v3838_v14, %v3813_v38  ;;  %v3912_v37 = vmul.f32 %v15144_v59, %v3559_v19  ;;  %v9942_v38 = vpop.eup %9941  ;;  %v3896_v14 = vld [vmem:[#allocation4 + $0x50] sm:$0xff] }
 0x3c6   : > { %v3840_v28 = vpop.xlane.xlu1 %3839  ;;  %v3816_v9 = vmul.f32 %v9942_v38, %v3560_v32 }
 0x3c7   : > { %3878 = vst.msk [vmem:[#allocation3 + $0x40] sm:$0xff] %vm3869_vm1, %v3861_v43  ;;  %v3862_v40 = vadd.f32 %v3840_v28, %v3814_v63  ;;  %v3815_v43 = vmul.f32 %v9940_v11, %v3559_v19  ;;  %v3913_v63 = vmul.f32 %v12046_v34, %v3560_v32  ;;  %v4041_v19 = vld [vmem:[#allocation5 + $0x58] sm:$0xff] }
 0x3c8   : > { %v3983_v56 = vpop.xlane.xlu0 %3982  ;;  %v9944_v32 = vpop.eup %9943 }
 0x3c9   : > { %3879 = vst.msk [vmem:[#allocation3 + $0x48] sm:$0xff] %vm3869_vm1, %v3862_v40  ;;  %v4006_v4 = vadd.f32 %v3983_v56, %v3942_v10  ;;  %v3928_v40 = vadd.f32 %v3912_v37, %v3896_v14  ;;  %v3929_v56 = vadd.f32 %v3913_v63, %v3897_v25  ;;  %v3898_v63 = vld [vmem:[#allocation4 + $0x60] sm:$0xff] }
 0x3ca   : > { %v3985_v22 = vpop.xlane.xlu1 %3984 }
 0x3cb   : > { %4022 = vst.msk [vmem:[#allocation4 + $0x40] sm:$0xff] %vm3869_vm1, %v4006_v4  ;;  %v4007_v42 = vadd.f32 %v3985_v22, %v3943_v50  ;;  %v3944_v0 = vmul.f32 %v9940_v11, %v3928_v40  ;;  %v15145_v4 = vld [vmem:[#allocation23_spill] sm:$0xff]  ;;  %v3945_v22 = vmul.f32 %v9942_v38, %v3929_v56 }
 0x3cc   : > { %v4095_v52 = vpop.xlane.xlu0 %4094  ;;  %v3659_v50 = vmul.f32 1.442695, %v15145_v4 }
 0x3cd   : > { %4023 = vst.msk [vmem:[#allocation4 + $0x48] sm:$0xff] %vm3869_vm1, %v4007_v42  ;;  %v4118_v23 = vadd.f32 %v4095_v52, %v4054_v49  ;;  %v3561_v42 = vld [vmem:[#allocation3 + $0x60] sm:$0xff]  ;;  %v4056_v52 = vmul.f32 %v9940_v11, %v4040_v45 }
 0x3ce   : > { %v4097_v33 = vpop.xlane.xlu1 %4096  ;;  %9949 = vpow2.f32 %v3659_v50  ;;  %v3914_v14 = vmul.f32 %v12049_v39, %v3561_v42  ;;  %v3817_v25 = vmul.f32 %v9944_v32, %v3561_v42 }
 0x3cf   : > { %4134 = vst.msk [vmem:[#allocation5 + $0x40] sm:$0xff] %vm3869_vm1, %v4118_v23  ;;  %v4119_v46 = vadd.f32 %v4097_v33, %v4055_v41  ;;  %v3562_v41 = vld [vmem:[#allocation3 + $0x68] sm:$0xff]  ;;  %v4057_v33 = vmul.f32 %v9942_v38, %v4041_v19 }
 0x3d0   : > { %v3842_v61 = vpop.xlane.xlu0 %3841  ;;  %v3930_v27 = vadd.f32 %v3914_v14, %v3898_v63 }
 0x3d1   : > { %4135 = vst.msk [vmem:[#allocation5 + $0x48] sm:$0xff] %vm3869_vm1, %v4119_v46  ;;  %v3863_v28 = vadd.f32 %v3842_v61, %v3815_v43  ;;  %v9946_v46 = vpop.eup %9945 }
 0x3d2   : > { %v3844_v10 = vpop.xlane.xlu1 %3843  ;;  %v3946_v38 = vmul.f32 %v9944_v32, %v3930_v27  ;;  %v9948_v42 = vpop.eup %9947 }
 0x3d3   : > { %3880 = vst.msk [vmem:[#allocation3 + $0x50] sm:$0xff] %vm3869_vm1, %v3863_v28  ;;  %v3864_v59 = vadd.f32 %v3844_v10, %v3816_v9  ;;  %v3915_v28 = vmul.f32 %v12052_v21, %v3562_v41  ;;  %v3899_v9 = vld [vmem:[#allocation4 + $0x68] sm:$0xff]  ;;  %v3818_v10 = vmul.f32 %v9946_v46, %v3562_v41 }
 0x3d4   : > { %v3987_v15 = vpop.xlane.xlu0 %3986 }
 0x3d5   : > { %3881 = vst.msk [vmem:[#allocation3 + $0x58] sm:$0xff] %vm3869_vm1, %v3864_v59  ;;  %v4008_v34 = vadd.f32 %v3987_v15, %v3944_v0  ;;  %v3931_v0 = vadd.f32 %v3915_v28, %v3899_v9  ;;  %v4042_v15 = vld [vmem:[#allocation5 + $0x60] sm:$0xff] }
 0x3d6   : > { %v3989_v18 = vpop.xlane.xlu1 %3988  ;;  %v4058_v19 = vmul.f32 %v9944_v32, %v4042_v15  ;;  %v3901_v32 = vld [vmem:[#allocation4 + $0x78] sm:$0xff] }
 0x3d7   : > { %4024 = vst.msk [vmem:[#allocation4 + $0x50] sm:$0xff] %vm3869_vm1, %v4008_v34  ;;  %v4009_v49 = vadd.f32 %v3989_v18, %v3945_v22  ;;  %v3947_v50 = vmul.f32 %v9946_v46, %v3931_v0  ;;  %v4043_v34 = vld [vmem:[#allocation5 + $0x68] sm:$0xff]  ;;  %v3563_v22 = vld [vmem:[#allocation3 + $0x70] sm:$0xff] }
 0x3d8   : > { %v4099_v23 = vpop.xlane.xlu0 %4098  ;;  %v4059_v41 = vmul.f32 %v9946_v46, %v4043_v34 }
 0x3d9   : > { %4025 = vst.msk [vmem:[#allocation4 + $0x58] sm:$0xff] %vm3869_vm1, %v4009_v49  ;;  %v4120_v37 = vadd.f32 %v4099_v23, %v4056_v52  ;;  %v3564_v52 = vld [vmem:[#allocation3 + $0x78] sm:$0xff] }
 0x3da   : > { %v4101_v43 = vpop.xlane.xlu1 %4100 }
 0x3db   : > { %4136 = vst.msk [vmem:[#allocation5 + $0x50] sm:$0xff] %vm3869_vm1, %v4120_v37  ;;  %v4121_v61 = vadd.f32 %v4101_v43, %v4057_v33  ;;  %v3916_v37 = vmul.f32 %v12055_v44, %v3563_v22  ;;  %v9950_v33 = vpop.eup %9949  ;;  %v3900_v43 = vld [vmem:[#allocation4 + $0x70] sm:$0xff] }
 0x3dc   : > { %v3846_v11 = vpop.xlane.xlu0 %3845  ;;  %v3820_v9 = vmul.f32 %v9950_v33, %v3564_v52 }
 0x3dd   : > { %4137 = vst.msk [vmem:[#allocation5 + $0x58] sm:$0xff] %vm3869_vm1, %v4121_v61  ;;  %v3865_v40 = vadd.f32 %v3846_v11, %v3817_v25  ;;  %v3819_v61 = vmul.f32 %v9948_v42, %v3563_v22  ;;  %v3917_v25 = vmul.f32 %v15145_v4, %v3564_v52  ;;  %v4157_v52 = vld [vmem:[#allocation6 + $0x78] sm:$0xff] }
 0x3de   : > { %v3848_v59 = vpop.xlane.xlu1 %3847 }
 0x3df   : > { %3882 = vst.msk [vmem:[#allocation3 + $0x60] sm:$0xff] %vm3869_vm1, %v3865_v40  ;;  %v3866_v39 = vadd.f32 %v3848_v59, %v3818_v10  ;;  %v3932_v40 = vadd.f32 %v3916_v37, %v3900_v43  ;;  %v3933_v27 = vadd.f32 %v3917_v25, %v3901_v32 }
 0x3e0   : > { %v3991_v56 = vpop.xlane.xlu0 %3990 }
 0x3e1   : > { %3883 = vst.msk [vmem:[#allocation3 + $0x68] sm:$0xff] %vm3869_vm1, %v3866_v39  ;;  %v4010_v45 = vadd.f32 %v3991_v56, %v3946_v38  ;;  %v3948_v46 = vmul.f32 %v9948_v42, %v3932_v40  ;;  %v4044_v39 = vld [vmem:[#allocation5 + $0x70] sm:$0xff]  ;;  %v3949_v0 = vmul.f32 %v9950_v33, %v3933_v27  ;;  %v4045_v56 = vld [vmem:[#allocation5 + $0x78] sm:$0xff] }
 0x3e2   : > { %v3993_v21 = vpop.xlane.xlu1 %3992  ;;  %v4061_v34 = vmul.f32 %v9950_v33, %v4045_v56 }
 0x3e3   : > { %4026 = vst.msk [vmem:[#allocation4 + $0x60] sm:$0xff] %vm3869_vm1, %v4010_v45  ;;  %v4011_v18 = vadd.f32 %v3993_v21, %v3947_v50  ;;  %v4060_v45 = vmul.f32 %v9948_v42, %v4044_v39 }
 0x3e4   : > { %v4103_v49 = vpop.xlane.xlu0 %4102 }
 0x3e5   : > { %4027 = vst.msk [vmem:[#allocation4 + $0x68] sm:$0xff] %vm3869_vm1, %v4011_v18  ;;  %v4122_v23 = vadd.f32 %v4103_v49, %v4058_v19  ;;  %v4156_v18 = vld [vmem:[#allocation6 + $0x70] sm:$0xff] }
 0x3e6   : > { %v4105_v14 = vpop.xlane.xlu1 %4104 }
 0x3e7   : > { %4138 = vst.msk [vmem:[#allocation5 + $0x60] sm:$0xff] %vm3869_vm1, %v4122_v23  ;;  %v4123_v63 = vadd.f32 %v4105_v14, %v4059_v41 }
 0x3e8   : > { %v3850_v28 = vpop.xlane.xlu0 %3849 }
 0x3e9   : > { %4139 = vst.msk [vmem:[#allocation5 + $0x68] sm:$0xff] %vm3869_vm1, %v4123_v63  ;;  %v3867_v11 = vadd.f32 %v3850_v28, %v3819_v61 }
 0x3ea   : > { %v3852_v10 = vpop.xlane.xlu1 %3851 }
 0x3eb   : > { %3884 = vst.msk [vmem:[#allocation3 + $0x70] sm:$0xff] %vm3869_vm1, %v3867_v11  ;;  %v3868_v44 = vadd.f32 %v3852_v10, %v3820_v9 }
 0x3ec   : > { %v3995_v59 = vpop.xlane.xlu0 %3994 }
 0x3ed   : > { %3885 = vst.msk [vmem:[#allocation3 + $0x78] sm:$0xff] %vm3869_vm1, %v3868_v44  ;;  %v4012_v38 = vadd.f32 %v3995_v59, %v3948_v46 }
 0x3ee   : > { %v3997_v4 = vpop.xlane.xlu1 %3996 }
 0x3ef   : > { %4028 = vst.msk [vmem:[#allocation4 + $0x70] sm:$0xff] %vm3869_vm1, %v4012_v38  ;;  %v4013_v15 = vadd.f32 %v3997_v4, %v3949_v0 }
 0x3f0   : > { %v4107_v50 = vpop.xlane.xlu0 %4106 }
 0x3f1   : > { %4029 = vst.msk [vmem:[#allocation4 + $0x78] sm:$0xff] %vm3869_vm1, %v4013_v15  ;;  %v4124_v21 = vadd.f32 %v4107_v50, %v4060_v45 }
 0x3f2   : > { %v4109_v22 = vpop.xlane.xlu1 %4108 }
 0x3f3   : > { %4140 = vst.msk [vmem:[#allocation5 + $0x70] sm:$0xff] %vm3869_vm1, %v4124_v21  ;;  %v4125_v19 = vadd.f32 %v4109_v22, %v4061_v34 }
 0x3f4   : > { %v4187_v49 = vpop.xlane.xlu0 %4186 }
 0x3f5   : > { %4141 = vst.msk [vmem:[#allocation5 + $0x78] sm:$0xff] %vm3869_vm1, %v4125_v19  ;;  %v4204_v23 = vadd.f32 %v4187_v49, %v4156_v18  ;;  %4240 = sbr.rel (%p7682_p7) target bundleno = 1872 (0x750), region = 60 }
 0x3f6   : > { %v4189_v41 = vpop.xlane.xlu1 %4188 }
 0x3f7   : > { %4220 = vst.msk [vmem:[#allocation6 + $0x70] sm:$0xff] %vm3869_vm1, %v4204_v23  ;;  %v4205_v37 = vadd.f32 %v4189_v41, %v4157_v52 }
 0x3f9   : > { %4221 = vst.msk [vmem:[#allocation6 + $0x78] sm:$0xff] %vm3869_vm1, %v4205_v37 }
 0x3fa   : > { %v4243_v42 = vld [vmem:[#allocation3 + $0x10] sm:$0xff]  ;;  %v4241_v33 = vld [vmem:[#allocation3] sm:$0xff]  ;;  %v10147_v14 = vmov 0   ;;  %v4244_v43 = vld [vmem:[#allocation3 + $0x18] sm:$0xff] }
 0x3fb   : > { %9952 = vset.pattern.permute.xlu1 %v10147_v14  ;;  %9951 = vset.pattern.permute.xlu0 %v10147_v14  ;;  %9953 = vrcp.f32 %v4243_v42  ;;  %v4242_v63 = vld [vmem:[#allocation3 + $0x8] sm:$0xff]  ;;  %v12555_v25 = vld [vmem:[#allocation3 + $0x20] sm:$0xff]  ;;  %v12557_v28 = vld [vmem:[#allocation3 + $0x38] sm:$0xff] }
 0x3fc   : > { %9955 = vlog2.f32 %v4243_v42  ;;  %v4246_v61 = vld [vmem:[#allocation3 + $0x28] sm:$0xff]  ;;  %v12561_v32 = vld [vmem:[#allocation3 + $0x30] sm:$0xff]  ;;  %v12569_v46 = vld [vmem:[#allocation3 + $0x40] sm:$0xff] }
 0x3fd   : > { %9957 = vrcp.f32 %v4241_v33  ;;  %v12565_v9 = vld [vmem:[#allocation3 + $0x48] sm:$0xff]  ;;  %v4355_v4 = vld [vmem:[#allocation4 + $0x10] sm:$0xff]  ;;  %v12576_v21 = vld [vmem:[#allocation3 + $0x58] sm:$0xff] }
 0x3fe   : > { %9959 = vlog2.f32 %v4241_v33  ;;  %v4353_v18 = vld [vmem:[#allocation4] sm:$0xff]  ;;  %v4367_v54 = vld [vmem:[#allocation4 + $0x70] sm:$0xff]  ;;  %v4700_v6 = vld [vmem:[%s10294_s18 + $0x38] sm:$0xff] }
 0x3ff   : > { %9961 = vrcp.f32 %v4244_v43  ;;  %v4473_v26 = vld [vmem:[#allocation6 + $0x40] sm:$0xff] }
 0x400   : > { %9963 = vlog2.f32 %v4244_v43 }
 0x401   : > { %9965 = vrcp.f32 %v4242_v63 }
 0x402   : > { %9967 = vlog2.f32 %v4242_v63 }
 0x403   : > { %9969 = vrcp.f32 %v4246_v61 }
 0x404   : > { %9971 = vlog2.f32 %v4246_v61 }
 0x405   : > { %9973 = vrcp.f32 %v12555_v25 }
 0x406   : > { %9975 = vlog2.f32 %v12555_v25 }
 0x407   : > { %9977 = vrcp.f32 %v12557_v28 }
 0x408   : > { %v9954_v11 = vpop.eup %9953  ;;  %9979 = vlog2.f32 %v12557_v28 }
 0x409   : > { %v9956_v40 = vpop.eup %9955  ;;  %v4275_v10 = vmul.f32 %v9954_v11, %v4243_v42  ;;  %9981 = vrcp.f32 %v12561_v32 }
 0x40a   : > { %v9958_v44 = vpop.eup %9957  ;;  %9983 = vlog2.f32 %v12561_v32  ;;  %v4326_v0 = vmul.f32 0.6931472, %v9956_v40 }
 0x40b   : > { %v9960_v27 = vpop.eup %9959  ;;  %v4291_v59 = vsub.f32 2.0, %v4275_v10  ;;  %v4273_v39 = vmul.f32 %v9958_v44, %v4241_v33  ;;  %9985 = vrcp.f32 %v12565_v9  ;;  %v4356_v33 = vld [vmem:[#allocation4 + $0x18] sm:$0xff] }
 0x40c   : > { %v9962_v38 = vpop.eup %9961  ;;  %9987 = vlog2.f32 %v12565_v9  ;;  %v4322_v22 = vmul.f32 0.6931472, %v9960_v27  ;;  %v12588_v27 = vld [vmem:[#allocation3 + $0x50] sm:$0xff] }
 0x40d   : > { %v9964_v56 = vpop.eup %9963  ;;  %v12573_v15 = vmul.f32 %v9954_v11, %v4291_v59  ;;  %v4289_v45 = vsub.f32 2.0, %v4273_v39  ;;  %v4276_v50 = vmul.f32 %v9962_v38, %v4244_v43  ;;  %9989 = vrcp.f32 %v12569_v46 }
 0x40e   : > { %v9966_v34 = vpop.eup %9965  ;;  %9991 = vlog2.f32 %v12569_v46  ;;  %v4328_v42 = vmul.f32 0.6931472, %v9964_v56 }
 0x40f   : > { %v9968_v19 = vpop.eup %9967  ;;  %4525 = vperm.xlu1 %9952, %v12573_v15   ;;  %v4371_v49 = vmul.f32 %v4355_v4, %v12573_v15  ;;  %v12581_v52 = vmul.f32 %v9958_v44, %v4289_v45  ;;  %v4292_v23 = vsub.f32 2.0, %v4276_v50  ;;  %v4274_v41 = vmul.f32 %v9966_v34, %v4242_v63  ;;  %v4354_v63 = vld [vmem:[#allocation4 + $0x8] sm:$0xff] }
 0x410   : > { %v9970_v37 = vpop.eup %9969  ;;  %9993 = vrcp.f32 %v12576_v21  ;;  %v4324_v59 = vmul.f32 0.6931472, %v9968_v19 }
 0x411   : > { %v9972_v14 = vpop.eup %9971  ;;  %v4387_v43 = vsub.f32 %v4326_v0, %v4371_v49  ;;  %4515 = vperm.xlu0 %9951, %v12581_v52   ;;  %v4369_v11 = vmul.f32 %v4353_v18, %v12581_v52  ;;  %v12586_v40 = vmul.f32 %v9962_v38, %v4292_v23  ;;  %v4290_v10 = vsub.f32 2.0, %v4274_v41 }
 0x412   : > { %v9974_v44 = vpop.eup %9973  ;;  %v4278_v39 = vmul.f32 %v9970_v37, %v4246_v61  ;;  %9995 = vlog2.f32 %v12576_v21  ;;  %v4332_v49 = vmul.f32 0.6931472, %v9972_v14 }
 0x413   : > { %v9976_v4 = vpop.eup %9975  ;;  %v4403_v56 = vmul.f32 0.18033688, %v4387_v43  ;;  %v4385_v45 = vsub.f32 %v4322_v22, %v4369_v11  ;;  %v4372_v0 = vmul.f32 %v4356_v33, %v12586_v40  ;;  %4530 = vperm.xlu1 %9952, %v12586_v40   ;;  %v12593_v50 = vmul.f32 %v9966_v34, %v4290_v10  ;;  %v4358_v33 = vld [vmem:[#allocation4 + $0x28] sm:$0xff] }
 0x414   : > { %v9978_v38 = vpop.eup %9977  ;;  %v4294_v18 = vsub.f32 2.0, %v4278_v39  ;;  %v4277_v23 = vmul.f32 %v9974_v44, %v12555_v25  ;;  %9997 = vrcp.f32 %v12588_v27  ;;  %v12602_v43 = vld [vmem:[#allocation3 + $0x68] sm:$0xff]  ;;  %v4330_v10 = vmul.f32 0.6931472, %v9976_v4 }
 0x415   : > { %v9980_v61 = vpop.eup %9979  ;;  %4419 = vst.msk [vmem:[%s10309_s12 + $0x10] sm:$0xff] %vm3869_vm1, %v4403_v56  ;;  %v4401_v19 = vmul.f32 0.18033688, %v4385_v45  ;;  %v4388_v41 = vsub.f32 %v4328_v42, %v4372_v0  ;;  %v4370_v22 = vmul.f32 %v4354_v63, %v12593_v50  ;;  %4520 = vperm.xlu0 %9951, %v12593_v50   ;;  %v4280_v34 = vmul.f32 %v9978_v38, %v12557_v28  ;;  %v4357_v56 = vld [vmem:[#allocation4 + $0x20] sm:$0xff] }
 0x416   : > { %v9982_v14 = vpop.eup %9981  ;;  %v12604_v11 = vmul.f32 %v9970_v37, %v4294_v18  ;;  %v4293_v25 = vsub.f32 2.0, %v4277_v23  ;;  %9999 = vlog2.f32 %v12588_v27  ;;  %v4336_v4 = vmul.f32 0.6931472, %v9980_v61  ;;  %v4360_v18 = vld [vmem:[#allocation4 + $0x38] sm:$0xff] }
 0x417   : > { %v9984_v39 = vpop.eup %9983  ;;  %4417 = vst.msk [vmem:[%s10309_s12] sm:$0xff] %vm3869_vm1, %v4401_v19  ;;  %v4404_v42 = vmul.f32 0.18033688, %v4388_v41  ;;  %v4386_v63 = vsub.f32 %v4324_v59, %v4370_v22  ;;  %v4296_v45 = vsub.f32 2.0, %v4280_v34  ;;  %v4279_v0 = vmul.f32 %v9982_v14, %v12561_v32  ;;  %v12620_v22 = vld [vmem:[#allocation3 + $0x60] sm:$0xff] }
 0x418   : > { %v9986_v28 = vpop.eup %9985  ;;  %v4374_v17 = vmul.f32 %v4358_v33, %v12604_v11  ;;  %4540 = vperm.xlu1 %9952, %v12604_v11   ;;  %v12612_v37 = vmul.f32 %v9974_v44, %v4293_v25  ;;  %10001 = vrcp.f32 %v12602_v43  ;;  %v4334_v61 = vmul.f32 0.6931472, %v9984_v39  ;;  %v4359_v25 = vld [vmem:[#allocation4 + $0x30] sm:$0xff]  ;;  %v4362_v39 = vld [vmem:[#allocation4 + $0x48] sm:$0xff] }
 0x419   : > { %v9988_v23 = vpop.eup %9987  ;;  %4420 = vst.msk [vmem:[%s10309_s12 + $0x18] sm:$0xff] %vm3869_vm1, %v4404_v42  ;;  %v4402_v59 = vmul.f32 0.18033688, %v4386_v63  ;;  %v12617_v19 = vmul.f32 %v9978_v38, %v4296_v45  ;;  %v4295_v41 = vsub.f32 2.0, %v4279_v0  ;;  %v4282_v32 = vmul.f32 %v9986_v28, %v12565_v9 }
 0x41a   : > { %v9990_v33 = vpop.eup %9989  ;;  %v4390_v34 = vsub.f32 %v4332_v49, %v4374_v17  ;;  %v4373_v44 = vmul.f32 %v4357_v56, %v12612_v37  ;;  %4535 = vperm.xlu0 %9951, %v12612_v37   ;;  %10003 = vlog2.f32 %v12602_v43  ;;  %v4340_v56 = vmul.f32 0.6931472, %v9988_v23  ;;  %v4361_v23 = vld [vmem:[#allocation4 + $0x40] sm:$0xff] }
 0x41b   : > { %v9992_v48 = vpop.eup %9991  ;;  %4418 = vst.msk [vmem:[%s10309_s12 + $0x8] sm:$0xff] %vm3869_vm1, %v4402_v59  ;;  %v4376_v38 = vmul.f32 %v4360_v18, %v12617_v19  ;;  %v12628_v42 = vmul.f32 %v9982_v14, %v4295_v41  ;;  %v4298_v9 = vsub.f32 2.0, %v4282_v32  ;;  %v4281_v63 = vmul.f32 %v9990_v33, %v12569_v46  ;;  %v12636_v18 = vld [vmem:[#allocation3 + $0x78] sm:$0xff] }
 0x41c   : > { %v4406_v17 = vmul.f32 0.18033688, %v4390_v34  ;;  %v4389_v49 = vsub.f32 %v4330_v10, %v4373_v44  ;;  %4550 = vperm.xlu1 %9952, %v12617_v19   ;;  %10005 = vrcp.f32 %v12620_v22  ;;  %v4338_v10 = vmul.f32 0.6931472, %v9992_v48 }
 0x41d   : > { %v9994_v45 = vpop.eup %9993  ;;  %v4392_v0 = vsub.f32 %v4336_v4, %v4376_v38  ;;  %v4375_v59 = vmul.f32 %v4359_v25, %v12628_v42  ;;  %v12634_v53 = vmul.f32 %v9986_v28, %v4298_v9  ;;  %v4297_v14 = vsub.f32 2.0, %v4281_v63  ;;  %v12646_v25 = vld [vmem:[#allocation3 + $0x70] sm:$0xff]  ;;  %v4364_v63 = vld [vmem:[#allocation4 + $0x58] sm:$0xff] }
 0x41e   : > { %4422 = vst.msk [vmem:[%s10309_s12 + $0x28] sm:$0xff] %vm3869_vm1, %v4406_v17  ;;  %v4405_v46 = vmul.f32 0.18033688, %v4389_v49  ;;  %4545 = vperm.xlu0 %9951, %v12628_v42   ;;  %v4284_v41 = vmul.f32 %v9994_v45, %v12576_v21  ;;  %10007 = vlog2.f32 %v12620_v22 }
 0x41f   : > { %v9996_v4 = vpop.eup %9995  ;;  %v4408_v32 = vmul.f32 0.18033688, %v4392_v0  ;;  %v4391_v28 = vsub.f32 %v4334_v61, %v4375_v59  ;;  %v4378_v34 = vmul.f32 %v4362_v39, %v12634_v53  ;;  %v12644_v44 = vmul.f32 %v9990_v33, %v4297_v14  ;;  %v4465_v33 = vld [vmem:[#allocation6] sm:$0xff] }
 0x420   : > { %4421 = vst.msk [vmem:[%s10309_s12 + $0x20] sm:$0xff] %vm3869_vm1, %v4405_v46  ;;  %4560 = vperm.xlu1 %9952, %v12634_v53   ;;  %v4300_v38 = vsub.f32 2.0, %v4284_v41  ;;  %10009 = vrcp.f32 %v12636_v18  ;;  %v4344_v49 = vmul.f32 0.6931472, %v9996_v4  ;;  %v4466_v41 = vld [vmem:[#allocation6 + $0x8] sm:$0xff] }
 0x421   : > { %v9998_v48 = vpop.eup %9997  ;;  %4424 = vst.msk [vmem:[%s10309_s12 + $0x38] sm:$0xff] %vm3869_vm1, %v4408_v32  ;;  %v4407_v21 = vmul.f32 0.18033688, %v4391_v28  ;;  %v4394_v9 = vsub.f32 %v4340_v56, %v4378_v34  ;;  %v4377_v61 = vmul.f32 %v4361_v23, %v12644_v44  ;;  %10011 = vlog2.f32 %v12636_v18  ;;  %v4363_v23 = vld [vmem:[#allocation4 + $0x50] sm:$0xff] }
 0x422   : > { %4555 = vperm.xlu0 %9951, %v12644_v44   ;;  %v12657_v17 = vmul.f32 %v9994_v45, %v4300_v38  ;;  %v4283_v39 = vmul.f32 %v9998_v48, %v12588_v27  ;;  %10013 = vrcp.f32 %v12646_v25 }
 0x423   : > { %v10000_v0 = vpop.eup %9999  ;;  %4423 = vst.msk [vmem:[%s10309_s12 + $0x30] sm:$0xff] %vm3869_vm1, %v4407_v21  ;;  %v4410_v56 = vmul.f32 0.18033688, %v4394_v9  ;;  %v4393_v59 = vsub.f32 %v4338_v10, %v4377_v61  ;;  %10015 = vlog2.f32 %v12646_v25 }
 0x424   : > { %v4380_v14 = vmul.f32 %v4364_v63, %v12657_v17  ;;  %4570 = vperm.xlu1 %9952, %v12657_v17   ;;  %v4299_v46 = vsub.f32 2.0, %v4283_v39  ;;  %10017 = vrcp.f32 %v4465_v33  ;;  %v4342_v10 = vmul.f32 0.6931472, %v10000_v0  ;;  %v4366_v63 = vld [vmem:[#allocation4 + $0x68] sm:$0xff]  ;;  %v4467_v33 = vld [vmem:[#allocation6 + $0x10] sm:$0xff] }
 0x425   : > { %v10002_v45 = vpop.eup %10001  ;;  %4426 = vst.msk [vmem:[%s10309_s12 + $0x48] sm:$0xff] %vm3869_vm1, %v4410_v56  ;;  %v4409_v27 = vmul.f32 0.18033688, %v4393_v59  ;;  %10019 = vrcp.f32 %v4466_v41  ;;  %v4365_v41 = vld [vmem:[#allocation4 + $0x60] sm:$0xff] }
 0x426   : > { %v4396_v4 = vsub.f32 %v4344_v49, %v4380_v14  ;;  %v12668_v32 = vmul.f32 %v9998_v48, %v4299_v46  ;;  %v4286_v28 = vmul.f32 %v10002_v45, %v12602_v43  ;;  %v4433_v46 = vld [vmem:[#allocation5] sm:$0xff]  ;;  %10021 = vrcp.f32 %v4467_v33 }
 0x427   : > { %v10004_v34 = vpop.eup %10003  ;;  %4425 = vst.msk [vmem:[%s10309_s12 + $0x40] sm:$0xff] %vm3869_vm1, %v4409_v27  ;;  %v4468_v27 = vld [vmem:[#allocation6 + $0x18] sm:$0xff] }
 0x428   : > { %v4412_v38 = vmul.f32 0.18033688, %v4396_v4  ;;  %v4379_v21 = vmul.f32 %v4363_v23, %v12668_v32  ;;  %4565 = vperm.xlu0 %9951, %v12668_v32   ;;  %v4302_v9 = vsub.f32 2.0, %v4286_v28  ;;  %v4348_v43 = vmul.f32 0.6931472, %v10004_v34  ;;  %v4434_v34 = vld [vmem:[#allocation5 + $0x8] sm:$0xff] }
 0x429   : > { %v10006_v61 = vpop.eup %10005  ;;  %10023 = vrcp.f32 %v4468_v27 }
 0x42a   : > { %4428 = vst.msk [vmem:[%s10309_s12 + $0x58] sm:$0xff] %vm3869_vm1, %v4412_v38  ;;  %v4395_v48 = vsub.f32 %v4342_v10, %v4379_v21  ;;  %v12677_v49 = vmul.f32 %v10002_v45, %v4302_v9  ;;  %v4285_v39 = vmul.f32 %v10006_v61, %v12620_v22  ;;  %v4449_v21 = vmul.f32 %v4433_v46, %v12581_v52  ;;  %v4708_v9 = vld [vmem:[%s10294_s18 + $0x78] sm:$0xff] }
 0x42b   : > { %v10008_v0 = vpop.eup %10007 }
 0x42c   : > { %v4411_v56 = vmul.f32 0.18033688, %v4395_v48  ;;  %v4382_v59 = vmul.f32 %v4366_v63, %v12677_v49  ;;  %4580 = vperm.xlu1 %9952, %v12677_v49   ;;  %v4301_v14 = vsub.f32 2.0, %v4285_v39  ;;  %v4346_v22 = vmul.f32 0.6931472, %v10008_v0  ;;  %v4469_v39 = vld [vmem:[#allocation6 + $0x20] sm:$0xff] }
 0x42d   : > { %v10010_v23 = vpop.eup %10009  ;;  %10025 = vrcp.f32 %v4469_v39 }
 0x42e   : > { %v10012_v4 = vpop.eup %10011  ;;  %4427 = vst.msk [vmem:[%s10309_s12 + $0x50] sm:$0xff] %vm3869_vm1, %v4411_v56  ;;  %v4398_v45 = vsub.f32 %v4348_v43, %v4382_v59  ;;  %v12684_v10 = vmul.f32 %v10006_v61, %v4301_v14  ;;  %v4288_v28 = vmul.f32 %v10010_v23, %v12636_v18  ;;  %v4368_v18 = vld [vmem:[#allocation4 + $0x78] sm:$0xff]  ;;  %v4450_v56 = vmul.f32 %v4434_v34, %v12593_v50  ;;  %v4707_v14 = vld [vmem:[%s10294_s18 + $0x70] sm:$0xff] }
 0x42f   : > { %v10014_v38 = vpop.eup %10013  ;;  %v12693_v59 = vand.u32 4294901760, %v4708_v9  ;;  %v4352_v27 = vmul.f32 0.6931472, %v10012_v4 }
 0x430   : > { %v10016_v63 = vpop.eup %10015  ;;  %v4414_v33 = vmul.f32 0.18033688, %v4398_v45  ;;  %v4381_v48 = vmul.f32 %v4365_v41, %v12684_v10  ;;  %4575 = vperm.xlu0 %9951, %v12684_v10   ;;  %v4304_v43 = vsub.f32 2.0, %v4288_v28  ;;  %v4287_v61 = vmul.f32 %v10014_v38, %v12646_v25 }
 0x431   : > { %v10018_v0 = vpop.eup %10017  ;;  %v4350_v45 = vmul.f32 0.6931472, %v10016_v63  ;;  %v12701_v25 = vsub.f32 %v4708_v9, %v12693_v59  ;;  %v12703_v28 = vand.u32 4294901760, %v4707_v14  ;;  %9134 = vmatprep.subr.mxu0 %v12693_v59  ;;  %v4470_v63 = vld [vmem:[#allocation6 + $0x28] sm:$0xff] }
 0x432   : > { %4430 = vst.msk [vmem:[%s10309_s12 + $0x68] sm:$0xff] %vm3869_vm1, %v4414_v33  ;;  %v4397_v52 = vsub.f32 %v4346_v22, %v4381_v48  ;;  %v12698_v46 = vmul.f32 %v10010_v23, %v4304_v43  ;;  %v4303_v41 = vsub.f32 2.0, %v4287_v61  ;;  %v12710_v4 = vmul.f32 %v10018_v0, %v4449_v21  ;;  %v4435_v22 = vld [vmem:[#allocation5 + $0x10] sm:$0xff]  ;;  %9135 = vmatpush3.msra.mxu0 %v12693_v59  ;;  %v10020_v9 = vpop.eup %10019  ;;  %v4706_v21 = vld [vmem:[%s10294_s18 + $0x68] sm:$0xff]  ;;  %v4705_v0 = vld [vmem:[%s10294_s18 + $0x60] sm:$0xff] }
 0x433   : > { %v12714_v33 = vand.u32 4294901760, %v12701_v25  ;;  %9136 = vmatprep.subr.mxu0 %v12703_v28  ;;  %v4451_v43 = vmul.f32 %v4435_v22, %v12573_v15  ;;  %v12727_v39 = vsub.f32 %v4707_v14, %v12703_v28  ;;  %10027 = vrcp.f32 %v4470_v63  ;;  %v10022_v15 = vpop.eup %10021  ;;  %v4703_v14 = vld [vmem:[%s10294_s18 + $0x50] sm:$0xff] }
 0x434   : > { %v4413_v50 = vmul.f32 0.18033688, %v4397_v52  ;;  %v4384_v34 = vmul.f32 %v4368_v18, %v12698_v46  ;;  %4590 = vperm.xlu1 %9952, %v12698_v46   ;;  %v12708_v23 = vmul.f32 %v10014_v38, %v4303_v41  ;;  %9137 = vmatpush3.msra.mxu0 %v12703_v28  ;;  %v4704_v18 = vld [vmem:[%s10294_s18 + $0x58] sm:$0xff] }
 0x435   : > { %15146 = vst [vmem:[#allocation64_spill] sm:$0xff] %v12714_v33  ;;  %v4954_v61 = vsub.f32 %v12701_v25, %v12714_v33  ;;  %15147 = vst [vmem:[#allocation65_spill] sm:$0xff] %v12727_v39  ;;  %v4436_v41 = vld [vmem:[#allocation5 + $0x18] sm:$0xff]  ;;  %v12735_v22 = vand.u32 4294901760, %v12727_v39  ;;  %v12737_v33 = vand.u32 4294901760, %v4706_v21  ;;  %v12759_v35 = vmul.f32 %v10022_v15, %v4451_v43  ;;  %v4701_v15 = vld [vmem:[%s10294_s18 + $0x40] sm:$0xff] }
 0x436   : > { %4429 = vst.msk [vmem:[%s10309_s12 + $0x60] sm:$0xff] %vm3869_vm1, %v4413_v50  ;;  %v4400_v48 = vsub.f32 %v4352_v27, %v4384_v34  ;;  %v4383_v38 = vmul.f32 %v4367_v54, %v12708_v23  ;;  %4585 = vperm.xlu0 %9951, %v12708_v23   ;;  %v12732_v54 = vmul.f32 %v10020_v9, %v4450_v56  ;;  %v4471_v50 = vld [vmem:[#allocation6 + $0x30] sm:$0xff]  ;;  %v12744_v56 = vand.u32 4294901760, %v4704_v18 }
 0x437   : > { %v4955_v34 = vand.u32 4294901760, %v4954_v61  ;;  %15148 = vst [vmem:[#allocation66_spill] sm:$0xff] %v12735_v22  ;;  %15149 = vst [vmem:[#allocation67_spill] sm:$0xff] %v12737_v33  ;;  %v12746_v9 = vand.u32 4294901760, %v4703_v14  ;;  %v4452_v63 = vmul.f32 %v4436_v41, %v12586_v40  ;;  %10029 = vrcp.f32 %v4471_v50  ;;  %9138 = vmatprep.subr.mxu0 %v12737_v33  ;;  %v4472_v40 = vld [vmem:[#allocation6 + $0x38] sm:$0xff] }
 0x438   : > { %v4416_v52 = vmul.f32 0.18033688, %v4400_v48  ;;  %v4399_v27 = vsub.f32 %v4350_v45, %v4383_v38  ;;  %6014 = vperm.xlu1 %9952, %v12710_v4   ;;  %v4437_v48 = vld [vmem:[#allocation5 + $0x20] sm:$0xff]  ;;  %v12742_v38 = vand.u32 4294901760, %v4705_v0  ;;  %15151 = vst [vmem:[#allocation69_spill] sm:$0xff] %v12744_v56  ;;  %v4961_v61 = vsub.f32 %v12727_v39, %v12735_v22  ;;  %9139 = vmatpush3.msra.mxu0 %v12737_v33 }
 0x439   : > { %15152 = vst [vmem:[#allocation70_spill] sm:$0xff] %v12746_v9  ;;  %9190 = vmatprep.subr.mxu1 %v4955_v34  ;;  %v12752_v8 = vsub.f32 %v4706_v21, %v12737_v33  ;;  %v12765_v50 = vsub.f32 %v4704_v18, %v12744_v56  ;;  %v4453_v22 = vmul.f32 %v4437_v48, %v12612_v37  ;;  %v12788_v37 = vand.u32 4294901760, %v4701_v15 }
 0x43a   : > { %4432 = vst.msk [vmem:[%s10309_s12 + $0x78] sm:$0xff] %vm3869_vm1, %v4416_v52  ;;  %v4415_v45 = vmul.f32 0.18033688, %v4399_v27  ;;  %15150 = vst [vmem:[#allocation68_spill] sm:$0xff] %v12742_v38  ;;  %v4702_v52 = vld [vmem:[%s10294_s18 + $0x48] sm:$0xff]  ;;  %v10024_v27 = vpop.eup %10023  ;;  %9191 = vmatpush3.msra.mxu1 %v4955_v34  ;;  %v12762_v41 = vsub.f32 %v4705_v0, %v12742_v38  ;;  %v4962_v39 = vand.u32 4294901760, %v4961_v61  ;;  %v12774_v43 = vsub.f32 %v4703_v14, %v12746_v9 }
 0x43b   : > { %15153 = vst [vmem:[#allocation71_spill] sm:$0xff] %v12752_v8  ;;  %15155 = vst [vmem:[#allocation73_spill] sm:$0xff] %v12765_v50  ;;  %v12767_v21 = vand.u32 4294901760, %v4702_v52  ;;  %v12782_v18 = vand.u32 4294901760, %v12765_v50  ;;  %9140 = vmatprep.subr.mxu0 %v12742_v38  ;;  %v12790_v48 = vmul.f32 %v10024_v27, %v4452_v63  ;;  %10031 = vrcp.f32 %v4472_v40 }
 0x43c   : > { %4431 = vst.msk [vmem:[%s10309_s12 + $0x70] sm:$0xff] %vm3869_vm1, %v4415_v45  ;;  %6019 = vperm.xlu1 %9952, %v12732_v54   ;;  %15154 = vst [vmem:[#allocation72_spill] sm:$0xff] %v12762_v41  ;;  %v12771_v45 = vand.u32 4294901760, %v12752_v8  ;;  %v12779_v0 = vand.u32 4294901760, %v12762_v41  ;;  %9192 = vmatprep.subr.mxu1 %v4962_v39  ;;  %v12795_v61 = vand.u32 4294901760, %v12774_v43  ;;  %10033 = vrcp.f32 %v4473_v26  ;;  %v4697_v26 = vld [vmem:[%s10294_s18 + $0x20] sm:$0xff] }
 0x43d   : > { %15156 = vst [vmem:[#allocation74_spill] sm:$0xff] %v12767_v21  ;;  %15158 = vst [vmem:[#allocation76_spill] sm:$0xff] %v12774_v43  ;;  %v12785_v34 = vsub.f32 %v4702_v52, %v12767_v21  ;;  %9141 = vmatpush3.msra.mxu0 %v12742_v38  ;;  %v10026_v52 = vpop.eup %10025  ;;  %9193 = vmatpush3.msra.mxu1 %v4962_v39  ;;  %v4982_v27 = vsub.f32 %v12765_v50, %v12782_v18  ;;  %v12813_v39 = vand.u32 4294901760, %v4700_v6 }
 0x43e   : > { %15157 = vst [vmem:[#allocation75_spill] sm:$0xff] %v12771_v45  ;;  %15159 = vst [vmem:[#allocation77_spill] sm:$0xff] %v12779_v0  ;;  %v4968_v14 = vsub.f32 %v12752_v8, %v12771_v45  ;;  %v4975_v63 = vsub.f32 %v12762_v41, %v12779_v0  ;;  %v12808_v45 = vsub.f32 %v4701_v15, %v12788_v37  ;;  %v4438_v8 = vld [vmem:[#allocation5 + $0x28] sm:$0xff]  ;;  %9142 = vmatprep.subr.mxu0 %v12744_v56  ;;  %v4699_v0 = vld [vmem:[%s10294_s18 + $0x30] sm:$0xff] }
 0x43f   : > { %15160 = vst [vmem:[#allocation78_spill] sm:$0xff] %v12782_v18  ;;  %15161 = vst [vmem:[#allocation79_spill] sm:$0xff] %v12785_v34  ;;  %v12805_v40 = vand.u32 4294901760, %v12785_v34  ;;  %v4989_v30 = vsub.f32 %v12774_v43, %v12795_v61  ;;  %9143 = vmatpush3.msra.mxu0 %v12744_v56  ;;  %v4439_v15 = vld [vmem:[#allocation5 + $0x30] sm:$0xff]  ;;  %v4983_v50 = vand.u32 4294901760, %v4982_v27  ;;  %v12823_v47 = vsub.f32 %v4700_v6, %v12813_v39  ;;  %v4474_v27 = vld [vmem:[#allocation6 + $0x48] sm:$0xff] }
 0x440   : > { %15162 = vst [vmem:[#allocation80_spill] sm:$0xff] %v12788_v37  ;;  %15163 = vst [vmem:[#allocation81_spill] sm:$0xff] %v12795_v61  ;;  %6024 = vperm.xlu1 %9952, %v12759_v35   ;;  %v4969_v24 = vand.u32 4294901760, %v4968_v14  ;;  %v4976_v41 = vand.u32 4294901760, %v4975_v63  ;;  %v12817_v18 = vand.u32 4294901760, %v12808_v45  ;;  %9144 = vmatprep.subr.mxu0 %v12746_v9  ;;  %v12826_v61 = vand.u32 4294901760, %v4699_v0 }
 0x441   : > { %15164 = vst [vmem:[#allocation82_spill] sm:$0xff] %v12805_v40  ;;  %15165 = vst [vmem:[#allocation83_spill] sm:$0xff] %v12808_v45  ;;  %v4996_v14 = vsub.f32 %v12785_v34, %v12805_v40  ;;  %v4698_v63 = vld [vmem:[%s10294_s18 + $0x28] sm:$0xff]  ;;  %v12830_v43 = vmul.f32 %v10026_v52, %v4453_v22  ;;  %v4454_v56 = vmul.f32 %v4438_v8, %v12604_v11  ;;  %v10028_v40 = vpop.eup %10027  ;;  %v4990_v6 = vand.u32 4294901760, %v4989_v30 }
 0x442   : > { %15166 = vst [vmem:[#allocation84_spill] sm:$0xff] %v12817_v18  ;;  %9194 = vmatprep.subr.mxu1 %v4969_v24  ;;  %15167 = vst [vmem:[#allocation85_spill] sm:$0xff] %v12823_v47  ;;  %v12833_v38 = vand.u32 4294901760, %v4698_v63  ;;  %v5003_v34 = vsub.f32 %v12808_v45, %v12817_v18  ;;  %v12838_v58 = vand.u32 4294901760, %v12823_v47  ;;  %9145 = vmatpush3.msra.mxu0 %v12746_v9  ;;  %v12850_v30 = vand.u32 4294901760, %v4697_v26  ;;  %v4475_v18 = vld [vmem:[#allocation6 + $0x50] sm:$0xff] }
 0x443   : > { %15168 = vst [vmem:[#allocation86_spill] sm:$0xff] %v12826_v61  ;;  %9195 = vmatpush3.msra.mxu1 %v4969_v24  ;;  %v12842_v22 = vsub.f32 %v4699_v0, %v12826_v61  ;;  %v4455_v8 = vmul.f32 %v4439_v15, %v12628_v42  ;;  %9146 = vmatprep.subr.mxu0 %v12767_v21  ;;  %10035 = vrcp.f32 %v4474_v27  ;;  %v4997_v11 = vand.u32 4294901760, %v4996_v14  ;;  %v4696_v42 = vld [vmem:[%s10294_s18 + $0x18] sm:$0xff] }
 0x444   : > { %6029 = vperm.xlu1 %9952, %v12790_v48   ;;  %9196 = vmatprep.subr.mxu1 %v4976_v41  ;;  %15169 = vst [vmem:[#allocation87_spill] sm:$0xff] %v12838_v58  ;;  %v12848_v24 = vsub.f32 %v4698_v63, %v12833_v38  ;;  %v5010_v52 = vsub.f32 %v12823_v47, %v12838_v58  ;;  %v12868_v27 = vand.u32 4294901760, %v4696_v42  ;;  %v4440_v58 = vld [vmem:[#allocation5 + $0x38] sm:$0xff]  ;;  %v5004_v47 = vand.u32 4294901760, %v5003_v34 }
 0x445   : > { %15170 = vst [vmem:[#allocation88_spill] sm:$0xff] %v12842_v22  ;;  %9197 = vmatpush3.msra.mxu1 %v4976_v41  ;;  %v12855_v0 = vand.u32 4294901760, %v12842_v22  ;;  %9147 = vmatpush3.msra.mxu0 %v12767_v21  ;;  %v10030_v41 = vpop.eup %10029  ;;  %v12860_v15 = vmul.f32 %v10028_v40, %v4454_v56  ;;  %v12866_v14 = vsub.f32 %v4697_v26, %v12850_v30  ;;  %v4695_v56 = vld [vmem:[%s10294_s18 + $0x10] sm:$0xff]  ;;  %10037 = vrcp.f32 %v4475_v18  ;;  %v4476_v9 = vld [vmem:[#allocation6 + $0x58] sm:$0xff] }
 0x446   : > { %15171 = vst [vmem:[#allocation89_spill] sm:$0xff] %v12848_v24  ;;  %9198 = vmatprep.subr.mxu1 %v4983_v50  ;;  %v12863_v63 = vand.u32 4294901760, %v12848_v24  ;;  %9148 = vmatprep.subr.mxu0 %v12788_v37  ;;  %v12879_v40 = vsub.f32 %v4696_v42, %v12868_v27  ;;  %v12881_v26 = vand.u32 4294901760, %v4695_v56  ;;  %v5011_v21 = vand.u32 4294901760, %v5010_v52  ;;  %v4441_v52 = vld [vmem:[#allocation5 + $0x40] sm:$0xff] }
 0x447   : > { %15172 = vst [vmem:[#allocation90_spill] sm:$0xff] %v12855_v0  ;;  %9199 = vmatpush3.msra.mxu1 %v4983_v50  ;;  %15174 = vst [vmem:[#allocation92_spill] sm:$0xff] %v12866_v14  ;;  %v5017_v45 = vsub.f32 %v12842_v22, %v12855_v0  ;;  %9149 = vmatpush3.msra.mxu0 %v12788_v37  ;;  %v12876_v50 = vand.u32 4294901760, %v12866_v14  ;;  %v4694_v0 = vld [vmem:[%s10294_s18 + $0x8] sm:$0xff]  ;;  %v12888_v22 = vmul.f32 %v10030_v41, %v4455_v8  ;;  %v4693_v8 = vld [vmem:[%s10294_s18] sm:$0xff] }
 0x448   : > { %6034 = vperm.xlu1 %9952, %v12830_v43   ;;  %15173 = vst [vmem:[#allocation91_spill] sm:$0xff] %v12863_v63  ;;  %9200 = vmatprep.subr.mxu1 %v4990_v6  ;;  %v5024_v34 = vsub.f32 %v12848_v24, %v12863_v63  ;;  %v4456_v37 = vmul.f32 %v4440_v58, %v12617_v19  ;;  %v12896_v24 = vand.u32 4294901760, %v12879_v40  ;;  %v12898_v33 = vand.u32 4294901760, %v4694_v0 }
 0x449   : > { %9201 = vmatpush3.msra.mxu1 %v4990_v6  ;;  %15175 = vst [vmem:[#allocation93_spill] sm:$0xff] %v12876_v50  ;;  %9150 = vmatprep.subr.mxu0 %v12813_v39  ;;  %v10032_v6 = vpop.eup %10031  ;;  %v12892_v42 = vsub.f32 %v4695_v56, %v12881_v26  ;;  %v5018_v63 = vand.u32 4294901760, %v5017_v45  ;;  %v5031_v58 = vsub.f32 %v12866_v14, %v12876_v50  ;;  %v12904_v19 = vand.u32 4294901760, %v4693_v8  ;;  %v4442_v50 = vld [vmem:[#allocation5 + $0x48] sm:$0xff]  ;;  %v4477_v14 = vld [vmem:[#allocation6 + $0x60] sm:$0xff] }
 0x44a   : > { %9202 = vmatprep.subr.mxu1 %v4997_v11  ;;  %9151 = vmatpush3.msra.mxu0 %v12813_v39  ;;  %v5025_v18 = vand.u32 4294901760, %v5024_v34  ;;  %v4457_v41 = vmul.f32 %v4441_v52, %v12644_v44  ;;  %10039 = vrcp.f32 %v4476_v9  ;;  %v10034_v56 = vpop.eup %10033  ;;  %v5038_v34 = vsub.f32 %v12879_v40, %v12896_v24  ;;  %v4478_v52 = vld [vmem:[#allocation6 + $0x68] sm:$0xff] }
 0x44b   : > { %9203 = vmatpush3.msra.mxu1 %v4997_v11  ;;  %9152 = vmatprep.subr.mxu0 %v12826_v61  ;;  %v12908_v45 = vand.u32 4294901760, %v12892_v42  ;;  %v12911_v11 = vsub.f32 %v4694_v0, %v12898_v33  ;;  %v12921_v0 = vsub.f32 %v4693_v8, %v12904_v19  ;;  %10041 = vrcp.f32 %v4477_v14 }
 0x44c   : > { %6039 = vperm.xlu1 %9952, %v12860_v15   ;;  %9204 = vmatprep.subr.mxu1 %v5004_v47  ;;  %v5039_v8 = vand.u32 4294901760, %v5038_v34  ;;  %10043 = vrcp.f32 %v4478_v52 }
 0x44d   : > { %9205 = vmatpush3.msra.mxu1 %v5004_v47  ;;  %9153 = vmatpush3.msra.mxu0 %v12826_v61  ;;  %v12914_v47 = vmul.f32 %v10032_v6, %v4456_v37  ;;  %v5032_v61 = vand.u32 4294901760, %v5031_v58  ;;  %v12925_v44 = vand.u32 4294901760, %v12911_v11  ;;  %v5045_v9 = vsub.f32 %v12892_v42, %v12908_v45  ;;  %v4443_v6 = vld [vmem:[#allocation5 + $0x50] sm:$0xff] }
 0x44e   : > { %9206 = vmatprep.subr.mxu1 %v5011_v21  ;;  %9154 = vmatprep.subr.mxu0 %v12833_v38  ;;  %v12932_v37 = vmul.f32 %v10034_v56, %v4457_v41  ;;  %v12937_v58 = vand.u32 4294901760, %v12921_v0  ;;  %v4459_v14 = vmul.f32 %v4443_v6, %v12668_v32  ;;  %v4479_v56 = vld [vmem:[#allocation6 + $0x70] sm:$0xff] }
 0x44f   : > { %9207 = vmatpush3.msra.mxu1 %v5011_v21  ;;  %9155 = vmatpush3.msra.mxu0 %v12833_v38  ;;  %v5046_v41 = vand.u32 4294901760, %v5045_v9  ;;  %10045 = vrcp.f32 %v4479_v56  ;;  %v4448_v56 = vld [vmem:[#allocation5 + $0x78] sm:$0xff] }
 0x450   : > { %6044 = vperm.xlu1 %9952, %v12888_v22   ;;  %9208 = vmatprep.subr.mxu1 %v5018_v63  ;;  %v10036_v21 = vpop.eup %10035  ;;  %v5059_v34 = vsub.f32 %v12921_v0, %v12937_v58 }
 0x451   : > { %9209 = vmatpush3.msra.mxu1 %v5018_v63  ;;  %9156 = vmatprep.subr.mxu0 %v12850_v30  ;;  %v4458_v63 = vmul.f32 %v4442_v50, %v12634_v53 }
 0x452   : > { %9210 = vmatprep.subr.mxu1 %v5025_v18  ;;  %9157 = vmatpush3.msra.mxu0 %v12850_v30  ;;  %v10038_v50 = vpop.eup %10037  ;;  %v5060_v6 = vand.u32 4294901760, %v5059_v34 }
 0x453   : > { %9211 = vmatpush3.msra.mxu1 %v5025_v18  ;;  %9158 = vmatprep.subr.mxu0 %v12868_v27  ;;  %v4500_v53 = vmul.f32 %v10036_v21, %v4458_v63  ;;  %v4444_v18 = vld [vmem:[#allocation5 + $0x58] sm:$0xff]  ;;  %v4502_v32 = vmul.f32 %v10038_v50, %v4459_v14  ;;  %v4445_v21 = vld [vmem:[#allocation5 + $0x60] sm:$0xff]  ;;  %v4447_v14 = vld [vmem:[#allocation5 + $0x70] sm:$0xff] }
 0x454   : > { %4609 = vxpose.xlu0.b32.start [1/16] (narrow) %v12710_v4, 8  ;;  %6049 = vperm.xlu1 %9952, %v12914_v47   ;;  %v5052_v4 = vsub.f32 %v12911_v11, %v12925_v44  ;;  %v4480_v63 = vld [vmem:[#allocation6 + $0x78] sm:$0xff]  ;;  %v4463_v50 = vmul.f32 %v4447_v14, %v12708_v23 }
 0x455   : > { %9212 = vmatprep.subr.mxu1 %v5032_v61  ;;  %9159 = vmatpush3.msra.mxu0 %v12868_v27  ;;  %10047 = vrcp.f32 %v4480_v63  ;;  %v4641_v63 = vlaneseq }
 0x456   : > { %9213 = vmatpush3.msra.mxu1 %v5032_v61  ;;  %9160 = vmatprep.subr.mxu0 %v12881_v26  ;;  %v5053_v61 = vand.u32 4294901760, %v5052_v4 }
 0x457   : > { %9214 = vmatprep.subr.mxu1 %v5039_v8  ;;  %9161 = vmatpush3.msra.mxu0 %v12881_v26  ;;  %v10040_v9 = vpop.eup %10039 }
 0x458   : > { %4610 = vxpose.xlu0.b32.cont [2/16] (narrow) %v12732_v54, 8  ;;  %6054 = vperm.xlu1 %9952, %v12932_v37   ;;  %v4460_v54 = vmul.f32 %v4444_v18, %v12657_v17  ;;  %v4461_v17 = vmul.f32 %v4445_v21, %v12684_v10  ;;  %v10042_v52 = vpop.eup %10041 }
 0x459   : > { %9215 = vmatpush3.msra.mxu1 %v5039_v8  ;;  %9162 = vmatprep.subr.mxu0 %v12898_v33  ;;  %v4446_v8 = vld [vmem:[#allocation5 + $0x68] sm:$0xff] }
 0x45a   : > { %9216 = vmatprep.subr.mxu1 %v5046_v41  ;;  %9163 = vmatpush3.msra.mxu0 %v12898_v33  ;;  %v4506_v4 = vmul.f32 %v10042_v52, %v4461_v17 }
 0x45b   : > { %9217 = vmatpush3.msra.mxu1 %v5046_v41  ;;  %9164 = vmatprep.subr.mxu0 %v12904_v19  ;;  %v4462_v41 = vmul.f32 %v4446_v8, %v12677_v49 }
 0x45c   : > { %4611 = vxpose.xlu0.b32.cont [3/16] (narrow) %v12759_v35, 8  ;;  %6059 = vperm.xlu1 %9952, %v4500_v53   ;;  %v4504_v35 = vmul.f32 %v10040_v9, %v4460_v54 }
 0x45d   : > { %9218 = vmatprep.subr.mxu1 %v5053_v61  ;;  %9165 = vmatpush3.msra.mxu0 %v12904_v19 }
 0x45e   : > { %9219 = vmatpush3.msra.mxu1 %v5053_v61  ;;  %9246 = vmatprep.subr.mxu0 %v12701_v25 }
 0x45f   : > { %9220 = vmatprep.subr.mxu1 %v5060_v6 }
 0x460   : > { %4612 = vxpose.xlu0.b32.cont [4/16] (narrow) %v12790_v48, 8  ;;  %6064 = vperm.xlu1 %9952, %v4502_v32   ;;  %v10044_v48 = vpop.eup %10043 }
 0x461   : > { %9221 = vmatpush3.msra.mxu1 %v5060_v6  ;;  %v4508_v10 = vmul.f32 %v10044_v48, %v4462_v41  ;;  %v10046_v18 = vpop.eup %10045 }
 0x462   : > { %9302 = vmatprep.subr.mxu1 %v12693_v59  ;;  %v4510_v34 = vmul.f32 %v10046_v18, %v4463_v50  ;;  %v10048_v61 = vpop.eup %10047 }
 0x464   : > { %4613 = vxpose.xlu0.b32.cont [5/16] (narrow) %v12830_v43, 8  ;;  %6069 = vperm.xlu1 %9952, %v4504_v35   ;;  %v4464_v43 = vmul.f32 %v4448_v56, %v12698_v46 }
 0x466   : > { %v4512_v49 = vmul.f32 %v10048_v61, %v4464_v43 }
 0x468   : > { %4614 = vxpose.xlu0.b32.cont [6/16] (narrow) %v12860_v15, 8  ;;  %6074 = vperm.xlu1 %9952, %v4506_v4  }
 0x46c   : > { %4615 = vxpose.xlu0.b32.cont [7/16] (narrow) %v12888_v22, 8  ;;  %6079 = vperm.xlu1 %9952, %v4508_v10  }
 0x470   : > { %4616 = vxpose.xlu0.b32.cont [8/16] (narrow) %v12914_v47, 8  ;;  %6084 = vperm.xlu1 %9952, %v4510_v34  }
 0x474   : > { %4617 = vxpose.xlu0.b32.cont [9/16] (narrow) %v12932_v37, 8  ;;  %6089 = vperm.xlu1 %9952, %v4512_v49  }
 0x478   : > { %4618 = vxpose.xlu0.b32.cont [10/16] (narrow) %v4500_v53, 8  ;;  %v4642_v53 = vshrl.u32 %v4641_v63, 7 }
 0x47a   : > { %v4643_v17 = vsub.s32 0, %v4642_v53 }
 0x47c   : > { %4619 = vxpose.xlu0.b32.cont [11/16] (narrow) %v4502_v32, 8 }
 0x480   : > { %4620 = vxpose.xlu0.b32.cont [12/16] (narrow) %v4504_v35, 8 }
 0x484   : > { %4621 = vxpose.xlu0.b32.cont [13/16] (narrow) %v4506_v4, 8 }
 0x488   : > { %4622 = vxpose.xlu0.b32.cont [14/16] (narrow) %v4508_v10, 8 }
 0x48a   : > { %v4526_v46 = vpop.permute.xlu1 %4525 }
 0x48b   : > { %v4595_v52 = vmul.f32 %v12346_v51, %v4526_v46 }
 0x48c   : > { %4623 = vxpose.xlu0.b32.cont [15/16] (narrow) %v4510_v34, 8  ;;  %v4516_v23 = vpop.permute.xlu0 %4515 }
 0x48d   : > { %v4593_v48 = vmul.f32 %v12335_v20, %v4516_v23 }
 0x48e   : > { %v4531_v21 = vpop.permute.xlu1 %4530 }
 0x48f   : > { %v4596_v8 = vmul.f32 %v12349_v55, %v4531_v21 }
 0x490   : > { %4624 = vxpose.xlu0.b32.end [16/16] (narrow) %v4512_v49, 8  ;;  %v4521_v22 = vpop.permute.xlu0 %4520  ;;  %v15177_v49 = vld [vmem:[#allocation63_spill] sm:$0xff] }
 0x491   : > { %v4594_v14 = vmul.f32 %v12332_v3, %v4521_v22 }
 0x493   : > { %v4541_v6 = vpop.permute.xlu1 %4540 }
 0x494   : > { %v4598_v4 = vmul.f32 %v12363_v60, %v4541_v6 }
 0x495   : > { %v4536_v15 = vpop.permute.xlu0 %4535 }
 0x496   : > { %v4597_v50 = vmul.f32 %v12360_v36, %v4536_v15  ;;  %v15178_v15 = vld [vmem:[#allocation25_spill] sm:$0xff] }
 0x497   : > { %v4551_v32 = vpop.permute.xlu1 %4550 }
 0x498   : > { %v4600_v18 = vmul.f32 %v12377_v2, %v4551_v32 }
 0x499   : > { %v4546_v54 = vpop.permute.xlu0 %4545 }
 0x49a   : > { %v4599_v56 = vmul.f32 %v12374_v62, %v4546_v54  ;;  %v15176_v62 = vld [vmem:[#allocation51_spill] sm:$0xff] }
 0x49b   : > { %v4561_v34 = vpop.permute.xlu1 %4560 }
 0x49d   : > { %v4556_v9 = vpop.permute.xlu0 %4555 }
 0x49f   : > { %v4571_v32 = vpop.permute.xlu1 %4570 }
 0x4a3   : > { %v12968_v47 = vpop.permute.xlu0 %4565 }
 0x4ab   : > { %v12970_v37 = vpop.permute.xlu0 %4575 }
 0x4b1   : > { %v12972_v35 = vpop.permute.xlu0 %4585 }
 0x4d0   : > { %v4625_v41 = vpop.trf.xlu0 }
 0x4d1   : > { %v12979_v10 = vrot.slane %v4625_v41, %v4643_v17 }
 0x4d3   : > { %v4645_v51 = vadd.f32 %v12979_v10, %v4593_v48  ;;  %v4646_v55 = vadd.f32 %v12979_v10, %v4594_v14  ;;  %v4647_v60 = vadd.f32 %v12979_v10, %v4595_v52  ;;  %v4648_v20 = vadd.f32 %v12979_v10, %v4596_v8 }
 0x4d4   : > { %v4649_v3 = vadd.f32 %v12979_v10, %v4597_v50  ;;  %v4650_v36 = vadd.f32 %v12979_v10, %v4598_v4  ;;  %v4651_v2 = vadd.f32 %v12979_v10, %v4599_v56  ;;  %v4652_v63 = vadd.f32 %v12979_v10, %v4600_v18 }
 0x4d5   : > { %v4661_v43 = vmul.f32 %v4645_v51, %v15176_v62  ;;  %v4662_v61 = vmul.f32 %v4646_v55, %v12124_v57  ;;  %v4663_v23 = vmul.f32 %v4647_v60, %v15177_v49  ;;  %v4664_v22 = vmul.f32 %v4648_v20, %v12137_v7  ;;  %v4581_v55 = vpop.permute.xlu1 %4580  ;;  %v15179_v60 = vld [vmem:[#allocation67_spill] sm:$0xff]  ;;  %v15181_v49 = vld [vmem:[#allocation68_spill] sm:$0xff] }
 0x4d6   : > { %v4665_v54 = vmul.f32 %v4649_v3, %v15178_v15  ;;  %v4666_v46 = vmul.f32 %v4650_v36, %v12169_v16  ;;  %v12998_v21 = vmul.f32 %v4651_v2, %v12132_v13  ;;  %v4601_v16 = vmul.f32 %v12388_v31, %v4556_v9  ;;  %v15180_v36 = vld [vmem:[#allocation37_spill] sm:$0xff] }
 0x4d7   : > { %4677 = vst [vmem:[%s10324_s29] sm:$0xff] %v4661_v43  ;;  %v13002_v6 = vand.u32 4294901760, %v4661_v43  ;;  %4678 = vst [vmem:[%s10324_s29 + $0x8] sm:$0xff] %v4662_v61  ;;  %v13005_v57 = vand.u32 4294901760, %v4662_v61  ;;  %v13008_v53 = vand.u32 4294901760, %v4663_v23  ;;  %v13011_v7 = vand.u32 4294901760, %v4664_v22 }
 0x4d8   : > { %4679 = vst [vmem:[%s10324_s29 + $0x10] sm:$0xff] %v4663_v23  ;;  %4680 = vst [vmem:[%s10324_s29 + $0x18] sm:$0xff] %v4664_v22  ;;  %v13015_v13 = vand.u32 4294901760, %v4665_v54  ;;  %v4602_v31 = vmul.f32 %v12391_v5, %v4561_v34  ;;  %v13036_v4 = vmul.f32 %v4652_v63, %v12215_v29  ;;  %v4653_v41 = vadd.f32 %v12979_v10, %v4601_v16 }
 0x4d9   : > { %4681 = vst [vmem:[%s10324_s29 + $0x20] sm:$0xff] %v4665_v54  ;;  %4682 = vst [vmem:[%s10324_s29 + $0x28] sm:$0xff] %v4666_v46  ;;  %9222 = vmatprep.mubr.f32.mxu1 %v13002_v6  ;;  %v13022_v17 = vsub.f32 %v4661_v43, %v13002_v6  ;;  %v13025_v52 = vsub.f32 %v4662_v61, %v13005_v57  ;;  %v13028_v8 = vsub.f32 %v4663_v23, %v13008_v53 }
 0x4da   : > { %4683 = vst [vmem:[%s10324_s29 + $0x30] sm:$0xff] %v12998_v21  ;;  %9223 = vmatmul.mubr.f32.vlgmr.msra.gmra.mxu1 %v13005_v57  ;;  %v13033_v9 = vsub.f32 %v4664_v22, %v13011_v7  ;;  %v13045_v50 = vsub.f32 %v4665_v54, %v13015_v13  ;;  %v13048_v29 = vand.u32 4294901760, %v4666_v46  ;;  %4684 = vst [vmem:[%s10324_s29 + $0x38] sm:$0xff] %v13036_v4  ;;  %v15182_v22 = vld [vmem:[#allocation33_spill] sm:$0xff]  ;;  %v15183_v54 = vld [vmem:[#allocation54_spill] sm:$0xff] }
 0x4db   : > { %9225 = vmatprep.mubr.f32.mxu1 %v13008_v53  ;;  %9303 = vmatpush3.msra.mxu1 %v12693_v59  ;;  %v14751_v48 = vand.u32 4294901760, %v13022_v17  ;;  %v14748_v14 = vand.u32 4294901760, %v13025_v52  ;;  %v14745_v5 = vand.u32 4294901760, %v13028_v8  ;;  %v13053_v18 = vmul.f32 %v4653_v41, %v12181_v12 }
 0x4dc   : > { %9304 = vmatprep.subr.mxu1 %v12703_v28  ;;  %v4604_v56 = vmul.f32 %v12412_v1, %v4571_v32  ;;  %v13069_v1 = vand.u32 4294901760, %v12998_v21  ;;  %v14744_v20 = vand.u32 4294901760, %v13033_v9  ;;  %v4654_v3 = vadd.f32 %v12979_v10, %v4602_v31 }
 0x4dd   : > { %9305 = vmatpush3.msra.mxu1 %v12703_v28  ;;  %v4793_v34 = vsub.f32 %v13022_v17, %v14751_v48  ;;  %v4803_v51 = vsub.f32 %v13025_v52, %v14748_v14  ;;  %v4813_v12 = vsub.f32 %v13028_v8, %v14745_v5  ;;  %4685 = vst [vmem:[%s10324_s29 + $0x40] sm:$0xff] %v13053_v18  ;;  %v14743_v61 = vand.u32 4294901760, %v13045_v50  ;;  %v15200_v5 = vld [vmem:[#allocation73_spill] sm:$0xff] }
 0x4de   : > { %9226 = vmatmul.mubr.f32.gmra.mxu1 %v13011_v7  ;;  %9306 = vmatprep.subr.mxu1 %v15179_v60  ;;  %v4603_v2 = vmul.f32 %v15180_v36, %v12968_v47  ;;  %v13082_v23 = vsub.f32 %v4666_v46, %v13048_v29  ;;  %v13085_v15 = vmul.f32 %v4654_v3, %v15182_v22  ;;  %v15184_v47 = vld [vmem:[#allocation52_spill] sm:$0xff]  ;;  %v13092_v32 = vand.u32 4294901760, %v13036_v4 }
 0x4df   : > { %9228 = vmatprep.mubr.f32.mxu1 %v13015_v13  ;;  %9307 = vmatpush3.msra.mxu1 %v15179_v60  ;;  %v4794_v62 = vand.u32 4294901760, %v4793_v34  ;;  %v4804_v43 = vand.u32 4294901760, %v4803_v51  ;;  %v4606_v63 = vmul.f32 %v15183_v54, %v4581_v55  ;;  %v4605_v16 = vmul.f32 %v15184_v47, %v12970_v37  ;;  %v15185_v51 = vld [vmem:[#allocation69_spill] sm:$0xff]  ;;  %v15190_v47 = vld [vmem:[#allocation32_spill] sm:$0xff] }
 0x4e0   : > { %9308 = vmatprep.subr.mxu1 %v15181_v49  ;;  %v4655_v31 = vadd.f32 %v12979_v10, %v4603_v2  ;;  %v4814_v46 = vand.u32 4294901760, %v4813_v12  ;;  %v4823_v41 = vsub.f32 %v13033_v9, %v14744_v20  ;;  %4686 = vst [vmem:[%s10324_s29 + $0x48] sm:$0xff] %v13085_v15  ;;  %v13103_v37 = vsub.f32 %v12998_v21, %v13069_v1  ;;  %v15186_v12 = vld [vmem:[#allocation29_spill] sm:$0xff]  ;;  %v4591_v2 = vpop.permute.xlu1 %4590 }
 0x4e1   : > { %9166 = vmatprep.mubr.f32.mxu0 %v4794_v62  ;;  %9309 = vmatpush3.msra.mxu1 %v15181_v49  ;;  %v4656_v34 = vadd.f32 %v12979_v10, %v4604_v56  ;;  %v4833_v55 = vsub.f32 %v13045_v50, %v14743_v61  ;;  %v4657_v36 = vadd.f32 %v12979_v10, %v4605_v16  ;;  %v13115_v21 = vand.u32 4294901760, %v13053_v18  ;;  %v15187_v56 = vld [vmem:[#allocation31_spill] sm:$0xff]  ;;  %v15189_v54 = vld [vmem:[#allocation65_spill] sm:$0xff] }
 0x4e2   : > { %9167 = vmatmul.mubr.f32.vlgmr.msra.gmra.mxu0 %v4804_v43  ;;  %9229 = vmatmul.mubr.f32.gmra.mxu1 %v13048_v29  ;;  %v4671_v3 = vmul.f32 %v4655_v31, %v15186_v12  ;;  %v15188_v43 = vld [vmem:[#allocation56_spill] sm:$0xff]  ;;  %v15191_v31 = vld [vmem:[#allocation70_spill] sm:$0xff]  ;;  %v14742_v12 = vand.u32 4294901760, %v13103_v37 }
 0x4e3   : > { %9247 = vmatpush3.msra.mxu0 %v12701_v25  ;;  %9310 = vmatprep.subr.mxu1 %v15185_v51  ;;  %v14741_v25 = vand.u32 4294901760, %v13082_v23  ;;  %v13119_v62 = vmul.f32 %v4656_v34, %v15187_v56  ;;  %v4608_v22 = vmul.f32 %v15188_v43, %v4591_v2  ;;  %v13126_v16 = vmul.f32 %v4657_v36, %v15190_v47  ;;  %v15192_v56 = vld [vmem:[#allocation50_spill] sm:$0xff]  ;;  %v15193_v36 = vld [vmem:[#allocation71_spill] sm:$0xff] }
 0x4e4   : > { %9169 = vmatprep.mubr.f32.mxu0 %v4814_v46  ;;  %9231 = vmatprep.mubr.f32.mxu1 %v13069_v1  ;;  %4687 = vst [vmem:[%s10324_s29 + $0x50] sm:$0xff] %v4671_v3  ;;  %v4824_v46 = vand.u32 4294901760, %v4823_v41  ;;  %v13133_v34 = vsub.f32 %v13036_v4, %v13092_v32  ;;  %v4658_v2 = vadd.f32 %v12979_v10, %v4606_v63  ;;  %v13149_v63 = vand.u32 4294901760, %v13085_v15  ;;  %v15194_v41 = vld [vmem:[#allocation34_spill] sm:$0xff] }
 0x4e5   : > { %9248 = vmatprep.subr.mxu0 %v15189_v54  ;;  %9311 = vmatpush3.msra.mxu1 %v15185_v51  ;;  %4688 = vst [vmem:[%s10324_s29 + $0x58] sm:$0xff] %v13119_v62  ;;  %v4607_v43 = vmul.f32 %v15192_v56, %v12972_v35  ;;  %4689 = vst [vmem:[%s10324_s29 + $0x60] sm:$0xff] %v13126_v16  ;;  %v4843_v4 = vsub.f32 %v13082_v23, %v14741_v25  ;;  %v13166_v25 = vand.u32 4294901760, %v4671_v3 }
 0x4e6   : > { %9249 = vmatpush3.msra.mxu0 %v15189_v54  ;;  %9312 = vmatprep.subr.mxu1 %v15191_v31  ;;  %v4834_v54 = vand.u32 4294901760, %v4833_v55  ;;  %v13153_v35 = vsub.f32 %v13053_v18, %v13115_v21  ;;  %v13156_v47 = vmul.f32 %v4658_v2, %v15194_v41  ;;  %v15195_v55 = vld [vmem:[#allocation74_spill] sm:$0xff]  ;;  %v4660_v56 = vadd.f32 %v12979_v10, %v4608_v22  ;;  %v15199_v41 = vld [vmem:[#allocation80_spill] sm:$0xff] }
 0x4e7   : > { %9250 = vmatprep.subr.mxu0 %v15193_v36  ;;  %9313 = vmatpush3.msra.mxu1 %v15191_v31  ;;  %v4853_v18 = vsub.f32 %v13103_v37, %v14742_v12  ;;  %v14747_v2 = vand.u32 4294901760, %v13133_v34  ;;  %v4844_v12 = vand.u32 4294901760, %v4843_v4  ;;  %v13182_v20 = vsub.f32 %v13085_v15, %v13149_v63 }
 0x4e8   : > { %9170 = vmatmul.mubr.f32.gmra.mxu0 %v4824_v46  ;;  %9232 = vmatmul.mubr.f32.gmra.mxu1 %v13092_v32  ;;  %v4659_v46 = vadd.f32 %v12979_v10, %v4607_v43  ;;  %4690 = vst [vmem:[%s10324_s29 + $0x68] sm:$0xff] %v13156_v47  ;;  %v15197_v10 = vld [vmem:[#allocation62_spill] sm:$0xff]  ;;  %v15198_v43 = vld [vmem:[#allocation20_spill] sm:$0xff]  ;;  %v14746_v61 = vand.u32 4294901760, %v13153_v35  ;;  %v13197_v15 = vsub.f32 %v4671_v3, %v13166_v25 }
 0x4e9   : > { %9251 = vmatpush3.msra.mxu0 %v15193_v36  ;;  %9314 = vmatprep.subr.mxu1 %v15195_v55  ;;  %v15196_v36 = vld [vmem:[#allocation72_spill] sm:$0xff]  ;;  %v4863_v4 = vsub.f32 %v13133_v34, %v14747_v2 }
 0x4ea   : > { %9172 = vmatprep.mubr.f32.mxu0 %v4834_v54  ;;  %9234 = vmatprep.mubr.f32.mxu1 %v13115_v21  ;;  %v4675_v22 = vmul.f32 %v4659_v46, %v15197_v10  ;;  %v13175_v54 = vmul.f32 %v4660_v56, %v15198_v43  ;;  %v4854_v46 = vand.u32 4294901760, %v4853_v18  ;;  %v13194_v56 = vand.u32 4294901760, %v13119_v62  ;;  %v15201_v10 = vld [vmem:[#allocation76_spill] sm:$0xff] }
 0x4eb   : > { %9252 = vmatprep.subr.mxu0 %v15196_v36  ;;  %9315 = vmatpush3.msra.mxu1 %v15195_v55  ;;  %v13206_v18 = vand.u32 4294901760, %v13126_v16  ;;  %v4864_v3 = vand.u32 4294901760, %v4863_v4  ;;  %v14750_v43 = vand.u32 4294901760, %v13197_v15  ;;  %v13225_v4 = vand.u32 4294901760, %v13156_v47 }
 0x4ec   : > { %9253 = vmatpush3.msra.mxu0 %v15196_v36  ;;  %9316 = vmatprep.subr.mxu1 %v15199_v41  ;;  %4691 = vst [vmem:[%s10324_s29 + $0x70] sm:$0xff] %v4675_v22  ;;  %4692 = vst [vmem:[%s10324_s29 + $0x78] sm:$0xff] %v13175_v54  ;;  %v14749_v36 = vand.u32 4294901760, %v13182_v20 }
 0x4ed   : > { %9254 = vmatprep.subr.mxu0 %v15200_v5  ;;  %9317 = vmatpush3.msra.mxu1 %v15199_v41  ;;  %v13229_v14 = vsub.f32 %v13126_v16, %v13206_v18 }
 0x4ee   : > { %9173 = vmatmul.mubr.f32.gmra.mxu0 %v4844_v12  ;;  %9235 = vmatmul.mubr.f32.gmra.mxu1 %v13149_v63  ;;  %v4873_v12 = vsub.f32 %v13153_v35, %v14746_v61  ;;  %v15203_v61 = vld [vmem:[#allocation79_spill] sm:$0xff] }
 0x4ef   : > { %9255 = vmatpush3.msra.mxu0 %v15200_v5  ;;  %9318 = vmatprep.subr.mxu1 %v12813_v39  ;;  %v15202_v5 = vld [vmem:[#allocation86_spill] sm:$0xff] }
 0x4f0   : > { %9175 = vmatprep.mubr.f32.mxu0 %v4854_v46  ;;  %9237 = vmatprep.mubr.f32.mxu1 %v13166_v25  ;;  %v13216_v46 = vsub.f32 %v13119_v62, %v13194_v56  ;;  %v4874_v2 = vand.u32 4294901760, %v4873_v12  ;;  %v4893_v62 = vsub.f32 %v13197_v15, %v14750_v43  ;;  %v13237_v12 = vand.u32 4294901760, %v4675_v22  ;;  %v15206_v43 = vld [vmem:[#allocation85_spill] sm:$0xff] }
 0x4f1   : > { %9256 = vmatprep.subr.mxu0 %v15201_v10  ;;  %9319 = vmatpush3.msra.mxu1 %v12813_v39 }
 0x4f2   : > { %9257 = vmatpush3.msra.mxu0 %v15201_v10  ;;  %9320 = vmatprep.subr.mxu1 %v15202_v5  ;;  %v4883_v10 = vsub.f32 %v13182_v20, %v14749_v36  ;;  %15204 = vst [vmem:[#allocation67_spill] sm:$0xff] %v13237_v12  ;;  %v15205_v36 = vld [vmem:[#allocation83_spill] sm:$0xff]  ;;  %v4894_v48 = vand.u32 4294901760, %v4893_v62  ;;  %v13259_v16 = vsub.f32 %v4675_v22, %v13237_v12 }
 0x4f3   : > { %9258 = vmatprep.subr.mxu0 %v15203_v61  ;;  %9321 = vmatpush3.msra.mxu1 %v15202_v5 }
 0x4f4   : > { %9176 = vmatmul.mubr.f32.gmra.mxu0 %v4864_v3  ;;  %9238 = vmatmul.mubr.f32.gmra.mxu1 %v13194_v56  ;;  %v14752_v3 = vand.u32 4294901760, %v13216_v46 }
 0x4f5   : > { %9259 = vmatpush3.msra.mxu0 %v15203_v61  ;;  %9322 = vmatprep.subr.mxu1 %v12833_v38  ;;  %v4884_v61 = vand.u32 4294901760, %v4883_v10  ;;  %v13256_v10 = vand.u32 4294901760, %v13175_v54 }
 0x4f6   : > { %9178 = vmatprep.mubr.f32.mxu0 %v4874_v2  ;;  %9240 = vmatprep.mubr.f32.mxu1 %v13206_v18  ;;  %v13247_v2 = vsub.f32 %v13156_v47, %v13225_v4  ;;  %v15207_v47 = vand.u32 4294901760, %v13229_v14 }
 0x4f7   : > { %9260 = vmatprep.subr.mxu0 %v15205_v36  ;;  %9323 = vmatpush3.msra.mxu1 %v12833_v38 }
 0x4f8   : > { %9261 = vmatpush3.msra.mxu0 %v15205_v36  ;;  %9324 = vmatprep.subr.mxu1 %v12850_v30  ;;  %v4903_v36 = vsub.f32 %v13216_v46, %v14752_v3  ;;  %v4913_v62 = vsub.f32 %v13229_v14, %v15207_v47  ;;  %v15208_v3 = vld [vmem:[#allocation88_spill] sm:$0xff] }
 0x4f9   : > { %9262 = vmatprep.subr.mxu0 %v15206_v43  ;;  %9325 = vmatpush3.msra.mxu1 %v12850_v30 }
 0x4fa   : > { %9179 = vmatmul.mubr.f32.gmra.mxu0 %v4884_v61  ;;  %9241 = vmatmul.mubr.f32.gmra.mxu1 %v13225_v4  ;;  %v14756_v61 = vand.u32 4294901760, %v13247_v2  ;;  %v4904_v22 = vand.u32 4294901760, %v4903_v36  ;;  %v4914_v47 = vand.u32 4294901760, %v4913_v62  ;;  %v15210_v36 = vld [vmem:[#allocation92_spill] sm:$0xff]  ;;  %v15211_v62 = vand.u32 4294901760, %v13022_v17 }
 0x4fb   : > { %9263 = vmatpush3.msra.mxu0 %v15206_v43  ;;  %9326 = vmatprep.subr.mxu1 %v12868_v27  ;;  %v14755_v43 = vand.u32 4294901760, %v13259_v16 }
 0x4fc   : > { %9181 = vmatprep.mubr.f32.mxu0 %v4894_v48  ;;  %9243 = vmatprep.mubr.f32.mxu1 %v13237_v12  ;;  %v13275_v48 = vsub.f32 %v13175_v54, %v13256_v10  ;;  %v15209_v12 = vld [vmem:[#allocation89_spill] sm:$0xff] }
 0x4fd   : > { %9264 = vmatprep.subr.mxu0 %v15208_v3  ;;  %9327 = vmatpush3.msra.mxu1 %v12868_v27  ;;  %v4933_v54 = vsub.f32 %v13259_v16, %v14755_v43 }
 0x4fe   : > { %9265 = vmatpush3.msra.mxu0 %v15208_v3  ;;  %9328 = vmatprep.subr.mxu1 %v12881_v26  ;;  %v4923_v3 = vsub.f32 %v13247_v2, %v14756_v61 }
 0x4ff   : > { %9266 = vmatprep.subr.mxu0 %v15209_v12  ;;  %9329 = vmatpush3.msra.mxu1 %v12881_v26  ;;  %v4934_v43 = vand.u32 4294901760, %v4933_v54  ;;  %v6003_v54 = vld [vmem:[%s14496_s6 + $0x40] sm:$0xff] }
 0x500   : > { %9182 = vmatmul.mubr.f32.gmra.mxu0 %v4904_v22  ;;  %9244 = vmatmul.mubr.f32.gmra.mxu1 %v13256_v10  ;;  %v4942_v22 = vand.u32 4294901760, %v13275_v48 }
 0x501   : > { %9267 = vmatpush3.msra.mxu0 %v15209_v12  ;;  %9330 = vmatprep.subr.mxu1 %v12898_v33  ;;  %v4924_v12 = vand.u32 4294901760, %v4923_v3  ;;  %v15213_v3 = vand.u32 4294901760, %v13028_v8 }
 0x502   : > { %9184 = vmatprep.mubr.f32.mxu0 %v4914_v47  ;;  %9268 = vmatprep.subr.mxu0 %v15210_v36  ;;  %v15212_v47 = vand.u32 4294901760, %v13025_v52  ;;  %v4943_v61 = vsub.f32 %v13275_v48, %v4942_v22 }
 0x503   : > { %9331 = vmatpush3.msra.mxu1 %v12898_v33  ;;  %9334 = vmatprep.mubr.f32.mxu1 %v15211_v62 }
 0x504   : > { %9269 = vmatpush3.msra.mxu0 %v15210_v36  ;;  %9332 = vmatprep.subr.mxu1 %v12904_v19  ;;  %v4944_v36 = vand.u32 4294901760, %v4943_v61 }
 0x505   : > { %9270 = vmatprep.subr.mxu0 %v12879_v40  ;;  %9333 = vmatpush3.msra.mxu1 %v12904_v19 }
 0x506   : > { %9185 = vmatmul.mubr.f32.gmra.mxu0 %v4924_v12  ;;  %9335 = vmatmul.mubr.f32.vlgmr.msra.gmra.mxu1 %v15212_v47  ;;  %v13545_v47 = vand.u32 4294901760, %v6003_v54 }
 0x507   : > { %9271 = vmatpush3.msra.mxu0 %v12879_v40  ;;  %9414 = vmatprep.subr.mxu1 %v12693_v59  ;;  %v15214_v40 = vand.u32 4294901760, %v13033_v9 }
 0x508   : > { %9187 = vmatprep.mubr.f32.mxu0 %v4934_v43  ;;  %9272 = vmatprep.subr.mxu0 %v12892_v42  ;;  %15255 = vst [vmem:[#allocation92_spill] sm:$0xff] %v13545_v47 }
 0x509   : > { %9337 = vmatprep.mubr.f32.mxu1 %v15213_v3  ;;  %9415 = vmatpush3.msra.mxu1 %v12693_v59  ;;  %v15215_v59 = vand.u32 4294901760, %v13045_v50 }
 0x50a   : > { %9273 = vmatpush3.msra.mxu0 %v12892_v42  ;;  %9416 = vmatprep.subr.mxu1 %v12703_v28  ;;  %v15217_v42 = vand.u32 4294901760, %v13082_v23 }
 0x50b   : > { %9274 = vmatprep.subr.mxu0 %v12911_v11  ;;  %9417 = vmatpush3.msra.mxu1 %v12703_v28  ;;  %v15216_v28 = vld [vmem:[#allocation64_spill] sm:$0xff] }
 0x50c   : > { %9188 = vmatmul.mubr.f32.gmra.mxu0 %v4944_v36  ;;  %9338 = vmatmul.mubr.f32.gmra.mxu1 %v15214_v40  ;;  %v6002_v36 = vld [vmem:[%s14496_s6 + $0x38] sm:$0xff] }
 0x50d   : > { %9275 = vmatpush3.msra.mxu0 %v12911_v11  ;;  %9418 = vmatprep.subr.mxu1 %v15179_v60  ;;  %v15218_v11 = vand.u32 4294901760, %v13103_v37 }
 0x50e   : > { %9276 = vmatprep.subr.mxu0 %v12921_v0  ;;  %9278 = vmatprep.mubr.f32.mxu0 %v13022_v17  ;;  %v15220_v17 = vld [vmem:[#allocation75_spill] sm:$0xff] }
 0x50f   : > { %9340 = vmatprep.mubr.f32.mxu1 %v15215_v59  ;;  %9419 = vmatpush3.msra.mxu1 %v15179_v60  ;;  %v15223_v60 = vld [vmem:[#allocation77_spill] sm:$0xff] }
 0x510   : > { %9277 = vmatpush3.msra.mxu0 %v12921_v0  ;;  %9420 = vmatprep.subr.mxu1 %v15181_v49  ;;  %v15219_v0 = vld [vmem:[#allocation66_spill] sm:$0xff] }
 0x511   : > { %9358 = vmatprep.subr.mxu0 %v15216_v28  ;;  %9421 = vmatpush3.msra.mxu1 %v15181_v49  ;;  %v15225_v49 = vand.u32 4294901760, %v13182_v20 }
 0x512   : > { %9279 = vmatmul.mubr.f32.vlgmr.msra.gmra.mxu0 %v13025_v52  ;;  %9341 = vmatmul.mubr.f32.gmra.mxu1 %v15217_v42  ;;  %v15221_v52 = vand.u32 4294901760, %v13133_v34  ;;  %v13562_v42 = vand.u32 4294901760, %v6002_v36 }
 0x513   : > { %9359 = vmatpush3.msra.mxu0 %v15216_v28  ;;  %9422 = vmatprep.subr.mxu1 %v15185_v51  ;;  %v13560_v28 = vsub.f32 %v6003_v54, %v13545_v47 }
 0x514   : > { %9281 = vmatprep.mubr.f32.mxu0 %v13028_v8  ;;  %9343 = vmatprep.mubr.f32.mxu1 %v15218_v11  ;;  %v15222_v8 = vand.u32 4294901760, %v13153_v35  ;;  %15258 = vst [vmem:[#allocation75_spill] sm:$0xff] %v13562_v42 }
 0x515   : > { %9360 = vmatprep.subr.mxu0 %v15219_v0  ;;  %9423 = vmatpush3.msra.mxu1 %v15185_v51  ;;  %v15227_v51 = vld [vmem:[#allocation81_spill] sm:$0xff]  ;;  %15257 = vst [vmem:[#allocation66_spill] sm:$0xff] %v13560_v28 }
 0x516   : > { %9361 = vmatpush3.msra.mxu0 %v15219_v0  ;;  %9424 = vmatprep.subr.mxu1 %v15191_v31  ;;  %v6001_v0 = vld [vmem:[%s14496_s6 + $0x30] sm:$0xff] }
 0x517   : > { %9362 = vmatprep.subr.mxu0 %v15220_v17  ;;  %9425 = vmatpush3.msra.mxu1 %v15191_v31  ;;  %v15229_v31 = vand.u32 4294901760, %v13216_v46 }
 0x518   : > { %9282 = vmatmul.mubr.f32.gmra.mxu0 %v13033_v9  ;;  %9344 = vmatmul.mubr.f32.gmra.mxu1 %v15221_v52  ;;  %v15224_v9 = vld [vmem:[#allocation78_spill] sm:$0xff] }
 0x519   : > { %9363 = vmatpush3.msra.mxu0 %v15220_v17  ;;  %9426 = vmatprep.subr.mxu1 %v15195_v55 }
 0x51a   : > { %9284 = vmatprep.mubr.f32.mxu0 %v13045_v50  ;;  %9346 = vmatprep.mubr.f32.mxu1 %v15222_v8  ;;  %v15226_v50 = vand.u32 4294901760, %v13197_v15  ;;  %v13572_v8 = vand.u32 4294901760, %v13560_v28 }
 0x51b   : > { %9364 = vmatprep.subr.mxu0 %v15223_v60  ;;  %9427 = vmatpush3.msra.mxu1 %v15195_v55  ;;  %v15233_v55 = vand.u32 4294901760, %v13247_v2 }
 0x51c   : > { %9365 = vmatpush3.msra.mxu0 %v15223_v60  ;;  %9428 = vmatprep.subr.mxu1 %v15199_v41  ;;  %15259 = vst [vmem:[#allocation77_spill] sm:$0xff] %v13572_v8  ;;  %v13575_v60 = vsub.f32 %v6002_v36, %v13562_v42 }
 0x51d   : > { %9366 = vmatprep.subr.mxu0 %v15224_v9  ;;  %9429 = vmatpush3.msra.mxu1 %v15199_v41 }
 0x51e   : > { %9285 = vmatmul.mubr.f32.gmra.mxu0 %v13082_v23  ;;  %9347 = vmatmul.mubr.f32.gmra.mxu1 %v15225_v49  ;;  %v15228_v23 = vld [vmem:[#allocation82_spill] sm:$0xff]  ;;  %15260 = vst [vmem:[#allocation78_spill] sm:$0xff] %v13575_v60  ;;  %v6000_v49 = vld [vmem:[%s14496_s6 + $0x28] sm:$0xff] }
 0x51f   : > { %9367 = vmatpush3.msra.mxu0 %v15224_v9  ;;  %9430 = vmatprep.subr.mxu1 %v12813_v39  ;;  %v13578_v9 = vand.u32 4294901760, %v6001_v0 }
 0x520   : > { %9287 = vmatprep.mubr.f32.mxu0 %v13103_v37  ;;  %9349 = vmatprep.mubr.f32.mxu1 %v15226_v50  ;;  %v15231_v37 = vld [vmem:[#allocation84_spill] sm:$0xff] }
 0x521   : > { %9368 = vmatprep.subr.mxu0 %v15227_v51  ;;  %9431 = vmatpush3.msra.mxu1 %v12813_v39  ;;  %v15230_v39 = vand.u32 4294901760, %v13229_v14  ;;  %15261 = vst [vmem:[#allocation81_spill] sm:$0xff] %v13578_v9 }
 0x522   : > { %9369 = vmatpush3.msra.mxu0 %v15227_v51  ;;  %9432 = vmatprep.subr.mxu1 %v15202_v5  ;;  %v6408_v51 = vsub.f32 %v13560_v28, %v13572_v8 }
 0x523   : > { %9370 = vmatprep.subr.mxu0 %v15228_v23  ;;  %9433 = vmatpush3.msra.mxu1 %v15202_v5 }
 0x524   : > { %9288 = vmatmul.mubr.f32.gmra.mxu0 %v13133_v34  ;;  %9350 = vmatmul.mubr.f32.gmra.mxu1 %v15229_v31  ;;  %v15232_v34 = vld [vmem:[#allocation87_spill] sm:$0xff]  ;;  %v13589_v31 = vand.u32 4294901760, %v6000_v49 }
 0x525   : > { %9371 = vmatpush3.msra.mxu0 %v15228_v23  ;;  %9434 = vmatprep.subr.mxu1 %v12833_v38  ;;  %v13587_v23 = vand.u32 4294901760, %v13575_v60 }
 0x526   : > { %9290 = vmatprep.mubr.f32.mxu0 %v13153_v35  ;;  %9352 = vmatprep.mubr.f32.mxu1 %v15230_v39  ;;  %v15235_v35 = vld [vmem:[#allocation90_spill] sm:$0xff]  ;;  %15263 = vst [vmem:[#allocation84_spill] sm:$0xff] %v13589_v31  ;;  %v13593_v39 = vsub.f32 %v6001_v0, %v13578_v9 }
 0x527   : > { %9372 = vmatprep.subr.mxu0 %v15231_v37  ;;  %9435 = vmatpush3.msra.mxu1 %v12833_v38  ;;  %v15234_v38 = vand.u32 4294901760, %v13259_v16  ;;  %15262 = vst [vmem:[#allocation82_spill] sm:$0xff] %v13587_v23 }
 0x528   : > { %9373 = vmatpush3.msra.mxu0 %v15231_v37  ;;  %9436 = vmatprep.subr.mxu1 %v12850_v30  ;;  %15264 = vst [vmem:[#allocation87_spill] sm:$0xff] %v13593_v39  ;;  %v5999_v37 = vld [vmem:[%s14496_s6 + $0x20] sm:$0xff] }
 0x529   : > { %9374 = vmatprep.subr.mxu0 %v15232_v34  ;;  %9437 = vmatpush3.msra.mxu1 %v12850_v30  ;;  %v15236_v30 = vld [vmem:[#allocation91_spill] sm:$0xff] }
 0x52a   : > { %9291 = vmatmul.mubr.f32.gmra.mxu0 %v13182_v20  ;;  %9353 = vmatmul.mubr.f32.gmra.mxu1 %v15233_v55  ;;  %v6006_v20 = vld [vmem:[%s14496_s6 + $0x58] sm:$0xff]  ;;  %v6415_v55 = vsub.f32 %v13575_v60, %v13587_v23 }
 0x52b   : > { %9375 = vmatpush3.msra.mxu0 %v15232_v34  ;;  %9438 = vmatprep.subr.mxu1 %v12868_v27  ;;  %v13504_v41 = vand.u32 4294901760, %v6006_v20  ;;  %v6409_v34 = vand.u32 4294901760, %v6408_v51 }
 0x52c   : > { %9293 = vmatprep.mubr.f32.mxu0 %v13197_v15  ;;  %9355 = vmatprep.mubr.f32.mxu1 %v15234_v38  ;;  %v13602_v38 = vsub.f32 %v6000_v49, %v13589_v31 }
 0x52d   : > { %9376 = vmatprep.subr.mxu0 %v15235_v35  ;;  %9439 = vmatpush3.msra.mxu1 %v12868_v27  ;;  %v15237_v27 = vld [vmem:[#allocation93_spill] sm:$0xff]  ;;  %15246 = vst [vmem:[#allocation80_spill] sm:$0xff] %v13504_v41 }
 0x52e   : > { %9377 = vmatpush3.msra.mxu0 %v15235_v35  ;;  %9440 = vmatprep.subr.mxu1 %v12881_v26  ;;  %15265 = vst [vmem:[#allocation90_spill] sm:$0xff] %v13602_v38  ;;  %v13604_v35 = vand.u32 4294901760, %v5999_v37 }
 0x52f   : > { %9378 = vmatprep.subr.mxu0 %v15236_v30  ;;  %9441 = vmatpush3.msra.mxu1 %v12881_v26 }
 0x530   : > { %9294 = vmatmul.mubr.f32.gmra.mxu0 %v13216_v46  ;;  %9356 = vmatmul.mubr.f32.gmra.mxu1 %v4942_v22  ;;  %15266 = vst [vmem:[#allocation91_spill] sm:$0xff] %v13604_v35 }
 0x531   : > { %9379 = vmatpush3.msra.mxu0 %v15236_v30  ;;  %9442 = vmatprep.subr.mxu1 %v12898_v33  ;;  %v13608_v30 = vand.u32 4294901760, %v13593_v39 }
 0x532   : > { %9296 = vmatprep.mubr.f32.mxu0 %v13229_v14  ;;  %9380 = vmatprep.subr.mxu0 %v15237_v27 }
 0x533   : > { %9443 = vmatpush3.msra.mxu1 %v12898_v33  ;;  %9446 = vmatprep.mubr.f32.mxu1 %v13002_v6  ;;  %v15238_v33 = vld [vmem:[#allocation67_spill] sm:$0xff]  ;;  %15267 = vst [vmem:[#allocation93_spill] sm:$0xff] %v13608_v30 }
 0x534   : > { %9381 = vmatpush3.msra.mxu0 %v15237_v27  ;;  %9444 = vmatprep.subr.mxu1 %v12904_v19  ;;  %v5998_v27 = vld [vmem:[%s14496_s6 + $0x18] sm:$0xff] }
 0x535   : > { %9382 = vmatprep.subr.mxu0 %v12896_v24  ;;  %9445 = vmatpush3.msra.mxu1 %v12904_v19  ;;  %v6009_v19 = vld [vmem:[%s14496_s6 + $0x70] sm:$0xff] }
 0x536   : > { %9297 = vmatmul.mubr.f32.gmra.mxu0 %v13247_v2  ;;  %9447 = vmatmul.mubr.f32.vlgmr.msra.gmra.mxu1 %v13005_v57 }
 0x537   : > { %9383 = vmatpush3.msra.mxu0 %v12896_v24  ;;  %9299 = vmatprep.mubr.f32.mxu0 %v13259_v16  ;;  %v6010_v24 = vld [vmem:[%s14496_s6 + $0x78] sm:$0xff]  ;;  %v6004_v16 = vld [vmem:[%s14496_s6 + $0x48] sm:$0xff] }
 0x538   : > { %9384 = vmatprep.subr.mxu0 %v12908_v45  ;;  %9449 = vmatprep.mubr.f32.mxu1 %v13008_v53  ;;  %v13452_v26 = vand.u32 4294901760, %v6010_v24  ;;  %v13529_v43 = vand.u32 4294901760, %v6004_v16 }
 0x539   : > { %9385 = vmatpush3.msra.mxu0 %v12908_v45 }
 0x53a   : > { %9386 = vmatprep.subr.mxu0 %v12925_v44  ;;  %9300 = vmatmul.mubr.f32.gmra.mxu0 %v13275_v48  ;;  %v13458_v45 = vsub.f32 %v6010_v24, %v13452_v26  ;;  %15251 = vst [vmem:[#allocation83_spill] sm:$0xff] %v13529_v43  ;;  %v13543_v12 = vsub.f32 %v6004_v16, %v13529_v43  ;;  %v13615_v24 = vand.u32 4294901760, %v13602_v38 }
 0x53b   : > { %9387 = vmatpush3.msra.mxu0 %v12925_v44  ;;  %9450 = vmatmul.mubr.f32.gmra.mxu1 %v13011_v7  ;;  %v13460_v44 = vand.u32 4294901760, %v6009_v19 }
 0x53c   : > { %9388 = vmatprep.subr.mxu0 %v12937_v58  ;;  %9390 = vmatprep.mubr.f32.mxu0 %v13002_v6  ;;  %15239 = vst [vmem:[#allocation68_spill] sm:$0xff] %v13458_v45  ;;  %v13468_v6 = vand.u32 4294901760, %v13458_v45  ;;  %15254 = vst [vmem:[#allocation89_spill] sm:$0xff] %v13543_v12  ;;  %v13557_v59 = vand.u32 4294901760, %v13543_v12 }
 0x53d   : > { %9452 = vmatprep.mubr.f32.mxu1 %v13015_v13  ;;  %9389 = vmatpush3.msra.mxu0 %v12937_v58  ;;  %v6008_v58 = vld [vmem:[%s14496_s6 + $0x68] sm:$0xff]  ;;  %15268 = vst [vmem:[#allocation67_spill] sm:$0xff] %v13615_v24 }
 0x53e   : > { %9391 = vmatmul.mubr.f32.vlgmr.msra.gmra.mxu0 %v13005_v57  ;;  %9470 = vmatprep.subr.mxu0 %v13452_v26  ;;  %15240 = vst [vmem:[#allocation69_spill] sm:$0xff] %v13468_v6  ;;  %v13471_v57 = vsub.f32 %v6009_v19, %v13460_v44  ;;  %15256 = vst [vmem:[#allocation64_spill] sm:$0xff] %v13557_v59  ;;  %v6401_v52 = vsub.f32 %v13543_v12, %v13557_v59 }
 0x53f   : > { %9453 = vmatmul.mubr.f32.gmra.mxu1 %v13048_v29  ;;  %9393 = vmatprep.mubr.f32.mxu0 %v13008_v53  ;;  %v13473_v53 = vand.u32 4294901760, %v6008_v58  ;;  %v13618_v19 = vsub.f32 %v5999_v37, %v13604_v35 }
 0x540   : > { %9455 = vmatprep.mubr.f32.mxu1 %v13069_v1  ;;  %9471 = vmatpush3.msra.mxu0 %v13452_v26  ;;  %15241 = vst [vmem:[#allocation65_spill] sm:$0xff] %v13471_v57  ;;  %v13483_v14 = vand.u32 4294901760, %v13471_v57  ;;  %v6402_v50 = vand.u32 4294901760, %v6401_v52 }
 0x541   : > { %9472 = vmatprep.subr.mxu0 %v13460_v44  ;;  %15269 = vst [vmem:[#allocation94_spill] sm:$0xff] %v13618_v19 }
 0x542   : > { %9394 = vmatmul.mubr.f32.gmra.mxu0 %v13011_v7  ;;  %v6007_v7 = vld [vmem:[%s14496_s6 + $0x60] sm:$0xff]  ;;  %15242 = vst [vmem:[#allocation70_spill] sm:$0xff] %v13483_v14 }
 0x543   : > { %9456 = vmatmul.mubr.f32.gmra.mxu1 %v13092_v32  ;;  %9396 = vmatprep.mubr.f32.mxu0 %v13015_v13  ;;  %v6359_v13 = vsub.f32 %v13458_v45, %v13468_v6 }
 0x544   : > { %9458 = vmatprep.mubr.f32.mxu1 %v13115_v21  ;;  %9473 = vmatpush3.msra.mxu0 %v13460_v44 }
 0x545   : > { %9474 = vmatprep.subr.mxu0 %v13473_v53 }
 0x546   : > { %9397 = vmatmul.mubr.f32.gmra.mxu0 %v13048_v29  ;;  %v13486_v29 = vsub.f32 %v6008_v58, %v13473_v53  ;;  %v13620_v58 = vand.u32 4294901760, %v5998_v27 }
 0x547   : > { %9459 = vmatmul.mubr.f32.gmra.mxu1 %v13149_v63  ;;  %9399 = vmatprep.mubr.f32.mxu0 %v13069_v1  ;;  %v13488_v1 = vand.u32 4294901760, %v6007_v7 }
 0x548   : > { %9461 = vmatprep.mubr.f32.mxu1 %v13166_v25  ;;  %15243 = vst [vmem:[#allocation71_spill] sm:$0xff] %v13486_v29  ;;  %9475 = vmatpush3.msra.mxu0 %v13473_v53  ;;  %15270 = vst [vmem:[#allocation95_spill] sm:$0xff] %v13620_v58 }
 0x549   : > { %9476 = vmatprep.subr.mxu0 %v13488_v1 }
 0x54a   : > { %9400 = vmatmul.mubr.f32.gmra.mxu0 %v13092_v32  ;;  %v6360_v32 = vand.u32 4294901760, %v6359_v13  ;;  %v5997_v13 = vld [vmem:[%s14496_s6 + $0x10] sm:$0xff] }
 0x54b   : > { %9462 = vmatmul.mubr.f32.gmra.mxu1 %v13194_v56  ;;  %9402 = vmatprep.mubr.f32.mxu0 %v13115_v21  ;;  %v6366_v21 = vsub.f32 %v13471_v57, %v13483_v14 }
 0x54c   : > { %9464 = vmatprep.mubr.f32.mxu1 %v13206_v18  ;;  %9477 = vmatpush3.msra.mxu0 %v13488_v1 }
 0x54d   : > { %9526 = vmatprep.subr.mxu1 %v6360_v32  ;;  %v6367_v15 = vand.u32 4294901760, %v6366_v21  ;;  %9478 = vmatprep.subr.mxu0 %v13504_v41  ;;  %v13635_v21 = vsub.f32 %v5998_v27, %v13620_v58 }
 0x54e   : > { %9403 = vmatmul.mubr.f32.gmra.mxu0 %v13149_v63  ;;  %v13501_v63 = vsub.f32 %v6007_v7, %v13488_v1  ;;  %9527 = vmatpush3.msra.mxu1 %v6360_v32  ;;  %v6422_v7 = vsub.f32 %v13593_v39, %v13608_v30  ;;  %v13632_v32 = vand.u32 4294901760, %v13618_v19 }
 0x54f   : > { %9465 = vmatmul.mubr.f32.gmra.mxu1 %v13225_v4  ;;  %9405 = vmatprep.mubr.f32.mxu0 %v13166_v25  ;;  %v13498_v25 = vand.u32 4294901760, %v13486_v29  ;;  %15272 = vst [vmem:[#allocation97_spill] sm:$0xff] %v13635_v21 }
 0x550   : > { %9467 = vmatprep.mubr.f32.mxu1 %v15238_v33  ;;  %15245 = vst [vmem:[#allocation72_spill] sm:$0xff] %v13501_v63  ;;  %v13513_v5 = vand.u32 4294901760, %v13501_v63  ;;  %9528 = vmatprep.subr.mxu1 %v6367_v15  ;;  %15271 = vst [vmem:[#allocation96_spill] sm:$0xff] %v13632_v32 }
 0x551   : > { %15244 = vst [vmem:[#allocation74_spill] sm:$0xff] %v13498_v25  ;;  %9479 = vmatpush3.msra.mxu0 %v13504_v41  ;;  %9529 = vmatpush3.msra.mxu1 %v6367_v15  ;;  %v6423_v15 = vand.u32 4294901760, %v6422_v7 }
 0x552   : > { %9406 = vmatmul.mubr.f32.gmra.mxu0 %v13194_v56  ;;  %v6005_v56 = vld [vmem:[%s14496_s6 + $0x50] sm:$0xff]  ;;  %15247 = vst [vmem:[#allocation73_spill] sm:$0xff] %v13513_v5 }
 0x553   : > { %9468 = vmatmul.mubr.f32.gmra.mxu1 %v13256_v10  ;;  %9408 = vmatprep.mubr.f32.mxu0 %v13206_v18  ;;  %v6373_v18 = vsub.f32 %v13486_v29, %v13498_v25  ;;  %v13515_v46 = vand.u32 4294901760, %v6005_v56 }
 0x555   : > { %15248 = vst [vmem:[#allocation76_spill] sm:$0xff] %v13515_v46  ;;  %v6374_v2 = vand.u32 4294901760, %v6373_v18  ;;  %v13527_v61 = vsub.f32 %v6005_v56, %v13515_v46  ;;  %9480 = vmatprep.subr.mxu0 %v13515_v46  ;;  %v13637_v56 = vand.u32 4294901760, %v5997_v13  ;;  %v5996_v18 = vld [vmem:[%s14496_s6 + $0x8] sm:$0xff] }
 0x556   : > { %9409 = vmatmul.mubr.f32.gmra.mxu0 %v13225_v4  ;;  %v13518_v4 = vsub.f32 %v6006_v20, %v13504_v41  ;;  %v6429_v20 = vsub.f32 %v13602_v38, %v13615_v24 }
 0x557   : > { %9411 = vmatprep.mubr.f32.mxu0 %v15238_v33  ;;  %15250 = vst [vmem:[#allocation79_spill] sm:$0xff] %v13527_v61  ;;  %9530 = vmatprep.subr.mxu1 %v6374_v2  ;;  %v13540_v62 = vand.u32 4294901760, %v13527_v61  ;;  %v6416_v33 = vand.u32 4294901760, %v6415_v55  ;;  %15273 = vst [vmem:[#allocation98_spill] sm:$0xff] %v13637_v56  ;;  %v13650_v54 = vsub.f32 %v5997_v13, %v13637_v56 }
 0x558   : > { %15249 = vst [vmem:[#allocation86_spill] sm:$0xff] %v13518_v4  ;;  %v13533_v48 = vand.u32 4294901760, %v13518_v4  ;;  %9481 = vmatpush3.msra.mxu0 %v13515_v46  ;;  %9531 = vmatpush3.msra.mxu1 %v6374_v2  ;;  %v6430_v16 = vand.u32 4294901760, %v6429_v20  ;;  %v6436_v2 = vsub.f32 %v13618_v19, %v13632_v32 }
 0x559   : > { %15253 = vst [vmem:[#allocation88_spill] sm:$0xff] %v13540_v62  ;;  %9482 = vmatprep.subr.mxu0 %v13529_v43  ;;  %v6394_v40 = vsub.f32 %v13527_v61, %v13540_v62  ;;  %15275 = vst [vmem:[#allocation100_spill] sm:$0xff] %v13650_v54 }
 0x55a   : > { %9412 = vmatmul.mubr.f32.gmra.mxu0 %v13256_v10  ;;  %v6380_v10 = vsub.f32 %v13501_v63, %v13513_v5  ;;  %15252 = vst [vmem:[#allocation85_spill] sm:$0xff] %v13533_v48  ;;  %v6387_v3 = vsub.f32 %v13518_v4, %v13533_v48  ;;  %v6437_v36 = vand.u32 4294901760, %v6436_v2 }
 0x55b   : > { %9483 = vmatpush3.msra.mxu0 %v13529_v43  ;;  %v6395_v17 = vand.u32 4294901760, %v6394_v40 }
 0x55c   : > { %v6381_v22 = vand.u32 4294901760, %v6380_v10  ;;  %v6388_v11 = vand.u32 4294901760, %v6387_v3  ;;  %9484 = vmatprep.subr.mxu0 %v13545_v47  ;;  %v13647_v10 = vand.u32 4294901760, %v13635_v21  ;;  %v5995_v3 = vld [vmem:[%s14496_s6] sm:$0xff] }
 0x55d   : > { %9485 = vmatpush3.msra.mxu0 %v13545_v47  ;;  %v13664_v0 = vand.u32 4294901760, %v5995_v3 }
 0x55e   : > { %9532 = vmatprep.subr.mxu1 %v6381_v22  ;;  %9486 = vmatprep.subr.mxu0 %v13562_v42  ;;  %15274 = vst [vmem:[#allocation99_spill] sm:$0xff] %v13647_v10  ;;  %v6443_v40 = vsub.f32 %v13635_v21, %v13647_v10 }
 0x55f   : > { %9533 = vmatpush3.msra.mxu1 %v6381_v22  ;;  %9487 = vmatpush3.msra.mxu0 %v13562_v42  ;;  %v13653_v22 = vand.u32 4294901760, %v5996_v18  ;;  %15278 = vst [vmem:[#allocation103_spill] sm:$0xff] %v13664_v0 }
 0x560   : > { %9534 = vmatprep.subr.mxu1 %v6388_v11  ;;  %9488 = vmatprep.subr.mxu0 %v13578_v9  ;;  %v6444_v52 = vand.u32 4294901760, %v6443_v40 }
 0x561   : > { %9535 = vmatpush3.msra.mxu1 %v6388_v11  ;;  %9489 = vmatpush3.msra.mxu0 %v13578_v9  ;;  %15276 = vst [vmem:[#allocation101_spill] sm:$0xff] %v13653_v22  ;;  %v13662_v11 = vand.u32 4294901760, %v13650_v54 }
 0x562   : > { %9536 = vmatprep.subr.mxu1 %v6395_v17  ;;  %9490 = vmatprep.subr.mxu0 %v13589_v31 }
 0x563   : > { %9537 = vmatpush3.msra.mxu1 %v6395_v17  ;;  %9491 = vmatpush3.msra.mxu0 %v13589_v31  ;;  %15277 = vst [vmem:[#allocation102_spill] sm:$0xff] %v13662_v11  ;;  %v13668_v17 = vsub.f32 %v5996_v18, %v13653_v22  ;;  %v6450_v49 = vsub.f32 %v13650_v54, %v13662_v11 }
 0x564   : > { %9538 = vmatprep.subr.mxu1 %v6402_v50  ;;  %9492 = vmatprep.subr.mxu0 %v13604_v35 }
 0x565   : > { %9539 = vmatpush3.msra.mxu1 %v6402_v50  ;;  %9493 = vmatpush3.msra.mxu0 %v13604_v35  ;;  %15279 = vst [vmem:[#allocation104_spill] sm:$0xff] %v13668_v17  ;;  %v13674_v50 = vsub.f32 %v5995_v3, %v13664_v0  ;;  %v13678_v51 = vand.u32 4294901760, %v13668_v17  ;;  %v6451_v37 = vand.u32 4294901760, %v6450_v49 }
 0x566   : > { %9540 = vmatprep.subr.mxu1 %v6409_v34  ;;  %9494 = vmatprep.subr.mxu0 %v13620_v58 }
 0x567   : > { %9541 = vmatpush3.msra.mxu1 %v6409_v34  ;;  %9495 = vmatpush3.msra.mxu0 %v13620_v58  ;;  %15280 = vst [vmem:[#allocation105_spill] sm:$0xff] %v13674_v50  ;;  %15281 = vst [vmem:[#allocation106_spill] sm:$0xff] %v13678_v51  ;;  %v13682_v34 = vand.u32 4294901760, %v13674_v50  ;;  %v6457_v55 = vsub.f32 %v13668_v17, %v13678_v51 }
 0x568   : > { %9542 = vmatprep.subr.mxu1 %v6416_v33  ;;  %9496 = vmatprep.subr.mxu0 %v13637_v56 }
 0x569   : > { %9543 = vmatpush3.msra.mxu1 %v6416_v33  ;;  %9497 = vmatpush3.msra.mxu0 %v13637_v56  ;;  %15282 = vst [vmem:[#allocation107_spill] sm:$0xff] %v13682_v34  ;;  %v6464_v27 = vsub.f32 %v13674_v50, %v13682_v34  ;;  %v6458_v33 = vand.u32 4294901760, %v6457_v55 }
 0x56a   : > { %9544 = vmatprep.subr.mxu1 %v6423_v15  ;;  %9498 = vmatprep.subr.mxu0 %v13653_v22 }
 0x56b   : > { %9545 = vmatpush3.msra.mxu1 %v6423_v15  ;;  %9499 = vmatpush3.msra.mxu0 %v13653_v22  ;;  %v6465_v7 = vand.u32 4294901760, %v6464_v27 }
 0x56c   : > { %9546 = vmatprep.subr.mxu1 %v6430_v16  ;;  %9500 = vmatprep.subr.mxu0 %v13664_v0 }
 0x56d   : > { %9547 = vmatpush3.msra.mxu1 %v6430_v16  ;;  %9501 = vmatpush3.msra.mxu0 %v13664_v0 }
 0x56e   : > { %9548 = vmatprep.subr.mxu1 %v6437_v36  ;;  %9582 = vmatprep.subr.mxu0 %v13458_v45 }
 0x56f   : > { %9549 = vmatpush3.msra.mxu1 %v6437_v36 }
 0x570   : > { %9550 = vmatprep.subr.mxu1 %v6444_v52 }
 0x571   : > { %9551 = vmatpush3.msra.mxu1 %v6444_v52 }
 0x572   : > { %9552 = vmatprep.subr.mxu1 %v6451_v37 }
 0x573   : > { %9553 = vmatpush3.msra.mxu1 %v6451_v37 }
 0x574   : > { %9554 = vmatprep.subr.mxu1 %v6458_v33 }
 0x575   : > { %9555 = vmatpush3.msra.mxu1 %v6458_v33 }
 0x576   : > { %9556 = vmatprep.subr.mxu1 %v6465_v7 }
 0x577   : > { %9557 = vmatpush3.msra.mxu1 %v6465_v7 }
 0x578   : > { %9638 = vmatprep.subr.mxu1 %v13452_v26 }
 0x59a   : > { %v13691_v13 = vpop.f32.mrf.mxu1 }
 0x59c   : > { %v13693_v20 = vpop.f32.mrf.mxu1 }
 0x59e   : > { %v13695_v15 = vpop.f32.mrf.mxu1 }
 0x5a0   : > { %v13697_v18 = vpop.f32.mrf.mxu1 }
 0x5a2   : > { %v13699_v16 = vpop.f32.mrf.mxu0  ;;  %v13701_v2 = vpop.f32.mrf.mxu1 }
 0x5a4   : > { %v13703_v3 = vpop.f32.mrf.mxu0  ;;  %v13705_v36 = vpop.f32.mrf.mxu1 }
 0x5a8   : > { %v13707_v40 = vpop.f32.mrf.mxu0  ;;  %v13709_v52 = vpop.f32.mrf.mxu1 }
 0x5aa   : > { %v13711_v49 = vpop.f32.mrf.mxu0  ;;  %v13713_v37 = vpop.f32.mrf.mxu1 }
 0x5ae   : > { %v13715_v55 = vpop.f32.mrf.mxu0  ;;  %v9236_v27 = vpop.f32.mrf.mxu1 }
 0x5b0   : > { %v13717_v33 = vpop.f32.mrf.mxu0  ;;  %v13719_v7 = vpop.f32.mrf.mxu1 }
 0x5b4   : > { %v13721_v34 = vpop.f32.mrf.mxu0  ;;  %v9239_v51 = vpop.f32.mrf.mxu1 }
 0x5b6   : > { %v13723_v11 = vpop.f32.mrf.mxu0  ;;  %v13725_v10 = vpop.f32.mrf.mxu1 }
 0x5ba   : > { %v9180_v32 = vpop.f32.mrf.mxu0  ;;  %v9242_v24 = vpop.f32.mrf.mxu1 }
 0x5bb   : > { %v13727_v30 = vadd.f32 %v9236_v27, %v9180_v32 }
 0x5bc   : > { %v13729_v23 = vpop.f32.mrf.mxu0  ;;  %v5169_v8 = vpop.f32.mrf.mxu1 }
 0x5c0   : > { %v9183_v59 = vpop.f32.mrf.mxu0  ;;  %v9245_v62 = vpop.f32.mrf.mxu1 }
 0x5c1   : > { %v13731_v48 = vadd.f32 %v9239_v51, %v9183_v59 }
 0x5c2   : > { %v13733_v5 = vpop.f32.mrf.mxu0  ;;  %v5181_v25 = vpop.f32.mrf.mxu1 }
 0x5c6   : > { %v9186_v14 = vpop.f32.mrf.mxu0  ;;  %v9336_v6 = vpop.f32.mrf.mxu1 }
 0x5c7   : > { %v13735_v50 = vadd.f32 %v9242_v24, %v9186_v14 }
 0x5c8   : > { %v4916_v17 = vpop.f32.mrf.mxu0  ;;  %v5485_v54 = vpop.f32.mrf.mxu1 }
 0x5c9   : > { %15283 = vst [vmem:[#allocation108_spill] sm:$0xff] %v13735_v50  ;;  %v13737_v21 = vadd.f32 %v5169_v8, %v4916_v17 }
 0x5cb   : > { %15284 = vst [vmem:[#allocation109_spill] sm:$0xff] %v13737_v21 }
 0x5cc   : > { %v9189_v32 = vpop.f32.mrf.mxu0  ;;  %v9339_v27 = vpop.f32.mrf.mxu1 }
 0x5cd   : > { %v13739_v0 = vadd.f32 %v9245_v62, %v9189_v32 }
 0x5ce   : > { %v4936_v19 = vpop.f32.mrf.mxu0  ;;  %v13741_v22 = vpop.f32.mrf.mxu1 }
 0x5cf   : > { %15285 = vst [vmem:[#allocation110_spill] sm:$0xff] %v13739_v0  ;;  %v13743_v59 = vadd.f32 %v5181_v25, %v4936_v19 }
 0x5d1   : > { %15286 = vst [vmem:[#allocation111_spill] sm:$0xff] %v13743_v59  ;;  %v5104_v59 = vadd.f32 %v13691_v13, %v13699_v16 }
 0x5d2   : > { %v9280_v51 = vpop.f32.mrf.mxu0  ;;  %v13745_v38 = vpop.f32.mrf.mxu1 }
 0x5d3   : > { %v5299_v46 = vadd.f32 %v9280_v51, %v5104_v59  ;;  %v5128_v59 = vadd.f32 %v13701_v2, %v13715_v55 }
 0x5d4   : > { %v5291_v56 = vpop.f32.mrf.mxu0  ;;  %v13747_v39 = vpop.f32.mrf.mxu1 }
 0x5d8   : > { %v9283_v14 = vpop.f32.mrf.mxu0  ;;  %v13749_v24 = vpop.f32.mrf.mxu1 }
 0x5da   : > { %v5305_v8 = vpop.f32.mrf.mxu0  ;;  %v13751_v17 = vpop.f32.mrf.mxu1 }
 0x5de   : > { %v9286_v58 = vpop.f32.mrf.mxu0  ;;  %v13753_v62 = vpop.f32.mrf.mxu1 }
 0x5e0   : > { %v5319_v32 = vpop.f32.mrf.mxu0  ;;  %v13755_v60 = vpop.f32.mrf.mxu1 }
 0x5e4   : > { %v9289_v25 = vpop.f32.mrf.mxu0  ;;  %v13757_v19 = vpop.f32.mrf.mxu1 }
 0x5e6   : > { %v5333_v35 = vpop.f32.mrf.mxu0  ;;  %v13759_v28 = vpop.f32.mrf.mxu1 }
 0x5e7   : > { %15287 = vst [vmem:[#allocation112_spill] sm:$0xff] %v13759_v28  ;;  %v5494_v28 = vadd.f32 %v9336_v6, %v5299_v46  ;;  %v5134_v6 = vadd.f32 %v13713_v37, %v13723_v11 }
 0x5ea   : > { %v9292_v31 = vpop.f32.mrf.mxu0  ;;  %v13761_v12 = vpop.f32.mrf.mxu1 }
 0x5eb   : > { %15288 = vst [vmem:[#allocation113_spill] sm:$0xff] %v13761_v12 }
 0x5ec   : > { %v13763_v9 = vpop.f32.mrf.mxu0  ;;  %v13765_v61 = vpop.f32.mrf.mxu1 }
 0x5ed   : > { %15289 = vst [vmem:[#allocation114_spill] sm:$0xff] %v13765_v61  ;;  %v5098_v61 = vadd.f32 %v13693_v20, %v13703_v3 }
 0x5ef   : > { %v5292_v50 = vadd.f32 %v5291_v56, %v5098_v61  ;;  %v5122_v61 = vadd.f32 %v13705_v36, %v13717_v33  ;;  %v5355_v36 = vadd.f32 %v9292_v31, %v13727_v30 }
 0x5f0   : > { %v13767_v42 = vpop.f32.mrf.mxu0  ;;  %v13769_v4 = vpop.f32.mrf.mxu1 }
 0x5f1   : > { %15290 = vst [vmem:[#allocation115_spill] sm:$0xff] %v13769_v4  ;;  %v5116_v4 = vadd.f32 %v13695_v15, %v13707_v40  ;;  %v5486_v3 = vadd.f32 %v5485_v54, %v5292_v50 }
 0x5f2   : > { %v13771_v47 = vpop.f32.mrf.mxu0  ;;  %v13773_v0 = vpop.f32.mrf.mxu1 }
 0x5f3   : > { %15291 = vst [vmem:[#allocation116_spill] sm:$0xff] %v13773_v0  ;;  %v5313_v13 = vadd.f32 %v9283_v14, %v5116_v4  ;;  %v5140_v4 = vadd.f32 %v13709_v52, %v13721_v34 }
 0x5f6   : > { %v13775_v63 = vpop.f32.mrf.mxu0  ;;  %v9448_v43 = vpop.f32.mrf.mxu1 }
 0x5f7   : > { %15292 = vst [vmem:[#allocation117_spill] sm:$0xff] %v13775_v63  ;;  %v5110_v63 = vadd.f32 %v13697_v18, %v13711_v49 }
 0x5f8   : > { %v13779_v29 = vpop.f32.mrf.mxu0  ;;  %v5901_v12 = vpop.f32.mrf.mxu1 }
 0x5f9   : > { %15293 = vst [vmem:[#allocation118_spill] sm:$0xff] %v13779_v29  ;;  %v5306_v29 = vadd.f32 %v5305_v8, %v5110_v63  ;;  %v5327_v63 = vadd.f32 %v9286_v58, %v5128_v59 }
 0x5fa   : > { %v13783_v57 = vpop.f32.mrf.mxu0 }
 0x5fb   : > { %15294 = vst [vmem:[#allocation119_spill] sm:$0xff] %v13783_v57  ;;  %v9451_v0 = vpop.f32.mrf.mxu1  ;;  %v5510_v57 = vadd.f32 %v9339_v27, %v5313_v13  ;;  %v5502_v2 = vadd.f32 %v13741_v22, %v5306_v29  ;;  %v5526_v29 = vadd.f32 %v13745_v38, %v5327_v63 }
 0x5fc   : > { %v13787_v45 = vpop.f32.mrf.mxu0 }
 0x5fd   : > { %v5913_v16 = vpop.f32.mrf.mxu1 }
 0x5fe   : > { %v9392_v41 = vpop.f32.mrf.mxu0 }
 0x5ff   : > { %v5731_v21 = vadd.f32 %v9392_v41, %v5494_v28  ;;  %v9454_v20 = vpop.f32.mrf.mxu1  ;;  %v5320_v41 = vadd.f32 %v5319_v32, %v5122_v61  ;;  %v5558_v32 = vadd.f32 %v13753_v62, %v5355_v36 }
 0x600   : > { %v5724_v56 = vpop.f32.mrf.mxu0 }
 0x601   : > { %v5908_v15 = vadd.f32 %v9448_v43, %v5731_v21  ;;  %v5725_v40 = vadd.f32 %v5724_v56, %v5486_v3  ;;  %v5925_v51 = vpop.f32.mrf.mxu1  ;;  %v5341_v43 = vadd.f32 %v9289_v25, %v5140_v4  ;;  %v5334_v21 = vadd.f32 %v5333_v35, %v5134_v6 }
 0x602   : > { %v9395_v46 = vpop.f32.mrf.mxu0  ;;  %v5518_v31 = vadd.f32 %v13747_v39, %v5320_v41 }
 0x603   : > { %v13799_v28 = vand.u32 4294901760, %v5908_v15  ;;  %v5902_v54 = vadd.f32 %v5901_v12, %v5725_v40  ;;  %v5743_v50 = vadd.f32 %v9395_v46, %v5510_v57  ;;  %v9457_v18 = vpop.f32.mrf.mxu1  ;;  %v5146_v12 = vadd.f32 %v13719_v7, %v13729_v23 }
 0x604   : > { %v5736_v49 = vpop.f32.mrf.mxu0  ;;  %v5158_v57 = vadd.f32 %v13725_v10, %v13733_v5  ;;  %v5542_v39 = vadd.f32 %v13749_v24, %v5341_v43  ;;  %v5534_v38 = vadd.f32 %v13751_v17, %v5334_v21 }
 0x605   : > { %v13804_v34 = vsub.f32 %v5908_v15, %v13799_v28  ;;  %v13806_v52 = vand.u32 4294901760, %v5902_v54  ;;  %v5920_v58 = vadd.f32 %v9451_v0, %v5743_v50  ;;  %v5737_v11 = vadd.f32 %v5736_v49, %v5502_v2  ;;  %v5937_v37 = vpop.f32.mrf.mxu1 }
 0x606   : > { %v9398_v35 = vpop.f32.mrf.mxu0  ;;  %v5348_v23 = vadd.f32 %v13763_v9, %v5146_v12  ;;  %v5369_v9 = vadd.f32 %v13767_v42, %v13731_v48  ;;  %v5362_v48 = vadd.f32 %v13771_v47, %v5158_v57 }
 0x607   : > { %v6207_v30 = vand.u32 4294901760, %v13804_v34  ;;  %v13816_v22 = vsub.f32 %v5902_v54, %v13806_v52  ;;  %v13818_v55 = vand.u32 4294901760, %v5920_v58  ;;  %v5914_v0 = vadd.f32 %v5913_v16, %v5737_v11  ;;  %v13820_v33 = vpop.f32.mrf.mxu1  ;;  %9558 = vmatprep.mubr.f32.mxu1 %v13806_v52  ;;  %v15296_v11 = vld [vmem:[#allocation118_spill] sm:$0xff] }
 0x608   : > { %v5755_v5 = vadd.f32 %v9398_v35, %v5526_v29  ;;  %v5748_v10 = vpop.f32.mrf.mxu0  ;;  %9559 = vmatmul.mubr.f32.vlgmr.msra.gmra.mxu1 %v13799_v28  ;;  %v5550_v41 = vadd.f32 %v13755_v60, %v5348_v23  ;;  %v5574_v36 = vadd.f32 %v13757_v19, %v5369_v9  ;;  %v15297_v29 = vld [vmem:[#allocation80_spill] sm:$0xff] }
 0x609   : > { %v13828_v7 = vsub.f32 %v5920_v58, %v13818_v55  ;;  %v13830_v27 = vand.u32 4294901760, %v5914_v0  ;;  %v5749_v14 = vadd.f32 %v5748_v10, %v5518_v31  ;;  %v5949_v8 = vpop.f32.mrf.mxu1  ;;  %9639 = vmatpush3.msra.mxu1 %v13452_v26  ;;  %v6208_v24 = vsub.f32 %v13804_v34, %v6207_v30  ;;  %v15295_v58 = vld [vmem:[#allocation109_spill] sm:$0xff]  ;;  %v15298_v35 = vld [vmem:[#allocation112_spill] sm:$0xff] }
 0x60a   : > { %v5932_v25 = vadd.f32 %v9454_v20, %v5755_v5  ;;  %v9401_v17 = vpop.f32.mrf.mxu0  ;;  %9640 = vmatprep.subr.mxu1 %v13460_v44  ;;  %v6197_v13 = vand.u32 4294901760, %v13816_v22  ;;  %v5566_v31 = vadd.f32 %v15298_v35, %v5362_v48  ;;  %v15308_v35 = vld [vmem:[#allocation72_spill] sm:$0xff] }
 0x60b   : > { %v13842_v16 = vsub.f32 %v5914_v0, %v13830_v27  ;;  %v5926_v3 = vadd.f32 %v5925_v51, %v5749_v14  ;;  %v5767_v59 = vadd.f32 %v9401_v17, %v5542_v39  ;;  %9561 = vmatprep.mubr.f32.mxu1 %v13830_v27  ;;  %9641 = vmatpush3.msra.mxu1 %v13460_v44  ;;  %v13849_v62 = vpop.f32.mrf.mxu1  ;;  %v6227_v56 = vand.u32 4294901760, %v13828_v7  ;;  %v15299_v0 = vld [vmem:[#allocation68_spill] sm:$0xff]  ;;  %v15301_v14 = vld [vmem:[#allocation117_spill] sm:$0xff] }
 0x60c   : > { %v13847_v42 = vand.u32 4294901760, %v5932_v25  ;;  %v5760_v20 = vpop.f32.mrf.mxu0  ;;  %9562 = vmatmul.mubr.f32.gmra.mxu1 %v13818_v55  ;;  %9642 = vmatprep.subr.mxu1 %v13473_v53  ;;  %v6198_v61 = vsub.f32 %v13816_v22, %v6197_v13  ;;  %v6209_v46 = vand.u32 4294901760, %v6208_v24 }
 0x60d   : > { %v13857_v15 = vand.u32 4294901760, %v5926_v3  ;;  %v5944_v40 = vadd.f32 %v9457_v18, %v5767_v59  ;;  %v5761_v51 = vadd.f32 %v5760_v20, %v5534_v38  ;;  %9643 = vmatpush3.msra.mxu1 %v13473_v53  ;;  %v6217_v47 = vand.u32 4294901760, %v13842_v16  ;;  %v5961_v43 = vpop.f32.mrf.mxu1  ;;  %v15300_v38 = vld [vmem:[#allocation108_spill] sm:$0xff] }
 0x60e   : > { %v13862_v4 = vsub.f32 %v5932_v25, %v13847_v42  ;;  %v9404_v6 = vpop.f32.mrf.mxu0  ;;  %9644 = vmatprep.subr.mxu1 %v13488_v1  ;;  %v6199_v63 = vand.u32 4294901760, %v6198_v61  ;;  %v6228_v49 = vsub.f32 %v13828_v7, %v6227_v56  ;;  %v15302_v25 = vld [vmem:[#allocation65_spill] sm:$0xff] }
 0x60f   : > { %v13867_v54 = vsub.f32 %v5926_v3, %v13857_v15  ;;  %v5938_v50 = vadd.f32 %v5937_v37, %v5761_v51  ;;  %v5779_v18 = vadd.f32 %v9404_v6, %v5558_v32  ;;  %9564 = vmatprep.mubr.f32.mxu1 %v13857_v15  ;;  %9645 = vmatpush3.msra.mxu1 %v13488_v1  ;;  %v13871_v2 = vand.u32 4294901760, %v5944_v40  ;;  %v9466_v3 = vpop.f32.mrf.mxu1 }
 0x610   : > { %9502 = vmatprep.mubr.f32.mxu0 %v6199_v63  ;;  %v5772_v21 = vpop.f32.mrf.mxu0  ;;  %9565 = vmatmul.mubr.f32.gmra.mxu1 %v13847_v42  ;;  %v6218_v60 = vsub.f32 %v13842_v16, %v6217_v47  ;;  %v5376_v37 = vadd.f32 %v15296_v11, %v15295_v58  ;;  %v6247_v39 = vand.u32 4294901760, %v13862_v4  ;;  %v5383_v32 = vadd.f32 %v15301_v14, %v15300_v38  ;;  %v15311_v38 = vld [vmem:[#allocation119_spill] sm:$0xff] }
 0x611   : > { %v13883_v12 = vand.u32 4294901760, %v5938_v50  ;;  %v5773_v57 = vadd.f32 %v5772_v21, %v5550_v41  ;;  %9503 = vmatmul.mubr.f32.vlgmr.msra.gmra.mxu0 %v6209_v46  ;;  %9646 = vmatprep.subr.mxu1 %v15297_v29  ;;  %v5956_v19 = vadd.f32 %v13820_v33, %v5779_v18  ;;  %v6237_v10 = vand.u32 4294901760, %v13867_v54  ;;  %v15303_v33 = vld [vmem:[#allocation76_spill] sm:$0xff]  ;;  %v5973_v11 = vpop.f32.mrf.mxu1 }
 0x612   : > { %9583 = vmatpush3.msra.mxu0 %v15299_v0  ;;  %9647 = vmatpush3.msra.mxu1 %v15297_v29  ;;  %v9407_v23 = vpop.f32.mrf.mxu0  ;;  %v6219_v5 = vand.u32 4294901760, %v6218_v60  ;;  %v13900_v17 = vsub.f32 %v5944_v40, %v13871_v2  ;;  %v6229_v20 = vand.u32 4294901760, %v6228_v49  ;;  %v15305_v40 = vld [vmem:[#allocation114_spill] sm:$0xff]  ;;  %v6248_v18 = vsub.f32 %v13862_v4, %v6247_v39 }
 0x613   : > { %v13895_v9 = vsub.f32 %v5938_v50, %v13883_v12  ;;  %v5950_v24 = vadd.f32 %v5949_v8, %v5773_v57  ;;  %9584 = vmatprep.subr.mxu0 %v15302_v25  ;;  %9648 = vmatprep.subr.mxu1 %v15303_v33  ;;  %v5791_v59 = vadd.f32 %v9407_v23, %v5574_v36  ;;  %v15304_v8 = vld [vmem:[#allocation71_spill] sm:$0xff]  ;;  %v13911_v41 = vand.u32 4294901760, %v5956_v19 }
 0x614   : > { %9585 = vmatpush3.msra.mxu0 %v15302_v25  ;;  %9505 = vmatprep.mubr.f32.mxu0 %v6219_v5  ;;  %v5784_v48 = vpop.f32.mrf.mxu0  ;;  %v6238_v61 = vsub.f32 %v13867_v54, %v6237_v10  ;;  %v5582_v63 = vadd.f32 %v15305_v40, %v5376_v37  ;;  %v15306_v36 = vld [vmem:[#allocation111_spill] sm:$0xff]  ;;  %v15310_v5 = vld [vmem:[#allocation110_spill] sm:$0xff]  ;;  %v15314_v40 = vld [vmem:[#allocation116_spill] sm:$0xff] }
 0x615   : > { %v13906_v51 = vand.u32 4294901760, %v5950_v24  ;;  %9567 = vmatprep.mubr.f32.mxu1 %v13883_v12  ;;  %9586 = vmatprep.subr.mxu0 %v15304_v8  ;;  %v5785_v6 = vadd.f32 %v5784_v48, %v5566_v31  ;;  %v6257_v21 = vand.u32 4294901760, %v13895_v9  ;;  %v5390_v60 = vadd.f32 %v13787_v45, %v15306_v36  ;;  %v15307_v57 = vld [vmem:[#allocation83_spill] sm:$0xff]  ;;  %v15309_v31 = vld [vmem:[#allocation113_spill] sm:$0xff] }
 0x616   : > { %9649 = vmatpush3.msra.mxu1 %v15303_v33  ;;  %9506 = vmatmul.mubr.f32.gmra.mxu0 %v6229_v20  ;;  %v9410_v46 = vpop.f32.mrf.mxu0  ;;  %v6239_v50 = vand.u32 4294901760, %v6238_v61  ;;  %v5968_v37 = vadd.f32 %v13849_v62, %v5791_v59  ;;  %v5590_v0 = vadd.f32 %v15309_v31, %v5383_v32  ;;  %v5397_v14 = vadd.f32 %v15311_v38, %v15310_v5  ;;  %v15312_v59 = vld [vmem:[#allocation92_spill] sm:$0xff]  ;;  %v15315_v31 = vld [vmem:[#allocation75_spill] sm:$0xff] }
 0x617   : > { %v13921_v49 = vsub.f32 %v5950_v24, %v13906_v51  ;;  %v5962_v58 = vadd.f32 %v5961_v43, %v5785_v6  ;;  %9568 = vmatmul.mubr.f32.gmra.mxu1 %v13871_v2  ;;  %9587 = vmatpush3.msra.mxu0 %v15304_v8  ;;  %v6258_v45 = vsub.f32 %v13895_v9, %v6257_v21  ;;  %v14850_v43 = vand.u32 4294901760, %v13900_v17  ;;  %v15313_v8 = vld [vmem:[#allocation86_spill] sm:$0xff] }
 0x618   : > { %9650 = vmatprep.subr.mxu1 %v15307_v57  ;;  %9588 = vmatprep.subr.mxu0 %v15308_v35  ;;  %v5796_v23 = vpop.f32.mrf.mxu0  ;;  %v13940_v25 = vsub.f32 %v5956_v19, %v13911_v41  ;;  %v5803_v32 = vadd.f32 %v9410_v46, %v5590_v0  ;;  %v6249_v48 = vand.u32 4294901760, %v6248_v18  ;;  %v5598_v36 = vadd.f32 %v15314_v40, %v5390_v60  ;;  %v15316_v0 = vld [vmem:[#allocation79_spill] sm:$0xff]  ;;  %v15319_v40 = vld [vmem:[#allocation89_spill] sm:$0xff] }
 0x619   : > { %v13935_v24 = vand.u32 4294901760, %v5962_v58  ;;  %9651 = vmatpush3.msra.mxu1 %v15307_v57  ;;  %9589 = vmatpush3.msra.mxu0 %v15308_v35  ;;  %v5797_v62 = vadd.f32 %v5796_v23, %v5582_v63  ;;  %v14847_v61 = vand.u32 4294901760, %v13921_v49  ;;  %v13947_v35 = vand.u32 4294901760, %v5968_v37  ;;  %v9469_v63 = vpop.f32.mrf.mxu1 }
 0x61a   : > { %9652 = vmatprep.subr.mxu1 %v15312_v59  ;;  %9508 = vmatprep.mubr.f32.mxu0 %v6239_v50  ;;  %v9413_v20 = vpop.f32.mrf.mxu0  ;;  %v6259_v46 = vand.u32 4294901760, %v6258_v45  ;;  %v6268_v18 = vsub.f32 %v13900_v17, %v14850_v43  ;;  %v14845_v5 = vand.u32 4294901760, %v13940_v25 }
 0x61b   : > { %9570 = vmatprep.mubr.f32.mxu1 %v13906_v51  ;;  %9590 = vmatprep.subr.mxu0 %v15313_v8  ;;  %v5974_v6 = vadd.f32 %v5973_v11, %v5797_v62  ;;  %v13950_v19 = vsub.f32 %v5962_v58, %v13935_v24  ;;  %v5980_v11 = vadd.f32 %v9466_v3, %v5803_v32  ;;  %v15317_v58 = vld [vmem:[#allocation115_spill] sm:$0xff]  ;;  %v5985_v62 = vpop.f32.mrf.mxu1 }
 0x61c   : > { %9653 = vmatpush3.msra.mxu1 %v15312_v59  ;;  %9509 = vmatmul.mubr.f32.gmra.mxu0 %v6249_v48  ;;  %v5808_v50 = vpop.f32.mrf.mxu0  ;;  %v5606_v23 = vadd.f32 %v15317_v58, %v5397_v14  ;;  %v6278_v45 = vsub.f32 %v13921_v49, %v14847_v61  ;;  %v13970_v3 = vsub.f32 %v5968_v37, %v13947_v35  ;;  %v15318_v48 = vld [vmem:[#allocation81_spill] sm:$0xff]  ;;  %v6269_v14 = vand.u32 4294901760, %v6268_v18 }
 0x61d   : > { %9571 = vmatmul.mubr.f32.gmra.mxu1 %v13911_v41  ;;  %9591 = vmatpush3.msra.mxu0 %v15313_v8  ;;  %v5809_v60 = vadd.f32 %v5808_v50, %v5598_v36  ;;  %v13965_v38 = vand.u32 4294901760, %v5974_v6  ;;  %v14844_v8 = vand.u32 4294901760, %v13950_v19  ;;  %v13976_v50 = vand.u32 4294901760, %v5980_v11 }
 0x61e   : > { %9654 = vmatprep.subr.mxu1 %v15315_v31  ;;  %9592 = vmatprep.subr.mxu0 %v15316_v0  ;;  %v5815_v32 = vadd.f32 %v9413_v20, %v5606_v23  ;;  %v6279_v37 = vand.u32 4294901760, %v6278_v45  ;;  %v6288_v20 = vsub.f32 %v13940_v25, %v14845_v5  ;;  %v14846_v23 = vand.u32 4294901760, %v13970_v3 }
 0x61f   : > { %9655 = vmatpush3.msra.mxu1 %v15315_v31  ;;  %9593 = vmatpush3.msra.mxu0 %v15316_v0  ;;  %v5986_v36 = vadd.f32 %v5985_v62, %v5809_v60  ;;  %v15320_v0 = vld [vmem:[#allocation84_spill] sm:$0xff]  ;;  %v15321_v60 = vld [vmem:[#allocation66_spill] sm:$0xff]  ;;  %v6298_v58 = vsub.f32 %v13950_v19, %v14844_v8 }
 0x620   : > { %9656 = vmatprep.subr.mxu1 %v15318_v48  ;;  %9511 = vmatprep.mubr.f32.mxu0 %v6259_v46  ;;  %v13983_v46 = vsub.f32 %v5974_v6, %v13965_v38  ;;  %v5992_v18 = vadd.f32 %v9469_v63, %v5815_v32  ;;  %v13998_v6 = vsub.f32 %v5980_v11, %v13976_v50  ;;  %v15322_v63 = vld [vmem:[#allocation91_spill] sm:$0xff]  ;;  %v6289_v62 = vand.u32 4294901760, %v6288_v20  ;;  %v15323_v32 = vld [vmem:[#allocation78_spill] sm:$0xff] }
 0x621   : > { %9573 = vmatprep.mubr.f32.mxu1 %v13935_v24  ;;  %9594 = vmatprep.subr.mxu0 %v15319_v40  ;;  %v13993_v45 = vand.u32 4294901760, %v5986_v36  ;;  %v6299_v8 = vand.u32 4294901760, %v6298_v58  ;;  %v6308_v11 = vsub.f32 %v13970_v3, %v14846_v23  ;;  %v15325_v20 = vld [vmem:[#allocation87_spill] sm:$0xff]  ;;  %v15327_v23 = vld [vmem:[#allocation90_spill] sm:$0xff] }
 0x622   : > { %9657 = vmatpush3.msra.mxu1 %v15318_v48  ;;  %9512 = vmatmul.mubr.f32.gmra.mxu0 %v6269_v14  ;;  %v14848_v14 = vand.u32 4294901760, %v13983_v46  ;;  %v14849_v5 = vand.u32 4294901760, %v13998_v6 }
 0x623   : > { %9574 = vmatmul.mubr.f32.gmra.mxu1 %v13947_v35  ;;  %9595 = vmatpush3.msra.mxu0 %v15319_v40  ;;  %v14004_v40 = vand.u32 4294901760, %v5992_v18 }
 0x624   : > { %9658 = vmatprep.subr.mxu1 %v15320_v0  ;;  %9596 = vmatprep.subr.mxu0 %v15321_v60  ;;  %v6318_v58 = vsub.f32 %v13983_v46, %v14848_v14 }
 0x625   : > { %9659 = vmatpush3.msra.mxu1 %v15320_v0  ;;  %9597 = vmatpush3.msra.mxu0 %v15321_v60  ;;  %v14011_v60 = vsub.f32 %v5986_v36, %v13993_v45  ;;  %v14024_v36 = vsub.f32 %v5992_v18, %v14004_v40 }
 0x626   : > { %9660 = vmatprep.subr.mxu1 %v15322_v63  ;;  %9514 = vmatprep.mubr.f32.mxu0 %v6279_v37  ;;  %v15324_v37 = vld [vmem:[#allocation95_spill] sm:$0xff]  ;;  %v6319_v18 = vand.u32 4294901760, %v6318_v58  ;;  %v15331_v58 = vld [vmem:[#allocation97_spill] sm:$0xff] }
 0x627   : > { %9576 = vmatprep.mubr.f32.mxu1 %v13965_v38  ;;  %9598 = vmatprep.subr.mxu0 %v15323_v32  ;;  %v6337_v61 = vand.u32 4294901760, %v14011_v60  ;;  %v6347_v14 = vand.u32 4294901760, %v14024_v36 }
 0x628   : > { %9661 = vmatpush3.msra.mxu1 %v15322_v63  ;;  %9515 = vmatmul.mubr.f32.gmra.mxu0 %v6289_v62  ;;  %v15326_v62 = vld [vmem:[#allocation98_spill] sm:$0xff] }
 0x629   : > { %9577 = vmatmul.mubr.f32.gmra.mxu1 %v13976_v50  ;;  %9599 = vmatpush3.msra.mxu0 %v15323_v32  ;;  %v6309_v32 = vand.u32 4294901760, %v6308_v11  ;;  %v15329_v11 = vld [vmem:[#allocation94_spill] sm:$0xff]  ;;  %v6348_v43 = vsub.f32 %v14024_v36, %v6347_v14 }
 0x62a   : > { %9662 = vmatprep.subr.mxu1 %v15324_v37  ;;  %9600 = vmatprep.subr.mxu0 %v15325_v20 }
 0x62b   : > { %9663 = vmatpush3.msra.mxu1 %v15324_v37  ;;  %9601 = vmatpush3.msra.mxu0 %v15325_v20  ;;  %v6328_v20 = vsub.f32 %v13998_v6, %v14849_v5  ;;  %v15330_v5 = vld [vmem:[#allocation103_spill] sm:$0xff] }
 0x62c   : > { %9664 = vmatprep.subr.mxu1 %v15326_v62  ;;  %9517 = vmatprep.mubr.f32.mxu0 %v6299_v8  ;;  %v15328_v8 = vld [vmem:[#allocation101_spill] sm:$0xff] }
 0x62d   : > { %9579 = vmatprep.mubr.f32.mxu1 %v13993_v45  ;;  %9602 = vmatprep.subr.mxu0 %v15327_v23 }
 0x62e   : > { %9665 = vmatpush3.msra.mxu1 %v15326_v62  ;;  %9518 = vmatmul.mubr.f32.gmra.mxu0 %v6309_v32  ;;  %v6338_v32 = vsub.f32 %v14011_v60, %v6337_v61 }
 0x62f   : > { %9580 = vmatmul.mubr.f32.gmra.mxu1 %v14004_v40  ;;  %9603 = vmatpush3.msra.mxu0 %v15327_v23  ;;  %v6329_v23 = vand.u32 4294901760, %v6328_v20  ;;  %v6349_v20 = vand.u32 4294901760, %v6348_v43  ;;  %v15356_v43 = vld [vmem:[#allocation106_spill] sm:$0xff] }
 0x630   : > { %9666 = vmatprep.subr.mxu1 %v15328_v8  ;;  %9604 = vmatprep.subr.mxu0 %v15329_v11 }
 0x631   : > { %9667 = vmatpush3.msra.mxu1 %v15328_v8  ;;  %9670 = vmatprep.mubr.f32.mxu1 %v6197_v13  ;;  %v6339_v13 = vand.u32 4294901760, %v6338_v32 }
 0x632   : > { %9605 = vmatpush3.msra.mxu0 %v15329_v11  ;;  %9668 = vmatprep.subr.mxu1 %v15330_v5  ;;  %v15332_v11 = vld [vmem:[#allocation100_spill] sm:$0xff] }
 0x633   : > { %9520 = vmatprep.mubr.f32.mxu0 %v6319_v18  ;;  %9606 = vmatprep.subr.mxu0 %v15331_v58  ;;  %v15333_v18 = vld [vmem:[#allocation104_spill] sm:$0xff] }
 0x634   : > { %9669 = vmatpush3.msra.mxu1 %v15330_v5  ;;  %9521 = vmatmul.mubr.f32.gmra.mxu0 %v6329_v23 }
 0x635   : > { %9607 = vmatpush3.msra.mxu0 %v15331_v58  ;;  %9671 = vmatmul.mubr.f32.vlgmr.msra.gmra.mxu1 %v6207_v30  ;;  %v15334_v30 = vld [vmem:[#allocation105_spill] sm:$0xff] }
 0x636   : > { %9750 = vmatprep.subr.mxu1 %v13452_v26  ;;  %9608 = vmatprep.subr.mxu0 %v15332_v11 }
 0x637   : > { %9673 = vmatprep.mubr.f32.mxu1 %v6217_v47  ;;  %9751 = vmatpush3.msra.mxu1 %v13452_v26  ;;  %v15335_v26 = vld [vmem:[#allocation69_spill] sm:$0xff]  ;;  %v15344_v47 = vld [vmem:[#allocation88_spill] sm:$0xff] }
 0x638   : > { %9609 = vmatpush3.msra.mxu0 %v15332_v11  ;;  %9752 = vmatprep.subr.mxu1 %v13460_v44 }
 0x639   : > { %9523 = vmatprep.mubr.f32.mxu0 %v6339_v13  ;;  %9610 = vmatprep.subr.mxu0 %v15333_v18 }
 0x63a   : > { %9753 = vmatpush3.msra.mxu1 %v13460_v44  ;;  %9524 = vmatmul.mubr.f32.gmra.mxu0 %v6349_v20  ;;  %v15336_v44 = vld [vmem:[#allocation70_spill] sm:$0xff] }
 0x63b   : > { %9611 = vmatpush3.msra.mxu0 %v15333_v18  ;;  %9674 = vmatmul.mubr.f32.gmra.mxu1 %v6227_v56  ;;  %v15343_v56 = vand.u32 4294901760, %v13950_v19 }
 0x63c   : > { %9754 = vmatprep.subr.mxu1 %v13473_v53  ;;  %9612 = vmatprep.subr.mxu0 %v15334_v30 }
 0x63d   : > { %9614 = vmatprep.mubr.f32.mxu0 %v13816_v22  ;;  %9676 = vmatprep.mubr.f32.mxu1 %v6237_v10  ;;  %v15340_v22 = vld [vmem:[#allocation73_spill] sm:$0xff] }
 0x63e   : > { %9755 = vmatpush3.msra.mxu1 %v13473_v53  ;;  %9613 = vmatpush3.msra.mxu0 %v15334_v30  ;;  %v15337_v53 = vld [vmem:[#allocation74_spill] sm:$0xff]  ;;  %v15348_v10 = vld [vmem:[#allocation77_spill] sm:$0xff] }
 0x63f   : > { %9756 = vmatprep.subr.mxu1 %v13488_v1  ;;  %9694 = vmatprep.subr.mxu0 %v15335_v26 }
 0x640   : > { %9757 = vmatpush3.msra.mxu1 %v13488_v1  ;;  %9615 = vmatmul.mubr.f32.vlgmr.msra.gmra.mxu0 %v13804_v34  ;;  %v15338_v1 = vand.u32 4294901760, %v13900_v17  ;;  %v15339_v34 = vand.u32 4294901760, %v13921_v49 }
 0x641   : > { %9677 = vmatmul.mubr.f32.gmra.mxu1 %v6247_v39  ;;  %9695 = vmatpush3.msra.mxu0 %v15335_v26  ;;  %v15349_v39 = vld [vmem:[#allocation82_spill] sm:$0xff] }
 0x642   : > { %9758 = vmatprep.subr.mxu1 %v15297_v29  ;;  %9617 = vmatprep.mubr.f32.mxu0 %v13842_v16  ;;  %v15342_v16 = vand.u32 4294901760, %v13940_v25 }
 0x643   : > { %9679 = vmatprep.mubr.f32.mxu1 %v6257_v21  ;;  %9696 = vmatprep.subr.mxu0 %v15336_v44  ;;  %v15353_v21 = vld [vmem:[#allocation96_spill] sm:$0xff] }
 0x644   : > { %9759 = vmatpush3.msra.mxu1 %v15297_v29  ;;  %9697 = vmatpush3.msra.mxu0 %v15336_v44  ;;  %v15347_v29 = vand.u32 4294901760, %v13983_v46 }
 0x645   : > { %9760 = vmatprep.subr.mxu1 %v15303_v33  ;;  %9698 = vmatprep.subr.mxu0 %v15337_v53 }
 0x646   : > { %9761 = vmatpush3.msra.mxu1 %v15303_v33  ;;  %9618 = vmatmul.mubr.f32.gmra.mxu0 %v13828_v7  ;;  %v15341_v7 = vld [vmem:[#allocation85_spill] sm:$0xff] }
 0x647   : > { %9680 = vmatmul.mubr.f32.gmra.mxu1 %v15338_v1  ;;  %9699 = vmatpush3.msra.mxu0 %v15337_v53  ;;  %v15351_v33 = vld [vmem:[#allocation93_spill] sm:$0xff] }
 0x648   : > { %9762 = vmatprep.subr.mxu1 %v15307_v57  ;;  %9620 = vmatprep.mubr.f32.mxu0 %v13867_v54  ;;  %v15346_v54 = vand.u32 4294901760, %v13970_v3 }
 0x649   : > { %9682 = vmatprep.mubr.f32.mxu1 %v15339_v34  ;;  %9700 = vmatprep.subr.mxu0 %v15340_v22 }
 0x64a   : > { %9763 = vmatpush3.msra.mxu1 %v15307_v57  ;;  %9701 = vmatpush3.msra.mxu0 %v15340_v22  ;;  %v15355_v57 = vld [vmem:[#allocation102_spill] sm:$0xff] }
 0x64b   : > { %9764 = vmatprep.subr.mxu1 %v15312_v59  ;;  %9702 = vmatprep.subr.mxu0 %v15341_v7 }
 0x64c   : > { %9765 = vmatpush3.msra.mxu1 %v15312_v59  ;;  %9621 = vmatmul.mubr.f32.gmra.mxu0 %v13862_v4  ;;  %v15345_v4 = vld [vmem:[#allocation64_spill] sm:$0xff] }
 0x64d   : > { %9683 = vmatmul.mubr.f32.gmra.mxu1 %v15342_v16  ;;  %9703 = vmatpush3.msra.mxu0 %v15341_v7 }
 0x64e   : > { %9766 = vmatprep.subr.mxu1 %v15315_v31  ;;  %9623 = vmatprep.mubr.f32.mxu0 %v13895_v9  ;;  %v15350_v9 = vand.u32 4294901760, %v13998_v6 }
 0x64f   : > { %9685 = vmatprep.mubr.f32.mxu1 %v15343_v56  ;;  %9704 = vmatprep.subr.mxu0 %v15344_v47 }
 0x650   : > { %9767 = vmatpush3.msra.mxu1 %v15315_v31  ;;  %9705 = vmatpush3.msra.mxu0 %v15344_v47 }
 0x651   : > { %9768 = vmatprep.subr.mxu1 %v15318_v48  ;;  %9706 = vmatprep.subr.mxu0 %v15345_v4 }
 0x652   : > { %9769 = vmatpush3.msra.mxu1 %v15318_v48  ;;  %9624 = vmatmul.mubr.f32.gmra.mxu0 %v13900_v17  ;;  %v15352_v17 = vld [vmem:[#allocation67_spill] sm:$0xff] }
 0x653   : > { %9686 = vmatmul.mubr.f32.gmra.mxu1 %v15346_v54  ;;  %9707 = vmatpush3.msra.mxu0 %v15345_v4 }
 0x654   : > { %9770 = vmatprep.subr.mxu1 %v15320_v0  ;;  %9626 = vmatprep.mubr.f32.mxu0 %v13921_v49  ;;  %v15354_v49 = vld [vmem:[#allocation99_spill] sm:$0xff] }
 0x655   : > { %9688 = vmatprep.mubr.f32.mxu1 %v15347_v29  ;;  %9708 = vmatprep.subr.mxu0 %v15348_v10 }
 0x656   : > { %9771 = vmatpush3.msra.mxu1 %v15320_v0  ;;  %9709 = vmatpush3.msra.mxu0 %v15348_v10 }
 0x657   : > { %9772 = vmatprep.subr.mxu1 %v15322_v63  ;;  %9710 = vmatprep.subr.mxu0 %v15349_v39 }
 0x658   : > { %9773 = vmatpush3.msra.mxu1 %v15322_v63  ;;  %9627 = vmatmul.mubr.f32.gmra.mxu0 %v13940_v25  ;;  %v15357_v25 = vld [vmem:[#allocation107_spill] sm:$0xff] }
 0x659   : > { %9689 = vmatmul.mubr.f32.gmra.mxu1 %v15350_v9  ;;  %9711 = vmatpush3.msra.mxu0 %v15349_v39 }
 0x65a   : > { %9774 = vmatprep.subr.mxu1 %v15324_v37  ;;  %9629 = vmatprep.mubr.f32.mxu0 %v13950_v19 }
 0x65b   : > { %9691 = vmatprep.mubr.f32.mxu1 %v6337_v61  ;;  %9712 = vmatprep.subr.mxu0 %v15351_v33 }
 0x65c   : > { %9775 = vmatpush3.msra.mxu1 %v15324_v37  ;;  %9713 = vmatpush3.msra.mxu0 %v15351_v33 }
 0x65d   : > { %9776 = vmatprep.subr.mxu1 %v15326_v62  ;;  %9714 = vmatprep.subr.mxu0 %v15352_v17 }
 0x65e   : > { %9777 = vmatpush3.msra.mxu1 %v15326_v62  ;;  %9630 = vmatmul.mubr.f32.gmra.mxu0 %v13970_v3 }
 0x65f   : > { %9692 = vmatmul.mubr.f32.gmra.mxu1 %v6347_v14  ;;  %9715 = vmatpush3.msra.mxu0 %v15352_v17 }
 0x660   : > { %9778 = vmatprep.subr.mxu1 %v15328_v8  ;;  %9632 = vmatprep.mubr.f32.mxu0 %v13983_v46 }
 0x661   : > { %9716 = vmatprep.subr.mxu0 %v15353_v21  ;;  %9779 = vmatpush3.msra.mxu1 %v15328_v8 }
 0x662   : > { %9782 = vmatprep.mubr.f32.mxu1 %v13806_v52  ;;  %9717 = vmatpush3.msra.mxu0 %v15353_v21 }
 0x663   : > { %9780 = vmatprep.subr.mxu1 %v15330_v5  ;;  %9718 = vmatprep.subr.mxu0 %v15354_v49 }
 0x664   : > { %9781 = vmatpush3.msra.mxu1 %v15330_v5  ;;  %9633 = vmatmul.mubr.f32.gmra.mxu0 %v13998_v6 }
 0x665   : > { %9719 = vmatpush3.msra.mxu0 %v15354_v49  ;;  %9783 = vmatmul.mubr.f32.vlgmr.msra.gmra.mxu1 %v13799_v28 }
 0x666   : > { %9635 = vmatprep.mubr.f32.mxu0 %v14011_v60  ;;  %9720 = vmatprep.subr.mxu0 %v15355_v57 }
 0x667   : > { %9785 = vmatprep.mubr.f32.mxu1 %v13830_v27  ;;  %9721 = vmatpush3.msra.mxu0 %v15355_v57 }
 0x668   : > { %9722 = vmatprep.subr.mxu0 %v15356_v43  ;;  %9636 = vmatmul.mubr.f32.gmra.mxu0 %v14024_v36 }
 0x669   : > { %9723 = vmatpush3.msra.mxu0 %v15356_v43  ;;  %9786 = vmatmul.mubr.f32.gmra.mxu1 %v13818_v55 }
 0x66a   : > { %9724 = vmatprep.subr.mxu0 %v15357_v25  ;;  %9726 = vmatprep.mubr.f32.mxu0 %v13806_v52 }
 0x66b   : > { %9788 = vmatprep.mubr.f32.mxu1 %v13857_v15  ;;  %9725 = vmatpush3.msra.mxu0 %v15357_v25 }
 0x66c   : > { %9727 = vmatmul.mubr.f32.vlgmr.msra.gmra.mxu0 %v13799_v28 }
 0x66d   : > { %9789 = vmatmul.mubr.f32.gmra.mxu1 %v13847_v42  ;;  %9729 = vmatprep.mubr.f32.mxu0 %v13830_v27 }
 0x66e   : > { %9791 = vmatprep.mubr.f32.mxu1 %v13883_v12 }
 0x670   : > { %9730 = vmatmul.mubr.f32.gmra.mxu0 %v13818_v55 }
 0x671   : > { %9792 = vmatmul.mubr.f32.gmra.mxu1 %v13871_v2  ;;  %9732 = vmatprep.mubr.f32.mxu0 %v13857_v15 }
 0x672   : > { %9794 = vmatprep.mubr.f32.mxu1 %v13906_v51 }
 0x674   : > { %9733 = vmatmul.mubr.f32.gmra.mxu0 %v13847_v42 }
 0x675   : > { %9795 = vmatmul.mubr.f32.gmra.mxu1 %v13911_v41  ;;  %9735 = vmatprep.mubr.f32.mxu0 %v13883_v12 }
 0x676   : > { %9797 = vmatprep.mubr.f32.mxu1 %v13935_v24 }
 0x678   : > { %9736 = vmatmul.mubr.f32.gmra.mxu0 %v13871_v2 }
 0x679   : > { %9798 = vmatmul.mubr.f32.gmra.mxu1 %v13947_v35  ;;  %9738 = vmatprep.mubr.f32.mxu0 %v13906_v51 }
 0x67a   : > { %9800 = vmatprep.mubr.f32.mxu1 %v13965_v38 }
 0x67c   : > { %9739 = vmatmul.mubr.f32.gmra.mxu0 %v13911_v41 }
 0x67d   : > { %9801 = vmatmul.mubr.f32.gmra.mxu1 %v13976_v50  ;;  %9741 = vmatprep.mubr.f32.mxu0 %v13935_v24 }
 0x67e   : > { %9803 = vmatprep.mubr.f32.mxu1 %v13993_v45 }
 0x680   : > { %9742 = vmatmul.mubr.f32.gmra.mxu0 %v13947_v35  ;;  %v6015_v35 = vpop.permute.xlu1 %6014 }
 0x681   : > { %9804 = vmatmul.mubr.f32.gmra.mxu1 %v14004_v40  ;;  %9744 = vmatprep.mubr.f32.mxu0 %v13965_v38 }
 0x684   : > { %9745 = vmatmul.mubr.f32.gmra.mxu0 %v13976_v50  ;;  %v6020_v3 = vpop.permute.xlu1 %6019 }
 0x685   : > { %9747 = vmatprep.mubr.f32.mxu0 %v13993_v45 }
 0x688   : > { %9748 = vmatmul.mubr.f32.gmra.mxu0 %v14004_v40  ;;  %v6025_v45 = vpop.permute.xlu1 %6024 }
 0x68c   : > { %v6030_v60 = vpop.permute.xlu1 %6029 }
 0x690   : > { %v6035_v32 = vpop.permute.xlu1 %6034 }
 0x694   : > { %v6040_v20 = vpop.permute.xlu1 %6039 }
 0x698   : > { %v6045_v53 = vpop.permute.xlu1 %6044 }
 0x69c   : > { %v6050_v16 = vpop.permute.xlu1 %6049 }
 0x6a0   : > { %v14283_v29 = vpop.permute.xlu1 %6054 }
 0x6a4   : > { %v6060_v17 = vpop.permute.xlu1 %6059 }
 0x6a8   : > { %v14301_v25 = vpop.permute.xlu1 %6064 }
 0x6c8   : > { %v14201_v28 = vpop.f32.mrf.mxu1 }
 0x6ca   : > { %v14203_v52 = vpop.f32.mrf.mxu1 }
 0x6cc   : > { %v14205_v55 = vpop.f32.mrf.mxu1 }
 0x6ce   : > { %v14207_v27 = vpop.f32.mrf.mxu1 }
 0x6d0   : > { %v14209_v42 = vpop.f32.mrf.mxu1 }
 0x6d1   : > { %v14211_v15 = vpop.f32.mrf.mxu0 }
 0x6d2   : > { %v14215_v12 = vpop.f32.mrf.mxu1 }
 0x6d3   : > { %v14213_v2 = vpop.f32.mrf.mxu0 }
 0x6d6   : > { %v14217_v51 = vpop.f32.mrf.mxu0 }
 0x6d7   : > { %v14219_v41 = vpop.f32.mrf.mxu1 }
 0x6d8   : > { %v14221_v24 = vpop.f32.mrf.mxu0 }
 0x6d9   : > { %v14223_v59 = vpop.f32.mrf.mxu1 }
 0x6dc   : > { %v14225_v61 = vpop.f32.mrf.mxu0 }
 0x6dd   : > { %v14227_v19 = vpop.f32.mrf.mxu1 }
 0x6de   : > { %v14229_v31 = vpop.f32.mrf.mxu0 }
 0x6df   : > { %v14231_v5 = vpop.f32.mrf.mxu1 }
 0x6e2   : > { %v14233_v38 = vpop.f32.mrf.mxu0 }
 0x6e3   : > { %v14235_v48 = vpop.f32.mrf.mxu1 }
 0x6e4   : > { %v14237_v50 = vpop.f32.mrf.mxu0 }
 0x6e5   : > { %v14239_v46 = vpop.f32.mrf.mxu1 }
 0x6e6   : > { %15358 = vst [vmem:[#allocation109_spill] sm:$0xff] %v14239_v46 }
 0x6e8   : > { %v14241_v0 = vpop.f32.mrf.mxu0 }
 0x6e9   : > { %v14243_v6 = vpop.f32.mrf.mxu1 }
 0x6ea   : > { %15359 = vst [vmem:[#allocation118_spill] sm:$0xff] %v14243_v6  ;;  %v14245_v63 = vpop.f32.mrf.mxu0 }
 0x6eb   : > { %v14247_v14 = vpop.f32.mrf.mxu1 }
 0x6ec   : > { %15360 = vst [vmem:[#allocation80_spill] sm:$0xff] %v14247_v14 }
 0x6ee   : > { %v14249_v40 = vpop.f32.mrf.mxu0 }
 0x6ef   : > { %v14251_v37 = vpop.f32.mrf.mxu1 }
 0x6f0   : > { %15361 = vst [vmem:[#allocation112_spill] sm:$0xff] %v14251_v37  ;;  %v14253_v36 = vpop.f32.mrf.mxu0 }
 0x6f1   : > { %v14255_v62 = vpop.f32.mrf.mxu1 }
 0x6f2   : > { %15362 = vst [vmem:[#allocation68_spill] sm:$0xff] %v14255_v62 }
 0x6f4   : > { %v14257_v8 = vpop.f32.mrf.mxu0 }
 0x6f5   : > { %v14259_v23 = vpop.f32.mrf.mxu1 }
 0x6f6   : > { %v14261_v58 = vpop.f32.mrf.mxu0 }
 0x6f7   : > { %15363 = vst [vmem:[#allocation108_spill] sm:$0xff] %v14261_v58  ;;  %v14263_v13 = vpop.f32.mrf.mxu1 }
 0x6fa   : > { %v14265_v11 = vpop.f32.mrf.mxu0 }
 0x6fb   : > { %15364 = vst [vmem:[#allocation117_spill] sm:$0xff] %v14265_v11  ;;  %v14267_v18 = vpop.f32.mrf.mxu1 }
 0x6fc   : > { %v14269_v30 = vpop.f32.mrf.mxu0 }
 0x6fd   : > { %15365 = vst [vmem:[#allocation65_spill] sm:$0xff] %v14269_v30  ;;  %v14271_v26 = vpop.f32.mrf.mxu1  ;;  %v14312_v30 = vld [vmem:[%s14497_s7] ss:$0 sm:$0xff] }
 0x700   : > { %v9616_v44 = vpop.f32.mrf.mxu0 }
 0x701   : > { %v14273_v1 = vpop.f32.mrf.mxu1 }
 0x702   : > { %v6696_v34 = vpop.f32.mrf.mxu0 }
 0x703   : > { %v14275_v22 = vpop.f32.mrf.mxu1 }
 0x706   : > { %v9619_v7 = vpop.f32.mrf.mxu0 }
 0x707   : > { %v14277_v56 = vpop.f32.mrf.mxu1 }
 0x708   : > { %v6710_v47 = vpop.f32.mrf.mxu0 }
 0x709   : > { %v14279_v4 = vpop.f32.mrf.mxu1 }
 0x70a   : > { %15366 = vst [vmem:[#allocation76_spill] sm:$0xff] %v14279_v4 }
 0x70c   : > { %v14281_v54 = vpop.f32.mrf.mxu0 }
 0x70d   : > { %v14285_v10 = vpop.f32.mrf.mxu1 }
 0x70e   : > { %15367 = vst [vmem:[#allocation71_spill] sm:$0xff] %v14285_v10  ;;  %v14287_v39 = vpop.f32.mrf.mxu0 }
 0x70f   : > { %v14289_v9 = vpop.f32.mrf.mxu1 }
 0x710   : > { %15368 = vst [vmem:[#allocation114_spill] sm:$0xff] %v14289_v9  ;;  %v6099_v9 = vmul.f32 %v14312_v30, %v6020_v3 }
 0x712   : > { %v14291_v33 = vpop.f32.mrf.mxu0  ;;  %v6212_v10 = vadd.f32 %v14211_v15, %v6099_v9  ;;  %v6103_v15 = vmul.f32 %v14312_v30, %v6040_v20 }
 0x713   : > { %v14293_v21 = vpop.f32.mrf.mxu1 }
 0x714   : > { %15369 = vst [vmem:[#allocation111_spill] sm:$0xff] %v14293_v21  ;;  %v14295_v49 = vpop.f32.mrf.mxu0 }
 0x715   : > { %v14297_v57 = vpop.f32.mrf.mxu1 }
 0x716   : > { %15370 = vst [vmem:[#allocation83_spill] sm:$0xff] %v14297_v57  ;;  %v6070_v57 = vpop.permute.xlu1 %6069 }
 0x718   : > { %v14299_v43 = vpop.f32.mrf.mxu0 }
 0x719   : > { %v14303_v62 = vpop.f32.mrf.mxu1 }
 0x71a   : > { %15371 = vst [vmem:[#allocation72_spill] sm:$0xff] %v14303_v62  ;;  %v14305_v37 = vpop.f32.mrf.mxu0  ;;  %v6098_v62 = vmul.f32 %v14312_v30, %v6015_v35  ;;  %v14330_v3 = vpop.permute.xlu1 %6074 }
 0x71b   : > { %15372 = vst [vmem:[#allocation113_spill] sm:$0xff] %v14305_v37  ;;  %v14307_v14 = vpop.f32.mrf.mxu1 }
 0x71c   : > { %15373 = vst [vmem:[#allocation110_spill] sm:$0xff] %v14307_v14  ;;  %v6101_v14 = vmul.f32 %v14312_v30, %v6030_v60  ;;  %v6202_v58 = vadd.f32 %v14213_v2, %v6098_v62 }
 0x71e   : > { %v14314_v21 = vpop.f32.mrf.mxu0  ;;  %v6503_v2 = vadd.f32 %v14203_v52, %v6202_v58 }
 0x71f   : > { %15374 = vst [vmem:[#allocation119_spill] sm:$0xff] %v14314_v21  ;;  %v14317_v6 = vpop.f32.mrf.mxu1  ;;  %v6100_v21 = vmul.f32 %v14312_v30, %v6025_v45 }
 0x720   : > { %15375 = vst [vmem:[#allocation92_spill] sm:$0xff] %v14317_v6  ;;  %v14319_v11 = vpop.f32.mrf.mxu0  ;;  %v6232_v6 = vadd.f32 %v14217_v51, %v6101_v14  ;;  %v6697_v51 = vadd.f32 %v6696_v34, %v6503_v2 }
 0x721   : > { %15376 = vst [vmem:[#allocation86_spill] sm:$0xff] %v14319_v11  ;;  %v14323_v46 = vpop.f32.mrf.mxu1  ;;  %v6509_v11 = vadd.f32 %v14201_v28, %v6212_v10  ;;  %v6222_v9 = vadd.f32 %v14221_v24, %v6100_v21  ;;  %v6105_v10 = vmul.f32 %v14312_v30, %v6050_v16  ;;  %v6080_v24 = vpop.permute.xlu1 %6079 }
 0x722   : > { %15377 = vst [vmem:[#allocation116_spill] sm:$0xff] %v14323_v46  ;;  %v6102_v46 = vmul.f32 %v14312_v30, %v6035_v32  ;;  %v6521_v28 = vadd.f32 %v14205_v55, %v6232_v6 }
 0x723   : > { %v6704_v60 = vadd.f32 %v9616_v44, %v6509_v11  ;;  %v6515_v52 = vadd.f32 %v14207_v27, %v6222_v9  ;;  %v6104_v44 = vmul.f32 %v14312_v30, %v6045_v53 }
 0x724   : > { %v14327_v4 = vpop.f32.mrf.mxu0  ;;  %v6242_v20 = vadd.f32 %v14229_v31, %v6102_v46  ;;  %v6718_v11 = vadd.f32 %v9619_v7, %v6521_v28  ;;  %v6891_v31 = vadd.f32 %v14263_v13, %v6697_v51  ;;  %v6107_v46 = vmul.f32 %v14312_v30, %v6060_v17 }
 0x725   : > { %15378 = vst [vmem:[#allocation75_spill] sm:$0xff] %v14327_v4  ;;  %v9784_v37 = vpop.f32.mrf.mxu1  ;;  %v6252_v4 = vadd.f32 %v14225_v61, %v6103_v15  ;;  %v6899_v32 = vadd.f32 %v14259_v23, %v6704_v60  ;;  %v6272_v61 = vadd.f32 %v14233_v38, %v6105_v10  ;;  %v6711_v55 = vadd.f32 %v6710_v47, %v6515_v52 }
 0x726   : > { %v14334_v35 = vpop.f32.mrf.mxu0  ;;  %v6262_v27 = vadd.f32 %v14237_v50, %v6104_v44  ;;  %v6527_v7 = vadd.f32 %v14215_v12, %v6242_v20  ;;  %v6915_v47 = vadd.f32 %v14267_v18, %v6718_v11  ;;  %v6292_v13 = vadd.f32 %v14241_v0, %v6107_v46  ;;  %v6085_v50 = vpop.permute.xlu1 %6084 }
 0x727   : > { %15379 = vst [vmem:[#allocation79_spill] sm:$0xff] %v14334_v35  ;;  %v7306_v62 = vpop.f32.mrf.mxu1  ;;  %v6533_v6 = vadd.f32 %v14209_v42, %v6252_v4  ;;  %v6106_v42 = vmul.f32 %v14312_v30, %v14283_v29  ;;  %v6545_v4 = vadd.f32 %v14219_v41, %v6272_v61  ;;  %v6907_v2 = vadd.f32 %v14271_v26, %v6711_v55 }
 0x728   : > { %v14340_v45 = vpop.f32.mrf.mxu0  ;;  %v6725_v12 = vadd.f32 %v14287_v39, %v6527_v7  ;;  %v6109_v18 = vmul.f32 %v14312_v30, %v6070_v57  ;;  %v6539_v51 = vadd.f32 %v14223_v59, %v6262_v27  ;;  %v6108_v20 = vmul.f32 %v14312_v30, %v14301_v25  ;;  %v15382_v27 = vld [vmem:[#allocation108_spill] sm:$0xff] }
 0x729   : > { %v9787_v14 = vpop.f32.mrf.mxu1  ;;  %v6732_v53 = vadd.f32 %v14281_v54, %v6533_v6  ;;  %v6282_v29 = vadd.f32 %v14245_v63, %v6106_v42  ;;  %v6746_v41 = vadd.f32 %v14291_v33, %v6545_v4  ;;  %v6557_v57 = vadd.f32 %v14227_v19, %v6292_v13  ;;  %v15386_v13 = vld [vmem:[#allocation117_spill] sm:$0xff] }
 0x72a   : > { %v14346_v35 = vpop.f32.mrf.mxu0  ;;  %v6312_v26 = vadd.f32 %v14249_v40, %v6109_v18  ;;  %v6739_v59 = vadd.f32 %v14295_v49, %v6539_v51  ;;  %v6090_v40 = vpop.permute.xlu1 %6089  ;;  %v6112_v42 = vmul.f32 %v14312_v30, %v6085_v50 }
 0x72b   : > { %v7318_v58 = vpop.f32.mrf.mxu1  ;;  %v6551_v25 = vadd.f32 %v14231_v5, %v6282_v29  ;;  %v6760_v19 = vadd.f32 %v14299_v43, %v6557_v57  ;;  %v15380_v5 = vld [vmem:[#allocation113_spill] sm:$0xff] }
 0x72c   : > { %v9728_v34 = vpop.f32.mrf.mxu0 }
 0x72d   : > { %v7136_v16 = vadd.f32 %v9728_v34, %v6899_v32  ;;  %v9790_v21 = vpop.f32.mrf.mxu1  ;;  %v6111_v32 = vmul.f32 %v14312_v30, %v6080_v24  ;;  %v6753_v6 = vadd.f32 %v15380_v5, %v6551_v25 }
 0x72e   : > { %v7129_v23 = vpop.f32.mrf.mxu0 }
 0x72f   : > { %v7313_v15 = vadd.f32 %v9784_v37, %v7136_v16  ;;  %v7130_v38 = vadd.f32 %v7129_v23, %v6891_v31  ;;  %v7330_v9 = vpop.f32.mrf.mxu1  ;;  %v6332_v24 = vadd.f32 %v14257_v8, %v6111_v32  ;;  %v15383_v23 = vld [vmem:[#allocation109_spill] sm:$0xff]  ;;  %v15384_v8 = vld [vmem:[#allocation119_spill] sm:$0xff] }
 0x730   : > { %v9731_v17 = vpop.f32.mrf.mxu0  ;;  %v15395_v32 = vld [vmem:[#allocation79_spill] sm:$0xff] }
 0x731   : > { %7401 = vst [vmem:[%s10304_s24 + $0x8] sm:$0xff] %v7313_v15  ;;  %v7307_v60 = vadd.f32 %v7306_v62, %v7130_v38  ;;  %v7148_v54 = vadd.f32 %v9731_v17, %v6915_v47  ;;  %v9793_v37 = vpop.f32.mrf.mxu1  ;;  %v6931_v62 = vadd.f32 %v14273_v1, %v6732_v53  ;;  %v6302_v1 = vadd.f32 %v14253_v36, %v6108_v20  ;;  %v15385_v47 = vld [vmem:[#allocation71_spill] sm:$0xff]  ;;  %v15387_v17 = vld [vmem:[#allocation118_spill] sm:$0xff] }
 0x732   : > { %v7141_v0 = vpop.f32.mrf.mxu0  ;;  %v6569_v36 = vadd.f32 %v14235_v48, %v6312_v26 }
 0x733   : > { %7400 = vst [vmem:[%s10304_s24] sm:$0xff] %v7307_v60  ;;  %v7325_v28 = vadd.f32 %v9787_v14, %v7148_v54  ;;  %v7142_v10 = vadd.f32 %v7141_v0, %v6907_v2  ;;  %v7342_v39 = vpop.f32.mrf.mxu1  ;;  %v6923_v14 = vadd.f32 %v14275_v22, %v6725_v12  ;;  %v6110_v22 = vmul.f32 %v14312_v30, %v14330_v3  ;;  %v15388_v2 = vld [vmem:[#allocation86_spill] sm:$0xff] }
 0x734   : > { %v9734_v63 = vpop.f32.mrf.mxu0  ;;  %v6563_v3 = vadd.f32 %v15383_v23, %v6302_v1  ;;  %v6774_v15 = vadd.f32 %v15384_v8, %v6569_v36  ;;  %v6581_v12 = vadd.f32 %v15387_v17, %v6332_v24  ;;  %v15389_v0 = vld [vmem:[#allocation114_spill] sm:$0xff]  ;;  %v15398_v36 = vld [vmem:[#allocation72_spill] sm:$0xff] }
 0x735   : > { %7403 = vst [vmem:[%s10304_s24 + $0x18] sm:$0xff] %v7325_v28  ;;  %v7319_v11 = vadd.f32 %v7318_v58, %v7142_v10  ;;  %v7160_v33 = vadd.f32 %v9734_v63, %v6931_v62  ;;  %v9796_v52 = vpop.f32.mrf.mxu1  ;;  %v6947_v58 = vadd.f32 %v14277_v56, %v6746_v41  ;;  %v6113_v56 = vmul.f32 %v14312_v30, %v6090_v40  ;;  %v15390_v41 = vld [vmem:[#allocation65_spill] sm:$0xff]  ;;  %v15391_v10 = vld [vmem:[#allocation80_spill] sm:$0xff]  ;;  %v15392_v30 = vld [vmem:[#allocation75_spill] sm:$0xff] }
 0x736   : > { %v7153_v44 = vpop.f32.mrf.mxu0  ;;  %v6322_v7 = vadd.f32 %v15382_v27, %v6110_v22  ;;  %v6767_v18 = vadd.f32 %v15388_v2, %v6563_v3  ;;  %v6342_v28 = vadd.f32 %v15390_v41, %v6112_v42  ;;  %v6788_v50 = vadd.f32 %v15392_v30, %v6581_v12  ;;  %v15393_v63 = vld [vmem:[#allocation111_spill] sm:$0xff]  ;;  %v15400_v27 = vld [vmem:[#allocation92_spill] sm:$0xff] }
 0x737   : > { %7402 = vst [vmem:[%s10304_s24 + $0x10] sm:$0xff] %v7319_v11  ;;  %v7337_v61 = vadd.f32 %v9790_v21, %v7160_v33  ;;  %v7154_v49 = vadd.f32 %v7153_v44, %v6923_v14  ;;  %v7354_v34 = vpop.f32.mrf.mxu1  ;;  %v15381_v21 = vld [vmem:[#allocation76_spill] sm:$0xff]  ;;  %v6352_v4 = vadd.f32 %v15386_v13, %v6113_v56  ;;  %v15396_v40 = vld [vmem:[#allocation83_spill] sm:$0xff] }
 0x738   : > { %v9737_v55 = vpop.f32.mrf.mxu0  ;;  %v6939_v46 = vadd.f32 %v15381_v21, %v6739_v59  ;;  %v6575_v62 = vadd.f32 %v15391_v10, %v6322_v7  ;;  %v6979_v59 = vadd.f32 %v15393_v63, %v6774_v15  ;;  %v15394_v11 = vld [vmem:[#allocation112_spill] sm:$0xff]  ;;  %v15399_v21 = vld [vmem:[#allocation110_spill] sm:$0xff] }
 0x739   : > { %7405 = vst [vmem:[%s10304_s24 + $0x28] sm:$0xff] %v7337_v61  ;;  %v7331_v16 = vadd.f32 %v7330_v9, %v7154_v49  ;;  %v7172_v43 = vadd.f32 %v9737_v55, %v6947_v58  ;;  %v9799_v31 = vpop.f32.mrf.mxu1  ;;  %v6963_v9 = vadd.f32 %v15385_v47, %v6760_v19  ;;  %v6593_v33 = vadd.f32 %v15394_v11, %v6352_v4  ;;  %v15397_v61 = vld [vmem:[#allocation68_spill] sm:$0xff] }
 0x73a   : > { %v7165_v53 = vpop.f32.mrf.mxu0  ;;  %v6781_v1 = vadd.f32 %v15395_v32, %v6575_v62  ;;  %v6971_v19 = vadd.f32 %v15396_v40, %v6767_v18  ;;  %v6587_v49 = vadd.f32 %v15397_v61, %v6342_v28  ;;  %v6995_v55 = vadd.f32 %v15398_v36, %v6788_v50 }
 0x73b   : > { %7404 = vst [vmem:[%s10304_s24 + $0x20] sm:$0xff] %v7331_v16  ;;  %v7349_v48 = vadd.f32 %v9793_v37, %v7172_v43  ;;  %v7166_v38 = vadd.f32 %v7165_v53, %v6939_v46  ;;  %v7366_v60 = vpop.f32.mrf.mxu1  ;;  %v6955_v37 = vadd.f32 %v15389_v0, %v6753_v6 }
 0x73c   : > { %v9740_v54 = vpop.f32.mrf.mxu0  ;;  %v6795_v16 = vadd.f32 %v14346_v35, %v6587_v49  ;;  %v6987_v46 = vadd.f32 %v15399_v21, %v6781_v1  ;;  %v15401_v35 = vld [vmem:[#allocation116_spill] sm:$0xff] }
 0x73d   : > { %7407 = vst [vmem:[%s10304_s24 + $0x38] sm:$0xff] %v7349_v48  ;;  %v7343_v29 = vadd.f32 %v7342_v39, %v7166_v38  ;;  %v7184_v51 = vadd.f32 %v9740_v54, %v6963_v9  ;;  %v9802_v14 = vpop.f32.mrf.mxu1 }
 0x73e   : > { %v7177_v20 = vpop.f32.mrf.mxu0  ;;  %v7003_v15 = vadd.f32 %v15401_v35, %v6795_v16 }
 0x73f   : > { %7406 = vst [vmem:[%s10304_s24 + $0x30] sm:$0xff] %v7343_v29  ;;  %v7361_v26 = vadd.f32 %v9796_v52, %v7184_v51  ;;  %v7178_v57 = vadd.f32 %v7177_v20, %v6955_v37  ;;  %v6802_v52 = vadd.f32 %v14340_v45, %v6593_v33  ;;  %v7378_v5 = vpop.f32.mrf.mxu1 }
 0x740   : > { %v9743_v39 = vpop.f32.mrf.mxu0 }
 0x741   : > { %7409 = vst [vmem:[%s10304_s24 + $0x48] sm:$0xff] %v7361_v26  ;;  %v7355_v25 = vadd.f32 %v7354_v34, %v7178_v57  ;;  %v7196_v44 = vadd.f32 %v9743_v39, %v6979_v59  ;;  %v7011_v7 = vadd.f32 %v15400_v27, %v6802_v52  ;;  %v9805_v23 = vpop.f32.mrf.mxu1 }
 0x742   : > { %v7189_v58 = vpop.f32.mrf.mxu0 }
 0x743   : > { %7408 = vst [vmem:[%s10304_s24 + $0x40] sm:$0xff] %v7355_v25  ;;  %v7373_v22 = vadd.f32 %v9799_v31, %v7196_v44  ;;  %v7190_v24 = vadd.f32 %v7189_v58, %v6971_v19  ;;  %v7390_v9 = vpop.f32.mrf.mxu1 }
 0x744   : > { %v9746_v6 = vpop.f32.mrf.mxu0 }
 0x745   : > { %7411 = vst [vmem:[%s10304_s24 + $0x58] sm:$0xff] %v7373_v22  ;;  %v7367_v34 = vadd.f32 %v7366_v60, %v7190_v24  ;;  %v7208_v43 = vadd.f32 %v9746_v6, %v6995_v55 }
 0x746   : > { %v7201_v56 = vpop.f32.mrf.mxu0 }
 0x747   : > { %7410 = vst [vmem:[%s10304_s24 + $0x50] sm:$0xff] %v7367_v34  ;;  %v7385_v45 = vadd.f32 %v9802_v14, %v7208_v43  ;;  %v7202_v31 = vadd.f32 %v7201_v56, %v6987_v46 }
 0x748   : > { %v9749_v3 = vpop.f32.mrf.mxu0 }
 0x749   : > { %7413 = vst [vmem:[%s10304_s24 + $0x68] sm:$0xff] %v7385_v45  ;;  %v7379_v53 = vadd.f32 %v7378_v5, %v7202_v31  ;;  %v7220_v8 = vadd.f32 %v9749_v3, %v7011_v7 }
 0x74a   : > { %v7213_v48 = vpop.f32.mrf.mxu0 }
 0x74b   : > { %7412 = vst [vmem:[%s10304_s24 + $0x60] sm:$0xff] %v7379_v53  ;;  %v7397_v38 = vadd.f32 %v9805_v23, %v7220_v8  ;;  %v7214_v47 = vadd.f32 %v7213_v48, %v7003_v15 }
 0x74d   : > { %7415 = vst [vmem:[%s10304_s24 + $0x78] sm:$0xff] %v7397_v38  ;;  %v7391_v42 = vadd.f32 %v7390_v9, %v7214_v47 }
 0x74f   : > { %7414 = vst [vmem:[%s10304_s24 + $0x70] sm:$0xff] %v7391_v42 }
 0x750 PF: > { %s7693_s21 = sshll.u32 %s10129_s17, 5  ;;  %s7460_s25 = sshll.u32 %s10324_s29, 4  ;;  %s14430_s25 = int_to_ptr.vmem [resolvable:$true] %s7460_s25 }
 0x751   : > { %s7457_s9 = sadd.s32 %s7693_s21, %s15431_s15  ;;  %s15403_s11 = sld [smem:[#allocation120_spill]] }
 0x752   : > { %s7690_s28 = sshll.u32 %s7457_s9, 7  ;;  %s15404_s24 = sand.u32 1, %s10117_s14  }
 0x753   : > { %s14439_s23 = scalar_lea.sflag [#allocation8], %s15404_s24  ;;  %s10049_s30 = scalar_lea.vmem %s14430_s25, 2048 }
 0x754   : > { %p10050_p9 = scmp.ne.s32.totalorder %s14430_s25, %s10049_s30  ;;  %s10148_s17 = smov [#allocation7]  }
 0x755   : > { %s10053_s15 = sshll.u32 %s10148_s17, 4  ;;  %s10054_s15 = int_to_ptr.vmem [resolvable:$false] %s10053_s15 }
 0x756   : > { %p10051_p10 = pnand %p10050_p9, %p10261_p5  ;;  %s10055_s29 = scalar_lea.vmem %s10054_s15, 4096 }
 0x757   : > { %s14435_s26 = scalar_lea.hbm %s15403_s11, %s7690_s28  ;;  %p10056_p12 = scmp.lt.s32.totalorder %s14430_s25, %s10054_s15 }
 0x758   : > { %p10052_p11 = pneg %p10051_p10  ;;  %p10057_p13 = scmp.lt.s32.totalorder %s10055_s29, %s10049_s30 }
 0x75a   : > { %p10058_p0 = por %p10057_p13, %p10056_p12 }
 0x75c   : > { %p10059_p1 = pnand %p10058_p0, %p10052_p11 }
 0x75e   : > { %10062 = shalt.err (!%p10059_p1)
}
 0x75f   : > { %s10063_s13 = scalar_lea.hbm %s14435_s26, 2048  ;;  %s10067_s16 = scalar_lea.hbm %s15403_s11, 8192 }
 0x760   : > { %p10064_p2 = scmp.ne.s32.totalorder %s14435_s26, %s10063_s13  ;;  %p10068_p6 = scmp.lt.s32.totalorder %s14435_s26, %s15403_s11 }
 0x761   : > { %p10069_p7 = scmp.lt.s32.totalorder %s10067_s16, %s10063_s13 }
 0x762   : > { %p10065_p3 = pnand %p10064_p2, %p10261_p5 }
 0x763   : > { %p10070_p9 = por %p10069_p7, %p10068_p6 }
 0x764   : > { %p10066_p4 = pneg %p10065_p3 }
 0x766   : > { %p10071_p10 = pnand %p10070_p9, %p10066_p4 }
 0x768   : > { %10074 = shalt.err (!%p10071_p10)
}
 0x769   : > { %s10149_s9 = smov 128   ;;  %s10150_s28 = smov 256  }
 0x76a   : > { %s10151_s27 = smov 8  }
 0x76b   : > { %9806 = dma.vmem_to_hbm [thread:$0]  (%p10261_p5), %s14430_s25, 2048, %s14435_s26, %s14439_s23, %s10149_s9, %s10150_s28, %s10151_s27  }
 0x76c PF: > { %s15405_s22 = sld [smem:[#allocation14_spill]] }
 0x76d   : > { %s15406_s24 = sld [smem:[#allocation10_spill]] }
 0x772   : > { %p9812_p11 = scmp.ge.s32.totalorder %s15405_s22, 2 }
 0x773   : > { %s7487_s17 = sand.u32 1, %s15406_s24  }
 0x774   : > { %p9809_p12 = pnand %p9812_p11, %p10267_p8  ;;  %s7488_s15 = scalar_lea.sflag [#allocation8], %s7487_s17 }
 0x776   : > { %p9810_p13 = pneg %p9809_p12 }
 0x778   : > { %10108 = dma.done.wait (%p9810_p13), %s7488_s15, 2048  }
 0x779   : > { %10110 = vsyncadd (%p9810_p13), %s7488_s15, 4294965248  ;;  %s24_s20 = sadd.s32 1, %s15405_s22   ;;  %s15408_s29 = sld [smem:[#allocation11_spill]] }
 0x77a   : > { %p21_p0 = scmp.ge.s32.totalorder %s24_s20, 6   ;;  %s15409_s15 = sld [smem:[#allocation19_spill]] }
 0x77b   : > { %s15410_s16 = sld [smem:[#allocation12_spill]]  ;;  %s15414_s13 = smov %s10117_s14 }
 0x77c   : > { %s15411_s17 = sld [smem:[#allocation13_spill]]  ;;  %23 = sbr.rel (!%p21_p0) target bundleno = 7 (0x7), region = 131 }
 0x77d   : > { %s15412_s18 = sld [smem:[#allocation15_spill]] }
 0x77e   : > { %s15413_s19 = sld [smem:[#allocation16_spill]] }
 0x77f   : > { %s15415_s14 = smov %s15408_s29 }
 0x781   :  { %7501 = vsyncpa [#allocation8], 1 }
 0x782   :  { %7503 = vsyncpa [#allocation8 + $0x1], 1 }

</bundles_post_ra>
